<compile_context>
chip_gen: v5e
topology: v5e:2x2
jax: 0.10.0
libtpu: 0.0.40
codegen_flags: <defaults>
</compile_context>

<pallas_src>
import functools
import math

import jax
import jax.numpy as jnp
import numpy as np
from jax.experimental import pallas as pl
from jax.experimental.pallas import tpu as pltpu


# Conv stack: [Conv3x3(cin->cout) -> ReLU -> MaxPool2x2] per entry.
CONV_CHANNELS = [(3, 16), (16, 32), (32, 64), (64, 64)]
FC_DIMS = [(64, 512), (512, 512), (512, 10)]
LOGIT_PAD = 128          # lane-dense logits block; sliced back to 10 outside


# ----------------------------------------------------------------------------
# Constant "pool-select + re-pad" matrices (built host-side, tiny).
# ----------------------------------------------------------------------------
def _pool_place_matrix(H, W):
    """0/1 matrix mapping the pooled (H//2, W//2) pixels of a stage (in the
    flattened padded-row conv-output layout) into the NEXT stage's zero-padded
    flattened layout.  Shape: ((H//2+2)*(W//2+2), (H-2)*(W+2)+W-1)."""
    Ho, Wo = H // 2, W // 2
    Wp = W + 2                       # padded row pitch of the current stage
    L2 = (H - 2) * Wp + W - 1        # length of the pooled-candidate vector
    Wpn = Wo + 2                     # padded row pitch of the next stage
    P = np.zeros(((Ho + 2) * Wpn, L2), np.float32)
    for ho in range(Ho):
        for wo in range(Wo):
            P[(1 + ho) * Wpn + (1 + wo), (2 * ho) * Wp + 2 * wo] = 1.0
    return P


# ----------------------------------------------------------------------------
# Fused kernel
# ----------------------------------------------------------------------------
def _conv_relu_pool(ap, w_ref, b_ref, p_ref, H, W):
    """One fused stage: 3x3 conv (stride 1, pad 1) + bias + ReLU + 2x2 maxpool.

    ap:    ((H+2)*(W+2), Cin) bf16 activation in flattened padded-row layout
    w_ref: (9, Cin, Cout) bf16 per-tap weights (tap index = kh*3 + kw)
    b_ref: (1, Cout) f32 bias
    p_ref: pool-select/re-pad matrix (bf16), or None for the last stage
    Returns the next stage's bf16 padded activation (or (1, Cout) bf16 at the
    last stage, which feeds the classifier directly).
    """
    Wp = W + 2
    L = (H - 1) * Wp + W                       # covers every output pixel h*Wp + w
    cout = w_ref.shape[-1]
    taps = [w_ref[t] for t in range(9)]        # hoisted (Cin, Cout) weight loads

    acc = jnp.zeros((L, cout), jnp.float32)
    for kh in range(3):
        for kw in range(3):
            off = kh * Wp + kw
            acc = acc + jnp.dot(ap[off:off + L, :], taps[kh * 3 + kw],
                                preferred_element_type=jnp.float32)
    # Bias + ReLU in f32, then a single bf16 round for this stage.  bf16
    # rounding is monotonic, so pooling the rounded values below is identical
    # to pooling in f32 and rounding afterwards.
    acc = jnp.maximum(acc + b_ref[...], 0.0).astype(jnp.bfloat16)

    # 2x2/stride-2 max pool: window members of pixel i are {i, i+1, i+Wp, i+Wp+1}.
    L2 = L - Wp - 1
    m = jnp.maximum(jnp.maximum(acc[0:L2, :], acc[1:L2 + 1, :]),
                    jnp.maximum(acc[Wp:Wp + L2, :], acc[Wp + 1:Wp + 1 + L2, :]))
    if p_ref is None:                          # last stage ends at 1x1 spatial
        return m                               # (1, Cout) bf16
    # Select pooled pixels + place into the next zero-padded layout (one matmul).
    # P is 0/1, m is bf16, so the f32 result is exact and the bf16 cast lossless.
    return jnp.dot(p_ref[...], m,
                   preferred_element_type=jnp.float32).astype(jnp.bfloat16)


def _vgg_kernel(stage_dims, *refs):
    ns = len(stage_dims)
    xp_ref = refs[0]
    conv_w = refs[1:1 + ns]
    conv_b = refs[1 + ns:1 + 2 * ns]
    pmats = refs[1 + 2 * ns:3 * ns]            # ns - 1 matrices
    fws = refs[3 * ns:3 * ns + 3]
    fbs = refs[3 * ns + 3:3 * ns + 6]
    o_ref = refs[3 * ns + 6]

    # features: [Conv3x3 -> ReLU -> MaxPool2x2] x ns, all resident in VMEM.
    a = xp_ref[0]                              # ((H0+2)*(W0+2), Cin0) bf16
    for s, (H, W, _cin, _cout) in enumerate(stage_dims):
        p_ref = pmats[s] if s + 1 < ns else None
        a = _conv_relu_pool(a, conv_w[s], conv_b[s], p_ref, H, W)

    # classifier: Dropout(id) -> Linear -> ReLU -> Dropout(id) -> Linear -> ReLU -> Linear
    h = a                                      # (1, 64) bf16 (1x1 spatial => torch flatten order)
    for i in range(3):
        h = jnp.dot(h, fws[i][...], preferred_element_type=jnp.float32) + fbs[i][...]
        if i < 2:
            # ReLU commutes with the monotonic bf16 round (round(0) == 0).
            h = jnp.maximum(h, 0.0).astype(jnp.bfloat16)
    o_ref[0] = h.astype(o_ref.dtype)           # lane-dense (1, 128) f32 store


# ----------------------------------------------------------------------------
# Host-side wrapper
# ----------------------------------------------------------------------------
def _const_spec(arr):
    if arr.ndim == 2:
        return pl.BlockSpec(arr.shape, lambda i: (0, 0))
    return pl.BlockSpec(arr.shape, lambda i: (0, 0, 0))


def vgg_forward(x_nchw, params):
    """Forward pass matching VGG.forward (eval mode).  x_nchw: (B, Cin, H, W)."""
    B, Cin0, H0, W0 = x_nchw.shape

    stage_dims = []
    H, W = H0, W0
    for cin, cout in CONV_CHANNELS:
        stage_dims.append((H, W, cin, cout))
        H, W = H // 2, W // 2
    # TODO(synk): general (non-1x1) final spatial would need NCHW flatten order.
    assert H == 1 and W == 1, "classifier expects the conv stack to end at 1x1"

    # layout: NCHW -> NHWC, SAME-pad once, flatten rows -> ((H0+2)*(W0+2), Cin).
    # Cast to bf16 here so the kernel never re-casts the input slab.
    x = jnp.transpose(x_nchw, (0, 2, 3, 1)).astype(jnp.float32)
    xp = jnp.pad(x, ((0, 0), (1, 1), (1, 1), (0, 0)))
    xp = xp.reshape(B, (H0 + 2) * (W0 + 2), Cin0).astype(jnp.bfloat16)

    conv_w = [w.reshape(9, w.shape[2], w.shape[3]).astype(jnp.bfloat16)
              for w, _b in params["convs"]]
    conv_b = [b.reshape(1, -1).astype(jnp.float32) for _w, b in params["convs"]]
    pmats = [jnp.asarray(_pool_place_matrix(Hs, Ws), jnp.bfloat16)
             for (Hs, Ws, _ci, _co) in stage_dims[:-1]]

    (w1, b1), (w2, b2), (w3, b3) = params["fcs"]
    w3p = jnp.zeros((w3.shape[0], LOGIT_PAD), w3.dtype).at[:, :w3.shape[1]].set(w3)
    b3p = jnp.zeros((LOGIT_PAD,), b3.dtype).at[:b3.shape[0]].set(b3)
    fws = [w1.astype(jnp.bfloat16), w2.astype(jnp.bfloat16), w3p.astype(jnp.bfloat16)]
    fbs = [b1.reshape(1, -1).astype(jnp.float32),
           b2.reshape(1, -1).astype(jnp.float32),
           b3p.reshape(1, -1).astype(jnp.float32)]

    consts = [*conv_w, *conv_b, *pmats, *fws, *fbs]
    in_specs = ([pl.BlockSpec((1, (H0 + 2) * (W0 + 2), Cin0), lambda i: (i, 0, 0))]
                + [_const_spec(a) for a in consts])

    out = pl.pallas_call(
        functools.partial(_vgg_kernel, tuple(stage_dims)),
        out_shape=jax.ShapeDtypeStruct((B, 1, LOGIT_PAD), jnp.float32),
        grid=(B,),
        in_specs=in_specs,
        out_specs=pl.BlockSpec((1, 1, LOGIT_PAD), lambda i: (i, 0, 0)),
        compiler_params=pltpu.CompilerParams(dimension_semantics=("parallel",)),
    )(xp, *consts)
    return out[:, 0, :FC_DIMS[-1][1]]


# ----------------------------------------------------------------------------
# Parameter construction (deterministic, mirrors the PyTorch __init__ init).
# ----------------------------------------------------------------------------
def init_params(key):
    keys = jax.random.split(key, len(CONV_CHANNELS) + 2 * len(FC_DIMS))
    ki = 0
    convs = []
    for cin, cout in CONV_CHANNELS:
        n = 3 * 3 * cout
        std = math.sqrt(2.0 / n)                     # m.weight.data.normal_(0, sqrt(2/n))
        w = std * jax.random.normal(keys[ki], (3, 3, cin, cout), jnp.float32); ki += 1
        b = jnp.zeros((cout,), jnp.float32)          # m.bias.data.zero_()
        convs.append((w, b))
    fcs = []
    for din, dout in FC_DIMS:
        bound = 1.0 / math.sqrt(din)                 # nn.Linear default init
        w = jax.random.uniform(keys[ki], (din, dout), jnp.float32, -bound, bound); ki += 1
        b = jax.random.uniform(keys[ki], (dout,), jnp.float32, -bound, bound); ki += 1
        fcs.append((w, b))
    return {"convs": convs, "fcs": fcs}


# ----------------------------------------------------------------------------
# Pure-JAX (XLA) reference with the same bf16-matmul / f32-accumulate scheme.
# ----------------------------------------------------------------------------
def vgg_reference(x_nchw, params):
    x = jnp.transpose(x_nchw, (0, 2, 3, 1)).astype(jnp.float32)
    for w, b in params["convs"]:
        y = jax.lax.conv_general_dilated(
            x.astype(jnp.bfloat16), w.astype(jnp.bfloat16),
            window_strides=(1, 1), padding="SAME",
            dimension_numbers=("NHWC", "HWIO", "NHWC"),
            preferred_element_type=jnp.float32)
        y = jnp.maximum(y + b, 0.0)
        Bq, Hq, Wq, Cq = y.shape
        x = y.reshape(Bq, Hq // 2, 2, Wq // 2, 2, Cq).max(axis=(2, 4))
    Bq = x.shape[0]
    h = jnp.transpose(x, (0, 3, 1, 2)).reshape(Bq, -1)   # torch-style flatten
    for i, (w, b) in enumerate(params["fcs"]):
        h = jnp.dot(h.astype(jnp.bfloat16), w.astype(jnp.bfloat16),
                    preferred_element_type=jnp.float32) + b
        if i < 2:
            h = jnp.maximum(h, 0.0)
    return h


if __name__ == "__main__":
    key = jax.random.PRNGKey(0)
    pkey, xkey = jax.random.split(key)
    params = init_params(pkey)

    # Small CIFAR-style input: batch=2, 3 channels, 16x16 spatial (NCHW).
    # (16x16 with four 2x2 max-pools collapses to 1x1, so flatten dim == 64.)
    x = jax.random.normal(xkey, (2, 3, 16, 16), jnp.float32)

    fwd = jax.jit(vgg_forward)
    out = jax.block_until_ready(fwd(x, params))

    assert out.shape == (2, 10), out.shape
    assert out.dtype == jnp.float32
    assert bool(jnp.all(jnp.isfinite(out)))

    ref = jax.block_until_ready(vgg_reference(x, params))
    assert bool(jnp.allclose(out, ref, rtol=3e-2, atol=3e-2)), \
        float(jnp.max(jnp.abs(out - ref)))

    print("KERNEL_OK")
</pallas_src>

<mosaic_0001>
module attributes {stable_mosaic.version = 11 : i64} {
  func.func @_vgg_kernel(%arg0: i32, %arg1: memref<1x324x3xbf16, #tpu.memory_space<vmem>>, %arg2: memref<9x3x16xbf16, #tpu.memory_space<vmem>>, %arg3: memref<9x16x32xbf16, #tpu.memory_space<vmem>>, %arg4: memref<9x32x64xbf16, #tpu.memory_space<vmem>>, %arg5: memref<9x64x64xbf16, #tpu.memory_space<vmem>>, %arg6: memref<1x16xf32, #tpu.memory_space<vmem>>, %arg7: memref<1x32xf32, #tpu.memory_space<vmem>>, %arg8: memref<1x64xf32, #tpu.memory_space<vmem>>, %arg9: memref<1x64xf32, #tpu.memory_space<vmem>>, %arg10: memref<100x267xbf16, #tpu.memory_space<vmem>>, %arg11: memref<36x67xbf16, #tpu.memory_space<vmem>>, %arg12: memref<16x15xbf16, #tpu.memory_space<vmem>>, %arg13: memref<64x512xbf16, #tpu.memory_space<vmem>>, %arg14: memref<512x512xbf16, #tpu.memory_space<vmem>>, %arg15: memref<512x128xbf16, #tpu.memory_space<vmem>>, %arg16: memref<1x512xf32, #tpu.memory_space<vmem>>, %arg17: memref<1x512xf32, #tpu.memory_space<vmem>>, %arg18: memref<1x128xf32, #tpu.memory_space<vmem>>, %arg19: memref<1x1x128xf32, #tpu.memory_space<vmem>>) attributes {dimension_semantics = [#tpu.dimension_semantics<parallel>], iteration_bounds = array<i64: 2>, scalar_prefetch = 0 : i64, scratch_operands = 0 : i64, tpu.core_type = #tpu.core_type<tc>, window_params = [{transform_indices = @transform_0, window_bounds = array<i64: 1, 324, 3>}, {pipeline_mode = #tpu.pipeline_mode<synchronous>, transform_indices = @transform_1, window_bounds = array<i64: 9, 3, 16>}, {pipeline_mode = #tpu.pipeline_mode<synchronous>, transform_indices = @transform_2, window_bounds = array<i64: 9, 16, 32>}, {pipeline_mode = #tpu.pipeline_mode<synchronous>, transform_indices = @transform_3, window_bounds = array<i64: 9, 32, 64>}, {pipeline_mode = #tpu.pipeline_mode<synchronous>, transform_indices = @transform_4, window_bounds = array<i64: 9, 64, 64>}, {pipeline_mode = #tpu.pipeline_mode<synchronous>, transform_indices = @transform_5, window_bounds = array<i64: 1, 16>}, {pipeline_mode = #tpu.pipeline_mode<synchronous>, transform_indices = @transform_6, window_bounds = array<i64: 1, 32>}, {pipeline_mode = #tpu.pipeline_mode<synchronous>, transform_indices = @transform_7, window_bounds = array<i64: 1, 64>}, {pipeline_mode = #tpu.pipeline_mode<synchronous>, transform_indices = @transform_8, window_bounds = array<i64: 1, 64>}, {pipeline_mode = #tpu.pipeline_mode<synchronous>, transform_indices = @transform_9, window_bounds = array<i64: 100, 267>}, {pipeline_mode = #tpu.pipeline_mode<synchronous>, transform_indices = @transform_10, window_bounds = array<i64: 36, 67>}, {pipeline_mode = #tpu.pipeline_mode<synchronous>, transform_indices = @transform_11, window_bounds = array<i64: 16, 15>}, {pipeline_mode = #tpu.pipeline_mode<synchronous>, transform_indices = @transform_12, window_bounds = array<i64: 64, 512>}, {pipeline_mode = #tpu.pipeline_mode<synchronous>, transform_indices = @transform_13, window_bounds = array<i64: 512, 512>}, {pipeline_mode = #tpu.pipeline_mode<synchronous>, transform_indices = @transform_14, window_bounds = array<i64: 512, 128>}, {pipeline_mode = #tpu.pipeline_mode<synchronous>, transform_indices = @transform_15, window_bounds = array<i64: 1, 512>}, {pipeline_mode = #tpu.pipeline_mode<synchronous>, transform_indices = @transform_16, window_bounds = array<i64: 1, 512>}, {pipeline_mode = #tpu.pipeline_mode<synchronous>, transform_indices = @transform_17, window_bounds = array<i64: 1, 128>}, {transform_indices = @transform_18, window_bounds = array<i64: 1, 1, 128>}]} {
    %c0 = arith.constant 0 : index
    %c0_0 = arith.constant 0 : index
    %c0_1 = arith.constant 0 : index
    %0 = vector.load %arg1[%c0, %c0_0, %c0_1] : memref<1x324x3xbf16, #tpu.memory_space<vmem>>, vector<1x324x3xbf16>
    %1 = vector.shape_cast %0 : vector<1x324x3xbf16> to vector<324x3xbf16>
    %c0_2 = arith.constant 0 : index
    %c0_3 = arith.constant 0 : index
    %c0_4 = arith.constant 0 : index
    %2 = vector.load %arg2[%c0_2, %c0_3, %c0_4] : memref<9x3x16xbf16, #tpu.memory_space<vmem>>, vector<1x3x16xbf16>
    %3 = vector.shape_cast %2 : vector<1x3x16xbf16> to vector<3x16xbf16>
    %c1 = arith.constant 1 : index
    %c0_5 = arith.constant 0 : index
    %c0_6 = arith.constant 0 : index
    %4 = vector.load %arg2[%c1, %c0_5, %c0_6] : memref<9x3x16xbf16, #tpu.memory_space<vmem>>, vector<1x3x16xbf16>
    %5 = vector.shape_cast %4 : vector<1x3x16xbf16> to vector<3x16xbf16>
    %c2 = arith.constant 2 : index
    %c0_7 = arith.constant 0 : index
    %c0_8 = arith.constant 0 : index
    %6 = vector.load %arg2[%c2, %c0_7, %c0_8] : memref<9x3x16xbf16, #tpu.memory_space<vmem>>, vector<1x3x16xbf16>
    %7 = vector.shape_cast %6 : vector<1x3x16xbf16> to vector<3x16xbf16>
    %c3 = arith.constant 3 : index
    %c0_9 = arith.constant 0 : index
    %c0_10 = arith.constant 0 : index
    %8 = vector.load %arg2[%c3, %c0_9, %c0_10] : memref<9x3x16xbf16, #tpu.memory_space<vmem>>, vector<1x3x16xbf16>
    %9 = vector.shape_cast %8 : vector<1x3x16xbf16> to vector<3x16xbf16>
    %c4 = arith.constant 4 : index
    %c0_11 = arith.constant 0 : index
    %c0_12 = arith.constant 0 : index
    %10 = vector.load %arg2[%c4, %c0_11, %c0_12] : memref<9x3x16xbf16, #tpu.memory_space<vmem>>, vector<1x3x16xbf16>
    %11 = vector.shape_cast %10 : vector<1x3x16xbf16> to vector<3x16xbf16>
    %c5 = arith.constant 5 : index
    %c0_13 = arith.constant 0 : index
    %c0_14 = arith.constant 0 : index
    %12 = vector.load %arg2[%c5, %c0_13, %c0_14] : memref<9x3x16xbf16, #tpu.memory_space<vmem>>, vector<1x3x16xbf16>
    %13 = vector.shape_cast %12 : vector<1x3x16xbf16> to vector<3x16xbf16>
    %c6 = arith.constant 6 : index
    %c0_15 = arith.constant 0 : index
    %c0_16 = arith.constant 0 : index
    %14 = vector.load %arg2[%c6, %c0_15, %c0_16] : memref<9x3x16xbf16, #tpu.memory_space<vmem>>, vector<1x3x16xbf16>
    %15 = vector.shape_cast %14 : vector<1x3x16xbf16> to vector<3x16xbf16>
    %c7 = arith.constant 7 : index
    %c0_17 = arith.constant 0 : index
    %c0_18 = arith.constant 0 : index
    %16 = vector.load %arg2[%c7, %c0_17, %c0_18] : memref<9x3x16xbf16, #tpu.memory_space<vmem>>, vector<1x3x16xbf16>
    %17 = vector.shape_cast %16 : vector<1x3x16xbf16> to vector<3x16xbf16>
    %c8 = arith.constant 8 : index
    %c0_19 = arith.constant 0 : index
    %c0_20 = arith.constant 0 : index
    %18 = vector.load %arg2[%c8, %c0_19, %c0_20] : memref<9x3x16xbf16, #tpu.memory_space<vmem>>, vector<1x3x16xbf16>
    %19 = vector.shape_cast %18 : vector<1x3x16xbf16> to vector<3x16xbf16>
    %cst = arith.constant 0.000000e+00 : f32
    %20 = vector.broadcast %cst : f32 to vector<286x16xf32>
    %21 = vector.extract_strided_slice %1 {offsets = [0, 0], sizes = [286, 3], strides = [1, 1]} : vector<324x3xbf16> to vector<286x3xbf16>
    %cst_21 = arith.constant dense<0.000000e+00> : vector<286x16xf32>
    %22 = tpu.matmul %21, %3, %cst_21 {dimension_numbers = #tpu.dot_dimension_numbers<[1], [0], [0], [1], [0, 0, 1, 1], [], []>} : vector<286x3xbf16>, vector<3x16xbf16>, vector<286x16xf32> -> vector<286x16xf32>
    %23 = arith.addf %20, %22 : vector<286x16xf32>
    %24 = vector.extract_strided_slice %1 {offsets = [1, 0], sizes = [286, 3], strides = [1, 1]} : vector<324x3xbf16> to vector<286x3xbf16>
    %cst_22 = arith.constant dense<0.000000e+00> : vector<286x16xf32>
    %25 = tpu.matmul %24, %5, %cst_22 {dimension_numbers = #tpu.dot_dimension_numbers<[1], [0], [0], [1], [0, 0, 1, 1], [], []>} : vector<286x3xbf16>, vector<3x16xbf16>, vector<286x16xf32> -> vector<286x16xf32>
    %26 = arith.addf %23, %25 : vector<286x16xf32>
    %27 = vector.extract_strided_slice %1 {offsets = [2, 0], sizes = [286, 3], strides = [1, 1]} : vector<324x3xbf16> to vector<286x3xbf16>
    %cst_23 = arith.constant dense<0.000000e+00> : vector<286x16xf32>
    %28 = tpu.matmul %27, %7, %cst_23 {dimension_numbers = #tpu.dot_dimension_numbers<[1], [0], [0], [1], [0, 0, 1, 1], [], []>} : vector<286x3xbf16>, vector<3x16xbf16>, vector<286x16xf32> -> vector<286x16xf32>
    %29 = arith.addf %26, %28 : vector<286x16xf32>
    %30 = vector.extract_strided_slice %1 {offsets = [18, 0], sizes = [286, 3], strides = [1, 1]} : vector<324x3xbf16> to vector<286x3xbf16>
    %cst_24 = arith.constant dense<0.000000e+00> : vector<286x16xf32>
    %31 = tpu.matmul %30, %9, %cst_24 {dimension_numbers = #tpu.dot_dimension_numbers<[1], [0], [0], [1], [0, 0, 1, 1], [], []>} : vector<286x3xbf16>, vector<3x16xbf16>, vector<286x16xf32> -> vector<286x16xf32>
    %32 = arith.addf %29, %31 : vector<286x16xf32>
    %33 = vector.extract_strided_slice %1 {offsets = [19, 0], sizes = [286, 3], strides = [1, 1]} : vector<324x3xbf16> to vector<286x3xbf16>
    %cst_25 = arith.constant dense<0.000000e+00> : vector<286x16xf32>
    %34 = tpu.matmul %33, %11, %cst_25 {dimension_numbers = #tpu.dot_dimension_numbers<[1], [0], [0], [1], [0, 0, 1, 1], [], []>} : vector<286x3xbf16>, vector<3x16xbf16>, vector<286x16xf32> -> vector<286x16xf32>
    %35 = arith.addf %32, %34 : vector<286x16xf32>
    %36 = vector.extract_strided_slice %1 {offsets = [20, 0], sizes = [286, 3], strides = [1, 1]} : vector<324x3xbf16> to vector<286x3xbf16>
    %cst_26 = arith.constant dense<0.000000e+00> : vector<286x16xf32>
    %37 = tpu.matmul %36, %13, %cst_26 {dimension_numbers = #tpu.dot_dimension_numbers<[1], [0], [0], [1], [0, 0, 1, 1], [], []>} : vector<286x3xbf16>, vector<3x16xbf16>, vector<286x16xf32> -> vector<286x16xf32>
    %38 = arith.addf %35, %37 : vector<286x16xf32>
    %39 = vector.extract_strided_slice %1 {offsets = [36, 0], sizes = [286, 3], strides = [1, 1]} : vector<324x3xbf16> to vector<286x3xbf16>
    %cst_27 = arith.constant dense<0.000000e+00> : vector<286x16xf32>
    %40 = tpu.matmul %39, %15, %cst_27 {dimension_numbers = #tpu.dot_dimension_numbers<[1], [0], [0], [1], [0, 0, 1, 1], [], []>} : vector<286x3xbf16>, vector<3x16xbf16>, vector<286x16xf32> -> vector<286x16xf32>
    %41 = arith.addf %38, %40 : vector<286x16xf32>
    %42 = vector.extract_strided_slice %1 {offsets = [37, 0], sizes = [286, 3], strides = [1, 1]} : vector<324x3xbf16> to vector<286x3xbf16>
    %cst_28 = arith.constant dense<0.000000e+00> : vector<286x16xf32>
    %43 = tpu.matmul %42, %17, %cst_28 {dimension_numbers = #tpu.dot_dimension_numbers<[1], [0], [0], [1], [0, 0, 1, 1], [], []>} : vector<286x3xbf16>, vector<3x16xbf16>, vector<286x16xf32> -> vector<286x16xf32>
    %44 = arith.addf %41, %43 : vector<286x16xf32>
    %45 = vector.extract_strided_slice %1 {offsets = [38, 0], sizes = [286, 3], strides = [1, 1]} : vector<324x3xbf16> to vector<286x3xbf16>
    %cst_29 = arith.constant dense<0.000000e+00> : vector<286x16xf32>
    %46 = tpu.matmul %45, %19, %cst_29 {dimension_numbers = #tpu.dot_dimension_numbers<[1], [0], [0], [1], [0, 0, 1, 1], [], []>} : vector<286x3xbf16>, vector<3x16xbf16>, vector<286x16xf32> -> vector<286x16xf32>
    %47 = arith.addf %44, %46 : vector<286x16xf32>
    %c0_30 = arith.constant 0 : index
    %c0_31 = arith.constant 0 : index
    %48 = vector.load %arg6[%c0_30, %c0_31] : memref<1x16xf32, #tpu.memory_space<vmem>>, vector<1x16xf32>
    %49 = vector.broadcast %48 : vector<1x16xf32> to vector<286x16xf32>
    %50 = arith.addf %47, %49 : vector<286x16xf32>
    %cst_32 = arith.constant 0.000000e+00 : f32
    %51 = vector.broadcast %cst_32 : f32 to vector<286x16xf32>
    %52 = arith.maximumf %50, %51 : vector<286x16xf32>
    %53 = arith.truncf %52 : vector<286x16xf32> to vector<286x16xbf16>
    %54 = vector.extract_strided_slice %53 {offsets = [0, 0], sizes = [267, 16], strides = [1, 1]} : vector<286x16xbf16> to vector<267x16xbf16>
    %55 = vector.extract_strided_slice %53 {offsets = [1, 0], sizes = [267, 16], strides = [1, 1]} : vector<286x16xbf16> to vector<267x16xbf16>
    %56 = arith.maximumf %54, %55 : vector<267x16xbf16>
    %57 = vector.extract_strided_slice %53 {offsets = [18, 0], sizes = [267, 16], strides = [1, 1]} : vector<286x16xbf16> to vector<267x16xbf16>
    %58 = vector.extract_strided_slice %53 {offsets = [19, 0], sizes = [267, 16], strides = [1, 1]} : vector<286x16xbf16> to vector<267x16xbf16>
    %59 = arith.maximumf %57, %58 : vector<267x16xbf16>
    %60 = arith.maximumf %56, %59 : vector<267x16xbf16>
    %c0_33 = arith.constant 0 : index
    %c0_34 = arith.constant 0 : index
    %61 = vector.load %arg10[%c0_33, %c0_34] : memref<100x267xbf16, #tpu.memory_space<vmem>>, vector<100x267xbf16>
    %cst_35 = arith.constant dense<0.000000e+00> : vector<100x16xf32>
    %62 = tpu.matmul %61, %60, %cst_35 {dimension_numbers = #tpu.dot_dimension_numbers<[1], [0], [0], [1], [0, 0, 1, 1], [], []>} : vector<100x267xbf16>, vector<267x16xbf16>, vector<100x16xf32> -> vector<100x16xf32>
    %63 = arith.truncf %62 : vector<100x16xf32> to vector<100x16xbf16>
    %c0_36 = arith.constant 0 : index
    %c0_37 = arith.constant 0 : index
    %c0_38 = arith.constant 0 : index
    %64 = vector.load %arg3[%c0_36, %c0_37, %c0_38] : memref<9x16x32xbf16, #tpu.memory_space<vmem>>, vector<1x16x32xbf16>
    %65 = vector.shape_cast %64 : vector<1x16x32xbf16> to vector<16x32xbf16>
    %c1_39 = arith.constant 1 : index
    %c0_40 = arith.constant 0 : index
    %c0_41 = arith.constant 0 : index
    %66 = vector.load %arg3[%c1_39, %c0_40, %c0_41] : memref<9x16x32xbf16, #tpu.memory_space<vmem>>, vector<1x16x32xbf16>
    %67 = vector.shape_cast %66 : vector<1x16x32xbf16> to vector<16x32xbf16>
    %c2_42 = arith.constant 2 : index
    %c0_43 = arith.constant 0 : index
    %c0_44 = arith.constant 0 : index
    %68 = vector.load %arg3[%c2_42, %c0_43, %c0_44] : memref<9x16x32xbf16, #tpu.memory_space<vmem>>, vector<1x16x32xbf16>
    %69 = vector.shape_cast %68 : vector<1x16x32xbf16> to vector<16x32xbf16>
    %c3_45 = arith.constant 3 : index
    %c0_46 = arith.constant 0 : index
    %c0_47 = arith.constant 0 : index
    %70 = vector.load %arg3[%c3_45, %c0_46, %c0_47] : memref<9x16x32xbf16, #tpu.memory_space<vmem>>, vector<1x16x32xbf16>
    %71 = vector.shape_cast %70 : vector<1x16x32xbf16> to vector<16x32xbf16>
    %c4_48 = arith.constant 4 : index
    %c0_49 = arith.constant 0 : index
    %c0_50 = arith.constant 0 : index
    %72 = vector.load %arg3[%c4_48, %c0_49, %c0_50] : memref<9x16x32xbf16, #tpu.memory_space<vmem>>, vector<1x16x32xbf16>
    %73 = vector.shape_cast %72 : vector<1x16x32xbf16> to vector<16x32xbf16>
    %c5_51 = arith.constant 5 : index
    %c0_52 = arith.constant 0 : index
    %c0_53 = arith.constant 0 : index
    %74 = vector.load %arg3[%c5_51, %c0_52, %c0_53] : memref<9x16x32xbf16, #tpu.memory_space<vmem>>, vector<1x16x32xbf16>
    %75 = vector.shape_cast %74 : vector<1x16x32xbf16> to vector<16x32xbf16>
    %c6_54 = arith.constant 6 : index
    %c0_55 = arith.constant 0 : index
    %c0_56 = arith.constant 0 : index
    %76 = vector.load %arg3[%c6_54, %c0_55, %c0_56] : memref<9x16x32xbf16, #tpu.memory_space<vmem>>, vector<1x16x32xbf16>
    %77 = vector.shape_cast %76 : vector<1x16x32xbf16> to vector<16x32xbf16>
    %c7_57 = arith.constant 7 : index
    %c0_58 = arith.constant 0 : index
    %c0_59 = arith.constant 0 : index
    %78 = vector.load %arg3[%c7_57, %c0_58, %c0_59] : memref<9x16x32xbf16, #tpu.memory_space<vmem>>, vector<1x16x32xbf16>
    %79 = vector.shape_cast %78 : vector<1x16x32xbf16> to vector<16x32xbf16>
    %c8_60 = arith.constant 8 : index
    %c0_61 = arith.constant 0 : index
    %c0_62 = arith.constant 0 : index
    %80 = vector.load %arg3[%c8_60, %c0_61, %c0_62] : memref<9x16x32xbf16, #tpu.memory_space<vmem>>, vector<1x16x32xbf16>
    %81 = vector.shape_cast %80 : vector<1x16x32xbf16> to vector<16x32xbf16>
    %cst_63 = arith.constant 0.000000e+00 : f32
    %82 = vector.broadcast %cst_63 : f32 to vector<78x32xf32>
    %83 = vector.extract_strided_slice %63 {offsets = [0, 0], sizes = [78, 16], strides = [1, 1]} : vector<100x16xbf16> to vector<78x16xbf16>
    %cst_64 = arith.constant dense<0.000000e+00> : vector<78x32xf32>
    %84 = tpu.matmul %83, %65, %cst_64 {dimension_numbers = #tpu.dot_dimension_numbers<[1], [0], [0], [1], [0, 0, 1, 1], [], []>} : vector<78x16xbf16>, vector<16x32xbf16>, vector<78x32xf32> -> vector<78x32xf32>
    %85 = arith.addf %82, %84 : vector<78x32xf32>
    %86 = vector.extract_strided_slice %63 {offsets = [1, 0], sizes = [78, 16], strides = [1, 1]} : vector<100x16xbf16> to vector<78x16xbf16>
    %cst_65 = arith.constant dense<0.000000e+00> : vector<78x32xf32>
    %87 = tpu.matmul %86, %67, %cst_65 {dimension_numbers = #tpu.dot_dimension_numbers<[1], [0], [0], [1], [0, 0, 1, 1], [], []>} : vector<78x16xbf16>, vector<16x32xbf16>, vector<78x32xf32> -> vector<78x32xf32>
    %88 = arith.addf %85, %87 : vector<78x32xf32>
    %89 = vector.extract_strided_slice %63 {offsets = [2, 0], sizes = [78, 16], strides = [1, 1]} : vector<100x16xbf16> to vector<78x16xbf16>
    %cst_66 = arith.constant dense<0.000000e+00> : vector<78x32xf32>
    %90 = tpu.matmul %89, %69, %cst_66 {dimension_numbers = #tpu.dot_dimension_numbers<[1], [0], [0], [1], [0, 0, 1, 1], [], []>} : vector<78x16xbf16>, vector<16x32xbf16>, vector<78x32xf32> -> vector<78x32xf32>
    %91 = arith.addf %88, %90 : vector<78x32xf32>
    %92 = vector.extract_strided_slice %63 {offsets = [10, 0], sizes = [78, 16], strides = [1, 1]} : vector<100x16xbf16> to vector<78x16xbf16>
    %cst_67 = arith.constant dense<0.000000e+00> : vector<78x32xf32>
    %93 = tpu.matmul %92, %71, %cst_67 {dimension_numbers = #tpu.dot_dimension_numbers<[1], [0], [0], [1], [0, 0, 1, 1], [], []>} : vector<78x16xbf16>, vector<16x32xbf16>, vector<78x32xf32> -> vector<78x32xf32>
    %94 = arith.addf %91, %93 : vector<78x32xf32>
    %95 = vector.extract_strided_slice %63 {offsets = [11, 0], sizes = [78, 16], strides = [1, 1]} : vector<100x16xbf16> to vector<78x16xbf16>
    %cst_68 = arith.constant dense<0.000000e+00> : vector<78x32xf32>
    %96 = tpu.matmul %95, %73, %cst_68 {dimension_numbers = #tpu.dot_dimension_numbers<[1], [0], [0], [1], [0, 0, 1, 1], [], []>} : vector<78x16xbf16>, vector<16x32xbf16>, vector<78x32xf32> -> vector<78x32xf32>
    %97 = arith.addf %94, %96 : vector<78x32xf32>
    %98 = vector.extract_strided_slice %63 {offsets = [12, 0], sizes = [78, 16], strides = [1, 1]} : vector<100x16xbf16> to vector<78x16xbf16>
    %cst_69 = arith.constant dense<0.000000e+00> : vector<78x32xf32>
    %99 = tpu.matmul %98, %75, %cst_69 {dimension_numbers = #tpu.dot_dimension_numbers<[1], [0], [0], [1], [0, 0, 1, 1], [], []>} : vector<78x16xbf16>, vector<16x32xbf16>, vector<78x32xf32> -> vector<78x32xf32>
    %100 = arith.addf %97, %99 : vector<78x32xf32>
    %101 = vector.extract_strided_slice %63 {offsets = [20, 0], sizes = [78, 16], strides = [1, 1]} : vector<100x16xbf16> to vector<78x16xbf16>
    %cst_70 = arith.constant dense<0.000000e+00> : vector<78x32xf32>
    %102 = tpu.matmul %101, %77, %cst_70 {dimension_numbers = #tpu.dot_dimension_numbers<[1], [0], [0], [1], [0, 0, 1, 1], [], []>} : vector<78x16xbf16>, vector<16x32xbf16>, vector<78x32xf32> -> vector<78x32xf32>
    %103 = arith.addf %100, %102 : vector<78x32xf32>
    %104 = vector.extract_strided_slice %63 {offsets = [21, 0], sizes = [78, 16], strides = [1, 1]} : vector<100x16xbf16> to vector<78x16xbf16>
    %cst_71 = arith.constant dense<0.000000e+00> : vector<78x32xf32>
    %105 = tpu.matmul %104, %79, %cst_71 {dimension_numbers = #tpu.dot_dimension_numbers<[1], [0], [0], [1], [0, 0, 1, 1], [], []>} : vector<78x16xbf16>, vector<16x32xbf16>, vector<78x32xf32> -> vector<78x32xf32>
    %106 = arith.addf %103, %105 : vector<78x32xf32>
    %107 = vector.extract_strided_slice %63 {offsets = [22, 0], sizes = [78, 16], strides = [1, 1]} : vector<100x16xbf16> to vector<78x16xbf16>
    %cst_72 = arith.constant dense<0.000000e+00> : vector<78x32xf32>
    %108 = tpu.matmul %107, %81, %cst_72 {dimension_numbers = #tpu.dot_dimension_numbers<[1], [0], [0], [1], [0, 0, 1, 1], [], []>} : vector<78x16xbf16>, vector<16x32xbf16>, vector<78x32xf32> -> vector<78x32xf32>
    %109 = arith.addf %106, %108 : vector<78x32xf32>
    %c0_73 = arith.constant 0 : index
    %c0_74 = arith.constant 0 : index
    %110 = vector.load %arg7[%c0_73, %c0_74] : memref<1x32xf32, #tpu.memory_space<vmem>>, vector<1x32xf32>
    %111 = vector.broadcast %110 : vector<1x32xf32> to vector<78x32xf32>
    %112 = arith.addf %109, %111 : vector<78x32xf32>
    %cst_75 = arith.constant 0.000000e+00 : f32
    %113 = vector.broadcast %cst_75 : f32 to vector<78x32xf32>
    %114 = arith.maximumf %112, %113 : vector<78x32xf32>
    %115 = arith.truncf %114 : vector<78x32xf32> to vector<78x32xbf16>
    %116 = vector.extract_strided_slice %115 {offsets = [0, 0], sizes = [67, 32], strides = [1, 1]} : vector<78x32xbf16> to vector<67x32xbf16>
    %117 = vector.extract_strided_slice %115 {offsets = [1, 0], sizes = [67, 32], strides = [1, 1]} : vector<78x32xbf16> to vector<67x32xbf16>
    %118 = arith.maximumf %116, %117 : vector<67x32xbf16>
    %119 = vector.extract_strided_slice %115 {offsets = [10, 0], sizes = [67, 32], strides = [1, 1]} : vector<78x32xbf16> to vector<67x32xbf16>
    %120 = vector.extract_strided_slice %115 {offsets = [11, 0], sizes = [67, 32], strides = [1, 1]} : vector<78x32xbf16> to vector<67x32xbf16>
    %121 = arith.maximumf %119, %120 : vector<67x32xbf16>
    %122 = arith.maximumf %118, %121 : vector<67x32xbf16>
    %c0_76 = arith.constant 0 : index
    %c0_77 = arith.constant 0 : index
    %123 = vector.load %arg11[%c0_76, %c0_77] : memref<36x67xbf16, #tpu.memory_space<vmem>>, vector<36x67xbf16>
    %cst_78 = arith.constant dense<0.000000e+00> : vector<36x32xf32>
    %124 = tpu.matmul %123, %122, %cst_78 {dimension_numbers = #tpu.dot_dimension_numbers<[1], [0], [0], [1], [0, 0, 1, 1], [], []>} : vector<36x67xbf16>, vector<67x32xbf16>, vector<36x32xf32> -> vector<36x32xf32>
    %125 = arith.truncf %124 : vector<36x32xf32> to vector<36x32xbf16>
    %c0_79 = arith.constant 0 : index
    %c0_80 = arith.constant 0 : index
    %c0_81 = arith.constant 0 : index
    %126 = vector.load %arg4[%c0_79, %c0_80, %c0_81] : memref<9x32x64xbf16, #tpu.memory_space<vmem>>, vector<1x32x64xbf16>
    %127 = vector.shape_cast %126 : vector<1x32x64xbf16> to vector<32x64xbf16>
    %c1_82 = arith.constant 1 : index
    %c0_83 = arith.constant 0 : index
    %c0_84 = arith.constant 0 : index
    %128 = vector.load %arg4[%c1_82, %c0_83, %c0_84] : memref<9x32x64xbf16, #tpu.memory_space<vmem>>, vector<1x32x64xbf16>
    %129 = vector.shape_cast %128 : vector<1x32x64xbf16> to vector<32x64xbf16>
    %c2_85 = arith.constant 2 : index
    %c0_86 = arith.constant 0 : index
    %c0_87 = arith.constant 0 : index
    %130 = vector.load %arg4[%c2_85, %c0_86, %c0_87] : memref<9x32x64xbf16, #tpu.memory_space<vmem>>, vector<1x32x64xbf16>
    %131 = vector.shape_cast %130 : vector<1x32x64xbf16> to vector<32x64xbf16>
    %c3_88 = arith.constant 3 : index
    %c0_89 = arith.constant 0 : index
    %c0_90 = arith.constant 0 : index
    %132 = vector.load %arg4[%c3_88, %c0_89, %c0_90] : memref<9x32x64xbf16, #tpu.memory_space<vmem>>, vector<1x32x64xbf16>
    %133 = vector.shape_cast %132 : vector<1x32x64xbf16> to vector<32x64xbf16>
    %c4_91 = arith.constant 4 : index
    %c0_92 = arith.constant 0 : index
    %c0_93 = arith.constant 0 : index
    %134 = vector.load %arg4[%c4_91, %c0_92, %c0_93] : memref<9x32x64xbf16, #tpu.memory_space<vmem>>, vector<1x32x64xbf16>
    %135 = vector.shape_cast %134 : vector<1x32x64xbf16> to vector<32x64xbf16>
    %c5_94 = arith.constant 5 : index
    %c0_95 = arith.constant 0 : index
    %c0_96 = arith.constant 0 : index
    %136 = vector.load %arg4[%c5_94, %c0_95, %c0_96] : memref<9x32x64xbf16, #tpu.memory_space<vmem>>, vector<1x32x64xbf16>
    %137 = vector.shape_cast %136 : vector<1x32x64xbf16> to vector<32x64xbf16>
    %c6_97 = arith.constant 6 : index
    %c0_98 = arith.constant 0 : index
    %c0_99 = arith.constant 0 : index
    %138 = vector.load %arg4[%c6_97, %c0_98, %c0_99] : memref<9x32x64xbf16, #tpu.memory_space<vmem>>, vector<1x32x64xbf16>
    %139 = vector.shape_cast %138 : vector<1x32x64xbf16> to vector<32x64xbf16>
    %c7_100 = arith.constant 7 : index
    %c0_101 = arith.constant 0 : index
    %c0_102 = arith.constant 0 : index
    %140 = vector.load %arg4[%c7_100, %c0_101, %c0_102] : memref<9x32x64xbf16, #tpu.memory_space<vmem>>, vector<1x32x64xbf16>
    %141 = vector.shape_cast %140 : vector<1x32x64xbf16> to vector<32x64xbf16>
    %c8_103 = arith.constant 8 : index
    %c0_104 = arith.constant 0 : index
    %c0_105 = arith.constant 0 : index
    %142 = vector.load %arg4[%c8_103, %c0_104, %c0_105] : memref<9x32x64xbf16, #tpu.memory_space<vmem>>, vector<1x32x64xbf16>
    %143 = vector.shape_cast %142 : vector<1x32x64xbf16> to vector<32x64xbf16>
    %cst_106 = arith.constant 0.000000e+00 : f32
    %144 = vector.broadcast %cst_106 : f32 to vector<22x64xf32>
    %145 = vector.extract_strided_slice %125 {offsets = [0, 0], sizes = [22, 32], strides = [1, 1]} : vector<36x32xbf16> to vector<22x32xbf16>
    %cst_107 = arith.constant dense<0.000000e+00> : vector<22x64xf32>
    %146 = tpu.matmul %145, %127, %cst_107 {dimension_numbers = #tpu.dot_dimension_numbers<[1], [0], [0], [1], [0, 0, 1, 1], [], []>} : vector<22x32xbf16>, vector<32x64xbf16>, vector<22x64xf32> -> vector<22x64xf32>
    %147 = arith.addf %144, %146 : vector<22x64xf32>
    %148 = vector.extract_strided_slice %125 {offsets = [1, 0], sizes = [22, 32], strides = [1, 1]} : vector<36x32xbf16> to vector<22x32xbf16>
    %cst_108 = arith.constant dense<0.000000e+00> : vector<22x64xf32>
    %149 = tpu.matmul %148, %129, %cst_108 {dimension_numbers = #tpu.dot_dimension_numbers<[1], [0], [0], [1], [0, 0, 1, 1], [], []>} : vector<22x32xbf16>, vector<32x64xbf16>, vector<22x64xf32> -> vector<22x64xf32>
    %150 = arith.addf %147, %149 : vector<22x64xf32>
    %151 = vector.extract_strided_slice %125 {offsets = [2, 0], sizes = [22, 32], strides = [1, 1]} : vector<36x32xbf16> to vector<22x32xbf16>
    %cst_109 = arith.constant dense<0.000000e+00> : vector<22x64xf32>
    %152 = tpu.matmul %151, %131, %cst_109 {dimension_numbers = #tpu.dot_dimension_numbers<[1], [0], [0], [1], [0, 0, 1, 1], [], []>} : vector<22x32xbf16>, vector<32x64xbf16>, vector<22x64xf32> -> vector<22x64xf32>
    %153 = arith.addf %150, %152 : vector<22x64xf32>
    %154 = vector.extract_strided_slice %125 {offsets = [6, 0], sizes = [22, 32], strides = [1, 1]} : vector<36x32xbf16> to vector<22x32xbf16>
    %cst_110 = arith.constant dense<0.000000e+00> : vector<22x64xf32>
    %155 = tpu.matmul %154, %133, %cst_110 {dimension_numbers = #tpu.dot_dimension_numbers<[1], [0], [0], [1], [0, 0, 1, 1], [], []>} : vector<22x32xbf16>, vector<32x64xbf16>, vector<22x64xf32> -> vector<22x64xf32>
    %156 = arith.addf %153, %155 : vector<22x64xf32>
    %157 = vector.extract_strided_slice %125 {offsets = [7, 0], sizes = [22, 32], strides = [1, 1]} : vector<36x32xbf16> to vector<22x32xbf16>
    %cst_111 = arith.constant dense<0.000000e+00> : vector<22x64xf32>
    %158 = tpu.matmul %157, %135, %cst_111 {dimension_numbers = #tpu.dot_dimension_numbers<[1], [0], [0], [1], [0, 0, 1, 1], [], []>} : vector<22x32xbf16>, vector<32x64xbf16>, vector<22x64xf32> -> vector<22x64xf32>
    %159 = arith.addf %156, %158 : vector<22x64xf32>
    %160 = vector.extract_strided_slice %125 {offsets = [8, 0], sizes = [22, 32], strides = [1, 1]} : vector<36x32xbf16> to vector<22x32xbf16>
    %cst_112 = arith.constant dense<0.000000e+00> : vector<22x64xf32>
    %161 = tpu.matmul %160, %137, %cst_112 {dimension_numbers = #tpu.dot_dimension_numbers<[1], [0], [0], [1], [0, 0, 1, 1], [], []>} : vector<22x32xbf16>, vector<32x64xbf16>, vector<22x64xf32> -> vector<22x64xf32>
    %162 = arith.addf %159, %161 : vector<22x64xf32>
    %163 = vector.extract_strided_slice %125 {offsets = [12, 0], sizes = [22, 32], strides = [1, 1]} : vector<36x32xbf16> to vector<22x32xbf16>
    %cst_113 = arith.constant dense<0.000000e+00> : vector<22x64xf32>
    %164 = tpu.matmul %163, %139, %cst_113 {dimension_numbers = #tpu.dot_dimension_numbers<[1], [0], [0], [1], [0, 0, 1, 1], [], []>} : vector<22x32xbf16>, vector<32x64xbf16>, vector<22x64xf32> -> vector<22x64xf32>
    %165 = arith.addf %162, %164 : vector<22x64xf32>
    %166 = vector.extract_strided_slice %125 {offsets = [13, 0], sizes = [22, 32], strides = [1, 1]} : vector<36x32xbf16> to vector<22x32xbf16>
    %cst_114 = arith.constant dense<0.000000e+00> : vector<22x64xf32>
    %167 = tpu.matmul %166, %141, %cst_114 {dimension_numbers = #tpu.dot_dimension_numbers<[1], [0], [0], [1], [0, 0, 1, 1], [], []>} : vector<22x32xbf16>, vector<32x64xbf16>, vector<22x64xf32> -> vector<22x64xf32>
    %168 = arith.addf %165, %167 : vector<22x64xf32>
    %169 = vector.extract_strided_slice %125 {offsets = [14, 0], sizes = [22, 32], strides = [1, 1]} : vector<36x32xbf16> to vector<22x32xbf16>
    %cst_115 = arith.constant dense<0.000000e+00> : vector<22x64xf32>
    %170 = tpu.matmul %169, %143, %cst_115 {dimension_numbers = #tpu.dot_dimension_numbers<[1], [0], [0], [1], [0, 0, 1, 1], [], []>} : vector<22x32xbf16>, vector<32x64xbf16>, vector<22x64xf32> -> vector<22x64xf32>
    %171 = arith.addf %168, %170 : vector<22x64xf32>
    %c0_116 = arith.constant 0 : index
    %c0_117 = arith.constant 0 : index
    %172 = vector.load %arg8[%c0_116, %c0_117] : memref<1x64xf32, #tpu.memory_space<vmem>>, vector<1x64xf32>
    %173 = vector.broadcast %172 : vector<1x64xf32> to vector<22x64xf32>
    %174 = arith.addf %171, %173 : vector<22x64xf32>
    %cst_118 = arith.constant 0.000000e+00 : f32
    %175 = vector.broadcast %cst_118 : f32 to vector<22x64xf32>
    %176 = arith.maximumf %174, %175 : vector<22x64xf32>
    %177 = arith.truncf %176 : vector<22x64xf32> to vector<22x64xbf16>
    %178 = vector.extract_strided_slice %177 {offsets = [0, 0], sizes = [15, 64], strides = [1, 1]} : vector<22x64xbf16> to vector<15x64xbf16>
    %179 = vector.extract_strided_slice %177 {offsets = [1, 0], sizes = [15, 64], strides = [1, 1]} : vector<22x64xbf16> to vector<15x64xbf16>
    %180 = arith.maximumf %178, %179 : vector<15x64xbf16>
    %181 = vector.extract_strided_slice %177 {offsets = [6, 0], sizes = [15, 64], strides = [1, 1]} : vector<22x64xbf16> to vector<15x64xbf16>
    %182 = vector.extract_strided_slice %177 {offsets = [7, 0], sizes = [15, 64], strides = [1, 1]} : vector<22x64xbf16> to vector<15x64xbf16>
    %183 = arith.maximumf %181, %182 : vector<15x64xbf16>
    %184 = arith.maximumf %180, %183 : vector<15x64xbf16>
    %c0_119 = arith.constant 0 : index
    %c0_120 = arith.constant 0 : index
    %185 = vector.load %arg12[%c0_119, %c0_120] : memref<16x15xbf16, #tpu.memory_space<vmem>>, vector<16x15xbf16>
    %cst_121 = arith.constant dense<0.000000e+00> : vector<16x64xf32>
    %186 = tpu.matmul %185, %184, %cst_121 {dimension_numbers = #tpu.dot_dimension_numbers<[1], [0], [0], [1], [0, 0, 1, 1], [], []>} : vector<16x15xbf16>, vector<15x64xbf16>, vector<16x64xf32> -> vector<16x64xf32>
    %187 = arith.truncf %186 : vector<16x64xf32> to vector<16x64xbf16>
    %c0_122 = arith.constant 0 : index
    %c0_123 = arith.constant 0 : index
    %c0_124 = arith.constant 0 : index
    %188 = vector.load %arg5[%c0_122, %c0_123, %c0_124] : memref<9x64x64xbf16, #tpu.memory_space<vmem>>, vector<1x64x64xbf16>
    %189 = vector.shape_cast %188 : vector<1x64x64xbf16> to vector<64x64xbf16>
    %c1_125 = arith.constant 1 : index
    %c0_126 = arith.constant 0 : index
    %c0_127 = arith.constant 0 : index
    %190 = vector.load %arg5[%c1_125, %c0_126, %c0_127] : memref<9x64x64xbf16, #tpu.memory_space<vmem>>, vector<1x64x64xbf16>
    %191 = vector.shape_cast %190 : vector<1x64x64xbf16> to vector<64x64xbf16>
    %c2_128 = arith.constant 2 : index
    %c0_129 = arith.constant 0 : index
    %c0_130 = arith.constant 0 : index
    %192 = vector.load %arg5[%c2_128, %c0_129, %c0_130] : memref<9x64x64xbf16, #tpu.memory_space<vmem>>, vector<1x64x64xbf16>
    %193 = vector.shape_cast %192 : vector<1x64x64xbf16> to vector<64x64xbf16>
    %c3_131 = arith.constant 3 : index
    %c0_132 = arith.constant 0 : index
    %c0_133 = arith.constant 0 : index
    %194 = vector.load %arg5[%c3_131, %c0_132, %c0_133] : memref<9x64x64xbf16, #tpu.memory_space<vmem>>, vector<1x64x64xbf16>
    %195 = vector.shape_cast %194 : vector<1x64x64xbf16> to vector<64x64xbf16>
    %c4_134 = arith.constant 4 : index
    %c0_135 = arith.constant 0 : index
    %c0_136 = arith.constant 0 : index
    %196 = vector.load %arg5[%c4_134, %c0_135, %c0_136] : memref<9x64x64xbf16, #tpu.memory_space<vmem>>, vector<1x64x64xbf16>
    %197 = vector.shape_cast %196 : vector<1x64x64xbf16> to vector<64x64xbf16>
    %c5_137 = arith.constant 5 : index
    %c0_138 = arith.constant 0 : index
    %c0_139 = arith.constant 0 : index
    %198 = vector.load %arg5[%c5_137, %c0_138, %c0_139] : memref<9x64x64xbf16, #tpu.memory_space<vmem>>, vector<1x64x64xbf16>
    %199 = vector.shape_cast %198 : vector<1x64x64xbf16> to vector<64x64xbf16>
    %c6_140 = arith.constant 6 : index
    %c0_141 = arith.constant 0 : index
    %c0_142 = arith.constant 0 : index
    %200 = vector.load %arg5[%c6_140, %c0_141, %c0_142] : memref<9x64x64xbf16, #tpu.memory_space<vmem>>, vector<1x64x64xbf16>
    %201 = vector.shape_cast %200 : vector<1x64x64xbf16> to vector<64x64xbf16>
    %c7_143 = arith.constant 7 : index
    %c0_144 = arith.constant 0 : index
    %c0_145 = arith.constant 0 : index
    %202 = vector.load %arg5[%c7_143, %c0_144, %c0_145] : memref<9x64x64xbf16, #tpu.memory_space<vmem>>, vector<1x64x64xbf16>
    %203 = vector.shape_cast %202 : vector<1x64x64xbf16> to vector<64x64xbf16>
    %c8_146 = arith.constant 8 : index
    %c0_147 = arith.constant 0 : index
    %c0_148 = arith.constant 0 : index
    %204 = vector.load %arg5[%c8_146, %c0_147, %c0_148] : memref<9x64x64xbf16, #tpu.memory_space<vmem>>, vector<1x64x64xbf16>
    %205 = vector.shape_cast %204 : vector<1x64x64xbf16> to vector<64x64xbf16>
    %cst_149 = arith.constant 0.000000e+00 : f32
    %206 = vector.broadcast %cst_149 : f32 to vector<6x64xf32>
    %207 = vector.extract_strided_slice %187 {offsets = [0, 0], sizes = [6, 64], strides = [1, 1]} : vector<16x64xbf16> to vector<6x64xbf16>
    %cst_150 = arith.constant dense<0.000000e+00> : vector<6x64xf32>
    %208 = tpu.matmul %207, %189, %cst_150 {dimension_numbers = #tpu.dot_dimension_numbers<[1], [0], [0], [1], [0, 0, 1, 1], [], []>} : vector<6x64xbf16>, vector<64x64xbf16>, vector<6x64xf32> -> vector<6x64xf32>
    %209 = arith.addf %206, %208 : vector<6x64xf32>
    %210 = vector.extract_strided_slice %187 {offsets = [1, 0], sizes = [6, 64], strides = [1, 1]} : vector<16x64xbf16> to vector<6x64xbf16>
    %cst_151 = arith.constant dense<0.000000e+00> : vector<6x64xf32>
    %211 = tpu.matmul %210, %191, %cst_151 {dimension_numbers = #tpu.dot_dimension_numbers<[1], [0], [0], [1], [0, 0, 1, 1], [], []>} : vector<6x64xbf16>, vector<64x64xbf16>, vector<6x64xf32> -> vector<6x64xf32>
    %212 = arith.addf %209, %211 : vector<6x64xf32>
    %213 = vector.extract_strided_slice %187 {offsets = [2, 0], sizes = [6, 64], strides = [1, 1]} : vector<16x64xbf16> to vector<6x64xbf16>
    %cst_152 = arith.constant dense<0.000000e+00> : vector<6x64xf32>
    %214 = tpu.matmul %213, %193, %cst_152 {dimension_numbers = #tpu.dot_dimension_numbers<[1], [0], [0], [1], [0, 0, 1, 1], [], []>} : vector<6x64xbf16>, vector<64x64xbf16>, vector<6x64xf32> -> vector<6x64xf32>
    %215 = arith.addf %212, %214 : vector<6x64xf32>
    %216 = vector.extract_strided_slice %187 {offsets = [4, 0], sizes = [6, 64], strides = [1, 1]} : vector<16x64xbf16> to vector<6x64xbf16>
    %cst_153 = arith.constant dense<0.000000e+00> : vector<6x64xf32>
    %217 = tpu.matmul %216, %195, %cst_153 {dimension_numbers = #tpu.dot_dimension_numbers<[1], [0], [0], [1], [0, 0, 1, 1], [], []>} : vector<6x64xbf16>, vector<64x64xbf16>, vector<6x64xf32> -> vector<6x64xf32>
    %218 = arith.addf %215, %217 : vector<6x64xf32>
    %219 = vector.extract_strided_slice %187 {offsets = [5, 0], sizes = [6, 64], strides = [1, 1]} : vector<16x64xbf16> to vector<6x64xbf16>
    %cst_154 = arith.constant dense<0.000000e+00> : vector<6x64xf32>
    %220 = tpu.matmul %219, %197, %cst_154 {dimension_numbers = #tpu.dot_dimension_numbers<[1], [0], [0], [1], [0, 0, 1, 1], [], []>} : vector<6x64xbf16>, vector<64x64xbf16>, vector<6x64xf32> -> vector<6x64xf32>
    %221 = arith.addf %218, %220 : vector<6x64xf32>
    %222 = vector.extract_strided_slice %187 {offsets = [6, 0], sizes = [6, 64], strides = [1, 1]} : vector<16x64xbf16> to vector<6x64xbf16>
    %cst_155 = arith.constant dense<0.000000e+00> : vector<6x64xf32>
    %223 = tpu.matmul %222, %199, %cst_155 {dimension_numbers = #tpu.dot_dimension_numbers<[1], [0], [0], [1], [0, 0, 1, 1], [], []>} : vector<6x64xbf16>, vector<64x64xbf16>, vector<6x64xf32> -> vector<6x64xf32>
    %224 = arith.addf %221, %223 : vector<6x64xf32>
    %225 = vector.extract_strided_slice %187 {offsets = [8, 0], sizes = [6, 64], strides = [1, 1]} : vector<16x64xbf16> to vector<6x64xbf16>
    %cst_156 = arith.constant dense<0.000000e+00> : vector<6x64xf32>
    %226 = tpu.matmul %225, %201, %cst_156 {dimension_numbers = #tpu.dot_dimension_numbers<[1], [0], [0], [1], [0, 0, 1, 1], [], []>} : vector<6x64xbf16>, vector<64x64xbf16>, vector<6x64xf32> -> vector<6x64xf32>
    %227 = arith.addf %224, %226 : vector<6x64xf32>
    %228 = vector.extract_strided_slice %187 {offsets = [9, 0], sizes = [6, 64], strides = [1, 1]} : vector<16x64xbf16> to vector<6x64xbf16>
    %cst_157 = arith.constant dense<0.000000e+00> : vector<6x64xf32>
    %229 = tpu.matmul %228, %203, %cst_157 {dimension_numbers = #tpu.dot_dimension_numbers<[1], [0], [0], [1], [0, 0, 1, 1], [], []>} : vector<6x64xbf16>, vector<64x64xbf16>, vector<6x64xf32> -> vector<6x64xf32>
    %230 = arith.addf %227, %229 : vector<6x64xf32>
    %231 = vector.extract_strided_slice %187 {offsets = [10, 0], sizes = [6, 64], strides = [1, 1]} : vector<16x64xbf16> to vector<6x64xbf16>
    %cst_158 = arith.constant dense<0.000000e+00> : vector<6x64xf32>
    %232 = tpu.matmul %231, %205, %cst_158 {dimension_numbers = #tpu.dot_dimension_numbers<[1], [0], [0], [1], [0, 0, 1, 1], [], []>} : vector<6x64xbf16>, vector<64x64xbf16>, vector<6x64xf32> -> vector<6x64xf32>
    %233 = arith.addf %230, %232 : vector<6x64xf32>
    %c0_159 = arith.constant 0 : index
    %c0_160 = arith.constant 0 : index
    %234 = vector.load %arg9[%c0_159, %c0_160] : memref<1x64xf32, #tpu.memory_space<vmem>>, vector<1x64xf32>
    %235 = vector.broadcast %234 : vector<1x64xf32> to vector<6x64xf32>
    %236 = arith.addf %233, %235 : vector<6x64xf32>
    %cst_161 = arith.constant 0.000000e+00 : f32
    %237 = vector.broadcast %cst_161 : f32 to vector<6x64xf32>
    %238 = arith.maximumf %236, %237 : vector<6x64xf32>
    %239 = arith.truncf %238 : vector<6x64xf32> to vector<6x64xbf16>
    %240 = vector.extract_strided_slice %239 {offsets = [0, 0], sizes = [1, 64], strides = [1, 1]} : vector<6x64xbf16> to vector<1x64xbf16>
    %241 = vector.extract_strided_slice %239 {offsets = [1, 0], sizes = [1, 64], strides = [1, 1]} : vector<6x64xbf16> to vector<1x64xbf16>
    %242 = arith.maximumf %240, %241 : vector<1x64xbf16>
    %243 = vector.extract_strided_slice %239 {offsets = [4, 0], sizes = [1, 64], strides = [1, 1]} : vector<6x64xbf16> to vector<1x64xbf16>
    %244 = vector.extract_strided_slice %239 {offsets = [5, 0], sizes = [1, 64], strides = [1, 1]} : vector<6x64xbf16> to vector<1x64xbf16>
    %245 = arith.maximumf %243, %244 : vector<1x64xbf16>
    %246 = arith.maximumf %242, %245 : vector<1x64xbf16>
    %c0_162 = arith.constant 0 : index
    %c0_163 = arith.constant 0 : index
    %247 = vector.load %arg13[%c0_162, %c0_163] : memref<64x512xbf16, #tpu.memory_space<vmem>>, vector<64x512xbf16>
    %cst_164 = arith.constant dense<0.000000e+00> : vector<1x512xf32>
    %248 = tpu.matmul %246, %247, %cst_164 {dimension_numbers = #tpu.dot_dimension_numbers<[1], [0], [0], [1], [0, 0, 1, 1], [], []>} : vector<1x64xbf16>, vector<64x512xbf16>, vector<1x512xf32> -> vector<1x512xf32>
    %c0_165 = arith.constant 0 : index
    %c0_166 = arith.constant 0 : index
    %249 = vector.load %arg16[%c0_165, %c0_166] : memref<1x512xf32, #tpu.memory_space<vmem>>, vector<1x512xf32>
    %250 = arith.addf %248, %249 : vector<1x512xf32>
    %cst_167 = arith.constant 0.000000e+00 : f32
    %251 = vector.broadcast %cst_167 : f32 to vector<1x512xf32>
    %252 = arith.maximumf %250, %251 : vector<1x512xf32>
    %253 = arith.truncf %252 : vector<1x512xf32> to vector<1x512xbf16>
    %c0_168 = arith.constant 0 : index
    %c0_169 = arith.constant 0 : index
    %254 = vector.load %arg14[%c0_168, %c0_169] : memref<512x512xbf16, #tpu.memory_space<vmem>>, vector<512x512xbf16>
    %cst_170 = arith.constant dense<0.000000e+00> : vector<1x512xf32>
    %255 = tpu.matmul %253, %254, %cst_170 {dimension_numbers = #tpu.dot_dimension_numbers<[1], [0], [0], [1], [0, 0, 1, 1], [], []>} : vector<1x512xbf16>, vector<512x512xbf16>, vector<1x512xf32> -> vector<1x512xf32>
    %c0_171 = arith.constant 0 : index
    %c0_172 = arith.constant 0 : index
    %256 = vector.load %arg17[%c0_171, %c0_172] : memref<1x512xf32, #tpu.memory_space<vmem>>, vector<1x512xf32>
    %257 = arith.addf %255, %256 : vector<1x512xf32>
    %cst_173 = arith.constant 0.000000e+00 : f32
    %258 = vector.broadcast %cst_173 : f32 to vector<1x512xf32>
    %259 = arith.maximumf %257, %258 : vector<1x512xf32>
    %260 = arith.truncf %259 : vector<1x512xf32> to vector<1x512xbf16>
    %c0_174 = arith.constant 0 : index
    %c0_175 = arith.constant 0 : index
    %261 = vector.load %arg15[%c0_174, %c0_175] : memref<512x128xbf16, #tpu.memory_space<vmem>>, vector<512x128xbf16>
    %cst_176 = arith.constant dense<0.000000e+00> : vector<1x128xf32>
    %262 = tpu.matmul %260, %261, %cst_176 {dimension_numbers = #tpu.dot_dimension_numbers<[1], [0], [0], [1], [0, 0, 1, 1], [], []>} : vector<1x512xbf16>, vector<512x128xbf16>, vector<1x128xf32> -> vector<1x128xf32>
    %c0_177 = arith.constant 0 : index
    %c0_178 = arith.constant 0 : index
    %263 = vector.load %arg18[%c0_177, %c0_178] : memref<1x128xf32, #tpu.memory_space<vmem>>, vector<1x128xf32>
    %264 = arith.addf %262, %263 : vector<1x128xf32>
    %c0_179 = arith.constant 0 : index
    %c0_180 = arith.constant 0 : index
    %c0_181 = arith.constant 0 : index
    %265 = vector.load %arg19[%c0_179, %c0_180, %c0_181] : memref<1x1x128xf32, #tpu.memory_space<vmem>>, vector<1x1x128xf32>
    %266 = vector.shape_cast %265 : vector<1x1x128xf32> to vector<1x128xf32>
    %267 = vector.shape_cast %264 : vector<1x128xf32> to vector<1x1x128xf32>
    tpu.vector_store %arg19[%c0_179, %c0_180, %c0_181], %267 {strides = array<i32>} : memref<1x1x128xf32, #tpu.memory_space<vmem>>, vector<1x1x128xf32>,
    return
  }
  func.func @transform_0(%arg0: i32) -> (i32, i32, i32) {
    %c0_i32 = arith.constant 0 : i32
    %c0_i32_0 = arith.constant 0 : i32
    %c0_i32_1 = arith.constant 0 : i32
    return %arg0, %c0_i32, %c0_i32_0 : i32, i32, i32
  }
  func.func @transform_1(%arg0: i32) -> (i32, i32, i32) {
    %c0_i32 = arith.constant 0 : i32
    %c0_i32_0 = arith.constant 0 : i32
    %c0_i32_1 = arith.constant 0 : i32
    %c0_i32_2 = arith.constant 0 : i32
    return %c0_i32, %c0_i32_0, %c0_i32_1 : i32, i32, i32
  }
  func.func @transform_2(%arg0: i32) -> (i32, i32, i32) {
    %c0_i32 = arith.constant 0 : i32
    %c0_i32_0 = arith.constant 0 : i32
    %c0_i32_1 = arith.constant 0 : i32
    %c0_i32_2 = arith.constant 0 : i32
    return %c0_i32, %c0_i32_0, %c0_i32_1 : i32, i32, i32
  }
  func.func @transform_3(%arg0: i32) -> (i32, i32, i32) {
    %c0_i32 = arith.constant 0 : i32
    %c0_i32_0 = arith.constant 0 : i32
    %c0_i32_1 = arith.constant 0 : i32
    %c0_i32_2 = arith.constant 0 : i32
    return %c0_i32, %c0_i32_0, %c0_i32_1 : i32, i32, i32
  }
  func.func @transform_4(%arg0: i32) -> (i32, i32, i32) {
    %c0_i32 = arith.constant 0 : i32
    %c0_i32_0 = arith.constant 0 : i32
    %c0_i32_1 = arith.constant 0 : i32
    %c0_i32_2 = arith.constant 0 : i32
    return %c0_i32, %c0_i32_0, %c0_i32_1 : i32, i32, i32
  }
  func.func @transform_5(%arg0: i32) -> (i32, i32) {
    %c0_i32 = arith.constant 0 : i32
    %c0_i32_0 = arith.constant 0 : i32
    %c0_i32_1 = arith.constant 0 : i32
    return %c0_i32, %c0_i32_0 : i32, i32
  }
  func.func @transform_6(%arg0: i32) -> (i32, i32) {
    %c0_i32 = arith.constant 0 : i32
    %c0_i32_0 = arith.constant 0 : i32
    %c0_i32_1 = arith.constant 0 : i32
    return %c0_i32, %c0_i32_0 : i32, i32
  }
  func.func @transform_7(%arg0: i32) -> (i32, i32) {
    %c0_i32 = arith.constant 0 : i32
    %c0_i32_0 = arith.constant 0 : i32
    %c0_i32_1 = arith.constant 0 : i32
    return %c0_i32, %c0_i32_0 : i32, i32
  }
  func.func @transform_8(%arg0: i32) -> (i32, i32) {
    %c0_i32 = arith.constant 0 : i32
    %c0_i32_0 = arith.constant 0 : i32
    %c0_i32_1 = arith.constant 0 : i32
    return %c0_i32, %c0_i32_0 : i32, i32
  }
  func.func @transform_9(%arg0: i32) -> (i32, i32) {
    %c0_i32 = arith.constant 0 : i32
    %c0_i32_0 = arith.constant 0 : i32
    %c0_i32_1 = arith.constant 0 : i32
    return %c0_i32, %c0_i32_0 : i32, i32
  }
  func.func @transform_10(%arg0: i32) -> (i32, i32) {
    %c0_i32 = arith.constant 0 : i32
    %c0_i32_0 = arith.constant 0 : i32
    %c0_i32_1 = arith.constant 0 : i32
    return %c0_i32, %c0_i32_0 : i32, i32
  }
  func.func @transform_11(%arg0: i32) -> (i32, i32) {
    %c0_i32 = arith.constant 0 : i32
    %c0_i32_0 = arith.constant 0 : i32
    %c0_i32_1 = arith.constant 0 : i32
    return %c0_i32, %c0_i32_0 : i32, i32
  }
  func.func @transform_12(%arg0: i32) -> (i32, i32) {
    %c0_i32 = arith.constant 0 : i32
    %c0_i32_0 = arith.constant 0 : i32
    %c0_i32_1 = arith.constant 0 : i32
    return %c0_i32, %c0_i32_0 : i32, i32
  }
  func.func @transform_13(%arg0: i32) -> (i32, i32) {
    %c0_i32 = arith.constant 0 : i32
    %c0_i32_0 = arith.constant 0 : i32
    %c0_i32_1 = arith.constant 0 : i32
    return %c0_i32, %c0_i32_0 : i32, i32
  }
  func.func @transform_14(%arg0: i32) -> (i32, i32) {
    %c0_i32 = arith.constant 0 : i32
    %c0_i32_0 = arith.constant 0 : i32
    %c0_i32_1 = arith.constant 0 : i32
    return %c0_i32, %c0_i32_0 : i32, i32
  }
  func.func @transform_15(%arg0: i32) -> (i32, i32) {
    %c0_i32 = arith.constant 0 : i32
    %c0_i32_0 = arith.constant 0 : i32
    %c0_i32_1 = arith.constant 0 : i32
    return %c0_i32, %c0_i32_0 : i32, i32
  }
  func.func @transform_16(%arg0: i32) -> (i32, i32) {
    %c0_i32 = arith.constant 0 : i32
    %c0_i32_0 = arith.constant 0 : i32
    %c0_i32_1 = arith.constant 0 : i32
    return %c0_i32, %c0_i32_0 : i32, i32
  }
  func.func @transform_17(%arg0: i32) -> (i32, i32) {
    %c0_i32 = arith.constant 0 : i32
    %c0_i32_0 = arith.constant 0 : i32
    %c0_i32_1 = arith.constant 0 : i32
    return %c0_i32, %c0_i32_0 : i32, i32
  }
  func.func @transform_18(%arg0: i32) -> (i32, i32, i32) {
    %c0_i32 = arith.constant 0 : i32
    %c0_i32_0 = arith.constant 0 : i32
    %c0_i32_1 = arith.constant 0 : i32
    return %arg0, %c0_i32, %c0_i32_0 : i32, i32, i32
  }
}

</mosaic_0001>

<bundles_post_ra>
// kernel: vgg_forward.1
= control target key start
LH: loop header
LB: loop body
LE: loop exit
PB: predicated region body
PF: predicated region fallthrough
CT: control target
= control target key end

     0   :  { %s12185_s0 = inlined_call_operand.vmem [shape: bf16[2,324,3], index: 0, kind: input, shape index: {}]   ;;  %s12186_s1 = inlined_call_operand.vmem [shape: bf16[9,3,16], index: 1, kind: input, shape index: {}]   ;;  %s12187_s2 = inlined_call_operand.vmem [shape: bf16[9,16,32], index: 2, kind: input, shape index: {}]   ;;  %s12188_s3 = inlined_call_operand.vmem [shape: bf16[9,32,64], index: 3, kind: input, shape index: {}]   ;;  %s12189_s4 = inlined_call_operand.vmem [shape: bf16[9,64,64], index: 4, kind: input, shape index: {}]   ;;  %s12190_s5 = inlined_call_operand.vmem [shape: f32[1,16], index: 5, kind: input, shape index: {}]   ;;  %s12191_s6 = inlined_call_operand.vmem [shape: f32[1,32], index: 6, kind: input, shape index: {}]   ;;  %s12192_s7 = inlined_call_operand.vmem [shape: f32[1,64], index: 7, kind: input, shape index: {}]   ;;  %s12193_s8 = inlined_call_operand.vmem [shape: f32[1,64], index: 8, kind: input, shape index: {}]   ;;  %s12194_s9 = inlined_call_operand.vmem [shape: bf16[100,267], index: 9, kind: input, shape index: {}]   ;;  %s12195_s10 = inlined_call_operand.vmem [shape: bf16[36,67], index: 10, kind: input, shape index: {}]   ;;  %s12196_s11 = inlined_call_operand.vmem [shape: bf16[16,15], index: 11, kind: input, shape index: {}]   ;;  %s12197_s12 = inlined_call_operand.vmem [shape: bf16[64,512], index: 12, kind: input, shape index: {}]   ;;  %s12198_s13 = inlined_call_operand.vmem [shape: bf16[512,512], index: 13, kind: input, shape index: {}]   ;;  %s12199_s14 = inlined_call_operand.vmem [shape: bf16[512,128], index: 14, kind: input, shape index: {}]   ;;  %s12200_s15 = inlined_call_operand.vmem [shape: f32[1,512], index: 15, kind: input, shape index: {}]   ;;  %s12201_s16 = inlined_call_operand.vmem [shape: f32[1,512], index: 16, kind: input, shape index: {}]   ;;  %s12202_s17 = inlined_call_operand.vmem [shape: f32[1,128], index: 17, kind: input, shape index: {}]   ;;  %s12203_s18 = inlined_call_operand.hbm [shape: f32[2,1,128], index: 18, kind: output, shape index: {}]  }
   0x1   :  { %12237 = sst [smem:[#allocation38_spill]] %s12185_s0 }
   0x2   :  { %12238 = sst [smem:[#allocation39_spill]] %s12186_s1 }
   0x3   :  { %12239 = sst [smem:[#allocation40_spill]] %s12187_s2 }
   0x4   :  { %12240 = sst [smem:[#allocation41_spill]] %s12188_s3 }
   0x5   :  { %12241 = sst [smem:[#allocation42_spill]] %s12189_s4 }
   0x6   :  { %12242 = sst [smem:[#allocation43_spill]] %s12190_s5 }
   0x7   :  { %12243 = sst [smem:[#allocation44_spill]] %s12191_s6 }
   0x8   :  { %23 = vsyncpa [#allocation3], 0 }
   0x9   :  { %25 = vsyncpa [#allocation3 + $0x1], 0  ;;  %s9208_s27 = smov 0   ;;  %s9210_s28 = smov 0  }
   0xa   :  { %s9212_s29 = smov 0   ;;  %s9214_s30 = smov 0  }
   0xb LB: > { %12244 = sst [smem:[#allocation5_spill]] %s9106_s29  ;;  %s9229_s0 = sadd.s32 4294967295, %s9110_s30   ;;  %s9110_s30 = sphi %s9214_s30, %s12371_s30   ;;  %s9106_s29 = sphi %s9212_s29, %s12373_s29   ;;  %s9102_s28 = sphi %s9210_s28, %s12375_s28   ;;  %s9098_s27 = sphi %s9208_s27, %s12374_s27  }
   0xc   : > { %s7210_s19 = sadd.s32 4294967294, %s9110_s30   ;;  %s9233_s1 = sadd.s32 1, %s9110_s30  }
   0xd   : > { %12245 = sst [smem:[#allocation6_spill]] %s9233_s1  ;;  %s421_s20 = sadd.s32 1, %s9106_s29 }
   0xe   : > { %s418_s21 = ssub.s32 %s9110_s30, %s9233_s1  ;;  %p431_p0 = scmp.ne.s32.totalorder %s9106_s29, %s9102_s28 }
   0xf   : > { %p419_p1 = scmp.eq.s32.totalorder %s418_s21, 0  ;;  %p432_p2 = scmp.eq.s32.totalorder %s9229_s0, 1 }
  0x10   : > { %p437_p3 = scmp.ne.s32.totalorder %s9102_s28, %s9098_s27  ;;  %p438_p4 = scmp.eq.s32.totalorder %s7210_s19, 1 }
  0x11   : > { %s9244_s22 = scalar_select %p419_p1, %s9106_s29, %s421_s20  }
  0x12   : > { %p9246_p5 = por %p432_p2, %p431_p0  ;;  %p9250_p6 = por %p438_p4, %p437_p3 }
  0x13   : > { %12246 = sst [smem:[#allocation7_spill]] %s9244_s22  ;;  %p7213_p7 = scmp.ge.s32.totalorder %s9110_s30, 1 }
  0x14   : > { %s12248_s23 = scalar_select %p9250_p6, 1, 0 }
  0x15   : > { %p515_p8 = scmp.lt.s32.totalorder %s9110_s30, 3 }
  0x16   : > { %12249 = sst [smem:[#allocation8_spill]] %s12248_s23 }
  0x17   : > { %p516_p9 = pnand %p7213_p7, %p515_p8 }
  0x19   : > { %519 = sbr.rel (%p516_p9) target bundleno = 2834 (0xb12), region = 92 }
  0x1e   : > { %s12250_s26 = sld [smem:[#allocation39_spill]]  ;;  %vm921_vm0 = vcmask 1040384   ;;  %vm922_vm1 = vcmask 1041408   ;;  %p568_p10 = scmp.lt.s32.totalorder %s9229_s0, 1  ;;  %v12210_v1 = vmov 65535   ;;  %vm866_vm2 = vcmask 23552  }
  0x1f   : > { %v923_v2 = vsel %vm921_vm0, 4294967295, %v12210_v1  ;;  %s12252_s23 = sld [smem:[#allocation38_spill]]  ;;  %vm1165_vm3 = vcmask 1046528   ;;  %vm722_vm4 = vsmask.f32 7424  ;;  %vm1821_vm5 = vcmask 1045504  }
  0x20   : > { %v9265_v4 = vsel %vm922_vm1, %v923_v2, 0  ;;  %s569_s21 = scalar_select %p568_p10, %s9229_s0, 1  ;;  %vm2205_vm6 = vsmask.f32 5376  ;;  %vm1547_vm7 = vsmask.f32 6400 }
  0x21   : > { %12251 = vst [vmem:[#allocation9_spill] sm:$0xff] %v9265_v4  ;;  %vm2483_vm8 = vcmask 1044480   ;;  %s12335_s5 = sld [smem:[#allocation43_spill]]  ;;  %vm3430_vm9 = vcmask 89088   ;;  %vm3696_vm10 = vcmask 130048   ;;  %vm4582_vm11 = vcmask 547840  }
  0x22   : > { %s8986_s19 = smul.u32 164, %s569_s21  ;;  %s12365_s24 = sld [smem:[#allocation40_spill]]  ;;  %vm4702_vm12 = vcmask 261120   ;;  %vm4848_vm13 = vsmask.f32 4352  ;;  %vm5147_vm14 = vcmask 1047552  }
  0x23   : > { %s12366_s6 = sld [smem:[#allocation44_spill]]  ;;  %vm5143_vm15 = vcmask 121856   ;;  %vm5283_vm0 = vcmask 523264   ;;  %s566_s25 = sand.u32 1, %s9102_s28  }
  0x24   : > { %v7216_v0 = vld [vmem:[%s12250_s26 + $0x4] sm:$0x3]  ;;  %v7217_v3 = vld [vmem:[%s12250_s26 + $0x6] sm:$0x3]  ;;  %v7215_v5 = vld [vmem:[%s12250_s26 + $0x2] sm:$0x3] }
  0x25   : > { %v615_v6 = vld [vmem:[%s12250_s26] sm:$0x3]  ;;  %v1256_v7 = vand.u32 %v7216_v0, %v9265_v4  ;;  %v1407_v8 = vand.u32 %v7217_v3, %v9265_v4  ;;  %v926_v9 = vand.u32 %v7215_v5, %v9265_v4  ;;  %s9281_s29 = scalar_lea.vmem %s12252_s23, %s8986_s19  ;;  %s12368_s3 = sld [smem:[#allocation41_spill]] }
  0x26   : > { %v1064_v10 = vand.u32 %v9265_v4, %v615_v6  ;;  %v8702_v11 = vld [vmem:[%s9281_s29] sm:$0xff]  ;;  %v9285_v12 = vld [vmem:[%s9281_s29 + $0x8] sm:$0xff]  ;;  %v9288_v13 = vld [vmem:[%s9281_s29 + $0x10] sm:$0xff]  ;;  %s12369_s4 = sld [smem:[#allocation42_spill]]  ;;  %s7151_s19 = scalar_lea.hbm %s12203_s18, %s9229_s0 }
  0x27   : > { %1265 = vmatpush.bf16.msra.mxu2 %v1256_v7  ;;  %1416 = vmatpush.bf16.msra.mxu3 %v1407_v8  ;;  %v1166_v14 = vrot.slane %v8702_v11, 1  ;;  %v1167_v15 = vrot.slane %v9285_v12, 1  ;;  %v1169_v16 = vrot.slane %v9288_v13, 1  ;;  %v724_v17 = vshrl.u32 %v8702_v11, 16  ;;  %v9303_v26 = vld [vmem:[%s9281_s29 + $0x18] sm:$0xff]  ;;  %v9321_v34 = vld [vmem:[%s9281_s29 + $0x20] sm:$0xff] }
  0x28   : > { %935 = vmatpush.bf16.msra.mxu0 %v926_v9  ;;  %1073 = vmatpush.bf16.msra.mxu1 %v1064_v10  ;;  %v726_v18 = vshll.u32 %v8702_v11, 16  ;;  %v12213_v19 = vshll.u32 %v9285_v12, 16  ;;  %v1171_v27 = vrot.slane %v9303_v26, 1  ;;  %v12212_v28 = vshrl.u32 %v9285_v12, 16  ;;  %v9340_v42 = vld [vmem:[%s9281_s29 + $0x28] sm:$0xff]  ;;  %v9359_v50 = vld [vmem:[%s9281_s29 + $0x30] sm:$0xff] }
  0x29   : > { %v1168_v20 = vsel %vm1165_vm3, %v1166_v14, %v1167_v15  ;;  %v1170_v21 = vsel %vm1165_vm3, %v1167_v15, %v1169_v16  ;;  %v9308_v29 = vshll.u32 %v9288_v13, 16  ;;  %v1173_v35 = vrot.slane %v9321_v34, 1  ;;  %v9378_v58 = vld [vmem:[%s9281_s29 + $0x38] sm:$0xff]  ;;  %v9397_v3 = vld [vmem:[%s9281_s29 + $0x40] sm:$0xff]  ;;  %v9416_v14 = vld [vmem:[%s9281_s29 + $0x48] sm:$0xff]  ;;  %s7155_s1 = sshll.u32 %s7151_s19, 4  ;;  %s7156_s1 = int_to_ptr.hbm [resolvable:$true] %s7155_s1 }
  0x2a   : > { %7331 = vmatmul.msk.bf16.vlgmr.msra.gmra.mxu2 %vm866_vm2, %v1168_v20  ;;  %7353 = vmatmul.msk.bf16.vlgmr.msra.gmra.mxu3 %vm866_vm2, %v1170_v21  ;;  %v728_v22 = vrot.slane %v726_v18, 1  ;;  %v733_v23 = vrot.slane %v12213_v19, 1  ;;  %v1172_v30 = vsel %vm1165_vm3, %v1169_v16, %v1171_v27  ;;  %v9325_v36 = vshrl.u32 %v9288_v13, 16  ;;  %s7143_s22 = scalar_lea.sflag [#allocation3], %s566_s25  ;;  %s9062_s23 = sshra.s32 %s7156_s1, 4  ;;  %s9063_s23 = int_to_ptr.hbm [resolvable:$true] %s9062_s23 }
  0x2b   : > { %7313 = vmatmul.msk.bf16.vlgmr.msra.gmra.mxu1 %vm866_vm2, %v8702_v11  ;;  %v741_v32 = vrot.slane %v9308_v29, 1  ;;  %v9328_v37 = vshll.u32 %v9303_v26, 16  ;;  %v1174_v38 = vsel %vm1165_vm3, %v1171_v27, %v1173_v35  ;;  %v1175_v43 = vrot.slane %v9340_v42, 1  ;;  %s9064_s21 = scalar_lea.hbm %s9063_s23, 1  ;;  %p9069_p0 = scmp.lt.s32.totalorder %s9063_s23, %s12203_s18 }
  0x2c   : > { %v729_v24 = vor.u32 %v728_v22, %v724_v17  ;;  %v737_v31 = vor.u32 %v12212_v28, %v733_v23  ;;  %v9344_v44 = vshrl.u32 %v9303_v26, 16  ;;  %v9347_v45 = vshll.u32 %v9321_v34, 16  ;;  %v9546_v28 = vld [vmem:[%s9281_s29 + $0x78] sm:$0xff]  ;;  %p9065_p11 = scmp.ne.s32.totalorder %s9063_s23, %s9064_s21 }
  0x2d   : > { %v745_v39 = vor.u32 %v9325_v36, %v741_v32  ;;  %v749_v40 = vrot.slane %v9328_v37, 1  ;;  %v1176_v46 = vsel %vm1165_vm3, %v1173_v35, %v1175_v43  ;;  %v1177_v51 = vrot.slane %v9359_v50, 1  ;;  %12260 = vst [vmem:[#allocation17_spill] sm:$0xff] %v9546_v28 }
  0x2e   : > { %v734_v25 = vsel %vm722_vm4, %v729_v24, %v733_v23  ;;  %v742_v33 = vsel %vm722_vm4, %v737_v31, %v741_v32  ;;  %v757_v48 = vrot.slane %v9347_v45, 1  ;;  %v9363_v52 = vshrl.u32 %v9321_v34, 16  ;;  %v9435_v23 = vld [vmem:[%s9281_s29 + $0x50] sm:$0xff]  ;;  %p9066_p12 = pnand %p9065_p11, %p9246_p5 }
  0x2f   : > { %7295 = vmatmul.msk.bf16.vlgmr.msra.gmra.mxu0 %vm866_vm2, %v734_v25  ;;  %v750_v41 = vsel %vm722_vm4, %v745_v39, %v749_v40  ;;  %v753_v47 = vor.u32 %v9344_v44, %v749_v40  ;;  %v9366_v53 = vshll.u32 %v9340_v42, 16  ;;  %v1178_v54 = vsel %vm1165_vm3, %v1175_v43, %v1177_v51 }
  0x30   : > { %v761_v55 = vor.u32 %v9363_v52, %v757_v48  ;;  %v1179_v59 = vrot.slane %v9378_v58, 1  ;;  %v9382_v60 = vshrl.u32 %v9340_v42, 16  ;;  %v9385_v61 = vshll.u32 %v9359_v50, 16  ;;  %p9067_p13 = pneg %p9066_p12 }
  0x31   : > { %v758_v49 = vsel %vm722_vm4, %v753_v47, %v757_v48  ;;  %v765_v56 = vrot.slane %v9366_v53, 1  ;;  %v1181_v5 = vrot.slane %v9397_v3, 1  ;;  %v9401_v6 = vshrl.u32 %v9359_v50, 16  ;;  %v9454_v47 = vld [vmem:[%s9281_s29 + $0x58] sm:$0xff] }
  0x32   : > { %v1180_v62 = vsel %vm1165_vm3, %v1177_v51, %v1179_v59  ;;  %v773_v0 = vrot.slane %v9385_v61, 1  ;;  %v9404_v7 = vshll.u32 %v9378_v58, 16  ;;  %v1183_v15 = vrot.slane %v9416_v14, 1 }
  0x33   : > { %v766_v57 = vsel %vm722_vm4, %v761_v55, %v765_v56  ;;  %v769_v63 = vor.u32 %v9382_v60, %v765_v56  ;;  %v1182_v8 = vsel %vm1165_vm3, %v1179_v59, %v1181_v5  ;;  %v9420_v16 = vshrl.u32 %v9378_v58, 16 }
  0x34   : > { %v777_v9 = vor.u32 %v9401_v6, %v773_v0  ;;  %v781_v10 = vrot.slane %v9404_v7, 1  ;;  %v9423_v17 = vshll.u32 %v9397_v3, 16  ;;  %v1184_v18 = vsel %vm1165_vm3, %v1181_v5, %v1183_v15 }
  0x35   : > { %v774_v2 = vsel %vm722_vm4, %v769_v63, %v773_v0  ;;  %v1185_v24 = vrot.slane %v9435_v23, 1  ;;  %v9439_v27 = vshrl.u32 %v9397_v3, 16  ;;  %v9460_v55 = vshrl.u32 %v9416_v14, 16 }
  0x36   : > { %v782_v11 = vsel %vm722_vm4, %v777_v9, %v781_v10  ;;  %v785_v20 = vor.u32 %v9420_v16, %v781_v10  ;;  %v9463_v56 = vshll.u32 %v9435_v23, 16 }
  0x37   : > { %v1186_v31 = vsel %vm1165_vm3, %v1183_v15, %v1185_v24 }
  0x38   : > { %v805_v5 = vrot.slane %v9463_v56, 1 }
  0x3a   : > { %7332 = vmatmul.msk.bf16.gmra.mxu2 %vm866_vm2, %v1170_v21  ;;  %7354 = vmatmul.msk.bf16.gmra.mxu3 %vm866_vm2, %v1172_v30  ;;  %v789_v21 = vrot.slane %v9423_v17, 1 }
  0x3b   : > { %7314 = vmatmul.msk.bf16.gmra.mxu1 %vm866_vm2, %v9285_v12 }
  0x3c   : > { %v790_v22 = vsel %vm722_vm4, %v785_v20, %v789_v21  ;;  %v793_v32 = vor.u32 %v9439_v27, %v789_v21 }
  0x3f   : > { %7296 = vmatmul.msk.bf16.gmra.mxu0 %vm866_vm2, %v742_v33 }
  0x4a   : > { %7333 = vmatmul.msk.bf16.gmra.mxu2 %vm866_vm2, %v1172_v30  ;;  %7355 = vmatmul.msk.bf16.gmra.mxu3 %vm866_vm2, %v1174_v38  ;;  %v9442_v30 = vshll.u32 %v9416_v14, 16 }
  0x4b   : > { %7315 = vmatmul.msk.bf16.gmra.mxu1 %vm866_vm2, %v9288_v13 }
  0x4c   : > { %v797_v33 = vrot.slane %v9442_v30, 1 }
  0x4f   : > { %7297 = vmatmul.msk.bf16.gmra.mxu0 %vm866_vm2, %v750_v41 }
  0x5a   : > { %7334 = vmatmul.msk.bf16.gmra.mxu2 %vm866_vm2, %v1174_v38  ;;  %7356 = vmatmul.msk.bf16.gmra.mxu3 %vm866_vm2, %v1176_v46  ;;  %v798_v38 = vsel %vm722_vm4, %v793_v32, %v797_v33 }
  0x5b   : > { %7316 = vmatmul.msk.bf16.gmra.mxu1 %vm866_vm2, %v9303_v26 }
  0x5f   : > { %7298 = vmatmul.msk.bf16.gmra.mxu0 %vm866_vm2, %v758_v49  ;;  %v1187_v49 = vrot.slane %v9454_v47, 1 }
  0x61   : > { %v1188_v0 = vsel %vm1165_vm3, %v1185_v24, %v1187_v49 }
  0x6a   : > { %7335 = vmatmul.msk.bf16.gmra.mxu2 %vm866_vm2, %v1176_v46  ;;  %7357 = vmatmul.msk.bf16.gmra.mxu3 %vm866_vm2, %v1178_v54 }
  0x6b   : > { %7317 = vmatmul.msk.bf16.gmra.mxu1 %vm866_vm2, %v9321_v34 }
  0x6f   : > { %7299 = vmatmul.msk.bf16.gmra.mxu0 %vm866_vm2, %v766_v57 }
  0x7a   : > { %7336 = vmatmul.msk.bf16.gmra.mxu2 %vm866_vm2, %v1178_v54  ;;  %7358 = vmatmul.msk.bf16.gmra.mxu3 %vm866_vm2, %v1180_v62 }
  0x7b   : > { %7318 = vmatmul.msk.bf16.gmra.mxu1 %vm866_vm2, %v9340_v42 }
  0x7f   : > { %7300 = vmatmul.msk.bf16.gmra.mxu0 %vm866_vm2, %v774_v2  ;;  %v801_v2 = vor.u32 %v9460_v55, %v797_v33  ;;  %v9483_v33 = vshrl.u32 %v9435_v23, 16 }
  0x81   : > { %v806_v10 = vsel %vm722_vm4, %v801_v2, %v805_v5 }
  0x8a   : > { %7337 = vmatmul.msk.bf16.gmra.mxu2 %vm866_vm2, %v1180_v62  ;;  %7359 = vmatmul.msk.bf16.gmra.mxu3 %vm866_vm2, %v1182_v8 }
  0x8b   : > { %7319 = vmatmul.msk.bf16.gmra.mxu1 %vm866_vm2, %v9359_v50 }
  0x8f   : > { %7301 = vmatmul.msk.bf16.gmra.mxu0 %vm866_vm2, %v782_v11 }
  0x9a   : > { %7338 = vmatmul.msk.bf16.gmra.mxu2 %vm866_vm2, %v1182_v8  ;;  %7360 = vmatmul.msk.bf16.gmra.mxu3 %vm866_vm2, %v1184_v18 }
  0x9b   : > { %7320 = vmatmul.msk.bf16.gmra.mxu1 %vm866_vm2, %v9378_v58 }
  0x9f   : > { %7302 = vmatmul.msk.bf16.gmra.mxu0 %vm866_vm2, %v790_v22  ;;  %v9477_v22 = vld [vmem:[%s9281_s29 + $0x60] sm:$0xff] }
  0xa8   : > { %v1075_v25 = vpop.f32.mrf.mxu1 }
  0xaa   : > { %7339 = vmatmul.msk.bf16.gmra.mxu2 %vm866_vm2, %v1184_v18  ;;  %7361 = vmatmul.msk.bf16.gmra.mxu3 %vm866_vm2, %v1186_v31 }
  0xab   : > { %7321 = vmatmul.msk.bf16.gmra.mxu1 %vm866_vm2, %v9397_v3 }
  0xac   : > { %v937_v35 = vpop.f32.mrf.mxu0 }
  0xad   : > { %v1076_v40 = vadd.f32 %v1075_v25, %v937_v35  ;;  %v1267_v41 = vpop.f32.mrf.mxu2  ;;  %v1418_v43 = vpop.f32.mrf.mxu3  ;;  %v1189_v25 = vrot.slane %v9477_v22, 1  ;;  %v9486_v35 = vshll.u32 %v9454_v47, 16 }
  0xaf   : > { %v1357_v46 = vadd.f32 %v1267_v41, %v1076_v40  ;;  %7303 = vmatmul.msk.bf16.gmra.mxu0 %vm866_vm2, %v798_v38 }
  0xb0   : > { %v1077_v39 = vpop.f32.mrf.mxu1 }
  0xb1   : > { %v9456_v48 = vadd.f32 %v1418_v43, %v1357_v46  ;;  %v1190_v43 = vsel %vm1165_vm3, %v1187_v49, %v1189_v25  ;;  %v809_v46 = vor.u32 %v9483_v33, %v805_v5 }
  0xb4   : > { %v939_v51 = vpop.f32.mrf.mxu0 }
  0xb5   : > { %v1078_v57 = vadd.f32 %v1077_v39, %v939_v51  ;;  %v1269_v59 = vpop.f32.mrf.mxu2  ;;  %v1420_v62 = vpop.f32.mrf.mxu3  ;;  %v813_v51 = vrot.slane %v9486_v35, 1 }
  0xb7   : > { %v1358_v63 = vadd.f32 %v1269_v59, %v1078_v57  ;;  %v814_v59 = vsel %vm722_vm4, %v809_v46, %v813_v51 }
  0xb8   : > { %v1080_v54 = vpop.f32.mrf.mxu1 }
  0xb9   : > { %v9470_v8 = vadd.f32 %v1420_v62, %v1358_v63 }
  0xba   : > { %7340 = vmatmul.msk.bf16.gmra.mxu2 %vm866_vm2, %v1186_v31  ;;  %7362 = vmatmul.msk.bf16.gmra.mxu3 %vm866_vm2, %v1188_v0 }
  0xbb   : > { %7322 = vmatmul.msk.bf16.gmra.mxu1 %vm866_vm2, %v9416_v14 }
  0xbc   : > { %v942_v9 = vpop.f32.mrf.mxu0 }
  0xbd   : > { %v1081_v15 = vadd.f32 %v1080_v54, %v942_v9  ;;  %v1272_v18 = vpop.f32.mrf.mxu2  ;;  %v1423_v20 = vpop.f32.mrf.mxu3 }
  0xbf   : > { %v1359_v21 = vadd.f32 %v1272_v18, %v1081_v15  ;;  %7304 = vmatmul.msk.bf16.gmra.mxu0 %vm866_vm2, %v806_v10  ;;  %v9500_v10 = vld [vmem:[%s9281_s29 + $0x68] sm:$0xff]  ;;  %v9506_v18 = vshrl.u32 %v9454_v47, 16 }
  0xc0   : > { %v1082_v11 = vpop.f32.mrf.mxu1  ;;  %12254 = vst [vmem:[#allocation11_spill] sm:$0xff] %v9500_v10  ;;  %v9552_v19 = vshrl.u32 %v9500_v10, 16 }
  0xc1   : > { %v9479_v24 = vadd.f32 %v1423_v20, %v1359_v21  ;;  %v9509_v20 = vshll.u32 %v9477_v22, 16 }
  0xc4   : > { %v944_v32 = vpop.f32.mrf.mxu0 }
  0xc5   : > { %v1083_v38 = vadd.f32 %v1082_v11, %v944_v32  ;;  %v1274_v39 = vpop.f32.mrf.mxu2  ;;  %v1425_v40 = vpop.f32.mrf.mxu3  ;;  %v1191_v11 = vrot.slane %v9500_v10, 1 }
  0xc7   : > { %v1360_v41 = vadd.f32 %v1274_v39, %v1083_v38  ;;  %v1192_v39 = vsel %vm1165_vm3, %v1189_v25, %v1191_v11 }
  0xc8   : > { %v1085_v31 = vpop.f32.mrf.mxu1 }
  0xc9   : > { %v9493_v54 = vadd.f32 %v1425_v40, %v1360_v41  ;;  %v817_v40 = vor.u32 %v9506_v18, %v813_v51  ;;  %v821_v41 = vrot.slane %v9509_v20, 1 }
  0xca   : > { %7341 = vmatmul.msk.bf16.gmra.mxu2 %vm866_vm2, %v1188_v0  ;;  %7363 = vmatmul.msk.bf16.gmra.mxu3 %vm866_vm2, %v1190_v43 }
  0xcb   : > { %7323 = vmatmul.msk.bf16.gmra.mxu1 %vm866_vm2, %v9435_v23  ;;  %12253 = vst [vmem:[#allocation10_spill] sm:$0xff] %v9493_v54 }
  0xcc   : > { %v947_v57 = vpop.f32.mrf.mxu0 }
  0xcd   : > { %v1086_v63 = vadd.f32 %v1085_v31, %v947_v57  ;;  %v1277_v2 = vpop.f32.mrf.mxu2  ;;  %v1428_v49 = vpop.f32.mrf.mxu3 }
  0xcf   : > { %v1361_v9 = vadd.f32 %v1277_v2, %v1086_v63  ;;  %7305 = vmatmul.msk.bf16.gmra.mxu0 %vm866_vm2, %v814_v59  ;;  %v822_v59 = vsel %vm722_vm4, %v817_v40, %v821_v41 }
  0xd0   : > { %v1087_v62 = vpop.f32.mrf.mxu1 }
  0xd1   : > { %v9502_v5 = vadd.f32 %v1428_v49, %v1361_v9  ;;  %v9523_v9 = vld [vmem:[%s9281_s29 + $0x70] sm:$0xff] }
  0xd2   : > { %12257 = vst [vmem:[#allocation14_spill] sm:$0xff] %v9523_v9 }
  0xd3   : > { %12255 = vst [vmem:[#allocation12_spill] sm:$0xff] %v9502_v5 }
  0xd4   : > { %v949_v15 = vpop.f32.mrf.mxu0 }
  0xd5   : > { %v1088_v21 = vadd.f32 %v1087_v62, %v949_v15  ;;  %v1279_v32 = vpop.f32.mrf.mxu2  ;;  %v1430_v31 = vpop.f32.mrf.mxu3  ;;  %v1193_v15 = vrot.slane %v9523_v9, 1 }
  0xd7   : > { %v1362_v38 = vadd.f32 %v1279_v32, %v1088_v21  ;;  %v9529_v32 = vshrl.u32 %v9477_v22, 16 }
  0xd8   : > { %v1090_v0 = vpop.f32.mrf.mxu1 }
  0xd9   : > { %v9516_v46 = vadd.f32 %v1430_v31, %v1362_v38  ;;  %v9532_v31 = vshll.u32 %v9500_v10, 16 }
  0xda   : > { %7342 = vmatmul.msk.bf16.gmra.mxu2 %vm866_vm2, %v1190_v43  ;;  %7364 = vmatmul.msk.bf16.gmra.mxu3 %vm866_vm2, %v1192_v39 }
  0xdb   : > { %7324 = vmatmul.msk.bf16.gmra.mxu1 %vm866_vm2, %v9454_v47  ;;  %12256 = vst [vmem:[#allocation13_spill] sm:$0xff] %v9516_v46  ;;  %v9569_v46 = vld [vmem:[%s9281_s29 + $0x80] sm:$0xff] }
  0xdc   : > { %v952_v57 = vpop.f32.mrf.mxu0  ;;  %12264 = vst [vmem:[#allocation21_spill] sm:$0xff] %v9569_v46 }
  0xdd   : > { %v1091_v63 = vadd.f32 %v1090_v0, %v952_v57  ;;  %v1282_v2 = vpop.f32.mrf.mxu2  ;;  %v1433_v25 = vpop.f32.mrf.mxu3 }
  0xdf   : > { %v1363_v49 = vadd.f32 %v1282_v2, %v1091_v63  ;;  %7306 = vmatmul.msk.bf16.gmra.mxu0 %vm866_vm2, %v822_v59  ;;  %v1194_v59 = vsel %vm1165_vm3, %v1191_v11, %v1193_v15  ;;  %v825_v63 = vor.u32 %v9529_v32, %v821_v41  ;;  %v829_v2 = vrot.slane %v9532_v31, 1 }
  0xe0   : > { %v1092_v62 = vpop.f32.mrf.mxu1 }
  0xe1   : > { %v9525_v51 = vadd.f32 %v1433_v25, %v1363_v49  ;;  %v830_v49 = vsel %vm722_vm4, %v825_v63, %v829_v2  ;;  %v9555_v63 = vshll.u32 %v9523_v9, 16 }
  0xe3   : > { %12258 = vst [vmem:[#allocation15_spill] sm:$0xff] %v9525_v51 }
  0xe4   : > { %v954_v21 = vpop.f32.mrf.mxu0  ;;  %12262 = vst [vmem:[#allocation19_spill] sm:$0xff] %v9555_v63 }
  0xe5   : > { %v1093_v0 = vadd.f32 %v1092_v62, %v954_v21  ;;  %v1284_v38 = vpop.f32.mrf.mxu2  ;;  %v1435_v40 = vpop.f32.mrf.mxu3 }
  0xe7   : > { %v1364_v57 = vadd.f32 %v1284_v38, %v1093_v0 }
  0xe8   : > { %v1095_v43 = vpop.f32.mrf.mxu1 }
  0xe9   : > { %v9539_v25 = vadd.f32 %v1435_v40, %v1364_v57  ;;  %v1195_v40 = vrot.slane %v9546_v28, 1 }
  0xea   : > { %7343 = vmatmul.msk.bf16.gmra.mxu2 %vm866_vm2, %v1192_v39  ;;  %7365 = vmatmul.msk.bf16.gmra.mxu3 %vm866_vm2, %v1194_v59 }
  0xeb   : > { %7325 = vmatmul.msk.bf16.gmra.mxu1 %vm866_vm2, %v9477_v22  ;;  %12259 = vst [vmem:[#allocation16_spill] sm:$0xff] %v9539_v25 }
  0xec   : > { %v957_v62 = vpop.f32.mrf.mxu0 }
  0xed   : > { %v1096_v0 = vadd.f32 %v1095_v43, %v957_v62  ;;  %v1287_v38 = vpop.f32.mrf.mxu2  ;;  %v1438_v11 = vpop.f32.mrf.mxu3 }
  0xef   : > { %v1365_v1 = vadd.f32 %v1287_v38, %v1096_v0  ;;  %7307 = vmatmul.msk.bf16.gmra.mxu0 %vm866_vm2, %v830_v49  ;;  %v1196_v49 = vsel %vm1165_vm3, %v1193_v15, %v1195_v40  ;;  %v837_v38 = vrot.slane %v9555_v63, 1 }
  0xf0   : > { %v1097_v21 = vpop.f32.mrf.mxu1 }
  0xf1   : > { %v9548_v41 = vadd.f32 %v1438_v11, %v1365_v1  ;;  %v833_v1 = vor.u32 %v9552_v19, %v829_v2 }
  0xf3   : > { %12261 = vst [vmem:[#allocation18_spill] sm:$0xff] %v9548_v41 }
  0xf4   : > { %v959_v57 = vpop.f32.mrf.mxu0 }
  0xf5   : > { %v1098_v43 = vadd.f32 %v1097_v21, %v959_v57  ;;  %v1289_v62 = vpop.f32.mrf.mxu2  ;;  %v1440_v25 = vpop.f32.mrf.mxu3  ;;  %v838_v57 = vsel %vm722_vm4, %v833_v1, %v837_v38  ;;  %v9578_v1 = vshll.u32 %v9546_v28, 16 }
  0xf7   : > { %v1366_v0 = vadd.f32 %v1289_v62, %v1098_v43  ;;  %12267 = vst [vmem:[#allocation24_spill] sm:$0xff] %v9578_v1 }
  0xf8   : > { %v1100_v39 = vpop.f32.mrf.mxu1 }
  0xf9   : > { %v9562_v11 = vadd.f32 %v1440_v25, %v1366_v0  ;;  %v1197_v25 = vrot.slane %v9569_v46, 1 }
  0xfa   : > { %7344 = vmatmul.msk.bf16.gmra.mxu2 %vm866_vm2, %v1194_v59  ;;  %7366 = vmatmul.msk.bf16.gmra.mxu3 %vm866_vm2, %v1196_v49 }
  0xfb   : > { %7326 = vmatmul.msk.bf16.gmra.mxu1 %vm866_vm2, %v9500_v10  ;;  %12263 = vst [vmem:[#allocation20_spill] sm:$0xff] %v9562_v11  ;;  %v9575_v11 = vshrl.u32 %v9523_v9, 16 }
  0xfc   : > { %v962_v21 = vpop.f32.mrf.mxu0 }
  0xfd   : > { %v1101_v62 = vadd.f32 %v1100_v39, %v962_v21  ;;  %v1292_v41 = vpop.f32.mrf.mxu2  ;;  %v1443_v15 = vpop.f32.mrf.mxu3  ;;  %12266 = vst [vmem:[#allocation23_spill] sm:$0xff] %v9575_v11 }
  0xff   : > { %v1367_v51 = vadd.f32 %v1292_v41, %v1101_v62  ;;  %7308 = vmatmul.msk.bf16.gmra.mxu0 %vm866_vm2, %v838_v57  ;;  %v1198_v57 = vsel %vm1165_vm3, %v1195_v40, %v1197_v25  ;;  %v845_v62 = vrot.slane %v9578_v1, 1 }
 0x100   : > { %v1102_v43 = vpop.f32.mrf.mxu1 }
 0x101   : > { %v9571_v2 = vadd.f32 %v1443_v15, %v1367_v51  ;;  %v841_v51 = vor.u32 %v9575_v11, %v837_v38 }
 0x103   : > { %12265 = vst [vmem:[#allocation22_spill] sm:$0xff] %v9571_v2 }
 0x104   : > { %v964_v0 = vpop.f32.mrf.mxu0 }
 0x105   : > { %v1103_v39 = vadd.f32 %v1102_v43, %v964_v0  ;;  %v1294_v21 = vpop.f32.mrf.mxu2  ;;  %v1445_v63 = vpop.f32.mrf.mxu3  ;;  %v846_v0 = vsel %vm722_vm4, %v841_v51, %v845_v62  ;;  %v9603_v51 = vshll.u32 %v9569_v46, 16 }
 0x107   : > { %v1368_v41 = vadd.f32 %v1294_v21, %v1103_v39  ;;  %12271 = vst [vmem:[#allocation28_spill] sm:$0xff] %v9603_v51 }
 0x108   : > { %v1105_v59 = vpop.f32.mrf.mxu1 }
 0x109   : > { %v9585_v15 = vadd.f32 %v1445_v63, %v1368_v41 }
 0x10a   : > { %7345 = vmatmul.msk.bf16.gmra.mxu2 %vm866_vm2, %v1196_v49  ;;  %7367 = vmatmul.msk.bf16.gmra.mxu3 %vm866_vm2, %v1198_v57 }
 0x10b   : > { %7327 = vmatmul.msk.bf16.gmra.mxu1 %vm866_vm2, %v9523_v9  ;;  %12268 = vst [vmem:[#allocation25_spill] sm:$0xff] %v9585_v15  ;;  %v9592_v9 = vld [vmem:[%s9281_s29 + $0x88] sm:$0xff]  ;;  %v9600_v15 = vshrl.u32 %v9546_v28, 16 }
 0x10c   : > { %v967_v43 = vpop.f32.mrf.mxu0  ;;  %v9597_v63 = vrot.slane %v9592_v9, 1 }
 0x10d   : > { %v1106_v21 = vadd.f32 %v1105_v59, %v967_v43  ;;  %v1297_v2 = vpop.f32.mrf.mxu2  ;;  %v1448_v40 = vpop.f32.mrf.mxu3  ;;  %12270 = vst [vmem:[#allocation27_spill] sm:$0xff] %v9600_v15 }
 0x10f   : > { %v1369_v5 = vadd.f32 %v1297_v2, %v1106_v21  ;;  %7309 = vmatmul.msk.bf16.gmra.mxu0 %vm866_vm2, %v846_v0  ;;  %v1200_v0 = vsel %vm1165_vm3, %v1197_v25, %v9597_v63 }
 0x110   : > { %v1107_v39 = vpop.f32.mrf.mxu1 }
 0x111   : > { %v9594_v38 = vadd.f32 %v1448_v40, %v1369_v5  ;;  %v849_v5 = vor.u32 %v9600_v15, %v845_v62  ;;  %v853_v40 = vrot.slane %v9603_v51, 1 }
 0x113   : > { %12269 = vst [vmem:[#allocation26_spill] sm:$0xff] %v9594_v38 }
 0x114   : > { %v969_v49 = vpop.f32.mrf.mxu0 }
 0x115   : > { %v1108_v59 = vadd.f32 %v1107_v39, %v969_v49  ;;  %v1299_v43 = vpop.f32.mrf.mxu2  ;;  %v1450_v2 = vpop.f32.mrf.mxu3  ;;  %v854_v49 = vsel %vm722_vm4, %v849_v5, %v853_v40 }
 0x117   : > { %v1370_v21 = vadd.f32 %v1299_v43, %v1108_v59 }
 0x118   : > { %v1110_v41 = vpop.f32.mrf.mxu1 }
 0x119   : > { %v9611_v38 = vadd.f32 %v1450_v2, %v1370_v21  ;;  %v9622_v2 = vld [vmem:[%s9281_s29 + $0x90] sm:$0xff] }
 0x11a   : > { %7346 = vmatmul.msk.bf16.gmra.mxu2 %vm866_vm2, %v1198_v57  ;;  %7368 = vmatmul.msk.bf16.gmra.mxu3 %vm866_vm2, %v1200_v0  ;;  %12273 = vst [vmem:[#allocation30_spill] sm:$0xff] %v9622_v2  ;;  %v1398_v21 = vrot.slane %v9622_v2, 1  ;;  %v7221_v2 = vld [vmem:[%s12250_s26 + $0xe] sm:$0x3] }
 0x11b   : > { %7328 = vmatmul.msk.bf16.gmra.mxu1 %vm866_vm2, %v9546_v28  ;;  %12272 = vst [vmem:[#allocation29_spill] sm:$0xff] %v9611_v38  ;;  %v7218_v28 = vld [vmem:[%s12250_s26 + $0x8] sm:$0x3]  ;;  %v9631_v38 = vshll.u32 %v9592_v9, 16 }
 0x11c   : > { %v972_v39 = vpop.f32.mrf.mxu0  ;;  %v1684_v62 = vand.u32 %v7218_v28, %v9265_v4 }
 0x11d   : > { %v1111_v43 = vadd.f32 %v1110_v41, %v972_v39  ;;  %v1302_v25 = vpop.f32.mrf.mxu2  ;;  %v1453_v1 = vpop.f32.mrf.mxu3  ;;  %v9628_v39 = vshrl.u32 %v9569_v46, 16  ;;  %12276 = vst [vmem:[#allocation33_spill] sm:$0xff] %v9631_v38 }
 0x11e   : > { %1693 = vmatpush.bf16.msrb.mxu0 %v1684_v62 }
 0x11f   : > { %v1371_v51 = vadd.f32 %v1302_v25, %v1111_v43  ;;  %7310 = vmatmul.msk.bf16.gmra.mxu0 %vm866_vm2, %v854_v49  ;;  %12275 = vst [vmem:[#allocation32_spill] sm:$0xff] %v9628_v39  ;;  %v12277_v49 = vshll.u32 %v9285_v12, 16 }
 0x120   : > { %v1112_v59 = vpop.f32.mrf.mxu1 }
 0x121   : > { %v9624_v57 = vadd.f32 %v1453_v1, %v1371_v51  ;;  %v9635_v25 = vrot.slane %v12277_v49, 2  ;;  %v1399_v1 = vsel %vm1165_vm3, %v9597_v63, %v1398_v21  ;;  %v7220_v51 = vld [vmem:[%s12250_s26 + $0xc] sm:$0x3]  ;;  %v861_v49 = vrot.slane %v9631_v38, 1 }
 0x123   : > { %12274 = vst [vmem:[#allocation31_spill] sm:$0xff] %v9624_v57  ;;  %v12278_v57 = vshrl.u32 %v9285_v12, 16 }
 0x124   : > { %v974_v5 = vpop.f32.mrf.mxu0 }
 0x125   : > { %v1113_v15 = vadd.f32 %v1112_v59, %v974_v5  ;;  %v1304_v28 = vpop.f32.mrf.mxu2  ;;  %v1455_v43 = vpop.f32.mrf.mxu3  ;;  %v9646_v59 = vrot.slane %v12278_v57, 1  ;;  %v857_v5 = vor.u32 %v9628_v39, %v853_v40  ;;  %v7219_v40 = vld [vmem:[%s12250_s26 + $0xa] sm:$0x3] }
 0x127   : > { %v1372_v62 = vadd.f32 %v1304_v28, %v1113_v15  ;;  %v2068_v15 = vand.u32 %v7220_v51, %v9265_v4  ;;  %v862_v51 = vsel %vm722_vm4, %v857_v5, %v861_v49 }
 0x128   : > { %v1115_v41 = vpop.f32.mrf.mxu1 }
 0x129   : > { %v9651_v28 = vadd.f32 %v1455_v43, %v1372_v62  ;;  %2077 = vmatpush.bf16.msrb.mxu2 %v2068_v15  ;;  %v1914_v62 = vand.u32 %v7219_v40, %v9265_v4  ;;  %v9670_v40 = vshrl.u32 %v9592_v9, 16 }
 0x12a   : > { %7347 = vmatmul.msk.bf16.gmra.mxu2 %vm866_vm2, %v1200_v0  ;;  %7369 = vmatmul.msk.bf16.gmra.mxu3 %vm866_vm2, %v1399_v1 }
 0x12b   : > { %7329 = vmatmul.msk.bf16.gmra.mxu1 %vm866_vm2, %v9569_v46  ;;  %12279 = vst [vmem:[#allocation34_spill] sm:$0xff] %v9651_v28  ;;  %v2346_v46 = vand.u32 %v7221_v2, %v9265_v4  ;;  %v1550_v28 = vor.u32 %v9635_v25, %v9646_v59 }
 0x12c   : > { %v977_v57 = vpop.f32.mrf.mxu0  ;;  %1923 = vmatpush.bf16.msrb.mxu1 %v1914_v62  ;;  %v2209_v62 = vrot.slane %v9344_v44, 2 }
 0x12d   : > { %2355 = vmatpush.bf16.msrb.mxu3 %v2346_v46  ;;  %v1116_v0 = vadd.f32 %v1115_v41, %v977_v57  ;;  %v1307_v38 = vpop.f32.mrf.mxu2  ;;  %v1458_v1 = vpop.f32.mrf.mxu3 }
 0x12f   : > { %v1373_v2 = vadd.f32 %v1307_v38, %v1116_v0  ;;  %7311 = vmatmul.msk.bf16.gmra.mxu0 %vm866_vm2, %v862_v51  ;;  %v865_v38 = vor.u32 %v9670_v40, %v861_v49  ;;  %v2206_v51 = vrot.slane %v9325_v36, 2  ;;  %v1823_v49 = vrot.slane %v9288_v13, 2 }
 0x130   : > { %v1117_v43 = vpop.f32.mrf.mxu1 }
 0x131   : > { %v9667_v15 = vadd.f32 %v1458_v1, %v1373_v2 }
 0x134   : > { %v979_v39 = vpop.f32.mrf.mxu0 }
 0x135   : > { %v1118_v54 = vadd.f32 %v1117_v43, %v979_v39  ;;  %v1309_v5 = vpop.f32.mrf.mxu2  ;;  %v1460_v10 = vpop.f32.mrf.mxu3 }
 0x137   : > { %v1374_v46 = vadd.f32 %v1309_v5, %v1118_v54 }
 0x138   : > { %v1120_v11 = vpop.f32.mrf.mxu1 }
 0x139   : > { %v9674_v41 = vadd.f32 %v1460_v10, %v1374_v46  ;;  %v2207_v10 = vrot.slane %v9308_v29, 3 }
 0x13a   : > { %7348 = vmatmul.msk.bf16.gmra.mxu2 %vm866_vm2, %v9597_v63  ;;  %7370 = vmatmul.msk.bf16.gmra.mxu3 %vm866_vm2, %v1398_v21  ;;  %v2210_v63 = vrot.slane %v9328_v37, 3  ;;  %v1822_v21 = vrot.slane %v9285_v12, 2 }
 0x13b   : > { %7330 = vmatmul.msk.bf16.gmra.mxu1 %vm866_vm2, %v9592_v9  ;;  %v2208_v1 = vor.u32 %v2207_v10, %v2206_v51 }
 0x13c   : > { %v982_v25 = vpop.f32.mrf.mxu0  ;;  %v2211_v2 = vor.u32 %v2210_v63, %v2209_v62 }
 0x13d   : > { %v1121_v59 = vadd.f32 %v1120_v11, %v982_v25  ;;  %v1312_v57 = vpop.f32.mrf.mxu2  ;;  %v1463_v54 = vpop.f32.mrf.mxu3  ;;  %v1825_v11 = vrot.slane %v9303_v26, 2  ;;  %v1552_v25 = vrot.slane %v9308_v29, 2 }
 0x13f   : > { %v1375_v43 = vadd.f32 %v1312_v57, %v1121_v59  ;;  %7312 = vmatmul.msk.bf16.gmra.mxu0 %vm866_vm2, %v865_v38  ;;  %v1551_v38 = vrot.slane %v9325_v36, 1  ;;  %v1824_v59 = vsel %vm1821_vm5, %v1822_v21, %v1823_v49  ;;  %v1826_v13 = vsel %vm1821_vm5, %v1823_v49, %v1825_v11 }
 0x140   : > { %v1122_v39 = vpop.f32.mrf.mxu1  ;;  %v2213_v49 = vrot.slane %v9363_v52, 2 }
 0x141   : > { %v9686_v0 = vadd.f32 %v1463_v54, %v1375_v43  ;;  %v1553_v26 = vor.u32 %v1552_v25, %v1551_v38  ;;  %v1827_v38 = vrot.slane %v9321_v34, 2 }
 0x143   : > { %12280 = vst [vmem:[#allocation35_spill] sm:$0xff] %v9686_v0  ;;  %v2212_v0 = vsel %vm2205_vm6, %v2208_v1, %v2211_v2  ;;  %v1554_v36 = vsel %vm1547_vm7, %v1550_v28, %v1553_v26  ;;  %v2214_v1 = vrot.slane %v9347_v45, 3  ;;  %v1555_v28 = vrot.slane %v9344_v44, 1 }
 0x144   : > { %v984_v5 = vpop.f32.mrf.mxu0 }
 0x145   : > { %v1123_v57 = vadd.f32 %v1122_v39, %v984_v5  ;;  %v1314_v12 = vpop.f32.mrf.mxu2  ;;  %v1465_v54 = vpop.f32.mrf.mxu3  ;;  %v2215_v25 = vor.u32 %v2214_v1, %v2213_v49  ;;  %v1829_v1 = vrot.slane %v9340_v42, 2 }
 0x147   : > { %v1376_v43 = vadd.f32 %v1314_v12, %v1123_v57 }
 0x148   : > { %v1125_v46 = vpop.f32.mrf.mxu1 }
 0x149   : > { %v9696_v51 = vadd.f32 %v1465_v54, %v1376_v43 }
 0x14a   : > { %7407 = vmatmul.msk.bf16.vlgmr.msrb.gmra.mxu2 %vm866_vm2, %v1826_v13  ;;  %7425 = vmatmul.msk.bf16.vlgmr.msrb.gmra.mxu3 %vm866_vm2, %v2212_v0 }
 0x14b   : > { %7389 = vmatmul.msk.bf16.vlgmr.msrb.gmra.mxu1 %vm866_vm2, %v1824_v59 }
 0x14c   : > { %v987_v29 = vpop.f32.mrf.mxu0 }
 0x14d   : > { %v1126_v10 = vadd.f32 %v1125_v46, %v987_v29  ;;  %v1317_v62 = vpop.f32.mrf.mxu2  ;;  %v1468_v63 = vpop.f32.mrf.mxu3  ;;  %v1556_v46 = vrot.slane %v9328_v37, 2  ;;  %v1828_v29 = vsel %vm1821_vm5, %v1825_v11, %v1827_v38  ;;  %v2217_v11 = vrot.slane %v9382_v60, 2 }
 0x14f   : > { %v1377_v21 = vadd.f32 %v1317_v62, %v1126_v10  ;;  %7371 = vmatmul.msk.bf16.vlgmr.msrb.gmra.mxu0 %vm866_vm2, %v1554_v36  ;;  %v2216_v36 = vsel %vm2205_vm6, %v2211_v2, %v2215_v25  ;;  %v1557_v10 = vor.u32 %v1556_v46, %v1555_v28  ;;  %v2218_v2 = vrot.slane %v9366_v53, 3 }
 0x150   : > { %v1127_v39 = vpop.f32.mrf.mxu1 }
 0x151   : > { %v9704_v5 = vadd.f32 %v1468_v63, %v1377_v21  ;;  %v1558_v37 = vsel %vm1547_vm7, %v1553_v26, %v1557_v10  ;;  %v1559_v26 = vrot.slane %v9363_v52, 1 }
 0x154   : > { %v989_v0 = vpop.f32.mrf.mxu0 }
 0x155   : > { %v1128_v57 = vadd.f32 %v1127_v39, %v989_v0  ;;  %v1319_v12 = vpop.f32.mrf.mxu2  ;;  %v1470_v54 = vpop.f32.mrf.mxu3  ;;  %v2219_v0 = vor.u32 %v2218_v2, %v2217_v11  ;;  %v1831_v11 = vrot.slane %v9359_v50, 2 }
 0x157   : > { %v1378_v43 = vadd.f32 %v1319_v12, %v1128_v57 }
 0x158   : > { %v1130_v59 = vpop.f32.mrf.mxu1 }
 0x159   : > { %v9712_v62 = vadd.f32 %v1470_v54, %v1378_v43 }
 0x15a   : > { %7408 = vmatmul.msk.bf16.gmra.mxu2 %vm866_vm2, %v1828_v29  ;;  %7426 = vmatmul.msk.bf16.gmra.mxu3 %vm866_vm2, %v2216_v36  ;;  %v1830_v36 = vsel %vm1821_vm5, %v1827_v38, %v1829_v1  ;;  %v2221_v38 = vrot.slane %v9401_v6, 2 }
 0x15b   : > { %7390 = vmatmul.msk.bf16.gmra.mxu1 %vm866_vm2, %v1826_v13 }
 0x15c   : > { %v992_v34 = vpop.f32.mrf.mxu0 }
 0x15d   : > { %v1131_v39 = vadd.f32 %v1130_v59, %v992_v34  ;;  %v1322_v63 = vpop.f32.mrf.mxu2  ;;  %v1473_v21 = vpop.f32.mrf.mxu3  ;;  %v1560_v59 = vrot.slane %v9347_v45, 2  ;;  %v2220_v34 = vsel %vm2205_vm6, %v2215_v25, %v2219_v0  ;;  %v2222_v25 = vrot.slane %v9385_v61, 3 }
 0x15f   : > { %v1379_v49 = vadd.f32 %v1322_v63, %v1131_v39  ;;  %7372 = vmatmul.msk.bf16.gmra.mxu0 %vm866_vm2, %v1558_v37  ;;  %v1561_v37 = vor.u32 %v1560_v59, %v1559_v26  ;;  %v2223_v2 = vor.u32 %v2222_v25, %v2221_v38 }
 0x160   : > { %v1132_v44 = vpop.f32.mrf.mxu1 }
 0x161   : > { %v9720_v13 = vadd.f32 %v1473_v21, %v1379_v49  ;;  %v1562_v45 = vsel %vm1547_vm7, %v1557_v10, %v1561_v37  ;;  %v1563_v10 = vrot.slane %v9382_v60, 1 }
 0x164   : > { %v994_v28 = vpop.f32.mrf.mxu0 }
 0x165   : > { %v1133_v57 = vadd.f32 %v1132_v44, %v994_v28  ;;  %v1324_v12 = vpop.f32.mrf.mxu2  ;;  %v1475_v54 = vpop.f32.mrf.mxu3 }
 0x167   : > { %v1380_v43 = vadd.f32 %v1324_v12, %v1133_v57 }
 0x168   : > { %v1135_v46 = vpop.f32.mrf.mxu1 }
 0x169   : > { %v9728_v39 = vadd.f32 %v1475_v54, %v1380_v43  ;;  %v1832_v43 = vsel %vm1821_vm5, %v1829_v1, %v1831_v11  ;;  %v2225_v1 = vrot.slane %v9420_v16, 2 }
 0x16a   : > { %7409 = vmatmul.msk.bf16.gmra.mxu2 %vm866_vm2, %v1830_v36  ;;  %7427 = vmatmul.msk.bf16.gmra.mxu3 %vm866_vm2, %v2220_v34  ;;  %v2224_v34 = vsel %vm2205_vm6, %v2219_v0, %v2223_v2  ;;  %v2226_v0 = vrot.slane %v9404_v7, 3 }
 0x16b   : > { %7391 = vmatmul.msk.bf16.gmra.mxu1 %vm866_vm2, %v1828_v29 }
 0x16c   : > { %v997_v42 = vpop.f32.mrf.mxu0  ;;  %v2227_v38 = vor.u32 %v2226_v0, %v2225_v1 }
 0x16d   : > { %v1136_v44 = vadd.f32 %v1135_v46, %v997_v42  ;;  %v1327_v63 = vpop.f32.mrf.mxu2  ;;  %v1478_v21 = vpop.f32.mrf.mxu3  ;;  %v1564_v46 = vrot.slane %v9366_v53, 2 }
 0x16f   : > { %v1381_v49 = vadd.f32 %v1327_v63, %v1136_v44  ;;  %7373 = vmatmul.msk.bf16.gmra.mxu0 %vm866_vm2, %v1562_v45  ;;  %v1565_v42 = vor.u32 %v1564_v46, %v1563_v10 }
 0x170   : > { %v1137_v52 = vpop.f32.mrf.mxu1 }
 0x171   : > { %v9736_v29 = vadd.f32 %v1478_v21, %v1381_v49  ;;  %v1566_v53 = vsel %vm1547_vm7, %v1561_v37, %v1565_v42  ;;  %v1833_v49 = vrot.slane %v9378_v58, 2  ;;  %v1567_v37 = vrot.slane %v9401_v6, 1 }
 0x174   : > { %v999_v28 = vpop.f32.mrf.mxu0 }
 0x175   : > { %v1138_v59 = vadd.f32 %v1137_v52, %v999_v28  ;;  %v1329_v57 = vpop.f32.mrf.mxu2  ;;  %v1480_v12 = vpop.f32.mrf.mxu3 }
 0x177   : > { %v1382_v54 = vadd.f32 %v1329_v57, %v1138_v59 }
 0x178   : > { %v1140_v26 = vpop.f32.mrf.mxu1 }
 0x179   : > { %v9744_v45 = vadd.f32 %v1480_v12, %v1382_v54  ;;  %v1834_v12 = vsel %vm1821_vm5, %v1831_v11, %v1833_v49  ;;  %v2228_v54 = vsel %vm2205_vm6, %v2223_v2, %v2227_v38  ;;  %v2229_v11 = vrot.slane %v9439_v27, 2 }
 0x17a   : > { %7410 = vmatmul.msk.bf16.gmra.mxu2 %vm866_vm2, %v1832_v43  ;;  %7428 = vmatmul.msk.bf16.gmra.mxu3 %vm866_vm2, %v2224_v34  ;;  %v2230_v2 = vrot.slane %v9423_v17, 3 }
 0x17b   : > { %7392 = vmatmul.msk.bf16.gmra.mxu1 %vm866_vm2, %v1830_v36 }
 0x17c   : > { %v1002_v50 = vpop.f32.mrf.mxu0 }
 0x17d   : > { %v1141_v52 = vadd.f32 %v1140_v26, %v1002_v50  ;;  %v1332_v44 = vpop.f32.mrf.mxu2  ;;  %v1483_v63 = vpop.f32.mrf.mxu3  ;;  %v1568_v26 = vrot.slane %v9385_v61, 2 }
 0x17f   : > { %v1383_v21 = vadd.f32 %v1332_v44, %v1141_v52  ;;  %7374 = vmatmul.msk.bf16.gmra.mxu0 %vm866_vm2, %v1566_v53  ;;  %v1569_v34 = vor.u32 %v1568_v26, %v1567_v37 }
 0x180   : > { %v1142_v60 = vpop.f32.mrf.mxu1 }
 0x181   : > { %v9752_v36 = vadd.f32 %v1483_v63, %v1383_v21  ;;  %v1570_v61 = vsel %vm1547_vm7, %v1565_v42, %v1569_v34  ;;  %v1835_v63 = vrot.slane %v9397_v3, 2  ;;  %v2231_v21 = vor.u32 %v2230_v2, %v2229_v11 }
 0x182   : > { %v1571_v42 = vrot.slane %v9420_v16, 1  ;;  %v1576_v2 = vrot.slane %v9423_v17, 2 }
 0x184   : > { %v1004_v25 = vpop.f32.mrf.mxu0 }
 0x185   : > { %v1143_v10 = vadd.f32 %v1142_v60, %v1004_v25  ;;  %v1334_v46 = vpop.f32.mrf.mxu2  ;;  %v1485_v59 = vpop.f32.mrf.mxu3  ;;  %v1572_v25 = vrot.slane %v9404_v7, 2 }
 0x187   : > { %v1384_v57 = vadd.f32 %v1334_v46, %v1143_v10  ;;  %v1836_v46 = vsel %vm1821_vm5, %v1833_v49, %v1835_v63  ;;  %v2233_v49 = vrot.slane %v9460_v55, 2 }
 0x188   : > { %v1145_v28 = vpop.f32.mrf.mxu1 }
 0x189   : > { %v9760_v50 = vadd.f32 %v1485_v59, %v1384_v57  ;;  %v2232_v59 = vsel %vm2205_vm6, %v2227_v38, %v2231_v21  ;;  %v1573_v57 = vor.u32 %v1572_v25, %v1571_v42  ;;  %v2234_v38 = vrot.slane %v9442_v30, 3 }
 0x18a   : > { %7411 = vmatmul.msk.bf16.gmra.mxu2 %vm866_vm2, %v1834_v12  ;;  %7429 = vmatmul.msk.bf16.gmra.mxu3 %vm866_vm2, %v2228_v54 }
 0x18b   : > { %7393 = vmatmul.msk.bf16.gmra.mxu1 %vm866_vm2, %v1832_v43  ;;  %v1574_v7 = vsel %vm1547_vm7, %v1569_v34, %v1573_v57  ;;  %v1575_v34 = vrot.slane %v9439_v27, 1 }
 0x18c   : > { %v1007_v58 = vpop.f32.mrf.mxu0 }
 0x18d   : > { %v1146_v53 = vadd.f32 %v1145_v28, %v1007_v58  ;;  %v1337_v60 = vpop.f32.mrf.mxu2  ;;  %v1488_v52 = vpop.f32.mrf.mxu3 }
 0x18f   : > { %v1385_v44 = vadd.f32 %v1337_v60, %v1146_v53  ;;  %7375 = vmatmul.msk.bf16.gmra.mxu0 %vm866_vm2, %v1570_v61  ;;  %v1837_v60 = vrot.slane %v9416_v14, 2 }
 0x190   : > { %v1147_v6 = vpop.f32.mrf.mxu1 }
 0x191   : > { %v9768_v43 = vadd.f32 %v1488_v52, %v1385_v44  ;;  %v2235_v52 = vor.u32 %v2234_v38, %v2233_v49  ;;  %v1580_v49 = vrot.slane %v9442_v30, 2 }
 0x194   : > { %v1009_v1 = vpop.f32.mrf.mxu0 }
 0x195   : > { %v1148_v28 = vadd.f32 %v1147_v6, %v1009_v1  ;;  %v1339_v37 = vpop.f32.mrf.mxu2  ;;  %v1490_v26 = vpop.f32.mrf.mxu3 }
 0x197   : > { %v1386_v10 = vadd.f32 %v1339_v37, %v1148_v28  ;;  %v1838_v28 = vsel %vm1821_vm5, %v1835_v63, %v1837_v60  ;;  %v2236_v37 = vsel %vm2205_vm6, %v2231_v21, %v2235_v52  ;;  %v2237_v63 = vrot.slane %v9483_v33, 2 }
 0x198   : > { %v1150_v0 = vpop.f32.mrf.mxu1  ;;  %v2238_v21 = vrot.slane %v9463_v56, 3 }
 0x199   : > { %v9776_v54 = vadd.f32 %v1490_v26, %v1386_v10  ;;  %v1577_v26 = vor.u32 %v1576_v2, %v1575_v34 }
 0x19a   : > { %7412 = vmatmul.msk.bf16.gmra.mxu2 %vm866_vm2, %v1836_v46  ;;  %7430 = vmatmul.msk.bf16.gmra.mxu3 %vm866_vm2, %v2232_v59 }
 0x19b   : > { %7394 = vmatmul.msk.bf16.gmra.mxu1 %vm866_vm2, %v1834_v12  ;;  %v1578_v17 = vsel %vm1547_vm7, %v1573_v57, %v1577_v26  ;;  %v1579_v57 = vrot.slane %v9460_v55, 1 }
 0x19c   : > { %v1012_v3 = vpop.f32.mrf.mxu0 }
 0x19d   : > { %v1151_v58 = vadd.f32 %v1150_v0, %v1012_v3  ;;  %v1342_v61 = vpop.f32.mrf.mxu2  ;;  %v1493_v6 = vpop.f32.mrf.mxu3 }
 0x19f   : > { %v1387_v53 = vadd.f32 %v1342_v61, %v1151_v58  ;;  %7376 = vmatmul.msk.bf16.gmra.mxu0 %vm866_vm2, %v1574_v7  ;;  %v1839_v58 = vrot.slane %v9435_v23, 2  ;;  %v2239_v61 = vor.u32 %v2238_v21, %v2237_v63 }
 0x1a0   : > { %v1152_v16 = vpop.f32.mrf.mxu1 }
 0x1a1   : > { %v9784_v12 = vadd.f32 %v1493_v6, %v1387_v53  ;;  %v1840_v2 = vsel %vm1821_vm5, %v1837_v60, %v1839_v58  ;;  %v2241_v60 = vrot.slane %v9506_v18, 2 }
 0x1a4   : > { %v1014_v44 = vpop.f32.mrf.mxu0 }
 0x1a5   : > { %v1153_v1 = vadd.f32 %v1152_v16, %v1014_v44  ;;  %v1344_v0 = vpop.f32.mrf.mxu2  ;;  %v1495_v42 = vpop.f32.mrf.mxu3 }
 0x1a7   : > { %v1388_v25 = vadd.f32 %v1344_v0, %v1153_v1  ;;  %v2240_v1 = vsel %vm2205_vm6, %v2235_v52, %v2239_v61  ;;  %v1581_v0 = vor.u32 %v1580_v49, %v1579_v57  ;;  %v2242_v52 = vrot.slane %v9486_v35, 3 }
 0x1a8   : > { %v1155_v11 = vpop.f32.mrf.mxu1 }
 0x1a9   : > { %v9792_v10 = vadd.f32 %v1495_v42, %v1388_v25  ;;  %v1582_v30 = vsel %vm1547_vm7, %v1577_v26, %v1581_v0  ;;  %v1583_v26 = vrot.slane %v9483_v33, 1 }
 0x1aa   : > { %7413 = vmatmul.msk.bf16.gmra.mxu2 %vm866_vm2, %v1838_v28  ;;  %7431 = vmatmul.msk.bf16.gmra.mxu3 %vm866_vm2, %v2236_v37 }
 0x1ab   : > { %7395 = vmatmul.msk.bf16.gmra.mxu1 %vm866_vm2, %v1836_v46 }
 0x1ac   : > { %v1017_v14 = vpop.f32.mrf.mxu0 }
 0x1ad   : > { %v1156_v59 = vadd.f32 %v1155_v11, %v1017_v14  ;;  %v1347_v3 = vpop.f32.mrf.mxu2  ;;  %v1498_v7 = vpop.f32.mrf.mxu3 }
 0x1af   : > { %v1389_v16 = vadd.f32 %v1347_v3, %v1156_v59  ;;  %7377 = vmatmul.msk.bf16.gmra.mxu0 %vm866_vm2, %v1578_v17  ;;  %v2243_v59 = vor.u32 %v2242_v52, %v2241_v60 }
 0x1b0   : > { %v1157_v27 = vpop.f32.mrf.mxu1 }
 0x1b1   : > { %v9800_v46 = vadd.f32 %v1498_v7, %v1389_v16  ;;  %v1584_v16 = vrot.slane %v9463_v56, 2  ;;  %v2244_v49 = vsel %vm2205_vm6, %v2239_v61, %v2243_v59  ;;  %v2245_v61 = vrot.slane %v9529_v32, 2 }
 0x1b4   : > { %v1019_v6 = vpop.f32.mrf.mxu0 }
 0x1b5   : > { %v1158_v38 = vadd.f32 %v1157_v27, %v1019_v6  ;;  %v1349_v44 = vpop.f32.mrf.mxu2  ;;  %v1500_v11 = vpop.f32.mrf.mxu3  ;;  %v1841_v27 = vrot.slane %v9454_v47, 2 }
 0x1b7   : > { %v1390_v34 = vadd.f32 %v1349_v44, %v1158_v38  ;;  %v1842_v57 = vsel %vm1821_vm5, %v1839_v58, %v1841_v27  ;;  %v1585_v38 = vor.u32 %v1584_v16, %v1583_v26 }
 0x1b8   : > { %v1160_v53 = vpop.f32.mrf.mxu1 }
 0x1b9   : > { %v9808_v42 = vadd.f32 %v1500_v11, %v1390_v34  ;;  %v1586_v56 = vsel %vm1547_vm7, %v1581_v0, %v1585_v38 }
 0x1ba   : > { %7414 = vmatmul.msk.bf16.gmra.mxu2 %vm866_vm2, %v1840_v2  ;;  %7432 = vmatmul.msk.bf16.gmra.mxu3 %vm866_vm2, %v2240_v1 }
 0x1bb   : > { %7396 = vmatmul.msk.bf16.gmra.mxu1 %vm866_vm2, %v1838_v28 }
 0x1bc   : > { %v1022_v23 = vpop.f32.mrf.mxu0 }
 0x1bd   : > { %v1161_v25 = vadd.f32 %v1160_v53, %v1022_v23  ;;  %v1352_v37 = vpop.f32.mrf.mxu2  ;;  %v1503_v14 = vpop.f32.mrf.mxu3 }
 0x1bf   : > { %v1391_v17 = vadd.f32 %v1352_v37, %v1161_v25  ;;  %7378 = vmatmul.msk.bf16.gmra.mxu0 %vm866_vm2, %v1582_v30 }
 0x1c0   : > { %v1162_v55 = vpop.f32.mrf.mxu1 }
 0x1c1   : > { %v9816_v28 = vadd.f32 %v1503_v14, %v1391_v17  ;;  %v1587_v14 = vrot.slane %v9506_v18, 1 }
 0x1c4   : > { %v1024_v3 = vpop.f32.mrf.mxu0 }
 0x1c5   : > { %v1163_v63 = vadd.f32 %v1162_v55, %v1024_v3  ;;  %v1354_v21 = vpop.f32.mrf.mxu2  ;;  %v1505_v6 = vpop.f32.mrf.mxu3  ;;  %v1843_v55 = vrot.slane %v9477_v22, 2 }
 0x1c7   : > { %v1392_v53 = vadd.f32 %v1354_v21, %v1163_v63 }
 0x1c8   : > { %v1925_v7 = vpop.f32.mrf.mxu1 }
 0x1c9   : > { %v9824_v44 = vadd.f32 %v1505_v6, %v1392_v53 }
 0x1ca   : > { %7415 = vmatmul.msk.bf16.gmra.mxu2 %vm866_vm2, %v1842_v57  ;;  %7433 = vmatmul.msk.bf16.gmra.mxu3 %vm866_vm2, %v2244_v49 }
 0x1cb   : > { %7397 = vmatmul.msk.bf16.gmra.mxu1 %vm866_vm2, %v1840_v2  ;;  %v2246_v2 = vrot.slane %v9509_v20, 3 }
 0x1cc   : > { %v1695_v47 = vpop.f32.mrf.mxu0 }
 0x1cd   : > { %v1785_v11 = vadd.f32 %v1695_v47, %v9456_v48  ;;  %v2079_v34 = vpop.f32.mrf.mxu2  ;;  %v2357_v1 = vpop.f32.mrf.mxu3  ;;  %v2247_v25 = vor.u32 %v2246_v2, %v2245_v61  ;;  %v1588_v48 = vrot.slane %v9486_v35, 2 }
 0x1cf   : > { %v2015_v58 = vadd.f32 %v1925_v7, %v1785_v11  ;;  %7379 = vmatmul.msk.bf16.gmra.mxu0 %vm866_vm2, %v1586_v56  ;;  %v1844_v7 = vsel %vm1821_vm5, %v1841_v27, %v1843_v55  ;;  %v2248_v26 = vsel %vm2205_vm6, %v2243_v59, %v2247_v25  ;;  %v1589_v16 = vor.u32 %v1588_v48, %v1587_v14  ;;  %v12281_v56 = vld [vmem:[#allocation11_spill] sm:$0xff] }
 0x1d0   : > { %v1927_v33 = vpop.f32.mrf.mxu1  ;;  %v2249_v59 = vrot.slane %v9552_v19, 2 }
 0x1d1   : > { %v2169_v23 = vadd.f32 %v2079_v34, %v2015_v58  ;;  %v12282_v58 = vld [vmem:[#allocation10_spill] sm:$0xff] }
 0x1d3   : > { %v9833_v30 = vadd.f32 %v2357_v1, %v2169_v23  ;;  %v1591_v1 = vrot.slane %v9529_v32, 1 }
 0x1d4   : > { %v1697_v37 = vpop.f32.mrf.mxu0 }
 0x1d5   : > { %v1786_v17 = vadd.f32 %v1697_v37, %v9470_v8  ;;  %v2081_v60 = vpop.f32.mrf.mxu2  ;;  %v2359_v52 = vpop.f32.mrf.mxu3  ;;  %v1590_v8 = vsel %vm1547_vm7, %v1585_v38, %v1589_v16 }
 0x1d7   : > { %v2016_v3 = vadd.f32 %v1927_v33, %v1786_v17  ;;  %v1845_v33 = vrot.slane %v12281_v56, 2  ;;  %v1596_v56 = vrot.slane %v9532_v31, 2 }
 0x1d8   : > { %v1930_v0 = vpop.f32.mrf.mxu1 }
 0x1d9   : > { %v2170_v22 = vadd.f32 %v2081_v60, %v2016_v3  ;;  %v12283_v3 = vld [vmem:[#allocation12_spill] sm:$0xff] }
 0x1da   : > { %7416 = vmatmul.msk.bf16.gmra.mxu2 %vm866_vm2, %v1844_v7  ;;  %7434 = vmatmul.msk.bf16.gmra.mxu3 %vm866_vm2, %v2248_v26 }
 0x1db   : > { %7398 = vmatmul.msk.bf16.gmra.mxu1 %vm866_vm2, %v1842_v57  ;;  %v9844_v18 = vadd.f32 %v2359_v52, %v2170_v22  ;;  %v2250_v57 = vrot.slane %v9532_v31, 3 }
 0x1dc   : > { %v1700_v35 = vpop.f32.mrf.mxu0 }
 0x1dd   : > { %v1787_v21 = vadd.f32 %v1700_v35, %v9479_v24  ;;  %v2084_v6 = vpop.f32.mrf.mxu2  ;;  %v2362_v27 = vpop.f32.mrf.mxu3  ;;  %v2251_v11 = vor.u32 %v2250_v57, %v2249_v59  ;;  %v1592_v24 = vrot.slane %v9509_v20, 2 }
 0x1df   : > { %v2017_v53 = vadd.f32 %v1930_v0, %v1787_v21  ;;  %7380 = vmatmul.msk.bf16.gmra.mxu0 %vm866_vm2, %v1590_v8  ;;  %v1846_v0 = vsel %vm1821_vm5, %v1843_v55, %v1845_v33  ;;  %v2252_v14 = vsel %vm2205_vm6, %v2247_v25, %v2251_v11  ;;  %v1593_v48 = vor.u32 %v1592_v24, %v1591_v1  ;;  %v12284_v25 = vld [vmem:[#allocation23_spill] sm:$0xff] }
 0x1e0   : > { %v1932_v63 = vpop.f32.mrf.mxu1  ;;  %v12285_v8 = vld [vmem:[#allocation19_spill] sm:$0xff] }
 0x1e1   : > { %v2171_v49 = vadd.f32 %v2084_v6, %v2017_v53  ;;  %v1594_v60 = vsel %vm1547_vm7, %v1589_v16, %v1593_v48 }
 0x1e3   : > { %v9851_v47 = vadd.f32 %v2362_v27, %v2171_v49  ;;  %v12286_v27 = vld [vmem:[#allocation14_spill] sm:$0xff]  ;;  %v1595_v49 = vrot.slane %v9552_v19, 1 }
 0x1e4   : > { %v1702_v34 = vpop.f32.mrf.mxu0  ;;  %v1847_v53 = vrot.slane %v12286_v27, 2 }
 0x1e5   : > { %v1788_v61 = vadd.f32 %v1702_v34, %v12282_v58  ;;  %v2086_v2 = vpop.f32.mrf.mxu2  ;;  %v2364_v23 = vpop.f32.mrf.mxu3  ;;  %v12287_v34 = vld [vmem:[#allocation13_spill] sm:$0xff] }
 0x1e7   : > { %v2018_v37 = vadd.f32 %v1932_v63, %v1788_v61  ;;  %v2254_v63 = vrot.slane %v12285_v8, 3  ;;  %v1848_v61 = vsel %vm1821_vm5, %v1845_v33, %v1847_v53 }
 0x1e8   : > { %v1935_v38 = vpop.f32.mrf.mxu1 }
 0x1e9   : > { %v2172_v17 = vadd.f32 %v2086_v2, %v2018_v37 }
 0x1ea   : > { %7417 = vmatmul.msk.bf16.gmra.mxu2 %vm866_vm2, %v1846_v0  ;;  %7435 = vmatmul.msk.bf16.gmra.mxu3 %vm866_vm2, %v2252_v14 }
 0x1eb   : > { %7399 = vmatmul.msk.bf16.gmra.mxu1 %vm866_vm2, %v1844_v7  ;;  %v9862_v32 = vadd.f32 %v2364_v23, %v2172_v17  ;;  %v2253_v7 = vrot.slane %v12284_v25, 2  ;;  %v1597_v23 = vor.u32 %v1596_v56, %v1595_v49  ;;  %v1600_v49 = vrot.slane %v12285_v8, 2  ;;  %v12292_v56 = vld [vmem:[#allocation16_spill] sm:$0xff] }
 0x1ec   : > { %v1705_v20 = vpop.f32.mrf.mxu0 }
 0x1ed   : > { %v1789_v26 = vadd.f32 %v1705_v20, %v12283_v3  ;;  %v2089_v22 = vpop.f32.mrf.mxu2  ;;  %v2367_v55 = vpop.f32.mrf.mxu3  ;;  %v2255_v59 = vor.u32 %v2254_v63, %v2253_v7  ;;  %v1598_v14 = vsel %vm1547_vm7, %v1593_v48, %v1597_v23  ;;  %v12288_v20 = vld [vmem:[#allocation15_spill] sm:$0xff]  ;;  %v12291_v7 = vld [vmem:[#allocation17_spill] sm:$0xff] }
 0x1ee   : > { %v1849_v63 = vrot.slane %v12291_v7, 2 }
 0x1ef   : > { %v2019_v35 = vadd.f32 %v1935_v38, %v1789_v26  ;;  %7381 = vmatmul.msk.bf16.gmra.mxu0 %vm866_vm2, %v1594_v60  ;;  %v2256_v2 = vsel %vm2205_vm6, %v2251_v11, %v2255_v59  ;;  %v12289_v11 = vld [vmem:[#allocation27_spill] sm:$0xff]  ;;  %v12290_v26 = vld [vmem:[#allocation24_spill] sm:$0xff] }
 0x1f0   : > { %v1937_v52 = vpop.f32.mrf.mxu1 }
 0x1f1   : > { %v2173_v21 = vadd.f32 %v2089_v22, %v2019_v35  ;;  %v2258_v22 = vrot.slane %v12290_v26, 3 }
 0x1f3   : > { %v9869_v6 = vadd.f32 %v2367_v55, %v2173_v21 }
 0x1f4   : > { %v1707_v57 = vpop.f32.mrf.mxu0 }
 0x1f5   : > { %v1790_v38 = vadd.f32 %v1707_v57, %v12287_v34  ;;  %v2091_v1 = vpop.f32.mrf.mxu2  ;;  %v2369_v24 = vpop.f32.mrf.mxu3  ;;  %v1599_v57 = vrot.slane %v12284_v25, 1 }
 0x1f7   : > { %v2020_v58 = vadd.f32 %v1937_v52, %v1790_v38 }
 0x1f8   : > { %v1940_v16 = vpop.f32.mrf.mxu1 }
 0x1f9   : > { %v2174_v37 = vadd.f32 %v2091_v1, %v2020_v58 }
 0x1fa   : > { %7418 = vmatmul.msk.bf16.gmra.mxu2 %vm866_vm2, %v1848_v61  ;;  %7436 = vmatmul.msk.bf16.gmra.mxu3 %vm866_vm2, %v2256_v2  ;;  %v1601_v2 = vor.u32 %v1600_v49, %v1599_v57  ;;  %v1603_v49 = vrot.slane %v12289_v11, 1 }
 0x1fb   : > { %7400 = vmatmul.msk.bf16.gmra.mxu1 %vm866_vm2, %v1846_v0  ;;  %v9880_v19 = vadd.f32 %v2369_v24, %v2174_v37  ;;  %v2257_v0 = vrot.slane %v12289_v11, 2  ;;  %v1850_v24 = vsel %vm1821_vm5, %v1847_v53, %v1849_v63 }
 0x1fc   : > { %v1710_v31 = vpop.f32.mrf.mxu0 }
 0x1fd   : > { %v1791_v60 = vadd.f32 %v1710_v31, %v12288_v20  ;;  %v2094_v52 = vpop.f32.mrf.mxu2  ;;  %v2372_v33 = vpop.f32.mrf.mxu3  ;;  %v2259_v21 = vor.u32 %v2258_v22, %v2257_v0  ;;  %v1602_v31 = vsel %vm1547_vm7, %v1597_v23, %v1601_v2  ;;  %v12293_v20 = vld [vmem:[#allocation18_spill] sm:$0xff] }
 0x1ff   : > { %v2021_v3 = vadd.f32 %v1940_v16, %v1791_v60  ;;  %7382 = vmatmul.msk.bf16.gmra.mxu0 %vm866_vm2, %v1598_v14  ;;  %v2260_v58 = vsel %vm2205_vm6, %v2255_v59, %v2259_v21  ;;  %v12294_v59 = vld [vmem:[#allocation32_spill] sm:$0xff] }
 0x200   : > { %v1942_v17 = vpop.f32.mrf.mxu1 }
 0x201   : > { %v2175_v55 = vadd.f32 %v2094_v52, %v2021_v3 }
 0x203   : > { %v9887_v35 = vadd.f32 %v2372_v33, %v2175_v55  ;;  %v12295_v33 = vld [vmem:[#allocation28_spill] sm:$0xff]  ;;  %v12296_v55 = vld [vmem:[#allocation21_spill] sm:$0xff] }
 0x204   : > { %v1712_v27 = vpop.f32.mrf.mxu0  ;;  %v2262_v3 = vrot.slane %v12295_v33, 3  ;;  %v1851_v7 = vrot.slane %v12296_v55, 2  ;;  %v1853_v55 = vrot.slane %v9592_v9, 2 }
 0x205   : > { %v1792_v16 = vadd.f32 %v1712_v27, %v12292_v56  ;;  %v2096_v34 = vpop.f32.mrf.mxu2  ;;  %v2374_v38 = vpop.f32.mrf.mxu3  ;;  %v1604_v56 = vrot.slane %v12290_v26, 2 }
 0x207   : > { %v2022_v1 = vadd.f32 %v1942_v17, %v1792_v16  ;;  %v12297_v16 = vld [vmem:[#allocation20_spill] sm:$0xff] }
 0x208   : > { %v1945_v48 = vpop.f32.mrf.mxu1 }
 0x209   : > { %v2176_v37 = vadd.f32 %v2096_v34, %v2022_v1 }
 0x20a   : > { %7419 = vmatmul.msk.bf16.gmra.mxu2 %vm866_vm2, %v1850_v24  ;;  %7437 = vmatmul.msk.bf16.gmra.mxu3 %vm866_vm2, %v2260_v58  ;;  %v1852_v58 = vsel %vm1821_vm5, %v1849_v63, %v1851_v7 }
 0x20b   : > { %7401 = vmatmul.msk.bf16.gmra.mxu1 %vm866_vm2, %v1848_v61  ;;  %v9898_v25 = vadd.f32 %v2374_v38, %v2176_v37  ;;  %v2261_v61 = vrot.slane %v12294_v59, 2 }
 0x20c   : > { %v1715_v8 = vpop.f32.mrf.mxu0 }
 0x20d   : > { %v1793_v17 = vadd.f32 %v1715_v8, %v12293_v20  ;;  %v2099_v60 = vpop.f32.mrf.mxu2  ;;  %v2377_v53 = vpop.f32.mrf.mxu3  ;;  %v2263_v27 = vor.u32 %v2262_v3, %v2261_v61  ;;  %v1605_v8 = vor.u32 %v1604_v56, %v1603_v49  ;;  %v1607_v56 = vrot.slane %v12294_v59, 1 }
 0x20f   : > { %v2023_v52 = vadd.f32 %v1945_v48, %v1793_v17  ;;  %7383 = vmatmul.msk.bf16.gmra.mxu0 %vm866_vm2, %v1602_v31  ;;  %v2264_v37 = vsel %vm2205_vm6, %v2259_v21, %v2263_v27  ;;  %v1606_v20 = vsel %vm1547_vm7, %v1601_v2, %v1605_v8  ;;  %v2265_v21 = vrot.slane %v9670_v40, 2 }
 0x210   : > { %v1947_v14 = vpop.f32.mrf.mxu1 }
 0x211   : > { %v2177_v0 = vadd.f32 %v2099_v60, %v2023_v52  ;;  %v12298_v60 = vld [vmem:[#allocation22_spill] sm:$0xff] }
 0x213   : > { %v9905_v22 = vadd.f32 %v2377_v53, %v2177_v0 }
 0x214   : > { %v1717_v57 = vpop.f32.mrf.mxu0 }
 0x215   : > { %v1794_v48 = vadd.f32 %v1717_v57, %v12297_v16  ;;  %v2101_v34 = vpop.f32.mrf.mxu2  ;;  %v2379_v38 = vpop.f32.mrf.mxu3  ;;  %v1608_v16 = vrot.slane %v12295_v33, 2  ;;  %v12301_v33 = vld [vmem:[#allocation30_spill] sm:$0xff] }
 0x217   : > { %v2024_v1 = vadd.f32 %v1947_v14, %v1794_v48  ;;  %v1609_v9 = vor.u32 %v1608_v16, %v1607_v56  ;;  %v1611_v56 = vrot.slane %v9670_v40, 1 }
 0x218   : > { %v1950_v23 = vpop.f32.mrf.mxu1 }
 0x219   : > { %v2178_v31 = vadd.f32 %v2101_v34, %v2024_v1 }
 0x21a   : > { %7420 = vmatmul.msk.bf16.gmra.mxu2 %vm866_vm2, %v1852_v58  ;;  %7438 = vmatmul.msk.bf16.gmra.mxu3 %vm866_vm2, %v2264_v37  ;;  %v1854_v37 = vsel %vm1821_vm5, %v1851_v7, %v1853_v55 }
 0x21b   : > { %7402 = vmatmul.msk.bf16.gmra.mxu1 %vm866_vm2, %v1850_v24  ;;  %v9916_v11 = vadd.f32 %v2379_v38, %v2178_v31  ;;  %v12299_v24 = vld [vmem:[#allocation33_spill] sm:$0xff] }
 0x21c   : > { %v1720_v26 = vpop.f32.mrf.mxu0  ;;  %v2266_v61 = vrot.slane %v12299_v24, 3  ;;  %v1612_v16 = vrot.slane %v12299_v24, 2 }
 0x21d   : > { %v1795_v14 = vadd.f32 %v1720_v26, %v12298_v60  ;;  %v2104_v53 = vpop.f32.mrf.mxu2  ;;  %v2382_v63 = vpop.f32.mrf.mxu3  ;;  %v1619_v60 = vshll.u32 %v12301_v33, 16 }
 0x21e   : > { %v2267_v57 = vor.u32 %v2266_v61, %v2265_v21  ;;  %v9952_v61 = vrot.slane %v12301_v33, 2 }
 0x21f   : > { %v2025_v52 = vadd.f32 %v1950_v23, %v1795_v14  ;;  %7384 = vmatmul.msk.bf16.gmra.mxu0 %vm866_vm2, %v1606_v20  ;;  %v12300_v23 = vld [vmem:[#allocation25_spill] sm:$0xff]  ;;  %v1616_v20 = vshrl.u32 %v12301_v33, 16  ;;  %v2270_v21 = vrot.slane %v1619_v60, 3  ;;  %v9970_v33 = vld [vmem:[%s9281_s29 + $0x98] sm:$0xff]  }
 0x220   : > { %v1952_v17 = vpop.f32.mrf.mxu1  ;;  %v2268_v31 = vsel %vm2205_vm6, %v2263_v27, %v2267_v57  ;;  %v12302_v27 = vld [vmem:[#allocation26_spill] sm:$0xff]  ;;  %12306 = vst [vmem:[#allocation12_spill] sm:$0xff] %v9970_v33  ;;  %v2274_v40 = vshrl.u32 %v9970_v33, 16  ;;  %v2277_v24 = vshll.u32 %v9970_v33, 16 }
 0x221   : > { %v2179_v3 = vadd.f32 %v2104_v53, %v2025_v52  ;;  %v2269_v52 = vrot.slane %v1616_v20, 2 }
 0x223   : > { %v9923_v0 = vadd.f32 %v2382_v63, %v2179_v3  ;;  %v2271_v3 = vor.u32 %v2270_v21, %v2269_v52  ;;  %v7222_v21 = vld [vmem:[%s12250_s26 + $0x10] sm:$0x3] }
 0x224   : > { %v1722_v49 = vpop.f32.mrf.mxu0 }
 0x225   : > { %v1796_v48 = vadd.f32 %v1722_v49, %v12300_v23  ;;  %v2106_v34 = vpop.f32.mrf.mxu2  ;;  %v2384_v38 = vpop.f32.mrf.mxu3  ;;  %v12304_v23 = vld [vmem:[#allocation29_spill] sm:$0xff] }
 0x227   : > { %v2026_v1 = vadd.f32 %v1952_v17, %v1796_v48  ;;  %v1610_v17 = vsel %vm1547_vm7, %v1605_v8, %v1609_v9 }
 0x228   : > { %v9926_v2 = vpop.f32.mrf.mxu1 }
 0x229   : > { %v2180_v26 = vadd.f32 %v2106_v34, %v2026_v1  ;;  %v1856_v1 = vsel %vm1821_vm5, %v1853_v55, %v9952_v61 }
 0x22a   : > { %7421 = vmatmul.msk.bf16.gmra.mxu2 %vm866_vm2, %v1854_v37  ;;  %7439 = vmatmul.msk.bf16.gmra.mxu3 %vm866_vm2, %v2268_v31  ;;  %v2272_v31 = vsel %vm2205_vm6, %v2267_v57, %v2271_v3  ;;  %v12308_v57 = vld [vmem:[#allocation31_spill] sm:$0xff] }
 0x22b   : > { %7403 = vmatmul.msk.bf16.gmra.mxu1 %vm866_vm2, %v1852_v58  ;;  %v9936_v59 = vadd.f32 %v2384_v38, %v2180_v26  ;;  %v1613_v26 = vor.u32 %v1612_v16, %v1611_v56  ;;  %v2276_v56 = vrot.slane %v2274_v40, 2  ;;  %v2279_v16 = vrot.slane %v2277_v24, 3 }
 0x22c   : > { %v1725_v14 = vpop.f32.mrf.mxu0 }
 0x22d   : > { %v9944_v53 = vadd.f32 %v1725_v14, %v12302_v27  ;;  %v9946_v58 = vpop.f32.mrf.mxu2  ;;  %v9948_v63 = vpop.f32.mrf.mxu3 }
 0x22f   : > { %7385 = vmatmul.msk.bf16.gmra.mxu0 %vm866_vm2, %v1610_v17  ;;  %v1614_v17 = vsel %vm1547_vm7, %v1609_v9, %v1613_v26  ;;  %v614_v9 = vld [vmem:[%s9281_s29 + $0xa0] sm:$0x3] }
 0x230   : > { %v9941_v7 = vpop.f32.mrf.mxu1 }
 0x234   : > { %v1727_v49 = vpop.f32.mrf.mxu0 }
 0x235   : > { %v9959_v48 = vadd.f32 %v1727_v49, %v12304_v23  ;;  %v9961_v34 = vpop.f32.mrf.mxu2  ;;  %v9963_v38 = vpop.f32.mrf.mxu3  ;;  %v2576_v49 = vand.u32 %v7222_v21, %v9265_v4  ;;  %v2057_v23 = vrot.slane %v9970_v33, 2 }
 0x236   : > { %12305 = vst [vmem:[#allocation10_spill] sm:$0xff] %v9963_v38 }
 0x237   : > { %2585 = vmatpush.bf16.msra.mxu0 %v2576_v49  ;;  %v2058_v40 = vsel %vm1821_vm5, %v9952_v61, %v2057_v23 }
 0x238   : > { %v9954_v8 = vpop.f32.mrf.mxu1 }
 0x239   : > { %12303 = vst [vmem:[#allocation11_spill] sm:$0xff] %v9954_v8  ;;  %v12312_v8 = vld [vmem:[#allocation34_spill] sm:$0xff] }
 0x23a   : > { %7422 = vmatmul.msk.bf16.gmra.mxu2 %vm866_vm2, %v1856_v1  ;;  %7440 = vmatmul.msk.bf16.gmra.mxu3 %vm866_vm2, %v2272_v31  ;;  %v2280_v31 = vor.u32 %v2279_v16, %v2276_v56 }
 0x23b   : > { %7404 = vmatmul.msk.bf16.gmra.mxu1 %vm866_vm2, %v1854_v37 }
 0x23c   : > { %v1730_v14 = vpop.f32.mrf.mxu0  ;;  %v2281_v24 = vsel %vm2205_vm6, %v2271_v3, %v2280_v31 }
 0x23d   : > { %v9980_v27 = vadd.f32 %v1730_v14, %v12308_v57  ;;  %v9982_v37 = vpop.f32.mrf.mxu2  ;;  %v9984_v52 = vpop.f32.mrf.mxu3  ;;  %v2054_v14 = vunpack.c.l.b16 %v614_v9 }
 0x23e   : > { %12310 = vst [vmem:[#allocation14_spill] sm:$0xff] %v9982_v37  ;;  %v1621_v37 = vrot.slane %v1619_v60, 2 }
 0x23f   : > { %12309 = vst [vmem:[#allocation19_spill] sm:$0xff] %v9980_v27  ;;  %7386 = vmatmul.msk.bf16.gmra.mxu0 %vm866_vm2, %v1614_v17  ;;  %v10006_v17 = vpack.c.b16 %v2054_v14, %v2054_v14 }
 0x240   : > { %v9977_v55 = vpop.f32.mrf.mxu1  ;;  %12311 = vst [vmem:[#allocation13_spill] sm:$0xff] %v9984_v52  ;;  %v1618_v52 = vrot.slane %v1616_v20, 1  ;;  %v8983_v20 = vunpack.c.l.b16 %v9970_v33 }
 0x241   : > { %12307 = vst [vmem:[#allocation23_spill] sm:$0xff] %v9977_v55  ;;  %v2283_v60 = vshrl.u32 %v10006_v17, 16 }
 0x242   : > { %12313 = vst [vmem:[#allocation15_spill] sm:$0xff] %v10006_v17  ;;  %v1622_v49 = vor.u32 %v1621_v37, %v1618_v52  ;;  %v1546_v52 = vpack.c.b16 %v8983_v20, %v8983_v20 }
 0x243   : > { %v2285_v14 = vrot.slane %v2283_v60, 2 }
 0x244   : > { %v1732_v57 = vpop.f32.mrf.mxu0  ;;  %v1623_v16 = vsel %vm1547_vm7, %v1613_v26, %v1622_v49 }
 0x245   : > { %v9996_v27 = vadd.f32 %v1732_v57, %v12312_v8  ;;  %v9998_v38 = vpop.f32.mrf.mxu2  ;;  %v10000_v21 = vpop.f32.mrf.mxu3  ;;  %v2286_v8 = vshll.u32 %v10006_v17, 16 }
 0x247   : > { %v2288_v57 = vrot.slane %v2286_v8, 3 }
 0x248   : > { %v9993_v55 = vpop.f32.mrf.mxu1 }
 0x249   : > { %v2289_v4 = vor.u32 %v2288_v57, %v2285_v14 }
 0x24a   : > { %7423 = vmatmul.msk.bf16.gmra.mxu2 %vm866_vm2, %v2058_v40  ;;  %7441 = vmatmul.msk.bf16.gmra.mxu3 %vm866_vm2, %v2281_v24  ;;  %v1857_v40 = vrot.slane %v1546_v52, 2  ;;  %v2059_v24 = vrot.slane %v10006_v17, 2 }
 0x24b   : > { %7405 = vmatmul.msk.bf16.gmra.mxu1 %vm866_vm2, %v1856_v1  ;;  %v2290_v8 = vsel %vm2205_vm6, %v2280_v31, %v2289_v4 }
 0x24c   : > { %v1735_v56 = vpop.f32.mrf.mxu0  ;;  %v2060_v60 = vsel %vm1821_vm5, %v2057_v23, %v2059_v24 }
 0x24d   : > { %v10017_v3 = vadd.f32 %v1735_v56, %v9667_v15  ;;  %v10019_v1 = vpop.f32.mrf.mxu2  ;;  %v10021_v37 = vpop.f32.mrf.mxu3  ;;  %v1858_v15 = vsel %vm1821_vm5, %v9952_v61, %v1857_v40 }
 0x24e   : > { %12315 = vst [vmem:[#allocation24_spill] sm:$0xff] %v10021_v37 }
 0x24f   : > { %7387 = vmatmul.msk.bf16.gmra.mxu0 %vm866_vm2, %v1623_v16 }
 0x250   : > { %v10014_v9 = vpop.f32.mrf.mxu1 }
 0x251   : > { %12314 = vst [vmem:[#allocation27_spill] sm:$0xff] %v10014_v9  ;;  %v1625_v9 = vshll.u32 %v1546_v52, 16  ;;  %v12317_v52 = vld [vmem:[#allocation35_spill] sm:$0xff] }
 0x253   : > { %v1627_v16 = vrot.slane %v1625_v9, 2 }
 0x254   : > { %v1737_v33 = vpop.f32.mrf.mxu0 }
 0x255   : > { %v10030_v56 = vadd.f32 %v1737_v33, %v9674_v41  ;;  %v10032_v37 = vpop.f32.mrf.mxu2  ;;  %v10034_v20 = vpop.f32.mrf.mxu3  ;;  %v1628_v41 = vsel %vm1547_vm7, %v1622_v49, %v1627_v16  ;;  %v9031_v49 = vld [vmem:[%s9281_s29 + $0x10] sm:$0xff] }
 0x258   : > { %v10025_v26 = vpop.f32.mrf.mxu1 }
 0x25a   : > { %7424 = vmatmul.msk.bf16.gmra.mxu2 %vm866_vm2, %v2060_v60  ;;  %7442 = vmatmul.msk.bf16.gmra.mxu3 %vm866_vm2, %v2290_v8  ;;  %v9032_v60 = vld [vmem:[%s9281_s29 + $0x18] sm:$0xff] }
 0x25b   : > { %7406 = vmatmul.msk.bf16.gmra.mxu1 %vm866_vm2, %v1858_v15  ;;  %v2484_v15 = vrot.slane %v9031_v49, 3  ;;  %v2485_v8 = vrot.slane %v9032_v60, 3 }
 0x25c   : > { %v1740_v61 = vpop.f32.mrf.mxu0 }
 0x25d   : > { %v10045_v14 = vadd.f32 %v1740_v61, %v12317_v52  ;;  %v10047_v23 = vpop.f32.mrf.mxu2  ;;  %v10049_v4 = vpop.f32.mrf.mxu3  ;;  %v2486_v61 = vsel %vm2483_vm8, %v2484_v15, %v2485_v8 }
 0x25e   : > { %12318 = vst [vmem:[#allocation16_spill] sm:$0xff] %v10049_v4 }
 0x25f   : > { %7388 = vmatmul.msk.bf16.gmra.mxu0 %vm866_vm2, %v1628_v41 }
 0x260   : > { %v10042_v33 = vpop.f32.mrf.mxu1 }
 0x261   : > { %12316 = vst [vmem:[#allocation17_spill] sm:$0xff] %v10042_v33 }
 0x264   : > { %v1742_v31 = vpop.f32.mrf.mxu0 }
 0x265   : > { %v10053_v57 = vadd.f32 %v1742_v31, %v9696_v51  ;;  %v10055_v40 = vpop.f32.mrf.mxu2  ;;  %v10057_v24 = vpop.f32.mrf.mxu3 }
 0x266   : > { %12320 = vst [vmem:[#allocation32_spill] sm:$0xff] %v10055_v40 }
 0x267   : > { %12319 = vst [vmem:[#allocation18_spill] sm:$0xff] %v10053_v57 }
 0x268   : > { %v1975_v9 = vpop.f32.mrf.mxu1  ;;  %12321 = vst [vmem:[#allocation28_spill] sm:$0xff] %v10057_v24 }
 0x26c   : > { %v1745_v16 = vpop.f32.mrf.mxu0 }
 0x26d   : > { %v1805_v41 = vadd.f32 %v1745_v16, %v9704_v5  ;;  %v2129_v33 = vpop.f32.mrf.mxu2  ;;  %v2407_v51 = vpop.f32.mrf.mxu3 }
 0x26f   : > { %v2035_v31 = vadd.f32 %v1975_v9, %v1805_v41  ;;  %7443 = vmatmul.msk.bf16.vlgmr.msra.gmra.mxu0 %vm866_vm2, %v2486_v61 }
 0x270   : > { %v10062_v52 = vpop.f32.mrf.mxu1 }
 0x271   : > { %12322 = vst [vmem:[#allocation21_spill] sm:$0xff] %v10062_v52  ;;  %v2189_v40 = vadd.f32 %v2129_v33, %v2035_v31  ;;  %v9033_v52 = vld [vmem:[%s9281_s29 + $0x20] sm:$0xff] }
 0x272   : > { %v2487_v17 = vrot.slane %v9033_v52, 3 }
 0x273   : > { %v10066_v24 = vadd.f32 %v2407_v51, %v2189_v40 }
 0x274   : > { %v1747_v49 = vpop.f32.mrf.mxu0  ;;  %v2488_v9 = vsel %vm2483_vm8, %v2485_v8, %v2487_v17 }
 0x275   : > { %v10069_v60 = vadd.f32 %v1747_v49, %v9712_v62  ;;  %v10071_v4 = vpop.f32.mrf.mxu2  ;;  %v10073_v15 = vpop.f32.mrf.mxu3 }
 0x276   : > { %12323 = vst [vmem:[#allocation20_spill] sm:$0xff] %v10071_v4 }
 0x277   : > { %12324 = vst [vmem:[#allocation22_spill] sm:$0xff] %v10073_v15 }
 0x278   : > { %v1980_v57 = vpop.f32.mrf.mxu1 }
 0x27c   : > { %v1750_v5 = vpop.f32.mrf.mxu0 }
 0x27d   : > { %v1807_v16 = vadd.f32 %v1750_v5, %v9720_v13  ;;  %v2134_v33 = vpop.f32.mrf.mxu2  ;;  %v2412_v40 = vpop.f32.mrf.mxu3  ;;  %v9034_v13 = vld [vmem:[%s9281_s29 + $0x28] sm:$0xff] }
 0x27e   : > { %v2489_v5 = vrot.slane %v9034_v13, 3 }
 0x27f   : > { %v2037_v41 = vadd.f32 %v1980_v57, %v1807_v16  ;;  %7444 = vmatmul.msk.bf16.gmra.mxu0 %vm866_vm2, %v2488_v9 }
 0x280   : > { %v10078_v61 = vpop.f32.mrf.mxu1  ;;  %v2490_v57 = vsel %vm2483_vm8, %v2487_v17, %v2489_v5 }
 0x281   : > { %v2191_v62 = vadd.f32 %v2134_v33, %v2037_v41 }
 0x283   : > { %v10081_v51 = vadd.f32 %v2412_v40, %v2191_v62 }
 0x284   : > { %v1752_v31 = vpop.f32.mrf.mxu0 }
 0x285   : > { %v10084_v49 = vadd.f32 %v1752_v31, %v9728_v39  ;;  %v10086_v52 = vpop.f32.mrf.mxu2  ;;  %v10088_v15 = vpop.f32.mrf.mxu3 }
 0x286   : > { %12325 = vst [vmem:[#allocation33_spill] sm:$0xff] %v10086_v52 }
 0x287   : > { %12326 = vst [vmem:[#allocation25_spill] sm:$0xff] %v10088_v15 }
 0x288   : > { %v1985_v8 = vpop.f32.mrf.mxu1 }
 0x28c   : > { %v1755_v4 = vpop.f32.mrf.mxu0 }
 0x28d   : > { %v1809_v9 = vadd.f32 %v1755_v4, %v9736_v29  ;;  %v2139_v16 = vpop.f32.mrf.mxu2  ;;  %v2417_v33 = vpop.f32.mrf.mxu3  ;;  %v9035_v29 = vld [vmem:[%s9281_s29 + $0x30] sm:$0xff] }
 0x28e   : > { %v2491_v4 = vrot.slane %v9035_v29, 3  ;;  %v9036_v29 = vld [vmem:[%s9281_s29 + $0x38] sm:$0xff] }
 0x28f   : > { %v2039_v40 = vadd.f32 %v1985_v8, %v1809_v9  ;;  %7445 = vmatmul.msk.bf16.gmra.mxu0 %vm866_vm2, %v2490_v57 }
 0x290   : > { %v10094_v41 = vpop.f32.mrf.mxu1  ;;  %v2492_v57 = vsel %vm2483_vm8, %v2489_v5, %v2491_v4 }
 0x291   : > { %v2193_v39 = vadd.f32 %v2139_v16, %v2039_v40 }
 0x293   : > { %v10096_v62 = vadd.f32 %v2417_v33, %v2193_v39 }
 0x294   : > { %v1757_v31 = vpop.f32.mrf.mxu0 }
 0x295   : > { %12327 = vst [vmem:[#allocation30_spill] sm:$0xff] %v10096_v62  ;;  %v10099_v15 = vadd.f32 %v1757_v31, %v9744_v45  ;;  %v10101_v13 = vpop.f32.mrf.mxu2  ;;  %v10103_v17 = vpop.f32.mrf.mxu3 }
 0x296   : > { %12328 = vst [vmem:[#allocation26_spill] sm:$0xff] %v10101_v13  ;;  %v2493_v13 = vrot.slane %v9036_v29, 3  ;;  %v9039_v29 = vld [vmem:[%s9281_s29 + $0x50] sm:$0xff] }
 0x297   : > { %12329 = vst [vmem:[#allocation29_spill] sm:$0xff] %v10103_v17 }
 0x298   : > { %v1990_v8 = vpop.f32.mrf.mxu1  ;;  %v2494_v5 = vsel %vm2483_vm8, %v2491_v4, %v2493_v13 }
 0x29c   : > { %v1760_v52 = vpop.f32.mrf.mxu0 }
 0x29d   : > { %v1811_v9 = vadd.f32 %v1760_v52, %v9752_v36  ;;  %v2144_v16 = vpop.f32.mrf.mxu2  ;;  %v2422_v45 = vpop.f32.mrf.mxu3 }
 0x29f   : > { %v2041_v33 = vadd.f32 %v1990_v8, %v1811_v9  ;;  %7446 = vmatmul.msk.bf16.gmra.mxu0 %vm866_vm2, %v2492_v57  ;;  %v9037_v57 = vld [vmem:[%s9281_s29 + $0x40] sm:$0xff] }
 0x2a0   : > { %v2495_v9 = vrot.slane %v9037_v57, 3 }
 0x2a1   : > { %v2195_v40 = vadd.f32 %v2144_v16, %v2041_v33 }
 0x2a2   : > { %v2496_v16 = vsel %vm2483_vm8, %v2493_v13, %v2495_v9 }
 0x2a3   : > { %v10109_v39 = vadd.f32 %v2422_v45, %v2195_v40 }
 0x2a4   : > { %v1762_v31 = vpop.f32.mrf.mxu0 }
 0x2a5   : > { %v10112_v17 = vadd.f32 %v1762_v31, %v9760_v50 }
 0x2ac   : > { %v1765_v62 = vpop.f32.mrf.mxu0 }
 0x2ad   : > { %v10117_v36 = vadd.f32 %v1765_v62, %v9768_v43  ;;  %v9038_v62 = vld [vmem:[%s9281_s29 + $0x48] sm:$0xff] }
 0x2ae   : > { %v2497_v45 = vrot.slane %v9038_v62, 3 }
 0x2af   : > { %7447 = vmatmul.msk.bf16.gmra.mxu0 %vm866_vm2, %v2494_v5  ;;  %v2499_v5 = vrot.slane %v9039_v29, 3  ;;  %v9041_v29 = vld [vmem:[%s9281_s29 + $0x60] sm:$0xff] }
 0x2b0   : > { %v2498_v40 = vsel %vm2483_vm8, %v2495_v9, %v2497_v45 }
 0x2b4   : > { %v1767_v52 = vpop.f32.mrf.mxu0 }
 0x2b5   : > { %v10121_v8 = vadd.f32 %v1767_v52, %v9776_v54 }
 0x2bc   : > { %v1770_v50 = vpop.f32.mrf.mxu0 }
 0x2bd   : > { %v10126_v33 = vadd.f32 %v1770_v50, %v9784_v12  ;;  %v9040_v50 = vld [vmem:[%s9281_s29 + $0x58] sm:$0xff] }
 0x2bf   : > { %7448 = vmatmul.msk.bf16.gmra.mxu0 %vm866_vm2, %v2496_v16  ;;  %v2501_v16 = vrot.slane %v9040_v50, 3 }
 0x2c4   : > { %v1772_v4 = vpop.f32.mrf.mxu0 }
 0x2c5   : > { %v10130_v43 = vadd.f32 %v1772_v4, %v9792_v10  ;;  %v2500_v10 = vsel %vm2483_vm8, %v2497_v45, %v2499_v5  ;;  %v10156_v45 = vld [vmem:[%s12335_s5] ss:$0 sm:$0xff] }
 0x2c7   : > { %12330 = vst [vmem:[#allocation31_spill] sm:$0xff] %v10130_v43 }
 0x2cc   : > { %v1775_v54 = vpop.f32.mrf.mxu0 }
 0x2cd   : > { %v10135_v31 = vadd.f32 %v1775_v54, %v9800_v46 }
 0x2cf   : > { %12331 = vst [vmem:[#allocation34_spill] sm:$0xff] %v10135_v31  ;;  %7449 = vmatmul.msk.bf16.gmra.mxu0 %vm866_vm2, %v2498_v40 }
 0x2d4   : > { %v1777_v13 = vpop.f32.mrf.mxu0 }
 0x2d5   : > { %v10139_v12 = vadd.f32 %v1777_v13, %v9808_v42  ;;  %v2502_v42 = vsel %vm2483_vm8, %v2499_v5, %v2501_v16 }
 0x2d7   : > { %12332 = vst [vmem:[#allocation35_spill] sm:$0xff] %v10139_v12 }
 0x2dc   : > { %v1780_v52 = vpop.f32.mrf.mxu0 }
 0x2dd   : > { %v10144_v57 = vadd.f32 %v1780_v52, %v9816_v28  ;;  %v2503_v52 = vrot.slane %v9041_v29, 3 }
 0x2df   : > { %12333 = vst [vmem:[#allocation36_spill] sm:$0xff] %v10144_v57  ;;  %7450 = vmatmul.msk.bf16.gmra.mxu0 %vm866_vm2, %v2500_v10  ;;  %v2504_v50 = vsel %vm2483_vm8, %v2501_v16, %v2503_v52  ;;  %v9042_v16 = vld [vmem:[%s9281_s29 + $0x68] sm:$0xff] }
 0x2e0   : > { %v2505_v12 = vrot.slane %v9042_v16, 3 }
 0x2e4   : > { %v1782_v9 = vpop.f32.mrf.mxu0 }
 0x2e5   : > { %v10148_v46 = vadd.f32 %v1782_v9, %v9824_v44 }
 0x2e7   : > { %12334 = vst [vmem:[#allocation37_spill] sm:$0xff] %v10148_v46 }
 0x2ec   : > { %v2587_v4 = vpop.f32.mrf.mxu0 }
 0x2ed   : > { %v2677_v62 = vadd.f32 %v2587_v4, %v9833_v30 }
 0x2ef   : > { %7451 = vmatmul.msk.bf16.gmra.mxu0 %vm866_vm2, %v2502_v42  ;;  %v2717_v28 = vadd.f32 %v10156_v45, %v2677_v62 }
 0x2f1   : > { %v2753_v40 = vmax.f32 %v2717_v28, 0.0 }
 0x2f3   : > { %v2894_v10 = vrot.slane %v2753_v40, 1 }
 0x2f4   : > { %v2589_v54 = vpop.f32.mrf.mxu0 }
 0x2f5   : > { %v2678_v44 = vadd.f32 %v2589_v54, %v9844_v18 }
 0x2f7   : > { %v2718_v13 = vadd.f32 %v10156_v45, %v2678_v44 }
 0x2f9   : > { %v2754_v5 = vmax.f32 %v2718_v13, 0.0 }
 0x2fb   : > { %v2895_v30 = vrot.slane %v2754_v5, 1 }
 0x2fc   : > { %v2592_v9 = vpop.f32.mrf.mxu0 }
 0x2fd   : > { %v2679_v4 = vadd.f32 %v2592_v9, %v9851_v47  ;;  %v2896_v42 = vsel %vm1165_vm3, %v2894_v10, %v2895_v30  ;;  %v2506_v9 = vsel %vm2483_vm8, %v2503_v52, %v2505_v12  ;;  %v9043_v52 = vld [vmem:[%s9281_s29 + $0x70] sm:$0xff] }
 0x2fe   : > { %v2995_v62 = vmax.f32 %v2753_v40, %v2896_v42  ;;  %v2507_v16 = vrot.slane %v9043_v52, 3 }
 0x2ff   : > { %v2719_v46 = vadd.f32 %v10156_v45, %v2679_v4  ;;  %7452 = vmatmul.msk.bf16.gmra.mxu0 %vm866_vm2, %v2504_v50 }
 0x301   : > { %v2755_v18 = vmax.f32 %v2719_v46, 0.0 }
 0x303   : > { %v2897_v28 = vrot.slane %v2755_v18, 1 }
 0x304   : > { %v2594_v54 = vpop.f32.mrf.mxu0 }
 0x305   : > { %v2680_v44 = vadd.f32 %v2594_v54, %v9862_v32  ;;  %v2898_v13 = vsel %vm1165_vm3, %v2895_v30, %v2897_v28 }
 0x306   : > { %v2996_v29 = vmax.f32 %v2754_v5, %v2898_v13 }
 0x307   : > { %v2720_v57 = vadd.f32 %v10156_v45, %v2680_v44 }
 0x309   : > { %v2756_v47 = vmax.f32 %v2720_v57, 0.0 }
 0x30b   : > { %v2899_v10 = vrot.slane %v2756_v47, 1 }
 0x30c   : > { %v2597_v40 = vpop.f32.mrf.mxu0 }
 0x30d   : > { %v2681_v50 = vadd.f32 %v2597_v40, %v9869_v6  ;;  %v2900_v46 = vsel %vm1165_vm3, %v2897_v28, %v2899_v10 }
 0x30e   : > { %v2997_v4 = vmax.f32 %v2755_v18, %v2900_v46 }
 0x30f   : > { %v2721_v32 = vadd.f32 %v10156_v45, %v2681_v50  ;;  %7453 = vmatmul.msk.bf16.gmra.mxu0 %vm866_vm2, %v2506_v9 }
 0x310   : > { %v3152_v6 = vrot.slane %v2997_v4, 2 }
 0x311   : > { %v2757_v5 = vmax.f32 %v2721_v32, 0.0  ;;  %v2508_v32 = vsel %vm2483_vm8, %v2505_v12, %v2507_v16 }
 0x313   : > { %v2901_v30 = vrot.slane %v2757_v5, 1 }
 0x314   : > { %v2599_v42 = vpop.f32.mrf.mxu0 }
 0x315   : > { %v2682_v54 = vadd.f32 %v2599_v42, %v9880_v19  ;;  %v2902_v57 = vsel %vm1165_vm3, %v2899_v10, %v2901_v30 }
 0x316   : > { %v2998_v44 = vmax.f32 %v2756_v47, %v2902_v57 }
 0x317   : > { %v2722_v13 = vadd.f32 %v10156_v45, %v2682_v54 }
 0x318   : > { %v3153_v40 = vrot.slane %v2998_v44, 2 }
 0x319   : > { %v2758_v28 = vmax.f32 %v2722_v13, 0.0 }
 0x31a   : > { %v3154_v18 = vsel %vm1821_vm5, %v3152_v6, %v3153_v40 }
 0x31b   : > { %v2903_v50 = vrot.slane %v2758_v28, 1  ;;  %v3253_v46 = vmax.f32 %v2995_v62, %v3154_v18 }
 0x31c   : > { %v2602_v9 = vpop.f32.mrf.mxu0 }
 0x31d   : > { %v2683_v31 = vadd.f32 %v2602_v9, %v9887_v35  ;;  %v2904_v19 = vsel %vm1165_vm3, %v2901_v30, %v2903_v50 }
 0x31e   : > { %v10185_v47 = vmax.f32 %v2757_v5, %v2904_v19 }
 0x31f   : > { %v2723_v10 = vadd.f32 %v10156_v45, %v2683_v31  ;;  %7454 = vmatmul.msk.bf16.gmra.mxu0 %vm866_vm2, %v2508_v32  ;;  %v9044_v31 = vld [vmem:[%s9281_s29 + $0x78] sm:$0xff] }
 0x320   : > { %v3155_v42 = vrot.slane %v10185_v47, 2  ;;  %v2509_v18 = vrot.slane %v9044_v31, 3 }
 0x321   : > { %v2759_v54 = vmax.f32 %v2723_v10, 0.0 }
 0x322   : > { %v3156_v57 = vsel %vm1821_vm5, %v3153_v40, %v3155_v42 }
 0x323   : > { %v2905_v62 = vrot.slane %v2759_v54, 1  ;;  %v3254_v13 = vmax.f32 %v2996_v29, %v3156_v57  ;;  %v2510_v29 = vsel %vm2483_vm8, %v2507_v16, %v2509_v18 }
 0x324   : > { %v2604_v52 = vpop.f32.mrf.mxu0 }
 0x325   : > { %v2684_v12 = vadd.f32 %v2604_v52, %v9898_v25  ;;  %v2906_v35 = vsel %vm1165_vm3, %v2903_v50, %v2905_v62  ;;  %v10193_v6 = vpack.c.bf16 %v3254_v13, %v3253_v46 }
 0x326   : > { %v3000_v5 = vmax.f32 %v2758_v28, %v2906_v35  ;;  %v9045_v35 = vld [vmem:[%s9281_s29 + $0x80] sm:$0xff] }
 0x327   : > { %v2724_v30 = vadd.f32 %v10156_v45, %v2684_v12 }
 0x328   : > { %v3157_v9 = vrot.slane %v3000_v5, 2 }
 0x329   : > { %v2760_v32 = vmax.f32 %v2724_v30, 0.0  ;;  %v2511_v30 = vrot.slane %v9045_v35, 3  ;;  %v9046_v35 = vld [vmem:[%s9281_s29 + $0x88] sm:$0xff] }
 0x32a   : > { %v3158_v19 = vsel %vm1821_vm5, %v3155_v42, %v3157_v9 }
 0x32b   : > { %v2907_v10 = vrot.slane %v2760_v32, 1  ;;  %v3255_v40 = vmax.f32 %v2997_v4, %v3158_v19 }
 0x32c   : > { %v2607_v43 = vpop.f32.mrf.mxu0 }
 0x32d   : > { %v2685_v25 = vadd.f32 %v2607_v43, %v9905_v22  ;;  %v2908_v50 = vsel %vm1165_vm3, %v2905_v62, %v2907_v10 }
 0x32e   : > { %v10201_v46 = vmax.f32 %v2759_v54, %v2908_v50  ;;  %v2512_v50 = vsel %vm2483_vm8, %v2509_v18, %v2511_v30 }
 0x32f   : > { %v2725_v28 = vadd.f32 %v10156_v45, %v2685_v25  ;;  %7455 = vmatmul.msk.bf16.gmra.mxu0 %vm866_vm2, %v2510_v29 }
 0x330   : > { %v3159_v57 = vrot.slane %v10201_v46, 2 }
 0x331   : > { %v2761_v13 = vmax.f32 %v2725_v28, 0.0 }
 0x332   : > { %v3160_v42 = vsel %vm1821_vm5, %v3157_v9, %v3159_v57 }
 0x333   : > { %v2909_v4 = vrot.slane %v2761_v13, 1  ;;  %v3256_v52 = vmax.f32 %v2998_v44, %v3160_v42 }
 0x334   : > { %v2609_v12 = vpop.f32.mrf.mxu0 }
 0x335   : > { %v2686_v16 = vadd.f32 %v2609_v12, %v9916_v11  ;;  %v2910_v22 = vsel %vm1165_vm3, %v2907_v10, %v2909_v4  ;;  %v10209_v43 = vpack.c.bf16 %v3256_v52, %v3255_v40 }
 0x336   : > { %v3002_v54 = vmax.f32 %v2760_v32, %v2910_v22 }
 0x337   : > { %v2726_v62 = vadd.f32 %v10156_v45, %v2686_v16 }
 0x338   : > { %v3161_v31 = vrot.slane %v3002_v54, 2 }
 0x339   : > { %v2762_v19 = vmax.f32 %v2726_v62, 0.0 }
 0x33a   : > { %v3162_v29 = vsel %vm1821_vm5, %v3159_v57, %v3161_v31 }
 0x33b   : > { %v2911_v25 = vrot.slane %v2762_v19, 1  ;;  %v3257_v9 = vmax.f32 %v10185_v47, %v3162_v29  ;;  %v2027_v47 = vadd.f32 %v9926_v2, %v9944_v53  ;;  %v2513_v29 = vrot.slane %v9046_v35, 3 }
 0x33c   : > { %v2612_v44 = vpop.f32.mrf.mxu0 }
 0x33d   : > { %v2687_v11 = vadd.f32 %v2612_v44, %v9923_v0  ;;  %v2912_v10 = vsel %vm1165_vm3, %v2909_v4, %v2911_v25  ;;  %v2181_v22 = vadd.f32 %v9946_v58, %v2027_v47 }
 0x33e   : > { %v10218_v40 = vmax.f32 %v2761_v13, %v2912_v10 }
 0x33f   : > { %v2727_v32 = vadd.f32 %v10156_v45, %v2687_v11  ;;  %7456 = vmatmul.msk.bf16.gmra.mxu0 %vm866_vm2, %v2512_v50  ;;  %v2459_v53 = vadd.f32 %v9948_v63, %v2181_v22  ;;  %v12339_v22 = vld [vmem:[#allocation14_spill] sm:$0xff] }
 0x340   : > { %v3163_v28 = vrot.slane %v10218_v40, 2 }
 0x341   : > { %v2763_v57 = vmax.f32 %v2727_v32, 0.0 }
 0x342   : > { %v3164_v42 = vsel %vm1821_vm5, %v3161_v31, %v3163_v28 }
 0x343   : > { %v2913_v18 = vrot.slane %v2763_v57, 1  ;;  %v3258_v52 = vmax.f32 %v3000_v5, %v3164_v42  ;;  %v12338_v42 = vld [vmem:[#allocation11_spill] sm:$0xff] }
 0x344   : > { %v2614_v0 = vpop.f32.mrf.mxu0 }
 0x345   : > { %v2688_v4 = vadd.f32 %v2614_v0, %v9936_v59  ;;  %v2914_v13 = vsel %vm1165_vm3, %v2911_v25, %v2913_v18  ;;  %v10228_v12 = vpack.c.bf16 %v3258_v52, %v3257_v9  ;;  %v2028_v59 = vadd.f32 %v9941_v7, %v9959_v48 }
 0x346   : > { %v3004_v16 = vmax.f32 %v2762_v19, %v2914_v13  ;;  %v2514_v19 = vsel %vm2483_vm8, %v2511_v30, %v2513_v29  ;;  %v12337_v30 = vld [vmem:[#allocation19_spill] sm:$0xff] }
 0x347   : > { %v2728_v62 = vadd.f32 %v10156_v45, %v2688_v4  ;;  %v2182_v10 = vadd.f32 %v9961_v34, %v2028_v59  ;;  %v2029_v47 = vadd.f32 %v12338_v42, %v12337_v30 }
 0x348   : > { %v3165_v31 = vrot.slane %v3004_v16, 2 }
 0x349   : > { %v2764_v44 = vmax.f32 %v2728_v62, 0.0  ;;  %v2183_v62 = vadd.f32 %v12339_v22, %v2029_v47 }
 0x34a   : > { %v3166_v2 = vsel %vm1821_vm5, %v3163_v28, %v3165_v31 }
 0x34b   : > { %v2915_v5 = vrot.slane %v2764_v44, 1  ;;  %v3259_v25 = vmax.f32 %v10201_v46, %v3166_v2  ;;  %v12336_v46 = vld [vmem:[#allocation10_spill] sm:$0xff] }
 0x34c   : > { %v2617_v9 = vpop.f32.mrf.mxu0  ;;  %v2460_v28 = vadd.f32 %v12336_v46, %v2182_v10  ;;  %v9047_v2 = vld [vmem:[%s9281_s29 + $0x90] sm:$0xff]  ;;  %s9068_s29 = scalar_lea.hbm %s12203_s18, 2 }
 0x34d   : > { %v2689_v58 = vadd.f32 %v2617_v9, %v2459_v53  ;;  %v2916_v50 = vsel %vm1165_vm3, %v2913_v18, %v2915_v5  ;;  %p9070_p1 = scmp.lt.s32.totalorder %s9068_s29, %s9064_s21 }
 0x34e   : > { %v10240_v11 = vmax.f32 %v2763_v57, %v2916_v50 }
 0x34f   : > { %v2729_v32 = vadd.f32 %v10156_v45, %v2689_v58  ;;  %7457 = vmatmul.msk.bf16.gmra.mxu0 %vm866_vm2, %v2514_v19  ;;  %v12340_v19 = vld [vmem:[#allocation13_spill] sm:$0xff]  ;;  %p9071_p2 = por %p9070_p1, %p9069_p0 }
 0x350   : > { %v3167_v7 = vrot.slane %v10240_v11, 2  ;;  %v2461_v58 = vadd.f32 %v12340_v19, %v2183_v62  ;;  %v12342_v62 = vld [vmem:[#allocation12_spill] sm:$0xff] }
 0x351   : > { %v2765_v63 = vmax.f32 %v2729_v32, 0.0  ;;  %p9072_p3 = pnand %p9071_p2, %p9067_p13 }
 0x352   : > { %v3168_v48 = vsel %vm1821_vm5, %v3165_v31, %v3167_v7  ;;  %v2515_v31 = vrot.slane %v9047_v2, 3 }
 0x353   : > { %v2917_v18 = vrot.slane %v2765_v63, 1  ;;  %v3260_v57 = vmax.f32 %v3002_v54, %v3168_v48  ;;  %v12341_v54 = vld [vmem:[#allocation23_spill] sm:$0xff] }
 0x354   : > { %v2619_v52 = vpop.f32.mrf.mxu0  ;;  %v2030_v50 = vadd.f32 %v12341_v54, %v9996_v27 }
 0x355   : > { %v2690_v0 = vadd.f32 %v2619_v52, %v2460_v28  ;;  %v2918_v34 = vsel %vm1165_vm3, %v2915_v5, %v2917_v18  ;;  %v10251_v4 = vpack.c.bf16 %v3260_v57, %v3259_v25 }
 0x356   : > { %v3006_v13 = vmax.f32 %v2764_v44, %v2918_v34  ;;  %v2516_v44 = vsel %vm2483_vm8, %v2513_v29, %v2515_v31  ;;  %v2184_v28 = vadd.f32 %v9998_v38, %v2030_v50  ;;  %v2031_v29 = vadd.f32 %v9993_v55, %v10017_v3  ;;  %v12343_v55 = vld [vmem:[#allocation24_spill] sm:$0xff] }
 0x357   : > { %v2730_v35 = vadd.f32 %v10156_v45, %v2690_v0 }
 0x358   : > { %v3169_v53 = vrot.slane %v3006_v13, 2  ;;  %v2185_v34 = vadd.f32 %v10019_v1, %v2031_v29 }
 0x359   : > { %v2766_v59 = vmax.f32 %v2730_v35, 0.0  ;;  %v2517_v35 = vrot.slane %v12342_v62, 3 }
 0x35a   : > { %v3170_v9 = vsel %vm1821_vm5, %v3167_v7, %v3169_v53  ;;  %v2463_v3 = vadd.f32 %v12343_v55, %v2185_v34 }
 0x35b   : > { %v2919_v10 = vrot.slane %v2766_v59, 1  ;;  %v3261_v5 = vmax.f32 %v10218_v40, %v3170_v9  ;;  %v2462_v40 = vadd.f32 %v10000_v21, %v2184_v28 }
 0x35c   : > { %v2622_v25 = vpop.f32.mrf.mxu0 }
 0x35d   : > { %v2691_v32 = vadd.f32 %v2622_v25, %v2461_v58  ;;  %v2920_v48 = vsel %vm1165_vm3, %v2917_v18, %v2919_v10 }
 0x35e   : > { %v10263_v46 = vmax.f32 %v2765_v63, %v2920_v48 }
 0x35f   : > { %v2731_v7 = vadd.f32 %v10156_v45, %v2691_v32  ;;  %7458 = vmatmul.msk.bf16.gmra.mxu0 %vm866_vm2, %v2516_v44 }
 0x360   : > { %v3171_v30 = vrot.slane %v10263_v46, 2 }
 0x361   : > { %v2767_v27 = vmax.f32 %v2731_v7, 0.0 }
 0x362   : > { %v3172_v42 = vsel %vm1821_vm5, %v3169_v53, %v3171_v30 }
 0x363   : > { %v2921_v47 = vrot.slane %v2767_v27, 1  ;;  %v3262_v18 = vmax.f32 %v3004_v16, %v3172_v42  ;;  %v12344_v16 = vld [vmem:[#allocation27_spill] sm:$0xff] }
 0x364   : > { %v2624_v63 = vpop.f32.mrf.mxu0  ;;  %v2032_v9 = vadd.f32 %v12344_v16, %v10030_v56 }
 0x365   : > { %v2692_v57 = vadd.f32 %v2624_v63, %v2462_v40  ;;  %v2922_v38 = vsel %vm1165_vm3, %v2919_v10, %v2921_v47  ;;  %v10274_v52 = vpack.c.bf16 %v3262_v18, %v3261_v5 }
 0x366   : > { %v3008_v0 = vmax.f32 %v2766_v59, %v2922_v38  ;;  %v2518_v59 = vsel %vm2483_vm8, %v2515_v31, %v2517_v35  ;;  %v2186_v5 = vadd.f32 %v10032_v37, %v2032_v9  ;;  %v2033_v31 = vadd.f32 %v10025_v26, %v10045_v14  ;;  %v12346_v26 = vld [vmem:[#allocation16_spill] sm:$0xff]  ;;  %v12348_v38 = vld [vmem:[#allocation17_spill] sm:$0xff] }
 0x367   : > { %v2732_v22 = vadd.f32 %v10156_v45, %v2692_v57 }
 0x368   : > { %v3173_v2 = vrot.slane %v3008_v0, 2  ;;  %v2187_v40 = vadd.f32 %v10047_v23, %v2033_v31 }
 0x369   : > { %v2768_v21 = vmax.f32 %v2732_v22, 0.0 }
 0x36a   : > { %v3174_v53 = vsel %vm1821_vm5, %v3171_v30, %v3173_v2  ;;  %v2465_v14 = vadd.f32 %v12346_v26, %v2187_v40 }
 0x36b   : > { %v2923_v19 = vrot.slane %v2768_v21, 1  ;;  %v3263_v58 = vmax.f32 %v10240_v11, %v3174_v53  ;;  %v2464_v11 = vadd.f32 %v10034_v20, %v2186_v5 }
 0x36c   : > { %v2627_v54 = vpop.f32.mrf.mxu0 }
 0x36d   : > { %v2924_v1 = vsel %vm1165_vm3, %v2921_v47, %v2923_v19  ;;  %v2693_v50 = vadd.f32 %v2627_v54, %v2463_v3  ;;  %v12345_v47 = vld [vmem:[#allocation15_spill] sm:$0xff]  ;;  %v12349_v3 = vld [vmem:[#allocation32_spill] sm:$0xff] }
 0x36e   : > { %v10286_v10 = vmax.f32 %v2767_v27, %v2924_v1  ;;  %v2519_v18 = vrot.slane %v12345_v47, 3 }
 0x36f   : > { %v2733_v25 = vadd.f32 %v10156_v45, %v2693_v50  ;;  %7459 = vmatmul.msk.bf16.gmra.mxu0 %vm866_vm2, %v2518_v59 }
 0x370   : > { %v3175_v44 = vrot.slane %v10286_v10, 2 }
 0x371   : > { %v2769_v56 = vmax.f32 %v2733_v25, 0.0 }
 0x372   : > { %v3176_v32 = vsel %vm1821_vm5, %v3173_v2, %v3175_v44 }
 0x373   : > { %v2925_v48 = vrot.slane %v2769_v56, 1  ;;  %v3264_v28 = vmax.f32 %v3006_v13, %v3176_v32  ;;  %v12347_v13 = vld [vmem:[#allocation18_spill] sm:$0xff] }
 0x374   : > { %v2629_v7 = vpop.f32.mrf.mxu0  ;;  %v2034_v34 = vadd.f32 %v12348_v38, %v12347_v13 }
 0x375   : > { %v2926_v30 = vsel %vm1165_vm3, %v2923_v19, %v2925_v48  ;;  %v2694_v37 = vadd.f32 %v2629_v7, %v2464_v11  ;;  %v10297_v27 = vpack.c.bf16 %v3264_v28, %v3263_v58  ;;  %v12351_v28 = vld [vmem:[#allocation21_spill] sm:$0xff] }
 0x376   : > { %v3010_v42 = vmax.f32 %v2768_v21, %v2926_v30  ;;  %v2520_v21 = vsel %vm2483_vm8, %v2517_v35, %v2519_v18  ;;  %v2188_v16 = vadd.f32 %v12349_v3, %v2034_v34  ;;  %v2036_v7 = vadd.f32 %v12351_v28, %v10069_v60  ;;  %v12352_v18 = vld [vmem:[#allocation20_spill] sm:$0xff]  ;;  %v12353_v60 = vld [vmem:[#allocation22_spill] sm:$0xff]  ;;  %v1992_v28 = vpop.f32.mrf.mxu1 }
 0x377   : > { %v2734_v29 = vadd.f32 %v10156_v45, %v2694_v37 }
 0x378   : > { %v3177_v63 = vrot.slane %v3010_v42, 2 }
 0x379   : > { %v2770_v20 = vmax.f32 %v2734_v29, 0.0 }
 0x37a   : > { %v3178_v57 = vsel %vm1821_vm5, %v3175_v44, %v3177_v63 }
 0x37b   : > { %v2927_v22 = vrot.slane %v2770_v20, 1  ;;  %v3265_v62 = vmax.f32 %v10263_v46, %v3178_v57  ;;  %v12350_v46 = vld [vmem:[#allocation28_spill] sm:$0xff] }
 0x37c   : > { %v2632_v2 = vpop.f32.mrf.mxu0  ;;  %v2466_v59 = vadd.f32 %v12350_v46, %v2188_v16  ;;  %v2038_v16 = vadd.f32 %v10078_v61, %v10084_v49 }
 0x37d   : > { %v2928_v23 = vsel %vm1165_vm3, %v2925_v48, %v2927_v22  ;;  %v2695_v53 = vadd.f32 %v2632_v2, %v2465_v14 }
 0x37e   : > { %v10309_v55 = vmax.f32 %v2769_v56, %v2928_v23 }
 0x37f   : > { %v2735_v9 = vadd.f32 %v10156_v45, %v2695_v53  ;;  %7460 = vmatmul.msk.bf16.gmra.mxu0 %vm866_vm2, %v2520_v21 }
 0x380   : > { %v3179_v19 = vrot.slane %v10309_v55, 2 }
 0x381   : > { %v2771_v58 = vmax.f32 %v2735_v9, 0.0 }
 0x382   : > { %v3180_v54 = vsel %vm1821_vm5, %v3177_v63, %v3179_v19  ;;  %v2190_v63 = vadd.f32 %v12352_v18, %v2036_v7  ;;  %v12356_v18 = vld [vmem:[#allocation30_spill] sm:$0xff] }
 0x383   : > { %v2929_v1 = vrot.slane %v2771_v58, 1  ;;  %v3266_v35 = vmax.f32 %v3008_v0, %v3180_v54 }
 0x384   : > { %v2634_v50 = vpop.f32.mrf.mxu0  ;;  %v2468_v13 = vadd.f32 %v12353_v60, %v2190_v63  ;;  %v1995_v60 = vpop.f32.mrf.mxu1 }
 0x385   : > { %v2930_v5 = vsel %vm1165_vm3, %v2927_v22, %v2929_v1  ;;  %v2696_v25 = vadd.f32 %v2634_v50, %v2466_v59  ;;  %v3293_v44 = vpack.c.bf16 %v3266_v35, %v3265_v62  ;;  %v12354_v59 = vld [vmem:[#allocation33_spill] sm:$0xff] }
 0x386   : > { %v3012_v56 = vmax.f32 %v2770_v20, %v2930_v5  ;;  %v12355_v5 = vld [vmem:[#allocation25_spill] sm:$0xff] }
 0x387   : > { %v2736_v32 = vadd.f32 %v10156_v45, %v2696_v25 }
 0x388   : > { %v3181_v11 = vrot.slane %v3012_v56, 2 }
 0x389   : > { %v2772_v31 = vmax.f32 %v2736_v32, 0.0 }
 0x38a   : > { %v3182_v48 = vsel %vm1821_vm5, %v3179_v19, %v3181_v11 }
 0x38b   : > { %v2931_v30 = vrot.slane %v2772_v31, 1  ;;  %v3267_v37 = vmax.f32 %v10286_v10, %v3182_v48 }
 0x38c   : > { %v2637_v40 = vpop.f32.mrf.mxu0 }
 0x38d   : > { %v2932_v0 = vsel %vm1165_vm3, %v2929_v1, %v2931_v30  ;;  %v2697_v29 = vadd.f32 %v2637_v40, %v10066_v24  ;;  %v2192_v1 = vadd.f32 %v12354_v59, %v2038_v16 }
 0x38e   : > { %v10325_v47 = vmax.f32 %v2771_v58, %v2932_v0  ;;  %v2146_v0 = vpop.f32.mrf.mxu2 }
 0x38f   : > { %v2737_v20 = vadd.f32 %v10156_v45, %v2697_v29 }
 0x390   : > { %v3183_v57 = vrot.slane %v10325_v47, 2 }
 0x391   : > { %v2773_v26 = vmax.f32 %v2737_v20, 0.0 }
 0x392   : > { %v3184_v14 = vsel %vm1821_vm5, %v3181_v11, %v3183_v57 }
 0x393   : > { %v2933_v38 = vrot.slane %v2773_v26, 1  ;;  %v3268_v10 = vmax.f32 %v3010_v42, %v3184_v14 }
 0x394   : > { %v2639_v34 = vpop.f32.mrf.mxu0 }
 0x395   : > { %v2698_v22 = vadd.f32 %v2639_v34, %v2468_v13  ;;  %v3294_v62 = vpack.c.bf16 %v3268_v10, %v3267_v37  ;;  %v2934_v24 = vsel %vm1165_vm3, %v2931_v30, %v2933_v38  ;;  %v12358_v13 = vld [vmem:[#allocation29_spill] sm:$0xff] }
 0x396   : > { %v3014_v2 = vmax.f32 %v2772_v31, %v2934_v24 }
 0x397   : > { %v2738_v21 = vadd.f32 %v10156_v45, %v2698_v22  ;;  %3458 = vmatpush.bf16.msra.mxu1 %v3294_v62 }
 0x398   : > { %v3185_v23 = vrot.slane %v3014_v2, 2 }
 0x399   : > { %v2774_v53 = vmax.f32 %v2738_v21, 0.0 }
 0x39a   : > { %v3186_v3 = vsel %vm1821_vm5, %v3183_v57, %v3185_v23  ;;  %v12357_v57 = vld [vmem:[#allocation26_spill] sm:$0xff] }
 0x39b   : > { %v2935_v9 = vrot.slane %v2774_v53, 1  ;;  %3459 = vmatpush.bf16.msra.mxu1 %v3293_v44  ;;  %v3269_v42 = vmax.f32 %v10309_v55, %v3186_v3  ;;  %v2470_v55 = vadd.f32 %v12355_v5, %v2192_v1 }
 0x39c   : > { %v2642_v19 = vpop.f32.mrf.mxu0 }
 0x39d   : > { %v2699_v58 = vadd.f32 %v2642_v19, %v10081_v51  ;;  %v2936_v54 = vsel %vm1165_vm3, %v2933_v38, %v2935_v9  ;;  %v2042_v19 = vadd.f32 %v1992_v28, %v10112_v17 }
 0x39e   : > { %v10340_v46 = vmax.f32 %v2773_v26, %v2936_v54 }
 0x39f   : > { %v2739_v35 = vadd.f32 %v10156_v45, %v2699_v58  ;;  %3460 = vmatpush.bf16.msra.mxu1 %v10297_v27 }
 0x3a0   : > { %v3187_v50 = vrot.slane %v10340_v46, 2 }
 0x3a1   : > { %v2775_v61 = vmax.f32 %v2739_v35, 0.0 }
 0x3a2   : > { %v3188_v49 = vsel %vm1821_vm5, %v3185_v23, %v3187_v50 }
 0x3a3   : > { %v2937_v25 = vrot.slane %v2775_v61, 1  ;;  %3461 = vmatpush.bf16.msra.mxu1 %v10274_v52  ;;  %v3270_v51 = vmax.f32 %v3012_v56, %v3188_v49  ;;  %v2040_v52 = vadd.f32 %v10094_v41, %v10099_v15  ;;  %v2424_v15 = vpop.f32.mrf.mxu3 }
 0x3a4   : > { %v2644_v44 = vpop.f32.mrf.mxu0 }
 0x3a5   : > { %v2700_v32 = vadd.f32 %v2644_v44, %v2470_v55  ;;  %v2938_v11 = vsel %vm1165_vm3, %v2935_v9, %v2937_v25  ;;  %v10350_v31 = vpack.c.bf16 %v3270_v51, %v3269_v42  ;;  %v2194_v26 = vadd.f32 %v12357_v57, %v2040_v52 }
 0x3a6   : > { %v3016_v48 = vmax.f32 %v2774_v53, %v2938_v11 }
 0x3a7   : > { %v2740_v27 = vadd.f32 %v10156_v45, %v2700_v32  ;;  %3462 = vmatpush.bf16.msra.mxu1 %v10251_v4  ;;  %v2472_v38 = vadd.f32 %v12358_v13, %v2194_v26 }
 0x3a8   : > { %v3189_v7 = vrot.slane %v3016_v48, 2 }
 0x3a9   : > { %v2776_v30 = vmax.f32 %v2740_v27, 0.0 }
 0x3aa   : > { %v3190_v37 = vsel %vm1821_vm5, %v3187_v50, %v3189_v7  ;;  %v2196_v50 = vadd.f32 %v2146_v0, %v2042_v19 }
 0x3ab   : > { %v2939_v56 = vrot.slane %v2776_v30, 1  ;;  %3463 = vmatpush.bf16.msra.mxu1 %v10228_v12  ;;  %v3271_v40 = vmax.f32 %v10325_v47, %v3190_v37  ;;  %v2427_v9 = vpop.f32.mrf.mxu3 }
 0x3ac   : > { %v2647_v29 = vpop.f32.mrf.mxu0 }
 0x3ad   : > { %v2701_v63 = vadd.f32 %v2647_v29, %v12356_v18  ;;  %v2940_v20 = vsel %vm1165_vm3, %v2937_v25, %v2939_v56  ;;  %v2474_v25 = vadd.f32 %v2424_v15, %v2196_v50 }
 0x3ae   : > { %v10361_v4 = vmax.f32 %v2775_v61, %v2940_v20 }
 0x3af   : > { %v2741_v14 = vadd.f32 %v10156_v45, %v2701_v63  ;;  %3464 = vmatpush.bf16.msra.mxu1 %v10209_v43  ;;  %v2149_v43 = vpop.f32.mrf.mxu2 }
 0x3b0   : > { %v3191_v41 = vrot.slane %v10361_v4, 2 }
 0x3b1   : > { %v2777_v12 = vmax.f32 %v2741_v14, 0.0 }
 0x3b2   : > { %v3192_v47 = vsel %vm1821_vm5, %v3189_v7, %v3191_v41 }
 0x3b3   : > { %v2941_v10 = vrot.slane %v2777_v12, 1  ;;  %3465 = vmatpush.bf16.msra.mxu1 %v10193_v6  ;;  %v3272_v34 = vmax.f32 %v3014_v2, %v3192_v47  ;;  %v1997_v2 = vpop.f32.mrf.mxu1  ;;  %v2429_v32 = vpop.f32.mrf.mxu3 }
 0x3b4   : > { %v2649_v22 = vpop.f32.mrf.mxu0  ;;  %v2044_v29 = vadd.f32 %v1997_v2, %v10121_v8  ;;  %v12359_v2 = vld [vmem:[#allocation31_spill] sm:$0xff] }
 0x3b5   : > { %v2702_v62 = vadd.f32 %v2649_v22, %v2472_v38  ;;  %v2942_v24 = vsel %vm1165_vm3, %v2939_v56, %v2941_v10  ;;  %v10371_v21 = vpack.c.bf16 %v3272_v34, %v3271_v40 }
 0x3b6   : > { %v3018_v23 = vmax.f32 %v2776_v30, %v2942_v24 }
 0x3b7   : > { %v2742_v53 = vadd.f32 %v10156_v45, %v2702_v62  ;;  %v2151_v49 = vpop.f32.mrf.mxu2 }
 0x3b8   : > { %v3193_v3 = vrot.slane %v3018_v23, 2 }
 0x3b9   : > { %v2778_v16 = vmax.f32 %v2742_v53, 0.0 }
 0x3ba   : > { %v3194_v42 = vsel %vm1821_vm5, %v3191_v41, %v3193_v3  ;;  %v2198_v41 = vadd.f32 %v2151_v49, %v2044_v29 }
 0x3bb   : > { %v2943_v58 = vrot.slane %v2778_v16, 1  ;;  %v3273_v6 = vmax.f32 %v10340_v46, %v3194_v42  ;;  %v2043_v46 = vadd.f32 %v1995_v60, %v10117_v36  ;;  %v2000_v7 = vpop.f32.mrf.mxu1  ;;  %v2432_v14 = vpop.f32.mrf.mxu3 }
 0x3bc   : > { %v2652_v54 = vpop.f32.mrf.mxu0  ;;  %v2476_v8 = vadd.f32 %v2429_v32, %v2198_v41 }
 0x3bd   : > { %v2703_v59 = vadd.f32 %v2652_v54, %v10109_v39  ;;  %v2944_v1 = vsel %vm1165_vm3, %v2941_v10, %v2943_v58  ;;  %v2197_v37 = vadd.f32 %v2149_v43, %v2043_v46  ;;  %v2045_v10 = vadd.f32 %v2000_v7, %v10126_v33 }
 0x3be   : > { %v10379_v35 = vmax.f32 %v2777_v12, %v2944_v1 }
 0x3bf   : > { %v2743_v61 = vadd.f32 %v10156_v45, %v2703_v59  ;;  %v2154_v0 = vpop.f32.mrf.mxu2 }
 0x3c0   : > { %v3195_v5 = vrot.slane %v10379_v35, 2 }
 0x3c1   : > { %v2779_v55 = vmax.f32 %v2743_v61, 0.0 }
 0x3c2   : > { %v3196_v17 = vsel %vm1821_vm5, %v3193_v3, %v3195_v5 }
 0x3c3   : > { %v2945_v51 = vrot.slane %v2779_v55, 1  ;;  %v3274_v44 = vmax.f32 %v3016_v48, %v3196_v17  ;;  %v2475_v48 = vadd.f32 %v2427_v9, %v2197_v37  ;;  %v2002_v60 = vpop.f32.mrf.mxu1  ;;  %v2434_v42 = vpop.f32.mrf.mxu3 }
 0x3c4   : > { %v2654_v39 = vpop.f32.mrf.mxu0  ;;  %v2046_v54 = vadd.f32 %v2002_v60, %v12359_v2 }
 0x3c5   : > { %v2704_v11 = vadd.f32 %v2654_v39, %v2474_v25  ;;  %v2946_v27 = vsel %vm1165_vm3, %v2943_v58, %v2945_v51  ;;  %v10386_v28 = vpack.c.bf16 %v3274_v44, %v3273_v6 }
 0x3c6   : > { %v10388_v30 = vmax.f32 %v2778_v16, %v2946_v27  ;;  %v2199_v16 = vadd.f32 %v2154_v0, %v2045_v10 }
 0x3c7   : > { %v2744_v52 = vadd.f32 %v10156_v45, %v2704_v11  ;;  %v2156_v22 = vpop.f32.mrf.mxu2  ;;  %v12360_v11 = vld [vmem:[#allocation34_spill] sm:$0xff] }
 0x3c8   : > { %v3197_v56 = vrot.slane %v10388_v30, 2  ;;  %v2200_v17 = vadd.f32 %v2156_v22, %v2046_v54 }
 0x3c9   : > { %v2780_v40 = vmax.f32 %v2744_v52, 0.0 }
 0x3ca   : > { %v3198_v36 = vsel %vm1821_vm5, %v3195_v5, %v3197_v56  ;;  %v2478_v39 = vadd.f32 %v2434_v42, %v2200_v17 }
 0x3cb   : > { %v2947_v18 = vrot.slane %v2780_v40, 1  ;;  %v3275_v63 = vmax.f32 %v10361_v4, %v3198_v36  ;;  %v2005_v6 = vpop.f32.mrf.mxu1  ;;  %v2437_v44 = vpop.f32.mrf.mxu3 }
 0x3cc   : > { %v2657_v20 = vpop.f32.mrf.mxu0  ;;  %v2047_v27 = vadd.f32 %v2005_v6, %v12360_v11 }
 0x3cd   : > { %v2705_v57 = vadd.f32 %v2657_v20, %v2475_v48  ;;  %v2948_v26 = vsel %vm1165_vm3, %v2945_v51, %v2947_v18 }
 0x3ce   : > { %v10396_v15 = vmax.f32 %v2779_v55, %v2948_v26 }
 0x3cf   : > { %v2745_v12 = vadd.f32 %v10156_v45, %v2705_v57  ;;  %v2159_v5 = vpop.f32.mrf.mxu2 }
 0x3d0   : > { %v3199_v47 = vrot.slane %v10396_v15, 2  ;;  %v2201_v48 = vadd.f32 %v2159_v5, %v2047_v27 }
 0x3d1   : > { %v2781_v13 = vmax.f32 %v2745_v12, 0.0 }
 0x3d2   : > { %v3200_v38 = vsel %vm1821_vm5, %v3197_v56, %v3199_v47  ;;  %v2479_v26 = vadd.f32 %v2437_v44, %v2201_v48 }
 0x3d3   : > { %v2949_v4 = vrot.slane %v2781_v13, 1  ;;  %v3276_v34 = vmax.f32 %v3018_v23, %v3200_v38  ;;  %v2477_v23 = vadd.f32 %v2432_v14, %v2199_v16  ;;  %v2007_v37 = vpop.f32.mrf.mxu1  ;;  %v12361_v14 = vld [vmem:[#allocation35_spill] sm:$0xff]  ;;  %v2439_v60 = vpop.f32.mrf.mxu3 }
 0x3d4   : > { %v2659_v62 = vpop.f32.mrf.mxu0  ;;  %v2048_v41 = vadd.f32 %v2007_v37, %v12361_v14 }
 0x3d5   : > { %v2706_v24 = vadd.f32 %v2659_v62, %v2476_v8  ;;  %v2950_v43 = vsel %vm1165_vm3, %v2947_v18, %v2949_v4  ;;  %v10403_v53 = vpack.c.bf16 %v3276_v34, %v3275_v63 }
 0x3d6   : > { %v10405_v3 = vmax.f32 %v2780_v40, %v2950_v43 }
 0x3d7   : > { %v2746_v9 = vadd.f32 %v10156_v45, %v2706_v24  ;;  %v2161_v18 = vpop.f32.mrf.mxu2 }
 0x3d8   : > { %v3201_v19 = vrot.slane %v10405_v3, 2 }
 0x3d9   : > { %v2782_v58 = vmax.f32 %v2746_v9, 0.0  ;;  %v12362_v9 = vld [vmem:[#allocation36_spill] sm:$0xff] }
 0x3da   : > { %v3202_v33 = vsel %vm1821_vm5, %v3199_v47, %v3201_v19 }
 0x3db   : > { %v2951_v59 = vrot.slane %v2782_v58, 1  ;;  %v3277_v1 = vmax.f32 %v10379_v35, %v3202_v33  ;;  %v2010_v8 = vpop.f32.mrf.mxu1  ;;  %v2442_v2 = vpop.f32.mrf.mxu3 }
 0x3dc   : > { %v2662_v50 = vpop.f32.mrf.mxu0 }
 0x3dd   : > { %v2707_v61 = vadd.f32 %v2662_v50, %v2477_v23  ;;  %v2952_v49 = vsel %vm1165_vm3, %v2949_v4, %v2951_v59  ;;  %v2202_v4 = vadd.f32 %v2161_v18, %v2048_v41 }
 0x3de   : > { %v10413_v55 = vmax.f32 %v2781_v13, %v2952_v49 }
 0x3df   : > { %v2747_v25 = vadd.f32 %v10156_v45, %v2707_v61  ;;  %v2164_v24 = vpop.f32.mrf.mxu2  ;;  %v2480_v16 = vadd.f32 %v2439_v60, %v2202_v4 }
 0x3e0   : > { %v3203_v46 = vrot.slane %v10413_v55, 2 }
 0x3e1   : > { %v2783_v51 = vmax.f32 %v2747_v25, 0.0  ;;  %v12363_v25 = vld [vmem:[#allocation37_spill] sm:$0xff] }
 0x3e2   : > { %v3204_v32 = vsel %vm1821_vm5, %v3201_v19, %v3203_v46 }
 0x3e3   : > { %v2953_v35 = vrot.slane %v2783_v51, 1  ;;  %v3278_v7 = vmax.f32 %v10388_v30, %v3204_v32  ;;  %v2012_v50 = vpop.f32.mrf.mxu1  ;;  %v2444_v37 = vpop.f32.mrf.mxu3 }
 0x3e4   : > { %v2664_v52 = vpop.f32.mrf.mxu0 }
 0x3e5   : > { %v2708_v56 = vadd.f32 %v2664_v52, %v2478_v39  ;;  %v2954_v40 = vsel %vm1165_vm3, %v2951_v59, %v2953_v35  ;;  %v10421_v0 = vpack.c.bf16 %v3278_v7, %v3277_v1 }
 0x3e6   : > { %v3024_v36 = vmax.f32 %v2782_v58, %v2954_v40 }
 0x3e7   : > { %v2748_v29 = vadd.f32 %v10156_v45, %v2708_v56  ;;  %v2166_v44 = vpop.f32.mrf.mxu2 }
 0x3e8   : > { %v3205_v63 = vrot.slane %v3024_v36, 2 }
 0x3e9   : > { %v2784_v20 = vmax.f32 %v2748_v29, 0.0 }
 0x3ea   : > { %v3206_v57 = vsel %vm1821_vm5, %v3203_v46, %v3205_v63  ;;  %v2050_v46 = vadd.f32 %v2012_v50, %v12363_v25  ;;  %v8725_v50 = vld [vmem:[%s12194_s9 + $0x20] sm:$0xf0] }
 0x3eb   : > { %v2955_v30 = vrot.slane %v2784_v20, 1  ;;  %v3279_v12 = vmax.f32 %v10396_v15, %v3206_v57  ;;  %v2049_v15 = vadd.f32 %v2010_v8, %v12362_v9  ;;  %v8721_v25 = vld [vmem:[%s12194_s9 + $0x4] sm:$0xf] }
 0x3ec   : > { %v2667_v47 = vpop.f32.mrf.mxu0 }
 0x3ed   : > { %v2956_v13 = vsel %vm1165_vm3, %v2953_v35, %v2955_v30  ;;  %v2709_v38 = vadd.f32 %v2667_v47, %v2479_v26  ;;  %v2203_v59 = vadd.f32 %v2164_v24, %v2049_v15  ;;  %v2204_v35 = vadd.f32 %v2166_v44, %v2050_v46  ;;  %v7499_v44 = vld [vmem:[%s12194_s9 + $0x48] sm:$0xf] }
 0x3ee   : > { %v10428_v10 = vmax.f32 %v2783_v51, %v2956_v13 }
 0x3ef   : > { %v2749_v34 = vadd.f32 %v10156_v45, %v2709_v38  ;;  %v2481_v17 = vadd.f32 %v2442_v2, %v2203_v59  ;;  %v2482_v48 = vadd.f32 %v2444_v37, %v2204_v35  ;;  %v8723_v2 = vld [vmem:[%s12194_s9 + $0x10] sm:$0xf0]  ;;  %v7507_v35 = vld [vmem:[%s12194_s9 + $0x50] sm:$0xf] }
 0x3f0   : > { %v3207_v22 = vrot.slane %v10428_v10, 2 }
 0x3f1   : > { %v2785_v62 = vmax.f32 %v2749_v34, 0.0 }
 0x3f2   : > { %v3208_v43 = vsel %vm1821_vm5, %v3205_v63, %v3207_v22 }
 0x3f3   : > { %v2957_v42 = vrot.slane %v2785_v62, 1  ;;  %v3280_v19 = vmax.f32 %v10405_v3, %v3208_v43  ;;  %v8722_v43 = vld [vmem:[%s12194_s9 + $0x8] sm:$0xf0] }
 0x3f4   : > { %v2669_v58 = vpop.f32.mrf.mxu0 }
 0x3f5   : > { %v2958_v6 = vsel %vm1165_vm3, %v2955_v30, %v2957_v42  ;;  %v2710_v33 = vadd.f32 %v2669_v58, %v2480_v16  ;;  %v10436_v23 = vpack.c.bf16 %v3280_v19, %v3279_v12 }
 0x3f6   : > { %v3026_v54 = vmax.f32 %v2784_v20, %v2958_v6 }
 0x3f7   : > { %v2750_v1 = vadd.f32 %v10156_v45, %v2710_v33  ;;  %v7471_v33 = vld [vmem:[%s12194_s9 + $0x8] sm:$0xf] }
 0x3f8   : > { %v3209_v61 = vrot.slane %v3026_v54, 2 }
 0x3f9   : > { %v2786_v49 = vmax.f32 %v2750_v1, 0.0  ;;  %v7472_v1 = vor.u32 %v8723_v2, %v7471_v33 }
 0x3fa   : > { %v3210_v5 = vsel %vm1821_vm5, %v3207_v22, %v3209_v61 }
 0x3fb   : > { %v2959_v3 = vrot.slane %v2786_v49, 1  ;;  %v3281_v51 = vmax.f32 %v10413_v55, %v3210_v5  ;;  %v8726_v5 = vld [vmem:[%s12194_s9 + $0x28] sm:$0xf0] }
 0x3fc   : > { %v2672_v32 = vpop.f32.mrf.mxu0 }
 0x3fd   : > { %v2960_v39 = vsel %vm1165_vm3, %v2957_v42, %v2959_v3  ;;  %v2711_v11 = vadd.f32 %v2672_v32, %v2481_v17  ;;  %v8724_v32 = vld [vmem:[%s12194_s9 + $0x1c] sm:$0xf] }
 0x3fe   : > { %v3027_v27 = vmax.f32 %v2785_v62, %v2960_v39  ;;  %v12364_v62 = vmov 65535   ;;  %v7477_v39 = vld [vmem:[%s12194_s9 + $0x24] sm:$0xf0] }
 0x3ff   : > { %v2751_v7 = vadd.f32 %v10156_v45, %v2711_v11  ;;  %v3453_v24 = vsel %vm2483_vm8, 4294967295, %v12364_v62 }
 0x400   : > { %v3211_v52 = vrot.slane %v3027_v27, 2  ;;  %v3454_v19 = vsel %vm1821_vm5, %v3453_v24, 0  ;;  %v3328_v24 = vld [vmem:[%s12194_s9 + $0x90] sm:$0x33] }
 0x401   : > { %v2787_v56 = vmax.f32 %v2751_v7, 0.0  ;;  %v8732_v7 = vld [vmem:[%s12194_s9 + $0x58] sm:$0xf0] }
 0x402   : > { %v3212_v40 = vsel %vm1821_vm5, %v3209_v61, %v3211_v52  ;;  %v7508_v37 = vor.u32 %v8732_v7, %v7507_v35 }
 0x403   : > { %v3067_v29 = vrot.slane %v2787_v56, 1  ;;  %v3282_v18 = vmax.f32 %v3024_v36, %v3212_v40  ;;  %v3028_v36 = vmax.f32 %v2786_v49, %v2959_v3  ;;  %v8727_v40 = vld [vmem:[%s12194_s9 + $0x34] sm:$0xf] }
 0x404   : > { %v2674_v63 = vpop.f32.mrf.mxu0 }
 0x405   : > { %v3068_v55 = vsel %vm1165_vm3, %v2959_v3, %v3067_v29  ;;  %v2712_v20 = vadd.f32 %v2674_v63, %v2482_v48  ;;  %v3301_v57 = vpack.c.bf16 %v3282_v18, %v3281_v51  ;;  %v7495_v3 = vld [vmem:[%s12194_s9 + $0x38] sm:$0xf]  ;;  %v7489_v48 = vld [vmem:[%s12194_s9 + $0x3c] sm:$0xf0]  ;;  %v7519_v63 = vld [vmem:[%s12194_s9 + $0x68] sm:$0xf] }
 0x406   : > { %v3074_v26 = vmax.f32 %v2786_v49, %v3068_v55  ;;  %v7483_v49 = vld [vmem:[%s12194_s9 + $0x20] sm:$0xf]  ;;  %v7492_v18 = vor.u32 %v8727_v40, %v7489_v48  ;;  %v8735_v55 = vld [vmem:[%s12194_s9 + $0x70] sm:$0xf0] }
 0x407   : > { %v2752_v14 = vadd.f32 %v10156_v45, %v2712_v20  ;;  %v7463_v45 = vld [vmem:[%s12194_s9] sm:$0xf]  ;;  %v7484_v17 = vor.u32 %v8726_v5, %v7483_v49  ;;  %v7520_v20 = vor.u32 %v8735_v55, %v7519_v63  ;;  %v8740_v49 = vld [vmem:[%s12365_s24 + $0x8] sm:$0xff] }
 0x408   : > { %v3213_v41 = vrot.slane %v3074_v26, 2  ;;  %v7464_v9 = vor.u32 %v8722_v43, %v7463_v45  ;;  %v7501_v26 = vld [vmem:[%s12194_s9 + $0x54] sm:$0xf0]  ;;  %v3393_v45 = vunpack.c.h.b16 %v3328_v24  ;;  %3719 = vmatpush.bf16.msrb.mxu1 %v8740_v49 }
 0x409   : > { %v2788_v30 = vmax.f32 %v2752_v14, 0.0  ;;  %v3329_v43 = vld [vmem:[%s12194_s9 + $0x98] sm:$0x3] }
 0x40a   : > { %v3214_v12 = vsel %vm1821_vm5, %v3211_v52, %v3213_v41  ;;  %3466 = vmatmul.bf16.vlgmr.msra.gmra.mxu1 %v7464_v9  ;;  %v7511_v52 = vld [vmem:[%s12194_s9 + $0x60] sm:$0xf] }
 0x40b   : > { %v3069_v60 = vrot.slane %v2788_v30, 1  ;;  %v3283_v47 = vmax.f32 %v10428_v10, %v3214_v12  ;;  %v7523_v12 = vld [vmem:[%s12194_s9 + $0x78] sm:$0xf] }
 0x40d   : > { %v3070_v13 = vsel %vm1165_vm3, %v3067_v29, %v3069_v60  ;;  %v3076_v38 = vmax.f32 %v2788_v30, %v3069_v60  ;;  %v8738_v30 = vld [vmem:[%s12194_s9 + $0x88] sm:$0xf0]  ;;  %v8737_v60 = vld [vmem:[%s12194_s9 + $0x80] sm:$0xf0] }
 0x40e   : > { %v3075_v8 = vmax.f32 %v2787_v56, %v3070_v13  ;;  %v8734_v56 = vld [vmem:[%s12194_s9 + $0x68] sm:$0xf0] }
 0x40f   : > { %v3217_v4 = vrot.slane %v3076_v38, 2  ;;  %v7512_v29 = vor.u32 %v8734_v56, %v7511_v52  ;;  %v8733_v38 = vld [vmem:[%s12194_s9 + $0x64] sm:$0xf] }
 0x410   : > { %v3215_v34 = vrot.slane %v3075_v8, 2  ;;  %v7513_v8 = vld [vmem:[%s12194_s9 + $0x6c] sm:$0xf0] }
 0x411   : > { %v3286_v22 = vmax.f32 %v3028_v36, %v3217_v4  ;;  %v7516_v36 = vor.u32 %v8733_v38, %v7513_v8 }
 0x412   : > { %v3218_v10 = vsel %vm1821_vm5, %v3215_v34, %v3217_v4  ;;  %v3216_v16 = vsel %vm1821_vm5, %v3213_v41, %v3215_v34  ;;  %v7531_v41 = vld [vmem:[%s12194_s9 + $0x80] sm:$0xf]  ;;  %v8736_v4 = vld [vmem:[%s12194_s9 + $0x7c] sm:$0xf]  ;;  %v7525_v34 = vld [vmem:[%s12194_s9 + $0x84] sm:$0xf0] }
 0x413   : > { %v3284_v15 = vmax.f32 %v3026_v54, %v3216_v16  ;;  %v3285_v42 = vmax.f32 %v3027_v27, %v3218_v10  ;;  %v7475_v54 = vld [vmem:[%s12194_s9 + $0x18] sm:$0xf]  ;;  %v7480_v27 = vor.u32 %v8724_v32, %v7477_v39  ;;  %v7532_v13 = vor.u32 %v8738_v30, %v7531_v41 }
 0x414   : > { %v7476_v61 = vor.u32 %v8725_v50, %v7475_v54  ;;  %v3414_v10 = vpack.c.b16 %v3393_v45, %v3393_v45  ;;  %v3394_v16 = vunpack.c.l.b16 %v3329_v43  ;;  %v8741_v50 = vld [vmem:[%s12365_s24 + $0x10] sm:$0xff] }
 0x415   : > { %v3302_v58 = vpack.c.bf16 %v3284_v15, %v3283_v47  ;;  %v3303_v6 = vpack.c.bf16 %v3286_v22, %v3285_v42  ;;  %v7524_v47 = vor.u32 %v8737_v60, %v7523_v12  ;;  %v7528_v22 = vor.u32 %v8736_v4, %v7525_v34 }
 0x416   : > { %v3415_v9 = vpack.c.b16 %v3394_v16, %v3394_v16  ;;  %v3392_v15 = vunpack.c.l.b16 %v3328_v24 }
 0x417   : > { %3501 = vmatpush.bf16.msra.mxu2 %v3302_v58  ;;  %v3456_v59 = vand.u32 %v3454_v19, %v3303_v6  ;;  %v8739_v6 = vld [vmem:[%s12365_s24] sm:$0xff] }
 0x418   : > { %v3413_v42 = vpack.c.b16 %v3392_v15, %v3392_v15 }
 0x419   : > { %3551 = vmatpush.bf16.msra.mxu3 %v3456_v59 }
 0x41a   : > { %3471 = vmatmul.bf16.gmra.mxu1 %v7476_v61 }
 0x41b   : > { %3502 = vmatpush.bf16.msra.mxu2 %v3301_v57  ;;  %v8730_v57 = vld [vmem:[%s12194_s9 + $0x4c] sm:$0xf] }
 0x41c   : > { %7533 = vmatmul.msk.bf16.vlgmr.msra.gmra.mxu3 %vm3430_vm9, %v7472_v1  ;;  %v7504_v14 = vor.u32 %v8730_v57, %v7501_v26 }
 0x41d   : > { %3833 = vmatpush.bf16.msrb.mxu3 %v8741_v50 }
 0x41f   : > { %3503 = vmatpush.bf16.msra.mxu2 %v10436_v23  ;;  %v8728_v23 = vld [vmem:[%s12194_s9 + $0x38] sm:$0xf0] }
 0x423   : > { %3504 = vmatpush.bf16.msra.mxu2 %v10421_v0  ;;  %v7487_v0 = vld [vmem:[%s12194_s9 + $0x30] sm:$0xf] }
 0x427   : > { %3505 = vmatpush.bf16.msra.mxu2 %v10403_v53  ;;  %v7488_v53 = vor.u32 %v8728_v23, %v7487_v0 }
 0x42a   : > { %3476 = vmatmul.bf16.gmra.mxu1 %v7488_v53 }
 0x42b   : > { %3506 = vmatpush.bf16.msra.mxu2 %v10386_v28  ;;  %v7465_v28 = vld [vmem:[%s12194_s9 + $0xc] sm:$0xf0] }
 0x42c   : > { %7534 = vmatmul.msk.bf16.gmra.mxu3 %vm3430_vm9, %v7484_v17  ;;  %v7468_v46 = vor.u32 %v8721_v25, %v7465_v28 }
 0x42f   : > { %3507 = vmatpush.bf16.msra.mxu2 %v10371_v21  ;;  %v8729_v21 = vld [vmem:[%s12194_s9 + $0x40] sm:$0xf0] }
 0x430   : > { %v7496_v51 = vor.u32 %v8729_v21, %v7495_v3 }
 0x433   : > { %3508 = vmatpush.bf16.msra.mxu2 %v10350_v31  ;;  %v8731_v31 = vld [vmem:[%s12194_s9 + $0x50] sm:$0xf0] }
 0x434   : > { %v7500_v11 = vor.u32 %v8731_v31, %v7499_v44 }
 0x436   : > { %3509 = vmatmul.bf16.vlgmr.msra.gmra.mxu2 %v7468_v46 }
 0x437   : > { %3769 = vmatpush.bf16.msrb.mxu2 %v8739_v6 }
 0x43a   : > { %3481 = vmatmul.bf16.gmra.mxu1 %v7500_v11 }
 0x43c   : > { %7535 = vmatmul.msk.bf16.gmra.mxu3 %vm3430_vm9, %v7496_v51 }
 0x446   : > { %3514 = vmatmul.bf16.gmra.mxu2 %v7480_v27 }
 0x44a   : > { %3486 = vmatmul.bf16.gmra.mxu1 %v7512_v29 }
 0x44c   : > { %7536 = vmatmul.msk.bf16.gmra.mxu3 %vm3430_vm9, %v7508_v37 }
 0x456   : > { %3519 = vmatmul.bf16.gmra.mxu2 %v7492_v18 }
 0x45a   : > { %3491 = vmatmul.bf16.gmra.mxu1 %v7524_v47 }
 0x45c   : > { %7537 = vmatmul.msk.bf16.gmra.mxu3 %vm3430_vm9, %v7520_v20 }
 0x466   : > { %3524 = vmatmul.bf16.gmra.mxu2 %v7504_v14 }
 0x46a   : > { %3496 = vmatmul.bf16.gmra.mxu1 %v3413_v42 }
 0x46c   : > { %7538 = vmatmul.msk.bf16.gmra.mxu3 %vm3430_vm9, %v7532_v13 }
 0x476   : > { %3529 = vmatmul.bf16.gmra.mxu2 %v7516_v36 }
 0x47c   : > { %7539 = vmatmul.msk.bf16.gmra.mxu3 %vm3430_vm9, %v3415_v9 }
 0x486   : > { %3534 = vmatmul.bf16.gmra.mxu2 %v7528_v22 }
 0x487   : > { %v3467_v19 = vpop.f32.mrf.mxu1 }
 0x48f   : > { %v3469_v33 = vpop.f32.mrf.mxu1 }
 0x496   : > { %3539 = vmatmul.bf16.gmra.mxu2 %v3414_v10 }
 0x497   : > { %v3472_v59 = vpop.f32.mrf.mxu1 }
 0x49f   : > { %v3553_v58 = vpop.f32.mrf.mxu3  ;;  %v3474_v0 = vpop.f32.mrf.mxu1 }
 0x4a7   : > { %v3555_v2 = vpop.f32.mrf.mxu3  ;;  %v3477_v31 = vpop.f32.mrf.mxu1 }
 0x4af   : > { %v3558_v54 = vpop.f32.mrf.mxu3  ;;  %v3479_v52 = vpop.f32.mrf.mxu1 }
 0x4b7   : > { %v3560_v25 = vpop.f32.mrf.mxu3  ;;  %v3482_v8 = vpop.f32.mrf.mxu1 }
 0x4b9   : > { %v3510_v1 = vpop.f32.mrf.mxu2 }
 0x4ba   : > { %v3511_v61 = vadd.f32 %v3510_v1, %v3467_v19 }
 0x4bc   : > { %v3554_v5 = vadd.f32 %v3553_v58, %v3511_v61 }
 0x4be   : > { %v3587_v28 = vpack.c.bf16 %v3554_v5, %v3554_v5 }
 0x4bf   : > { %v3563_v39 = vpop.f32.mrf.mxu3  ;;  %v3484_v19 = vpop.f32.mrf.mxu1 }
 0x4c0   : > { %v3636_v3 = vunpack.c.l.b16 %v3587_v28 }
 0x4c1   : > { %v3512_v17 = vpop.f32.mrf.mxu2 }
 0x4c2   : > { %v3513_v23 = vadd.f32 %v3512_v17, %v3469_v33 }
 0x4c4   : > { %v3556_v53 = vadd.f32 %v3555_v2, %v3513_v23 }
 0x4c6   : > { %v3588_v46 = vpack.c.bf16 %v3556_v53, %v3556_v53 }
 0x4c7   : > { %v3565_v48 = vpop.f32.mrf.mxu3 }
 0x4c8   : > { %v10591_v21 = vunpack.c.l.b16 %v3588_v46 }
 0x4c9   : > { %v3515_v51 = vpop.f32.mrf.mxu2 }
 0x4ca   : > { %v3646_v44 = vpack.c.b16 %v10591_v21, %v3636_v3  ;;  %v3516_v32 = vadd.f32 %v3515_v51, %v3472_v59 }
 0x4cc   : > { %7569 = vmatmul.msk.bf16.vlgmr.msrb.gmra.mxu2 %vm3696_vm10, %v3646_v44  ;;  %v3559_v11 = vadd.f32 %v3558_v54, %v3516_v32  ;;  %v3654_v56 = vshll.u32 %v3646_v44, 16  ;;  %v3652_v57 = vshrl.u32 %v3646_v44, 16  ;;  %v3796_v26 = vrot.slane %v3646_v44, 1 }
 0x4ce   : > { %v3589_v7 = vpack.c.bf16 %v3559_v11, %v3559_v11  ;;  %v3656_v20 = vrot.slane %v3654_v56, 1 }
 0x4cf   : > { %v3568_v24 = vpop.f32.mrf.mxu3 }
 0x4d0   : > { %v10595_v29 = vunpack.c.l.b16 %v3589_v7  ;;  %v3657_v47 = vor.u32 %v3656_v20, %v3652_v57 }
 0x4d1   : > { %v3517_v27 = vpop.f32.mrf.mxu2 }
 0x4d2   : > { %v3518_v35 = vadd.f32 %v3517_v27, %v3474_v0 }
 0x4d4   : > { %v3561_v37 = vadd.f32 %v3560_v25, %v3518_v35 }
 0x4d6   : > { %v3590_v40 = vpack.c.bf16 %v3561_v37, %v3561_v37 }
 0x4d7   : > { %v3570_v33 = vpop.f32.mrf.mxu3 }
 0x4d8   : > { %v10597_v18 = vunpack.c.l.b16 %v3590_v40  ;;  %v8743_v40 = vld [vmem:[%s12365_s24 + $0x20] sm:$0xff] }
 0x4d9   : > { %v3520_v63 = vpop.f32.mrf.mxu2  ;;  %4031 = vmatpush.bf16.msra.mxu2 %v8743_v40 }
 0x4da   : > { %v3647_v55 = vpack.c.b16 %v10597_v18, %v10595_v29  ;;  %v3521_v14 = vadd.f32 %v3520_v63, %v3477_v31 }
 0x4dc   : > { %7570 = vmatmul.msk.bf16.gmra.mxu2 %vm3696_vm10, %v3647_v55  ;;  %v3797_v41 = vrot.slane %v3647_v55, 1  ;;  %v3659_v30 = vshll.u32 %v3647_v55, 16  ;;  %v3663_v12 = vshrl.u32 %v3647_v55, 16  ;;  %v3564_v4 = vadd.f32 %v3563_v39, %v3521_v14  ;;  %v3487_v39 = vpop.f32.mrf.mxu1 }
 0x4dd   : > { %v4322_v50 = vrot.slane %v3647_v55, 3  ;;  %v4148_v49 = vrot.slane %v3647_v55, 2 }
 0x4de   : > { %v3798_v60 = vsel %vm1165_vm3, %v3796_v26, %v3797_v41  ;;  %v3661_v13 = vrot.slane %v3659_v30, 1  ;;  %v4224_v38 = vrot.slane %v3663_v12, 2  ;;  %v4225_v36 = vrot.slane %v3659_v30, 3 }
 0x4df   : > { %7578 = vmatmul.msk.bf16.vlgmr.msrb.gmra.mxu3 %vm3696_vm10, %v3798_v60  ;;  %v3591_v10 = vpack.c.bf16 %v3564_v4, %v3564_v4  ;;  %v3573_v7 = vpop.f32.mrf.mxu3 }
 0x4e0   : > { %v3662_v34 = vsel %vm722_vm4, %v3657_v47, %v3661_v13  ;;  %v4226_v45 = vor.u32 %v4225_v36, %v4224_v38  ;;  %v3665_v0 = vor.u32 %v3663_v12, %v3661_v13 }
 0x4e1   : > { %v3522_v22 = vpop.f32.mrf.mxu2  ;;  %7560 = vmatmul.msk.bf16.vlgmr.msrb.gmra.mxu1 %vm3696_vm10, %v3662_v34  ;;  %v10606_v15 = vunpack.c.l.b16 %v3591_v10 }
 0x4e2   : > { %v3523_v43 = vadd.f32 %v3522_v22, %v3479_v52 }
 0x4e4   : > { %v3566_v16 = vadd.f32 %v3565_v48, %v3523_v43  ;;  %v3489_v14 = vpop.f32.mrf.mxu1 }
 0x4e6   : > { %v3592_v9 = vpack.c.bf16 %v3566_v16, %v3566_v16 }
 0x4e7   : > { %v3575_v38 = vpop.f32.mrf.mxu3 }
 0x4e8   : > { %v10608_v42 = vunpack.c.l.b16 %v3592_v9 }
 0x4e9   : > { %v3525_v58 = vpop.f32.mrf.mxu2 }
 0x4ea   : > { %v3648_v6 = vpack.c.b16 %v10608_v42, %v10606_v15  ;;  %v3526_v2 = vadd.f32 %v3525_v58, %v3482_v8 }
 0x4ec   : > { %7571 = vmatmul.msk.bf16.gmra.mxu2 %vm3696_vm10, %v3648_v6  ;;  %v3799_v59 = vrot.slane %v3648_v6, 1  ;;  %v3667_v1 = vshll.u32 %v3648_v6, 16  ;;  %v3671_v54 = vshrl.u32 %v3648_v6, 16  ;;  %v4323_v61 = vrot.slane %v3648_v6, 3 }
 0x4ed   : > { %v4149_v5 = vrot.slane %v3648_v6, 2  ;;  %v3569_v3 = vadd.f32 %v3568_v24, %v3526_v2 }
 0x4ee   : > { %v3800_v17 = vsel %vm1165_vm3, %v3797_v41, %v3799_v59  ;;  %v3669_v23 = vrot.slane %v3667_v1, 1  ;;  %v4228_v25 = vrot.slane %v3667_v1, 3  ;;  %v4227_v28 = vrot.slane %v3671_v54, 2 }
 0x4ef   : > { %7579 = vmatmul.msk.bf16.gmra.mxu3 %vm3696_vm10, %v3800_v17  ;;  %v10616_v53 = vsel %vm2483_vm8, %v4322_v50, %v4323_v61  ;;  %v10619_v46 = vsel %vm1821_vm5, %v4148_v49, %v4149_v5  ;;  %v3593_v27 = vpack.c.bf16 %v3569_v3, %v3569_v3  ;;  %v3578_v6 = vpop.f32.mrf.mxu3  ;;  %v8744_v50 = vld [vmem:[%s12365_s24 + $0x28] sm:$0xff]  ;;  %v10674_v17 = vpack.c.b16 %v10595_v29, %v10591_v21 }
 0x4f0   : > { %v3670_v51 = vsel %vm722_vm4, %v3665_v0, %v3669_v23  ;;  %v4229_v31 = vor.u32 %v4228_v25, %v4227_v28  ;;  %v3673_v60 = vor.u32 %v3671_v54, %v3669_v23  ;;  %4107 = vmatpush.bf16.msra.mxu3 %v8744_v50 }
 0x4f1   : > { %v3527_v44 = vpop.f32.mrf.mxu2  ;;  %7561 = vmatmul.msk.bf16.gmra.mxu1 %vm3696_vm10, %v3670_v51  ;;  %v10626_v52 = vunpack.c.l.b16 %v3593_v27 }
 0x4f2   : > { %v3528_v32 = vadd.f32 %v3527_v44, %v3484_v19  ;;  %v10624_v11 = vsel %vm2205_vm6, %v4226_v45, %v4229_v31  ;;  %v3492_v19 = vpop.f32.mrf.mxu1 }
 0x4f4   : > { %v3571_v35 = vadd.f32 %v3570_v33, %v3528_v32 }
 0x4f6   : > { %v3594_v37 = vpack.c.bf16 %v3571_v35, %v3571_v35 }
 0x4f8   : > { %v10628_v56 = vunpack.c.l.b16 %v3594_v37  ;;  %v3958_v37 = vshll.u32 %v10674_v17, 16 }
 0x4f9   : > { %v3530_v48 = vpop.f32.mrf.mxu2 }
 0x4fa   : > { %v3649_v63 = vpack.c.b16 %v10628_v56, %v10626_v52  ;;  %v3531_v55 = vadd.f32 %v3530_v48, %v3487_v39  ;;  %v3494_v32 = vpop.f32.mrf.mxu1  ;;  %v3580_v48 = vpop.f32.mrf.mxu3 }
 0x4fc   : > { %7572 = vmatmul.msk.bf16.gmra.mxu2 %vm3696_vm10, %v3649_v63  ;;  %v3801_v20 = vrot.slane %v3649_v63, 1  ;;  %v3675_v57 = vshll.u32 %v3649_v63, 16  ;;  %v3679_v26 = vshrl.u32 %v3649_v63, 16  ;;  %v4325_v41 = vrot.slane %v3649_v63, 3 }
 0x4fd   : > { %v4151_v30 = vrot.slane %v3649_v63, 2  ;;  %v3574_v34 = vadd.f32 %v3573_v7, %v3531_v55  ;;  %v3955_v7 = vshrl.u32 %v10674_v17, 16 }
 0x4fe   : > { %v3802_v12 = vsel %vm1165_vm3, %v3799_v59, %v3801_v20  ;;  %v3677_v47 = vrot.slane %v3675_v57, 1  ;;  %v4231_v13 = vrot.slane %v3679_v26, 2  ;;  %v4232_v8 = vrot.slane %v3675_v57, 3 }
 0x4ff   : > { %7580 = vmatmul.msk.bf16.gmra.mxu3 %vm3696_vm10, %v3802_v12  ;;  %v10639_v36 = vsel %vm2483_vm8, %v4323_v61, %v4325_v41  ;;  %v10642_v4 = vsel %vm1821_vm5, %v4149_v5, %v4151_v30  ;;  %v3595_v16 = vpack.c.bf16 %v3574_v34, %v3574_v34  ;;  %v10655_v59 = vpack.c.b16 %v10606_v15, %v10597_v18  ;;  %v8742_v15 = vld [vmem:[%s12365_s24 + $0x18] sm:$0xff] }
 0x500   : > { %v3678_v22 = vsel %vm722_vm4, %v3673_v60, %v3677_v47  ;;  %v4233_v45 = vor.u32 %v4232_v8, %v4231_v13  ;;  %v3681_v3 = vor.u32 %v3679_v26, %v3677_v47  ;;  %3914 = vmatpush.bf16.msra.mxu1 %v8742_v15  ;;  %v3960_v12 = vrot.slane %v3958_v37, 2 }
 0x501   : > { %v3532_v24 = vpop.f32.mrf.mxu2  ;;  %7562 = vmatmul.msk.bf16.gmra.mxu1 %vm3696_vm10, %v3678_v22  ;;  %v10649_v33 = vunpack.c.l.b16 %v3595_v16  ;;  %v3963_v0 = vshrl.u32 %v10655_v59, 16  ;;  %v10701_v34 = vpack.c.b16 %v10626_v52, %v10608_v42 }
 0x502   : > { %v3533_v43 = vadd.f32 %v3532_v24, %v3489_v14  ;;  %v10647_v10 = vsel %vm2205_vm6, %v4229_v31, %v4233_v45  ;;  %v3966_v31 = vshll.u32 %v10655_v59, 16  ;;  %v3583_v15 = vpop.f32.mrf.mxu3 }
 0x504   : > { %v3576_v9 = vadd.f32 %v3575_v38, %v3533_v43  ;;  %v3968_v57 = vrot.slane %v3966_v31, 2 }
 0x506   : > { %v3596_v58 = vpack.c.bf16 %v3576_v9, %v3576_v9 }
 0x508   : > { %v10651_v2 = vunpack.c.l.b16 %v3596_v58  ;;  %v3975_v58 = vshll.u32 %v10701_v34, 16 }
 0x509   : > { %v3535_v1 = vpop.f32.mrf.mxu2 }
 0x50a   : > { %v10659_v54 = vpack.c.b16 %v10651_v2, %v10649_v33  ;;  %v3536_v61 = vadd.f32 %v3535_v1, %v3492_v19  ;;  %v3972_v19 = vshrl.u32 %v10701_v34, 16  ;;  %v3977_v31 = vrot.slane %v3975_v58, 2 }
 0x50c   : > { %7573 = vmatmul.msk.bf16.gmra.mxu2 %vm3696_vm10, %v10659_v54  ;;  %v3803_v49 = vrot.slane %v10659_v54, 1  ;;  %v3683_v5 = vshll.u32 %v10659_v54, 16  ;;  %v3687_v18 = vshrl.u32 %v10659_v54, 16  ;;  %v4327_v23 = vrot.slane %v10659_v54, 3 }
 0x50d   : > { %v4153_v25 = vrot.slane %v10659_v54, 2  ;;  %v3579_v27 = vadd.f32 %v3578_v6, %v3536_v61  ;;  %v3497_v6 = vpop.f32.mrf.mxu1 }
 0x50e   : > { %v3804_v28 = vsel %vm1165_vm3, %v3801_v20, %v3803_v49  ;;  %v3685_v51 = vrot.slane %v3683_v5, 1  ;;  %v4235_v44 = vrot.slane %v3687_v18, 2  ;;  %v4236_v21 = vrot.slane %v3683_v5, 3 }
 0x50f   : > { %7581 = vmatmul.msk.bf16.gmra.mxu3 %vm3696_vm10, %v3804_v28  ;;  %v10683_v29 = vsel %vm2483_vm8, %v4325_v41, %v4327_v23  ;;  %v10686_v39 = vsel %vm1821_vm5, %v4151_v30, %v4153_v25  ;;  %v3965_v20 = vrot.slane %v3963_v0, 1  ;;  %v3597_v14 = vpack.c.bf16 %v3579_v27, %v3579_v27  ;;  %v3585_v27 = vpop.f32.mrf.mxu3 }
 0x510   : > { %v3686_v35 = vsel %vm722_vm4, %v3681_v3, %v3685_v51  ;;  %v4237_v63 = vor.u32 %v4236_v21, %v4235_v44  ;;  %v3957_v30 = vrot.slane %v3955_v7, 1  ;;  %v3689_v52 = vor.u32 %v3687_v18, %v3685_v51 }
 0x511   : > { %v3537_v40 = vpop.f32.mrf.mxu2  ;;  %7563 = vmatmul.msk.bf16.gmra.mxu1 %vm3696_vm10, %v3686_v35  ;;  %v3969_v47 = vor.u32 %v3968_v57, %v3965_v20  ;;  %v10695_v13 = vunpack.c.l.b16 %v3597_v14  ;;  %v3974_v44 = vrot.slane %v3972_v19, 1  ;;  %v4069_v7 = vrot.slane %v10655_v59, 2 }
 0x512   : > { %v3538_v55 = vadd.f32 %v3537_v40, %v3494_v32  ;;  %v10693_v26 = vsel %vm2205_vm6, %v4233_v45, %v4237_v63  ;;  %v3961_v8 = vor.u32 %v3960_v12, %v3957_v30  ;;  %v3878_v20 = vrot.slane %v10655_v59, 1 }
 0x513   : > { %v3978_v21 = vor.u32 %v3977_v31, %v3974_v44 }
 0x514   : > { %v3581_v41 = vadd.f32 %v3580_v48, %v3538_v55  ;;  %v3970_v24 = vsel %vm1547_vm7, %v3961_v8, %v3969_v47  ;;  %v10723_v48 = vpack.c.b16 %v10649_v33, %v10628_v56  ;;  %v4068_v55 = vrot.slane %v10674_v17, 2 }
 0x515   : > { %v3499_v51 = vpop.f32.mrf.mxu1  ;;  %v3877_v56 = vrot.slane %v10674_v17, 1  ;;  %v3876_v17 = vpack.c.b16 %v10695_v13, %v10651_v2  ;;  %v8746_v2 = vld [vmem:[%s12365_s24 + $0x38] sm:$0xff] }
 0x516   : > { %v3598_v60 = vpack.c.bf16 %v3581_v41, %v3581_v41  ;;  %v4070_v12 = vsel %vm1821_vm5, %v4068_v55, %v4069_v7  ;;  %v3984_v59 = vshll.u32 %v10723_v48, 16  ;;  %4285 = vmatpush.bf16.msrb.mxu2 %v8746_v2 }
 0x517   : > { %v3990_v58 = vshrl.u32 %v3876_v17, 16 }
 0x518   : > { %v10697_v38 = vunpack.c.l.b16 %v3598_v60  ;;  %v3981_v60 = vshrl.u32 %v10723_v48, 16 }
 0x519   : > { %v3540_v1 = vpop.f32.mrf.mxu2 }
 0x51a   : > { %v4146_v22 = vpack.c.b16 %v10697_v38, %v10695_v13  ;;  %v3541_v50 = vadd.f32 %v3540_v1, %v3497_v6  ;;  %v3993_v6 = vshll.u32 %v3876_v17, 16  ;;  %v4073_v13 = vrot.slane %v10723_v48, 2 }
 0x51c   : > { %7596 = vmatmul.msk.bf16.vlgmr.msra.gmra.mxu2 %vm3696_vm10, %v3970_v24  ;;  %v4240_v45 = vshrl.u32 %v4146_v22, 16  ;;  %v4243_v43 = vshll.u32 %v4146_v22, 16  ;;  %v4329_v16 = vrot.slane %v4146_v22, 3  ;;  %v4155_v9 = vrot.slane %v4146_v22, 2 }
 0x51d   : > { %v3584_v28 = vadd.f32 %v3583_v15, %v3541_v50  ;;  %v3983_v22 = vrot.slane %v3981_v60, 1  ;;  %v3986_v24 = vrot.slane %v3984_v59, 2  ;;  %v3882_v50 = vrot.slane %v10723_v48, 1 }
 0x51e   : > { %v4242_v54 = vrot.slane %v4240_v45, 2  ;;  %v4245_v42 = vrot.slane %v4243_v43, 3  ;;  %v10711_v61 = vsel %vm2483_vm8, %v4327_v23, %v4329_v16  ;;  %v10714_v5 = vsel %vm1821_vm5, %v4153_v25, %v4155_v9 }
 0x51f   : > { %7582 = vmatmul.msk.bf16.gmra.mxu3 %vm3696_vm10, %v3803_v49  ;;  %v3599_v32 = vpack.c.bf16 %v3584_v28, %v3584_v28  ;;  %v3987_v45 = vor.u32 %v3986_v24, %v3983_v22  ;;  %v4071_v43 = vrot.slane %v10701_v34, 2 }
 0x520   : > { %v4246_v0 = vor.u32 %v4245_v42, %v4242_v54  ;;  %v3992_v54 = vrot.slane %v3990_v58, 1  ;;  %v3995_v42 = vrot.slane %v3993_v6, 2 }
 0x521   : > { %7564 = vmatmul.msk.bf16.gmra.mxu1 %vm3696_vm10, %v3689_v52  ;;  %v4145_v49 = vunpack.c.l.b16 %v3599_v32  ;;  %v3542_v18 = vpop.f32.mrf.mxu2  ;;  %v4072_v19 = vsel %vm1821_vm5, %v4069_v7, %v4071_v43  ;;  %v4074_v15 = vsel %vm1821_vm5, %v4071_v43, %v4073_v13 }
 0x522   : > { %v10718_v3 = vsel %vm2205_vm6, %v4237_v63, %v4246_v0  ;;  %v3979_v63 = vsel %vm1547_vm7, %v3969_v47, %v3978_v21  ;;  %v3879_v47 = vsel %vm1165_vm3, %v3877_v56, %v3878_v20  ;;  %v3996_v52 = vor.u32 %v3995_v42, %v3992_v54 }
 0x523   : > { %v4147_v23 = vpack.c.b16 %v4145_v49, %v4145_v49  ;;  %v4075_v18 = vrot.slane %v3876_v17, 2 }
 0x525   : > { %v4249_v35 = vshrl.u32 %v4147_v23, 16  ;;  %v4252_v25 = vshll.u32 %v4147_v23, 16  ;;  %v4331_v37 = vrot.slane %v4147_v23, 3  ;;  %v4157_v40 = vrot.slane %v4147_v23, 2  ;;  %v8745_v23 = vld [vmem:[%s12365_s24 + $0x30] sm:$0xff] }
 0x526   : > { %4187 = vmatpush.bf16.msrb.mxu1 %v8745_v23 }
 0x527   : > { %v4251_v57 = vrot.slane %v4249_v35, 2  ;;  %v4254_v14 = vrot.slane %v4252_v25, 3  ;;  %v10730_v41 = vsel %vm2483_vm8, %v4329_v16, %v4331_v37  ;;  %v10733_v30 = vsel %vm1821_vm5, %v4155_v9, %v4157_v40 }
 0x528   : > { %v3988_v16 = vsel %vm1547_vm7, %v3978_v21, %v3987_v45  ;;  %v3880_v9 = vrot.slane %v10701_v34, 1  ;;  %v3997_v34 = vsel %vm1547_vm7, %v3987_v45, %v3996_v52  ;;  %v8747_v21 = vld [vmem:[%s12365_s24 + $0x40] sm:$0xff]  ;;  %v4076_v35 = vsel %vm1821_vm5, %v4073_v13, %v4075_v18 }
 0x529   : > { %v4255_v33 = vor.u32 %v4254_v14, %v4251_v57  ;;  %4361 = vmatpush.bf16.msrb.mxu3 %v8747_v21 }
 0x52a   : > { %v3881_v1 = vsel %vm1165_vm3, %v3878_v20, %v3880_v9  ;;  %v3883_v44 = vsel %vm1165_vm3, %v3880_v9, %v3882_v50 }
 0x52b   : > { %v10742_v8 = vsel %vm2205_vm6, %v4246_v0, %v4255_v33  ;;  %v3953_v0 = vpack.c.b16 %v10697_v38, %v10697_v38  ;;  %v3884_v38 = vrot.slane %v3876_v17, 1 }
 0x52c   : > { %7597 = vmatmul.msk.bf16.gmra.mxu2 %vm3696_vm10, %v3979_v63 }
 0x52d   : > { %v3999_v31 = vshll.u32 %v3953_v0, 16  ;;  %v3885_v37 = vsel %vm1165_vm3, %v3882_v50, %v3884_v38  ;;  %v4077_v57 = vrot.slane %v3953_v0, 2 }
 0x52f   : > { %7605 = vmatmul.msk.bf16.vlgmr.msra.gmra.mxu3 %vm3696_vm10, %v4070_v12  ;;  %v4001_v32 = vrot.slane %v3999_v31, 2  ;;  %v4078_v33 = vsel %vm1821_vm5, %v4075_v18, %v4077_v57 }
 0x531   : > { %7587 = vmatmul.msk.bf16.vlgmr.msra.gmra.mxu1 %vm3696_vm10, %v3879_v47  ;;  %v4002_v51 = vsel %vm1547_vm7, %v3996_v52, %v4001_v32 }
 0x53c   : > { %7598 = vmatmul.msk.bf16.gmra.mxu2 %vm3696_vm10, %v3988_v16 }
 0x53f   : > { %7606 = vmatmul.msk.bf16.gmra.mxu3 %vm3696_vm10, %v4072_v19 }
 0x541   : > { %7588 = vmatmul.msk.bf16.gmra.mxu1 %vm3696_vm10, %v3881_v1 }
 0x54c   : > { %7599 = vmatmul.msk.bf16.gmra.mxu2 %vm3696_vm10, %v3997_v34 }
 0x54f   : > { %v3771_v28 = vpop.f32.mrf.mxu2  ;;  %7607 = vmatmul.msk.bf16.gmra.mxu3 %vm3696_vm10, %v4074_v15 }
 0x551   : > { %7589 = vmatmul.msk.bf16.gmra.mxu1 %vm3696_vm10, %v3883_v44 }
 0x557   : > { %v3773_v49 = vpop.f32.mrf.mxu2 }
 0x55c   : > { %7600 = vmatmul.msk.bf16.gmra.mxu2 %vm3696_vm10, %v4002_v51 }
 0x55e   : > { %v3721_v27 = vpop.f32.mrf.mxu1 }
 0x55f   : > { %v3772_v25 = vadd.f32 %v3771_v28, %v3721_v27  ;;  %v3776_v7 = vpop.f32.mrf.mxu2  ;;  %7608 = vmatmul.msk.bf16.gmra.mxu3 %vm3696_vm10, %v4076_v35 }
 0x561   : > { %7590 = vmatmul.msk.bf16.gmra.mxu1 %vm3696_vm10, %v3885_v37 }
 0x562   : > { %v3835_v40 = vpop.f32.mrf.mxu3 }
 0x563   : > { %v3860_v48 = vadd.f32 %v3835_v40, %v3772_v25 }
 0x566   : > { %v3723_v63 = vpop.f32.mrf.mxu1 }
 0x567   : > { %v3774_v55 = vadd.f32 %v3773_v49, %v3723_v63  ;;  %v3778_v20 = vpop.f32.mrf.mxu2 }
 0x56a   : > { %v3837_v14 = vpop.f32.mrf.mxu3 }
 0x56b   : > { %v10780_v12 = vadd.f32 %v3837_v14, %v3774_v55 }
 0x56c   : > { %7623 = vmatmul.msk.bf16.vlgmr.msrb.gmra.mxu2 %vm3696_vm10, %v10624_v11 }
 0x56e   : > { %v3726_v56 = vpop.f32.mrf.mxu1 }
 0x56f   : > { %v3777_v60 = vadd.f32 %v3776_v7, %v3726_v56  ;;  %v3781_v59 = vpop.f32.mrf.mxu2  ;;  %7609 = vmatmul.msk.bf16.gmra.mxu3 %vm3696_vm10, %v4078_v33 }
 0x571   : > { %7591 = vmatmul.msk.bf16.gmra.mxu1 %vm3696_vm10, %v3884_v38 }
 0x572   : > { %v3840_v47 = vpop.f32.mrf.mxu3 }
 0x573   : > { %v3862_v22 = vadd.f32 %v3840_v47, %v3777_v60 }
 0x576   : > { %v3728_v24 = vpop.f32.mrf.mxu1 }
 0x577   : > { %v3779_v45 = vadd.f32 %v3778_v20, %v3728_v24  ;;  %v3783_v43 = vpop.f32.mrf.mxu2 }
 0x57a   : > { %v3842_v17 = vpop.f32.mrf.mxu3 }
 0x57b   : > { %v10787_v16 = vadd.f32 %v3842_v17, %v3779_v45 }
 0x57c   : > { %7624 = vmatmul.msk.bf16.gmra.mxu2 %vm3696_vm10, %v10647_v10 }
 0x57e   : > { %v3731_v11 = vpop.f32.mrf.mxu1 }
 0x57f   : > { %v3782_v9 = vadd.f32 %v3781_v59, %v3731_v11  ;;  %v3786_v19 = vpop.f32.mrf.mxu2  ;;  %7632 = vmatmul.msk.bf16.vlgmr.msrb.gmra.mxu3 %vm3696_vm10, %v10616_v53 }
 0x581   : > { %7614 = vmatmul.msk.bf16.vlgmr.msrb.gmra.mxu1 %vm3696_vm10, %v10619_v46 }
 0x582   : > { %v3845_v58 = vpop.f32.mrf.mxu3 }
 0x583   : > { %v3864_v6 = vadd.f32 %v3845_v58, %v3782_v9 }
 0x586   : > { %v3733_v1 = vpop.f32.mrf.mxu1 }
 0x587   : > { %v3784_v54 = vadd.f32 %v3783_v43, %v3733_v1  ;;  %v10795_v42 = vpop.f32.mrf.mxu2 }
 0x58a   : > { %v3847_v52 = vpop.f32.mrf.mxu3 }
 0x58b   : > { %v10797_v2 = vadd.f32 %v3847_v52, %v3784_v54 }
 0x58c   : > { %7625 = vmatmul.msk.bf16.gmra.mxu2 %vm3696_vm10, %v10693_v26 }
 0x58e   : > { %v3736_v10 = vpop.f32.mrf.mxu1 }
 0x58f   : > { %v3787_v13 = vadd.f32 %v3786_v19, %v3736_v10  ;;  %v3791_v34 = vpop.f32.mrf.mxu2  ;;  %7633 = vmatmul.msk.bf16.gmra.mxu3 %vm3696_vm10, %v10639_v36 }
 0x591   : > { %7615 = vmatmul.msk.bf16.gmra.mxu1 %vm3696_vm10, %v10642_v4 }
 0x592   : > { %v3850_v53 = vpop.f32.mrf.mxu3 }
 0x593   : > { %v3866_v46 = vadd.f32 %v3850_v53, %v3787_v13 }
 0x596   : > { %v10805_v50 = vpop.f32.mrf.mxu1 }
 0x597   : > { %v10807_v15 = vpop.f32.mrf.mxu2 }
 0x59a   : > { %v10809_v0 = vpop.f32.mrf.mxu3 }
 0x59c   : > { %7626 = vmatmul.msk.bf16.gmra.mxu2 %vm3696_vm10, %v10718_v3 }
 0x59e   : > { %v3741_v26 = vpop.f32.mrf.mxu1 }
 0x59f   : > { %v3792_v28 = vadd.f32 %v3791_v34, %v3741_v26  ;;  %v4033_v44 = vpop.f32.mrf.mxu2  ;;  %7634 = vmatmul.msk.bf16.gmra.mxu3 %vm3696_vm10, %v10683_v29 }
 0x5a1   : > { %7616 = vmatmul.msk.bf16.gmra.mxu1 %vm3696_vm10, %v10686_v39 }
 0x5a2   : > { %v3855_v36 = vpop.f32.mrf.mxu3 }
 0x5a3   : > { %v3868_v4 = vadd.f32 %v3855_v36, %v3792_v28 }
 0x5a6   : > { %v10817_v31 = vpop.f32.mrf.mxu1 }
 0x5a7   : > { %v4035_v32 = vpop.f32.mrf.mxu2 }
 0x5aa   : > { %v10819_v49 = vpop.f32.mrf.mxu3 }
 0x5ac   : > { %7627 = vmatmul.msk.bf16.gmra.mxu2 %vm3696_vm10, %v10742_v8 }
 0x5ae   : > { %v3916_v3 = vpop.f32.mrf.mxu1 }
 0x5af   : > { %v3941_v18 = vadd.f32 %v3916_v3, %v3860_v48  ;;  %v4038_v51 = vpop.f32.mrf.mxu2  ;;  %7635 = vmatmul.msk.bf16.gmra.mxu3 %vm3696_vm10, %v10711_v61 }
 0x5b1   : > { %7617 = vmatmul.msk.bf16.gmra.mxu1 %vm3696_vm10, %v10714_v5  ;;  %v4058_v29 = vadd.f32 %v4033_v44, %v3941_v18  ;;  %v10861_v18 = vld [vmem:[%s12366_s6] ss:$0 sm:$0xff]  ;;  %s567_s6 = scalar_lea.vmem [#allocation2], %s566_s25 }
 0x5b2   : > { %v4109_v39 = vpop.f32.mrf.mxu3  ;;  %s7153_s20 = sshll.u32 %s567_s6, 4  ;;  %s7154_s20 = int_to_ptr.vmem [resolvable:$true] %s7153_s20 }
 0x5b3   : > { %v4134_v21 = vadd.f32 %v4109_v39, %v4058_v29 }
 0x5b6   : > { %v3918_v38 = vpop.f32.mrf.mxu1 }
 0x5b7   : > { %v10827_v23 = vpop.f32.mrf.mxu2  ;;  %v3942_v34 = vadd.f32 %v3918_v38, %v10780_v12 }
 0x5b9   : > { %v4059_v26 = vadd.f32 %v4035_v32, %v3942_v34 }
 0x5ba   : > { %v4111_v27 = vpop.f32.mrf.mxu3 }
 0x5be   : > { %v3921_v35 = vpop.f32.mrf.mxu1 }
 0x5bf   : > { %v3943_v25 = vadd.f32 %v3921_v35, %v3862_v22  ;;  %v4043_v7 = vpop.f32.mrf.mxu2  ;;  %7636 = vmatmul.msk.bf16.gmra.mxu3 %vm3696_vm10, %v10730_v41 }
 0x5c1   : > { %7618 = vmatmul.msk.bf16.gmra.mxu1 %vm3696_vm10, %v10733_v30  ;;  %v4060_v61 = vadd.f32 %v4038_v51, %v3943_v25 }
 0x5c2   : > { %v4114_v8 = vpop.f32.mrf.mxu3 }
 0x5c3   : > { %v4136_v37 = vadd.f32 %v4114_v8, %v4060_v61 }
 0x5c6   : > { %v3923_v5 = vpop.f32.mrf.mxu1 }
 0x5c7   : > { %v10833_v40 = vpop.f32.mrf.mxu2  ;;  %v3944_v32 = vadd.f32 %v3923_v5, %v10787_v16 }
 0x5ca   : > { %v4116_v48 = vpop.f32.mrf.mxu3 }
 0x5ce   : > { %v3926_v63 = vpop.f32.mrf.mxu1 }
 0x5cf   : > { %v3945_v55 = vadd.f32 %v3926_v63, %v3864_v6  ;;  %v4048_v20 = vpop.f32.mrf.mxu2  ;;  %v4061_v63 = vadd.f32 %v10827_v23, %v3944_v32  ;;  %v3789_v32 = vadd.f32 %v10795_v42, %v10805_v50 }
 0x5d1   : > { %v4062_v57 = vadd.f32 %v4043_v7, %v3945_v55 }
 0x5d2   : > { %v4119_v14 = vpop.f32.mrf.mxu3 }
 0x5d3   : > { %v10835_v56 = vadd.f32 %v4119_v14, %v4062_v57 }
 0x5d6   : > { %v10837_v33 = vpop.f32.mrf.mxu1 }
 0x5d7   : > { %v10839_v41 = vpop.f32.mrf.mxu2  ;;  %v3946_v34 = vadd.f32 %v10837_v33, %v10797_v2 }
 0x5da   : > { %v10841_v60 = vpop.f32.mrf.mxu3 }
 0x5de   : > { %v3931_v30 = vpop.f32.mrf.mxu1 }
 0x5df   : > { %v3947_v59 = vadd.f32 %v3931_v30, %v3866_v46  ;;  %v4053_v47 = vpop.f32.mrf.mxu2 }
 0x5e1   : > { %v4064_v22 = vadd.f32 %v4048_v20, %v3947_v59 }
 0x5e2   : > { %v4124_v24 = vpop.f32.mrf.mxu3 }
 0x5e3   : > { %v10843_v45 = vadd.f32 %v4124_v24, %v4064_v22  ;;  %v4137_v22 = vadd.f32 %v4116_v48, %v4061_v63 }
 0x5e6   : > { %v10845_v43 = vpop.f32.mrf.mxu1 }
 0x5e7   : > { %v10847_v17 = vpop.f32.mrf.mxu2 }
 0x5ea   : > { %v10849_v11 = vpop.f32.mrf.mxu3 }
 0x5ee   : > { %v3936_v9 = vpop.f32.mrf.mxu1 }
 0x5ef   : > { %v3949_v19 = vadd.f32 %v3936_v9, %v3868_v4  ;;  %v4287_v58 = vpop.f32.mrf.mxu2  ;;  %v4135_v4 = vadd.f32 %v4111_v27, %v4059_v26 }
 0x5f1   : > { %v4066_v6 = vadd.f32 %v4053_v47, %v3949_v19 }
 0x5f2   : > { %v4129_v1 = vpop.f32.mrf.mxu3 }
 0x5f3   : > { %v10851_v54 = vadd.f32 %v4129_v1, %v4066_v6 }
 0x5f6   : > { %v10853_v52 = vpop.f32.mrf.mxu1 }
 0x5f7   : > { %v4289_v10 = vpop.f32.mrf.mxu2 }
 0x5fa   : > { %v10855_v13 = vpop.f32.mrf.mxu3 }
 0x5fe   : > { %v4189_v53 = vpop.f32.mrf.mxu1 }
 0x5ff   : > { %v4214_v46 = vadd.f32 %v4189_v53, %v4134_v21  ;;  %v4292_v44 = vpop.f32.mrf.mxu2 }
 0x601   : > { %v4312_v28 = vadd.f32 %v4287_v58, %v4214_v46 }
 0x602   : > { %v4363_v36 = vpop.f32.mrf.mxu3 }
 0x603   : > { %v4388_v3 = vadd.f32 %v4363_v36, %v4312_v28 }
 0x605   : > { %v4402_v39 = vadd.f32 %v10861_v18, %v4388_v3 }
 0x606   : > { %v4191_v51 = vpop.f32.mrf.mxu1 }
 0x607   : > { %v4215_v29 = vadd.f32 %v4191_v51, %v4135_v4  ;;  %v4294_v38 = vpop.f32.mrf.mxu2  ;;  %v4412_v21 = vmax.f32 %v4402_v39, 0.0 }
 0x609   : > { %v4313_v35 = vadd.f32 %v4289_v10, %v4215_v29  ;;  %v4450_v55 = vrot.slane %v4412_v21, 1 }
 0x60a   : > { %v4365_v25 = vpop.f32.mrf.mxu3 }
 0x60b   : > { %v4389_v12 = vadd.f32 %v4365_v25, %v4313_v35 }
 0x60d   : > { %v4403_v7 = vadd.f32 %v10861_v18, %v4389_v12 }
 0x60e   : > { %v4194_v61 = vpop.f32.mrf.mxu1 }
 0x60f   : > { %v4413_v27 = vmax.f32 %v4403_v7, 0.0  ;;  %v4216_v8 = vadd.f32 %v4194_v61, %v4136_v37  ;;  %v4297_v16 = vpop.f32.mrf.mxu2 }
 0x611   : > { %v4451_v20 = vrot.slane %v4413_v27, 1  ;;  %v4314_v57 = vadd.f32 %v4292_v44, %v4216_v8  ;;  %v4063_v44 = vadd.f32 %v10833_v40, %v3946_v34 }
 0x612   : > { %v4368_v14 = vpop.f32.mrf.mxu3 }
 0x613   : > { %v4390_v30 = vadd.f32 %v4368_v14, %v4314_v57  ;;  %v4452_v59 = vsel %vm1165_vm3, %v4450_v55, %v4451_v20  ;;  %v4139_v35 = vadd.f32 %v10841_v60, %v4063_v44  ;;  %v3867_v60 = vadd.f32 %v10809_v0, %v3789_v32 }
 0x614   : > { %v4476_v47 = vmax.f32 %v4412_v21, %v4452_v59 }
 0x615   : > { %v4404_v24 = vadd.f32 %v10861_v18, %v4390_v30  ;;  %v3948_v57 = vadd.f32 %v10845_v43, %v3867_v60 }
 0x616   : > { %v4196_v5 = vpop.f32.mrf.mxu1 }
 0x617   : > { %v4414_v9 = vmax.f32 %v4404_v24, 0.0  ;;  %v4217_v19 = vadd.f32 %v4196_v5, %v4137_v22  ;;  %v4299_v28 = vpop.f32.mrf.mxu2 }
 0x619   : > { %v4453_v58 = vrot.slane %v4414_v9, 1  ;;  %v4315_v6 = vadd.f32 %v4294_v38, %v4217_v19 }
 0x61a   : > { %v4370_v37 = vpop.f32.mrf.mxu3 }
 0x61b   : > { %v4391_v1 = vadd.f32 %v4370_v37, %v4315_v6  ;;  %v4454_v23 = vsel %vm1165_vm3, %v4451_v20, %v4453_v58 }
 0x61c   : > { %v4477_v10 = vmax.f32 %v4413_v27, %v4454_v23 }
 0x61d   : > { %v4405_v53 = vadd.f32 %v10861_v18, %v4391_v1 }
 0x61e   : > { %v4199_v46 = vpop.f32.mrf.mxu1  ;;  %v4524_v12 = vrot.slane %v4477_v10, 2 }
 0x61f   : > { %v4415_v48 = vmax.f32 %v4405_v53, 0.0  ;;  %v4218_v26 = vadd.f32 %v4199_v46, %v10835_v56  ;;  %v4302_v27 = vpop.f32.mrf.mxu2 }
 0x621   : > { %v4455_v36 = vrot.slane %v4415_v48, 1  ;;  %v4316_v3 = vadd.f32 %v4297_v16, %v4218_v26 }
 0x622   : > { %v4373_v4 = vpop.f32.mrf.mxu3 }
 0x623   : > { %v4392_v51 = vadd.f32 %v4373_v4, %v4316_v3  ;;  %v4456_v29 = vsel %vm1165_vm3, %v4453_v58, %v4455_v36 }
 0x624   : > { %v10876_v39 = vmax.f32 %v4414_v9, %v4456_v29 }
 0x625   : > { %v4406_v2 = vadd.f32 %v10861_v18, %v4392_v51 }
 0x626   : > { %v4201_v33 = vpop.f32.mrf.mxu1  ;;  %v4525_v25 = vrot.slane %v10876_v39, 2 }
 0x627   : > { %v4416_v56 = vmax.f32 %v4406_v2, 0.0  ;;  %v4219_v38 = vadd.f32 %v4201_v33, %v4139_v35  ;;  %v4304_v43 = vpop.f32.mrf.mxu2 }
 0x628   : > { %v4526_v40 = vsel %vm1821_vm5, %v4524_v12, %v4525_v25 }
 0x629   : > { %v4457_v21 = vrot.slane %v4416_v56, 1  ;;  %v4317_v7 = vadd.f32 %v4299_v28, %v4219_v38  ;;  %v4550_v61 = vmax.f32 %v4476_v47, %v4526_v40  ;;  %v4065_v47 = vadd.f32 %v10839_v41, %v3948_v57 }
 0x62a   : > { %v4375_v8 = vpop.f32.mrf.mxu3 }
 0x62b   : > { %v4393_v63 = vadd.f32 %v4375_v8, %v4317_v7  ;;  %v4458_v55 = vsel %vm1165_vm3, %v4455_v36, %v4457_v21  ;;  %v4141_v37 = vadd.f32 %v10849_v11, %v4065_v47 }
 0x62c   : > { %v4479_v20 = vmax.f32 %v4415_v48, %v4458_v55 }
 0x62d   : > { %v4407_v14 = vadd.f32 %v10861_v18, %v4393_v63 }
 0x62e   : > { %v4204_v30 = vpop.f32.mrf.mxu1  ;;  %v4527_v59 = vrot.slane %v4479_v20, 2 }
 0x62f   : > { %v4417_v22 = vmax.f32 %v4407_v14, 0.0  ;;  %v4220_v42 = vadd.f32 %v4204_v30, %v10843_v45  ;;  %v4307_v29 = vpop.f32.mrf.mxu2 }
 0x630   : > { %v4528_v50 = vsel %vm1821_vm5, %v4525_v25, %v4527_v59 }
 0x631   : > { %v4459_v24 = vrot.slane %v4417_v22, 1  ;;  %v4318_v16 = vadd.f32 %v4302_v27, %v4220_v42  ;;  %v4551_v0 = vmax.f32 %v4477_v10, %v4528_v50  ;;  %v3794_v10 = vadd.f32 %v10807_v15, %v10817_v31 }
 0x632   : > { %v4378_v5 = vpop.f32.mrf.mxu3 }
 0x633   : > { %v4394_v9 = vadd.f32 %v4378_v5, %v4318_v16  ;;  %v4460_v19 = vsel %vm1165_vm3, %v4457_v21, %v4459_v24  ;;  %v10892_v58 = vpack.c.bf16 %v4551_v0, %v4550_v61  ;;  %v3869_v44 = vadd.f32 %v10819_v49, %v3794_v10 }
 0x634   : > { %v4480_v6 = vmax.f32 %v4416_v56, %v4460_v19 }
 0x635   : > { %v4408_v1 = vadd.f32 %v10861_v18, %v4394_v9  ;;  %v3950_v4 = vadd.f32 %v10853_v52, %v3869_v44 }
 0x636   : > { %v4206_v45 = vpop.f32.mrf.mxu1  ;;  %v4529_v23 = vrot.slane %v4480_v6, 2 }
 0x637   : > { %v4418_v34 = vmax.f32 %v4408_v1, 0.0  ;;  %v4221_v53 = vadd.f32 %v4206_v45, %v4141_v37  ;;  %v4309_v60 = vpop.f32.mrf.mxu2 }
 0x638   : > { %v4530_v41 = vsel %vm1821_vm5, %v4527_v59, %v4529_v23 }
 0x639   : > { %v4461_v46 = vrot.slane %v4418_v34, 1  ;;  %v4319_v48 = vadd.f32 %v4304_v43, %v4221_v53  ;;  %v4552_v26 = vmax.f32 %v10876_v39, %v4530_v41  ;;  %v4067_v39 = vadd.f32 %v10847_v17, %v3950_v4  ;;  %v12367_v53 = vld [vmem:[#allocation9_spill] sm:$0xff]  ;;  %v8752_v4 = vld [vmem:[%s12368_s3 + $0x10] sm:$0xff] }
 0x63a   : > { %v4380_v28 = vpop.f32.mrf.mxu3 }
 0x63b   : > { %v4395_v36 = vadd.f32 %v4380_v28, %v4319_v48  ;;  %v4462_v11 = vsel %vm1165_vm3, %v4459_v24, %v4461_v46  ;;  %v4143_v21 = vadd.f32 %v10855_v13, %v4067_v39  ;;  %v8749_v48 = vld [vmem:[%s12195_s10 + $0x8] sm:$0xff] }
 0x63c   : > { %v4481_v3 = vmax.f32 %v4417_v22, %v4462_v11  ;;  %v8755_v11 = vld [vmem:[%s12368_s3 + $0x28] sm:$0xff] }
 0x63d   : > { %v4409_v51 = vadd.f32 %v10861_v18, %v4395_v36  ;;  %v8751_v36 = vld [vmem:[%s12368_s3 + $0x8] sm:$0xff]  ;;  %4788 = vmatpush.bf16.msra.mxu2 %v8755_v11 }
 0x63e   : > { %v4209_v35 = vpop.f32.mrf.mxu1  ;;  %v4531_v2 = vrot.slane %v4481_v3, 2  ;;  %4749 = vmatpush.bf16.msra.mxu1 %v8751_v36 }
 0x63f   : > { %v4419_v33 = vmax.f32 %v4409_v51, 0.0  ;;  %v4222_v15 = vadd.f32 %v4209_v35, %v10851_v54  ;;  %v8754_v51 = vld [vmem:[%s12368_s3 + $0x20] sm:$0xff]  ;;  %v8756_v35 = vld [vmem:[%s12368_s3 + $0x30] sm:$0xff] }
 0x640   : > { %v4532_v31 = vsel %vm1821_vm5, %v4529_v23, %v4531_v2 }
 0x641   : > { %v4463_v25 = vrot.slane %v4419_v33, 1  ;;  %v4320_v49 = vadd.f32 %v4307_v29, %v4222_v15  ;;  %v4553_v12 = vmax.f32 %v4479_v20, %v4532_v31  ;;  %4789 = vmatpush.bf16.msra.mxu2 %v8754_v51  ;;  %v8757_v29 = vld [vmem:[%s12368_s3 + $0x38] sm:$0xff] }
 0x642   : > { %v4383_v56 = vpop.f32.mrf.mxu3  ;;  %4833 = vmatpush.bf16.msra.mxu3 %v8757_v29  ;;  %v8761_v15 = vld [vmem:[%s12368_s3 + $0x58] sm:$0xff] }
 0x643   : > { %v4396_v38 = vadd.f32 %v4383_v56, %v4320_v49  ;;  %v4464_v40 = vsel %vm1165_vm3, %v4461_v46, %v4463_v25  ;;  %v4560_v52 = vpack.c.bf16 %v4553_v12, %v4552_v26  ;;  %v8748_v46 = vld [vmem:[%s12195_s10] sm:$0xff]  ;;  %v4568_v26 = vld [vmem:[%s12195_s10 + $0x10] sm:$0x3]  ;;  %v8759_v56 = vld [vmem:[%s12368_s3 + $0x48] sm:$0xff] }
 0x644   : > { %v4482_v32 = vmax.f32 %v4418_v34, %v4464_v40  ;;  %v4578_v28 = vunpack.c.l.b16 %v4568_v26  ;;  %v8760_v12 = vld [vmem:[%s12368_s3 + $0x50] sm:$0xff]  ;;  %v8758_v40 = vld [vmem:[%s12368_s3 + $0x40] sm:$0xff] }
 0x645   : > { %v4410_v7 = vadd.f32 %v10861_v18, %v4396_v38 }
 0x646   : > { %v4211_v61 = vpop.f32.mrf.mxu1  ;;  %v4533_v27 = vrot.slane %v4482_v32, 2  ;;  %v4581_v44 = vpack.c.b16 %v4578_v28, %v4578_v28  ;;  %4834 = vmatpush.bf16.msra.mxu3 %v8756_v35 }
 0x647   : > { %v4420_v54 = vmax.f32 %v4410_v7, 0.0  ;;  %v4223_v8 = vadd.f32 %v4211_v61, %v4143_v21  ;;  %v8763_v7 = vld [vmem:[%s12368_s3 + $0x68] sm:$0xff] }
 0x648   : > { %v4534_v17 = vsel %vm1821_vm5, %v4531_v2, %v4533_v27  ;;  %4971 = vmatpush.bf16.msrb.mxu2 %v8763_v7 }
 0x649   : > { %v4465_v63 = vrot.slane %v4420_v54, 1  ;;  %v4321_v55 = vadd.f32 %v4309_v60, %v4223_v8  ;;  %v4554_v20 = vmax.f32 %v4480_v6, %v4534_v17  ;;  %v8762_v8 = vld [vmem:[%s12368_s3 + $0x60] sm:$0xff] }
 0x64a   : > { %v4385_v57 = vpop.f32.mrf.mxu3 }
 0x64b   : > { %v4397_v14 = vadd.f32 %v4385_v57, %v4321_v55  ;;  %v4466_v30 = vsel %vm1165_vm3, %v4463_v25, %v4465_v63  ;;  %v4484_v19 = vmax.f32 %v4420_v54, %v4465_v63 }
 0x64c   : > { %v4483_v59 = vmax.f32 %v4419_v33, %v4466_v30  ;;  %4972 = vmatpush.bf16.msrb.mxu2 %v8762_v8 }
 0x64d   : > { %v4411_v22 = vadd.f32 %v10861_v18, %v4397_v14 }
 0x64e   : > { %v4535_v13 = vrot.slane %v4483_v59, 2 }
 0x64f   : > { %v4421_v42 = vmax.f32 %v4411_v22, 0.0  ;;  %v8765_v22 = vld [vmem:[%s12368_s3 + $0x78] sm:$0xff] }
 0x650   : > { %v4536_v50 = vsel %vm1821_vm5, %v4533_v27, %v4535_v13  ;;  %5026 = vmatpush.bf16.msrb.mxu3 %v8765_v22 }
 0x651   : > { %v4496_v47 = vrot.slane %v4421_v42, 1  ;;  %v4555_v24 = vmax.f32 %v4481_v3, %v4536_v50  ;;  %v8753_v3 = vld [vmem:[%s12368_s3 + $0x18] sm:$0xff] }
 0x653   : > { %v4497_v16 = vsel %vm1165_vm3, %v4465_v63, %v4496_v47  ;;  %v4501_v0 = vmax.f32 %v4421_v42, %v4496_v47  ;;  %v4561_v5 = vpack.c.bf16 %v4555_v24, %v4554_v20  ;;  %v8764_v47 = vld [vmem:[%s12368_s3 + $0x70] sm:$0xff] }
 0x654   : > { %v4500_v9 = vmax.f32 %v4420_v54, %v4497_v16  ;;  %5027 = vmatpush.bf16.msrb.mxu3 %v8764_v47 }
 0x655   : > { %v4539_v43 = vrot.slane %v4501_v0, 2 }
 0x656   : > { %v4537_v6 = vrot.slane %v4500_v9, 2 }
 0x657   : > { %v4558_v37 = vmax.f32 %v4484_v19, %v4539_v43 }
 0x658   : > { %v4538_v1 = vsel %vm1821_vm5, %v4535_v13, %v4537_v6  ;;  %v4540_v45 = vsel %vm1821_vm5, %v4537_v6, %v4539_v43 }
 0x659   : > { %v4563_v18 = vpack.c.bf16 %v4558_v37, %v4558_v37  ;;  %v4556_v23 = vmax.f32 %v4482_v32, %v4538_v1  ;;  %v4557_v34 = vmax.f32 %v4483_v59, %v4540_v45  ;;  %v8767_v37 = vld [vmem:[%s12368_s3 + $0x88] sm:$0xff] }
 0x65b   : > { %v4593_v41 = vand.u32 %v4563_v18, %v12367_v53  ;;  %v4562_v10 = vpack.c.bf16 %v4557_v34, %v4556_v23  ;;  %v8766_v18 = vld [vmem:[%s12368_s3 + $0x80] sm:$0xff] }
 0x65d   : > { %4598 = vmatpush.bf16.msrb.mxu0 %v4593_v41 }
 0x661   : > { %4599 = vmatpush.bf16.msrb.mxu0 %v4562_v10 }
 0x665   : > { %4600 = vmatpush.bf16.msrb.mxu0 %v4561_v5 }
 0x669   : > { %4601 = vmatpush.bf16.msrb.mxu0 %v4560_v52 }
 0x66d   : > { %4602 = vmatpush.bf16.msrb.mxu0 %v10892_v58  ;;  %v8750_v58 = vld [vmem:[%s12368_s3] sm:$0xff] }
 0x66e   : > { %4750 = vmatpush.bf16.msra.mxu1 %v8750_v58 }
 0x670   : > { %7645 = vmatmul.msk.bf16.vlgmr.msrb.gmra.mxu0 %vm4582_vm11, %v8748_v46 }
 0x671   : > { %4715 = vmatpush.bf16.msra.mxu0 %v8753_v3 }
 0x672   : > { %4926 = vmatpush.bf16.msrb.mxu1 %v8761_v15 }
 0x675   : > { %4716 = vmatpush.bf16.msra.mxu0 %v8752_v4 }
 0x676   : > { %4927 = vmatpush.bf16.msrb.mxu1 %v8760_v12 }
 0x679   : > { %4885 = vmatpush.bf16.msrb.mxu0 %v8759_v56 }
 0x67d   : > { %4886 = vmatpush.bf16.msrb.mxu0 %v8758_v40 }
 0x680   : > { %7646 = vmatmul.msk.bf16.gmra.mxu0 %vm4582_vm11, %v8749_v48 }
 0x690   : > { %7647 = vmatmul.msk.bf16.gmra.mxu0 %vm4582_vm11, %v4581_v44 }
 0x6ed   : > { %v4604_v2 = vpop.f32.mrf.mxu0 }
 0x6ee   : > { %v4618_v33 = vpack.c.bf16 %v4604_v2, %v4604_v2 }
 0x6f0   : > { %v4670_v25 = vunpack.c.l.b16 %v4618_v33 }
 0x6f5   : > { %v4606_v31 = vpop.f32.mrf.mxu0 }
 0x6f6   : > { %v4619_v39 = vpack.c.bf16 %v4606_v31, %v4606_v31 }
 0x6f8   : > { %v4671_v49 = vunpack.c.l.b16 %v4619_v39 }
 0x6fa   : > { %v4673_v38 = vpack.c.b16 %v4671_v49, %v4670_v25 }
 0x6fc   : > { %7698 = vmatmul.msk.bf16.vlgmr.msra.gmra.mxu1 %vm4702_vm12, %v4673_v38  ;;  %v4678_v32 = vshll.u32 %v4673_v38, 16  ;;  %v4676_v60 = vshrl.u32 %v4673_v38, 16  ;;  %v4761_v63 = vrot.slane %v4673_v38, 1  ;;  %v4806_v16 = vrot.slane %v4673_v38, 3 }
 0x6fd   : > { %v4609_v52 = vpop.f32.mrf.mxu0 }
 0x6fe   : > { %v4620_v21 = vpack.c.bf16 %v4609_v52, %v4609_v52  ;;  %v4680_v54 = vrot.slane %v4678_v32, 1  ;;  %v4849_v46 = vrot.slane %v4676_v60, 3  ;;  %v4850_v48 = vrot.slane %v4678_v32, 4 }
 0x700   : > { %v4672_v61 = vunpack.c.l.b16 %v4620_v21  ;;  %v4681_v57 = vor.u32 %v4680_v54, %v4676_v60  ;;  %v4851_v4 = vor.u32 %v4850_v48, %v4849_v46 }
 0x702   : > { %v4674_v27 = vpack.c.b16 %v4672_v61, %v4672_v61  ;;  %v4900_v1 = vpack.c.b16 %v4672_v61, %v4671_v49 }
 0x704   : > { %v4683_v17 = vshll.u32 %v4674_v27, 16  ;;  %v4762_v55 = vrot.slane %v4674_v27, 1  ;;  %v4687_v9 = vshrl.u32 %v4674_v27, 16  ;;  %v4944_v58 = vrot.slane %v4900_v1, 2 }
 0x705   : > { %v4611_v20 = vpop.f32.mrf.mxu0  ;;  %v4986_v11 = vshrl.u32 %v4900_v1, 16  ;;  %v4989_v3 = vshll.u32 %v4900_v1, 16  ;;  %v5041_v56 = vrot.slane %v4900_v1, 3 }
 0x706   : > { %v4685_v14 = vrot.slane %v4683_v17, 1  ;;  %v4621_v30 = vpack.c.bf16 %v4611_v20, %v4611_v20  ;;  %v4763_v59 = vsel %vm1165_vm3, %v4761_v63, %v4762_v55 }
 0x707   : > { %7708 = vmatmul.msk.bf16.vlgmr.msra.gmra.mxu2 %vm4702_vm12, %v4763_v59  ;;  %v4988_v33 = vrot.slane %v4986_v11, 2  ;;  %v4991_v15 = vrot.slane %v4989_v3, 3 }
 0x708   : > { %v4686_v13 = vsel %vm722_vm4, %v4681_v57, %v4685_v14  ;;  %v4804_v42 = vunpack.c.l.b16 %v4621_v30  ;;  %v4689_v6 = vor.u32 %v4687_v9, %v4685_v14 }
 0x709   : > { %7688 = vmatmul.msk.bf16.vlgmr.msra.gmra.mxu0 %vm4702_vm12, %v4686_v13  ;;  %v4992_v25 = vor.u32 %v4991_v15, %v4988_v33  ;;  %v8776_v33 = vld [vmem:[%s12369_s4 + $0x38] sm:$0xff] }
 0x70a   : > { %v4805_v50 = vpack.c.b16 %v4804_v42, %v4672_v61  ;;  %5068 = vmatpush.bf16.msra.mxu0 %v8767_v37  ;;  %v4901_v31 = vpack.c.b16 %v4804_v42, %v4804_v42  ;;  %5291 = vmatpush.bf16.msra.mxu2 %v8776_v33  ;;  %v8798_v33 = vld [vmem:[%s12369_s4 + $0xe8] sm:$0xff] }
 0x70c   : > { %v4807_v24 = vrot.slane %v4805_v50, 3  ;;  %7699 = vmatmul.msk.bf16.gmra.mxu1 %vm4702_vm12, %v4674_v27  ;;  %v4853_v23 = vshrl.u32 %v4805_v50, 16  ;;  %v4856_v34 = vshll.u32 %v4805_v50, 16 }
 0x70d   : > { %v4614_v0 = vpop.f32.mrf.mxu0 }
 0x70e   : > { %v4808_v5 = vsel %vm2483_vm8, %v4806_v16, %v4807_v24  ;;  %v4622_v43 = vpack.c.bf16 %v4614_v0, %v4614_v0  ;;  %5069 = vmatpush.bf16.msra.mxu0 %v8766_v18  ;;  %v4855_v41 = vrot.slane %v4853_v23, 3  ;;  %v4858_v10 = vrot.slane %v4856_v34, 4 }
 0x70f   : > { %7718 = vmatmul.msk.bf16.vlgmr.msra.gmra.mxu3 %vm4702_vm12, %v4808_v5 }
 0x710   : > { %v4942_v45 = vunpack.c.l.b16 %v4622_v43  ;;  %v4859_v36 = vor.u32 %v4858_v10, %v4855_v41 }
 0x712   : > { %v4943_v53 = vpack.c.b16 %v4942_v45, %v4804_v42  ;;  %v4860_v2 = vsel %vm4848_vm13, %v4851_v4, %v4859_v36 }
 0x714   : > { %v4945_v26 = vrot.slane %v4943_v53, 2  ;;  %v4994_v28 = vshrl.u32 %v4943_v53, 16  ;;  %v4997_v44 = vshll.u32 %v4943_v53, 16  ;;  %v5042_v12 = vrot.slane %v4943_v53, 3 }
 0x715   : > { %v4616_v19 = vpop.f32.mrf.mxu0 }
 0x716   : > { %v4996_v51 = vrot.slane %v4994_v28, 2  ;;  %v4999_v29 = vrot.slane %v4997_v44, 3  ;;  %v4946_v35 = vsel %vm1821_vm5, %v4944_v58, %v4945_v26  ;;  %v5043_v38 = vsel %vm2483_vm8, %v5041_v56, %v5042_v12 }
 0x717   : > { %7709 = vmatmul.msk.bf16.gmra.mxu2 %vm4702_vm12, %v4762_v55 }
 0x718   : > { %v5000_v39 = vor.u32 %v4999_v29, %v4996_v51  ;;  %v9029_v29 = vld [vmem:[%s12192_s7] ss:$0 sm:$0xff] }
 0x719   : > { %7689 = vmatmul.msk.bf16.gmra.mxu0 %vm4702_vm12, %v4689_v6 }
 0x71a   : > { %v5001_v49 = vsel %vm2205_vm6, %v4992_v25, %v5000_v39 }
 0x71c   : > { %7738 = vmatmul.msk.bf16.vlgmr.msrb.gmra.mxu1 %vm4702_vm12, %v4900_v1 }
 0x71f   : > { %7719 = vmatmul.msk.bf16.gmra.mxu3 %vm4702_vm12, %v4807_v24 }
 0x727   : > { %7748 = vmatmul.msk.bf16.vlgmr.msrb.gmra.mxu2 %vm4702_vm12, %v4946_v35 }
 0x729   : > { %7728 = vmatmul.msk.bf16.vlgmr.msrb.gmra.mxu0 %vm4702_vm12, %v4860_v2 }
 0x72c   : > { %7739 = vmatmul.msk.bf16.gmra.mxu1 %vm4702_vm12, %v4901_v31 }
 0x72f   : > { %7758 = vmatmul.msk.bf16.vlgmr.msrb.gmra.mxu3 %vm4702_vm12, %v5001_v49 }
 0x737   : > { %7749 = vmatmul.msk.bf16.gmra.mxu2 %vm4702_vm12, %v4945_v26 }
 0x739   : > { %7729 = vmatmul.msk.bf16.gmra.mxu0 %vm4702_vm12, %v4859_v36 }
 0x73f   : > { %7759 = vmatmul.msk.bf16.gmra.mxu3 %vm4702_vm12, %v5000_v39 }
 0x749   : > { %7768 = vmatmul.msk.bf16.vlgmr.msra.gmra.mxu0 %vm4702_vm12, %v5043_v38 }
 0x759   : > { %7769 = vmatmul.msk.bf16.gmra.mxu0 %vm4702_vm12, %v5042_v12 }
 0x779   : > { %v4752_v40 = vpop.f32.mrf.mxu1 }
 0x781   : > { %v4754_v52 = vpop.f32.mrf.mxu1 }
 0x786   : > { %v4718_v32 = vpop.f32.mrf.mxu0 }
 0x787   : > { %v4753_v21 = vadd.f32 %v4752_v40, %v4718_v32 }
 0x789   : > { %v4757_v7 = vpop.f32.mrf.mxu1 }
 0x78a   : > { %v4791_v61 = vpop.f32.mrf.mxu2 }
 0x78b   : > { %v4800_v27 = vadd.f32 %v4791_v61, %v4753_v21 }
 0x78e   : > { %v4720_v54 = vpop.f32.mrf.mxu0 }
 0x78f   : > { %v4755_v6 = vadd.f32 %v4754_v52, %v4720_v54 }
 0x791   : > { %v4759_v8 = vpop.f32.mrf.mxu1 }
 0x792   : > { %v4836_v60 = vpop.f32.mrf.mxu3  ;;  %v4793_v17 = vpop.f32.mrf.mxu2 }
 0x793   : > { %v4845_v1 = vadd.f32 %v4836_v60, %v4800_v27  ;;  %v4801_v45 = vadd.f32 %v4793_v17, %v4755_v6  ;;  %v8769_v6 = vld [vmem:[%s12369_s4] sm:$0xff] }
 0x796   : > { %v4723_v63 = vpop.f32.mrf.mxu0 }
 0x797   : > { %v4758_v10 = vadd.f32 %v4757_v7, %v4723_v63 }
 0x799   : > { %v4929_v55 = vpop.f32.mrf.mxu1 }
 0x79a   : > { %v4838_v20 = vpop.f32.mrf.mxu3  ;;  %v4796_v57 = vpop.f32.mrf.mxu2 }
 0x79b   : > { %v4846_v23 = vadd.f32 %v4838_v20, %v4801_v45  ;;  %v4802_v26 = vadd.f32 %v4796_v57, %v4758_v10  ;;  %v8778_v45 = vld [vmem:[%s12369_s4 + $0x48] sm:$0xff]  ;;  %v8773_v10 = vld [vmem:[%s12369_s4 + $0x20] sm:$0xff] }
 0x79e   : > { %v4725_v14 = vpop.f32.mrf.mxu0 }
 0x7a1   : > { %v4931_v30 = vpop.f32.mrf.mxu1 }
 0x7a2   : > { %v4841_v59 = vpop.f32.mrf.mxu3  ;;  %v4798_v22 = vpop.f32.mrf.mxu2 }
 0x7a3   : > { %v4847_v44 = vadd.f32 %v4841_v59, %v4802_v26  ;;  %v5148_v59 = vsel %vm1165_vm3, 4294967295, %v12364_v62  ;;  %v8772_v62 = vld [vmem:[%s12369_s4 + $0x18] sm:$0xff]  ;;  %v8790_v26 = vld [vmem:[%s12369_s4 + $0xa8] sm:$0xff] }
 0x7a4   : > { %5331 = vmatpush.bf16.msra.mxu3 %v8772_v62 }
 0x7a6   : > { %v4888_v13 = vpop.f32.mrf.mxu0 }
 0x7a7   : > { %v4897_v18 = vadd.f32 %v4888_v13, %v4845_v1  ;;  %v8784_v1 = vld [vmem:[%s12369_s4 + $0x78] sm:$0xff] }
 0x7a9   : > { %v4934_v42 = vpop.f32.mrf.mxu1  ;;  %v4938_v46 = vadd.f32 %v4929_v55, %v4897_v18  ;;  %v8792_v18 = vld [vmem:[%s12369_s4 + $0xb8] sm:$0xff] }
 0x7aa   : > { %v4843_v50 = vpop.f32.mrf.mxu3  ;;  %v4974_v47 = vpop.f32.mrf.mxu2 }
 0x7ab   : > { %v4983_v36 = vadd.f32 %v4974_v47, %v4938_v46  ;;  %v5149_v47 = vsel %vm5147_vm14, %v5148_v59, 0  ;;  %v8782_v46 = vld [vmem:[%s12369_s4 + $0x68] sm:$0xff] }
 0x7ae   : > { %v4890_v24 = vpop.f32.mrf.mxu0 }
 0x7af   : > { %v4898_v41 = vadd.f32 %v4890_v24, %v4846_v23  ;;  %v8774_v23 = vld [vmem:[%s12369_s4 + $0x28] sm:$0xff] }
 0x7b1   : > { %v4936_v16 = vpop.f32.mrf.mxu1  ;;  %v4939_v28 = vadd.f32 %v4931_v30, %v4898_v41  ;;  %v8791_v41 = vld [vmem:[%s12369_s4 + $0xb0] sm:$0xff] }
 0x7b2   : > { %v5029_v0 = vpop.f32.mrf.mxu3  ;;  %v4976_v5 = vpop.f32.mrf.mxu2 }
 0x7b3   : > { %v5038_v3 = vadd.f32 %v5029_v0, %v4983_v36  ;;  %v4984_v4 = vadd.f32 %v4976_v5, %v4939_v28  ;;  %v8768_v0 = vld [vmem:[%s12196_s11] sm:$0xff]  ;;  %v8771_v5 = vld [vmem:[%s12369_s4 + $0x10] sm:$0xff]  ;;  %v8788_v28 = vld [vmem:[%s12369_s4 + $0x98] sm:$0xff] }
 0x7b4   : > { %5332 = vmatpush.bf16.msra.mxu3 %v8771_v5  ;;  %v8795_v36 = vld [vmem:[%s12369_s4 + $0xd0] sm:$0xff] }
 0x7b6   : > { %v4893_v9 = vpop.f32.mrf.mxu0 }
 0x7b7   : > { %v4899_v11 = vadd.f32 %v4893_v9, %v4847_v44  ;;  %v8780_v9 = vld [vmem:[%s12369_s4 + $0x58] sm:$0xff]  ;;  %v8781_v44 = vld [vmem:[%s12369_s4 + $0x60] sm:$0xff] }
 0x7b8   : > { %5372 = vmatpush.bf16.msrb.mxu0 %v8780_v9 }
 0x7b9   : > { %v4940_v31 = vadd.f32 %v4934_v42, %v4899_v11  ;;  %v8787_v11 = vld [vmem:[%s12369_s4 + $0x90] sm:$0xff] }
 0x7ba   : > { %v5031_v19 = vpop.f32.mrf.mxu3  ;;  %v4979_v43 = vpop.f32.mrf.mxu2 }
 0x7bb   : > { %v5039_v35 = vadd.f32 %v5031_v19, %v4984_v4  ;;  %v4985_v12 = vadd.f32 %v4979_v43, %v4940_v31  ;;  %v8770_v19 = vld [vmem:[%s12369_s4 + $0x8] sm:$0xff]  ;;  %v8779_v43 = vld [vmem:[%s12369_s4 + $0x50] sm:$0xff] }
 0x7bc   : > { %5333 = vmatpush.bf16.msra.mxu3 %v8770_v19  ;;  %5373 = vmatpush.bf16.msrb.mxu0 %v8779_v43  ;;  %v8794_v4 = vld [vmem:[%s12369_s4 + $0xc8] sm:$0xff]  ;;  %v8042_v19 = vld [vmem:[%s12197_s12 + $0x60] sm:$0xf]  ;;  %v8819_v43 = vld [vmem:[%s12197_s12 + $0x6c] sm:$0xf0] }
 0x7be   : > { %v4895_v37 = vpop.f32.mrf.mxu0 }
 0x7bf   : > { %v8775_v37 = vld [vmem:[%s12369_s4 + $0x30] sm:$0xff] }
 0x7c0   : > { %5334 = vmatpush.bf16.msra.mxu3 %v8769_v6  ;;  %5292 = vmatpush.bf16.msra.mxu2 %v8775_v37  ;;  %v8818_v6 = vld [vmem:[%s12197_s12 + $0x6c] sm:$0xf]  ;;  %v8043_v37 = vor.u32 %v8819_v43, %v8042_v19  ;;  %v8558_v43 = vld [vmem:[%s12198_s13 + $0x3e0] sm:$0xf] }
 0x7c1   : > { %5374 = vmatpush.bf16.msrb.mxu0 %v8778_v45  ;;  %v8817_v45 = vld [vmem:[%s12197_s12 + $0x64] sm:$0xf] }
 0x7c2   : > { %v5034_v34 = vpop.f32.mrf.mxu3  ;;  %v4981_v53 = vpop.f32.mrf.mxu2 }
 0x7c3   : > { %v5040_v38 = vadd.f32 %v5034_v34, %v4985_v12  ;;  %v8783_v34 = vld [vmem:[%s12369_s4 + $0x70] sm:$0xff]  ;;  %v8777_v53 = vld [vmem:[%s12369_s4 + $0x40] sm:$0xff] }
 0x7c4   : > { %5508 = vmatpush.bf16.msrb.mxu3 %v8792_v18  ;;  %5293 = vmatpush.bf16.msra.mxu2 %v8774_v23  ;;  %v8044_v23 = vld [vmem:[%s12197_s12 + $0x70] sm:$0xf0] }
 0x7c5   : > { %5375 = vmatpush.bf16.msrb.mxu0 %v8777_v53  ;;  %v8820_v53 = vld [vmem:[%s12197_s12 + $0x74] sm:$0xf0] }
 0x7c6   : > { %v5071_v48 = vpop.f32.mrf.mxu0 }
 0x7c7   : > { %v5080_v51 = vadd.f32 %v5071_v48, %v5038_v3  ;;  %v8796_v48 = vld [vmem:[%s12369_s4 + $0xd8] sm:$0xff] }
 0x7c8   : > { %5509 = vmatpush.bf16.msrb.mxu3 %v8791_v41  ;;  %5294 = vmatpush.bf16.msra.mxu2 %v8773_v10  ;;  %v8800_v3 = vld [vmem:[%s12369_s4 + $0xf8] sm:$0xff]  ;;  %v8047_v41 = vor.u32 %v8817_v45, %v8044_v23  ;;  %v8302_v45 = vld [vmem:[%s12198_s13 + $0x1e0] sm:$0xf]  ;;  %v8883_v23 = vld [vmem:[%s12198_s13 + $0x1ec] sm:$0xf0] }
 0x7c9   : > { %v5087_v39 = vadd.f32 %v9029_v29, %v5080_v51  ;;  %5549 = vmatpush.bf16.msra.mxu0 %v8796_v48  ;;  %v8786_v51 = vld [vmem:[%s12369_s4 + $0x88] sm:$0xff]  ;;  %v8815_v48 = vld [vmem:[%s12197_s12 + $0x4c] sm:$0xf0] }
 0x7ca   : > { %v5036_v58 = vpop.f32.mrf.mxu3 }
 0x7cb   : > { %v5090_v56 = vmax.f32 %v5087_v39, 0.0  ;;  %v8789_v58 = vld [vmem:[%s12369_s4 + $0xa0] sm:$0xff] }
 0x7cc   : > { %5510 = vmatpush.bf16.msrb.mxu3 %v8790_v26  ;;  %5466 = vmatpush.bf16.msrb.mxu2 %v8788_v28  ;;  %v8814_v26 = vld [vmem:[%s12197_s12 + $0x4c] sm:$0xf] }
 0x7cd   : > { %v5100_v21 = vrot.slane %v5090_v56, 1  ;;  %5550 = vmatpush.bf16.msra.mxu0 %v8795_v36  ;;  %v8813_v36 = vld [vmem:[%s12197_s12 + $0x44] sm:$0xf] }
 0x7ce   : > { %v5073_v2 = vpop.f32.mrf.mxu0 }
 0x7cf   : > { %v5081_v15 = vadd.f32 %v5073_v2, %v5039_v35  ;;  %v8793_v35 = vld [vmem:[%s12369_s4 + $0xc0] sm:$0xff] }
 0x7d0   : > { %5511 = vmatpush.bf16.msrb.mxu3 %v8789_v58  ;;  %5467 = vmatpush.bf16.msrb.mxu2 %v8787_v11  ;;  %v8785_v2 = vld [vmem:[%s12369_s4 + $0x80] sm:$0xff]  ;;  %v8028_v58 = vld [vmem:[%s12197_s12 + $0x50] sm:$0xf0] }
 0x7d1   : > { %v5088_v25 = vadd.f32 %v9029_v29, %v5081_v15  ;;  %5551 = vmatpush.bf16.msra.mxu0 %v8794_v4  ;;  %v8797_v15 = vld [vmem:[%s12369_s4 + $0xe0] sm:$0xff] }
 0x7d3   : > { %v5091_v49 = vmax.f32 %v5088_v25, 0.0 }
 0x7d4   : > { %5468 = vmatpush.bf16.msrb.mxu2 %v8786_v51  ;;  %v8031_v51 = vor.u32 %v8813_v36, %v8028_v58  ;;  %v8286_v58 = vld [vmem:[%s12198_s13 + $0x1c0] sm:$0xf] }
 0x7d5   : > { %v5101_v52 = vrot.slane %v5091_v49, 1  ;;  %5552 = vmatpush.bf16.msra.mxu0 %v8793_v35  ;;  %v8816_v35 = vld [vmem:[%s12197_s12 + $0x54] sm:$0xf0] }
 0x7d6   : > { %v5076_v40 = vpop.f32.mrf.mxu0 }
 0x7d7   : > { %v5082_v32 = vadd.f32 %v5076_v40, %v5040_v38  ;;  %v5102_v61 = vsel %vm1165_vm3, %v5100_v21, %v5101_v52  ;;  %v5106_v30 = vmax.f32 %v5091_v49, %v5101_v52  ;;  %v8804_v21 = vld [vmem:[%s12369_s4 + $0x118] sm:$0xff] }
 0x7d8   : > { %v5105_v8 = vmax.f32 %v5090_v56, %v5102_v61  ;;  %5469 = vmatpush.bf16.msrb.mxu2 %v8785_v2 }
 0x7d9   : > { %v5089_v7 = vadd.f32 %v9029_v29, %v5082_v32  ;;  %v8799_v29 = vld [vmem:[%s12369_s4 + $0xf0] sm:$0xff] }
 0x7da   : > { %v5126_v57 = vrot.slane %v5105_v8, 6 }
 0x7db   : > { %v5092_v27 = vmax.f32 %v5089_v7, 0.0 }
 0x7dd   : > { %v5111_v54 = vrot.slane %v5092_v27, 1 }
 0x7de   : > { %v5078_v60 = vpop.f32.mrf.mxu0 }
 0x7df   : > { %v5112_v17 = vsel %vm1165_vm3, %v5101_v52, %v5111_v54  ;;  %v5116_v63 = vmax.f32 %v5092_v27, %v5111_v54  ;;  %v8803_v54 = vld [vmem:[%s12369_s4 + $0x110] sm:$0xff] }
 0x7e0   : > { %v5115_v55 = vmax.f32 %v5091_v49, %v5112_v17  ;;  %v8802_v17 = vld [vmem:[%s12369_s4 + $0x108] sm:$0xff] }
 0x7e1   : > { %v5129_v20 = vrot.slane %v5116_v63, 6 }
 0x7e2   : > { %v5127_v14 = vrot.slane %v5115_v55, 6 }
 0x7e4   : > { %v5130_v22 = vsel %vm922_vm1, %v5127_v14, %v5129_v20  ;;  %v5128_v13 = vsel %vm922_vm1, %v5126_v57, %v5127_v14  ;;  %v8801_v57 = vld [vmem:[%s12369_s4 + $0x100] sm:$0xff] }
 0x7e5   : > { %v5134_v42 = vmax.f32 %v5106_v30, %v5130_v22  ;;  %v5133_v50 = vmax.f32 %v5105_v8, %v5128_v13 }
 0x7e7   : > { %v5135_v24 = vpack.c.bf16 %v5134_v42, %v5133_v50 }
 0x7e9   : > { %v5151_v16 = vand.u32 %v5149_v47, %v5135_v24 }
 0x7eb   : > { %5160 = vmatpush.bf16.msra.mxu1 %v5151_v16 }
 0x7ee   : > { %7774 = vmatmul.msk.bf16.vlgmr.msra.gmra.mxu1 %vm5143_vm15, %v8768_v0 }
 0x7ef   : > { %5417 = vmatpush.bf16.msrb.mxu1 %v8784_v1  ;;  %v8052_v1 = vld [vmem:[%s12197_s12 + $0x78] sm:$0xf0] }
 0x7f0   : > { %v8055_v18 = vor.u32 %v8818_v6, %v8052_v1  ;;  %v8947_v6 = vld [vmem:[%s12198_s13 + $0x3ec] sm:$0xf0]  ;;  %v8142_v1 = vld [vmem:[%s12198_s13 + $0xa0] sm:$0xf] }
 0x7f3   : > { %5418 = vmatpush.bf16.msrb.mxu1 %v8783_v34  ;;  %v8050_v34 = vld [vmem:[%s12197_s12 + $0x68] sm:$0xf] }
 0x7f4   : > { %v8051_v10 = vor.u32 %v8820_v53, %v8050_v34  ;;  %v8430_v34 = vld [vmem:[%s12198_s13 + $0x2e0] sm:$0xf]  ;;  %v8915_v53 = vld [vmem:[%s12198_s13 + $0x2ec] sm:$0xf0] }
 0x7f7   : > { %5419 = vmatpush.bf16.msrb.mxu1 %v8782_v46  ;;  %v8026_v46 = vld [vmem:[%s12197_s12 + $0x40] sm:$0xf] }
 0x7f8   : > { %v8027_v28 = vor.u32 %v8815_v48, %v8026_v46  ;;  %v8303_v46 = vor.u32 %v8883_v23, %v8302_v45  ;;  %v8431_v48 = vor.u32 %v8915_v53, %v8430_v34  ;;  %v8222_v45 = vld [vmem:[%s12198_s13 + $0x140] sm:$0xf] }
 0x7f9   : > { %v8350_v53 = vld [vmem:[%s12198_s13 + $0x240] sm:$0xf] }
 0x7fb   : > { %5420 = vmatpush.bf16.msrb.mxu1 %v8781_v44  ;;  %v8036_v44 = vld [vmem:[%s12197_s12 + $0x58] sm:$0xf0] }
 0x7fc   : > { %v8039_v4 = vor.u32 %v8814_v26, %v8036_v44  ;;  %v8542_v26 = vld [vmem:[%s12198_s13 + $0x3c0] sm:$0xf] }
 0x7ff   : > { %5598 = vmatpush.bf16.msra.mxu1 %v8800_v3 }
 0x803   : > { %5599 = vmatpush.bf16.msra.mxu1 %v8799_v29  ;;  %v8034_v29 = vld [vmem:[%s12197_s12 + $0x48] sm:$0xf] }
 0x807   : > { %5600 = vmatpush.bf16.msra.mxu1 %v8798_v33  ;;  %v8035_v33 = vor.u32 %v8816_v35, %v8034_v29  ;;  %v8414_v29 = vld [vmem:[%s12198_s13 + $0x2c0] sm:$0xf] }
 0x808   : > { %v8526_v35 = vld [vmem:[%s12198_s13 + $0x3a0] sm:$0xf] }
 0x80b   : > { %5601 = vmatpush.bf16.msra.mxu1 %v8797_v15 }
 0x86b   : > { %v5162_v31 = vpop.f32.mrf.mxu1 }
 0x86c   : > { %v5167_v39 = vpack.c.bf16 %v5162_v31, %v5162_v31  ;;  %v8010_v31 = vld [vmem:[%s12197_s12 + $0x20] sm:$0xf] }
 0x86e   : > { %v5250_v25 = vunpack.c.l.b16 %v5167_v39  ;;  %7872 = vmatmul.msk.bf16.vlgmr.msra.gmra.mxu3 %vm5283_vm0, %v5167_v39  ;;  %v8811_v39 = vld [vmem:[%s12197_s12 + $0x2c] sm:$0xf0] }
 0x86f   : > { %5782 = vmatpush.bf16.msra.mxu3 %v8043_v37  ;;  %v8559_v37 = vor.u32 %v8947_v6, %v8558_v43  ;;  %v8478_v43 = vld [vmem:[%s12198_s13 + $0x340] sm:$0xf]  ;;  %v8927_v6 = vld [vmem:[%s12198_s13 + $0x34c] sm:$0xf0] }
 0x870   : > { %v5251_v49 = vpack.c.b16 %v5250_v25, %v5250_v25 }
 0x872   : > { %v5255_v12 = vshll.u32 %v5251_v49, 16  ;;  %v5340_v56 = vrot.slane %v5251_v49, 1  ;;  %v5253_v40 = vshrl.u32 %v5251_v49, 16 }
 0x873   : > { %v5164_v38 = vpop.f32.mrf.mxu1  ;;  %5783 = vmatpush.bf16.msra.mxu3 %v8027_v28  ;;  %v8943_v28 = vld [vmem:[%s12198_s13 + $0x3cc] sm:$0xf0] }
 0x874   : > { %v5257_v52 = vrot.slane %v5255_v12, 1  ;;  %v5168_v32 = vpack.c.bf16 %v5164_v38, %v5164_v38  ;;  %7889 = vmatmul.msk.bf16.vlgmr.msrb.gmra.mxu0 %vm5283_vm0, %v5340_v56  ;;  %v8011_v12 = vor.u32 %v8811_v39, %v8010_v31  ;;  %v8020_v56 = vld [vmem:[%s12197_s12 + $0x38] sm:$0xf0]  ;;  %v8809_v38 = vld [vmem:[%s12197_s12 + $0x24] sm:$0xf]  ;;  %v8543_v36 = vor.u32 %v8943_v28, %v8542_v26 }
 0x875   : > { %5795 = vmatpush.bf16.msrb.mxu0 %v8047_v41  ;;  %v8839_v31 = vld [vmem:[%s12198_s13 + $0x8c] sm:$0xf0]  ;;  %v8462_v28 = vld [vmem:[%s12198_s13 + $0x320] sm:$0xf] }
 0x876   : > { %v5258_v7 = vor.u32 %v5257_v52, %v5253_v40  ;;  %v5383_v61 = vunpack.c.l.b16 %v5168_v32  ;;  %v8012_v40 = vld [vmem:[%s12197_s12 + $0x30] sm:$0xf0] }
 0x877   : > { %5784 = vmatpush.bf16.msra.mxu3 %v8011_v12  ;;  %v8270_v12 = vld [vmem:[%s12198_s13 + $0x1a0] sm:$0xf] }
 0x878   : > { %7855 = vmatmul.msk.bf16.vlgmr.msra.gmra.mxu2 %vm5283_vm0, %v5258_v7  ;;  %v5384_v27 = vpack.c.b16 %v5383_v61, %v5250_v25  ;;  %v5559_v20 = vpack.c.b16 %v5383_v61, %v5383_v61  ;;  %v8810_v25 = vld [vmem:[%s12197_s12 + $0x2c] sm:$0xf]  ;;  %v8812_v7 = vld [vmem:[%s12197_s12 + $0x34] sm:$0xf0] }
 0x879   : > { %5640 = vmatpush.bf16.msra.mxu2 %v8804_v21  ;;  %5796 = vmatpush.bf16.msrb.mxu0 %v8031_v51  ;;  %v8023_v52 = vor.u32 %v8810_v25, %v8020_v56  ;;  %v8018_v21 = vld [vmem:[%s12197_s12 + $0x28] sm:$0xf]  ;;  %v8939_v25 = vld [vmem:[%s12198_s13 + $0x3ac] sm:$0xf0] }
 0x87a   : > { %v5385_v8 = vrot.slane %v5384_v27, 2  ;;  %v5476_v60 = vrot.slane %v5384_v27, 3  ;;  %v5428_v63 = vshrl.u32 %v5384_v27, 16  ;;  %v5431_v55 = vshll.u32 %v5384_v27, 16  ;;  %v7994_v27 = vld [vmem:[%s12197_s12] sm:$0xf] }
 0x87b   : > { %v5563_v59 = vshll.u32 %v5559_v20, 16  ;;  %v5561_v42 = vshrl.u32 %v5559_v20, 16  ;;  %v5608_v47 = vrot.slane %v5559_v20, 1  ;;  %v8019_v61 = vor.u32 %v8812_v7, %v8018_v21  ;;  %v7996_v20 = vld [vmem:[%s12197_s12 + $0x10] sm:$0xf0] }
 0x87c   : > { %7906 = vmatmul.msk.bf16.vlgmr.msrb.gmra.mxu1 %vm5283_vm0, %v5385_v8  ;;  %v5430_v14 = vrot.slane %v5428_v63, 2  ;;  %v5433_v30 = vrot.slane %v5431_v55, 3  ;;  %v8806_v8 = vld [vmem:[%s12197_s12 + $0xc] sm:$0xf]  ;;  %v8004_v63 = vld [vmem:[%s12197_s12 + $0x18] sm:$0xf0] }
 0x87d   : > { %5641 = vmatpush.bf16.msra.mxu2 %v8803_v54  ;;  %v5565_v13 = vrot.slane %v5563_v59, 1  ;;  %5808 = vmatpush.bf16.msrb.mxu1 %v8051_v10  ;;  %v8807_v54 = vld [vmem:[%s12197_s12 + $0xc] sm:$0xf0]  ;;  %v8805_v55 = vld [vmem:[%s12197_s12 + $0x4] sm:$0xf] }
 0x87e   : > { %7940 = vmatmul.msk.bf16.vlgmr.msrb.gmra.mxu3 %vm5283_vm0, %v5476_v60  ;;  %v5434_v22 = vor.u32 %v5433_v30, %v5430_v14  ;;  %v8007_v14 = vor.u32 %v8806_v8, %v8004_v63  ;;  %v7999_v30 = vor.u32 %v8805_v55, %v7996_v20  ;;  %v8002_v59 = vld [vmem:[%s12197_s12 + $0x8] sm:$0xf]  ;;  %v8843_v10 = vld [vmem:[%s12198_s13 + $0xac] sm:$0xf0]  ;;  %v8382_v8 = vld [vmem:[%s12198_s13 + $0x280] sm:$0xf] }
 0x87f   : > { %v5566_v50 = vor.u32 %v5565_v13, %v5561_v42  ;;  %v8875_v56 = vld [vmem:[%s12198_s13 + $0x1ac] sm:$0xf0] }
 0x880   : > { %v8935_v21 = vld [vmem:[%s12198_s13 + $0x38c] sm:$0xf0]  ;;  %v8271_v7 = vor.u32 %v8875_v56, %v8270_v12  ;;  %v8176_v12 = vld [vmem:[%s12198_s13 + $0xf0] sm:$0xf0] }
 0x881   : > { %5642 = vmatpush.bf16.msra.mxu2 %v8802_v17  ;;  %5809 = vmatpush.bf16.msrb.mxu1 %v8035_v33  ;;  %v7995_v17 = vor.u32 %v8807_v54, %v7994_v27  ;;  %v8143_v33 = vor.u32 %v8843_v10, %v8142_v1  ;;  %v8871_v54 = vld [vmem:[%s12198_s13 + $0x18c] sm:$0xf0]  ;;  %v8078_v10 = vld [vmem:[%s12198_s13 + $0x20] sm:$0xf] }
 0x882   : > { %v8835_v63 = vld [vmem:[%s12198_s13 + $0x6c] sm:$0xf0] }
 0x883   : > { %5785 = vmatpush.bf16.msra.mxu3 %v7995_v17  ;;  %v8110_v17 = vld [vmem:[%s12198_s13 + $0x60] sm:$0xf] }
 0x884   : > { %7957 = vmatmul.msk.bf16.vlgmr.msra.gmra.mxu0 %vm5283_vm0, %v5168_v32  ;;  %v8015_v32 = vor.u32 %v8809_v38, %v8012_v40  ;;  %v8398_v38 = vld [vmem:[%s12198_s13 + $0x2a0] sm:$0xf] }
 0x885   : > { %5643 = vmatpush.bf16.msra.mxu2 %v8801_v57  ;;  %5810 = vmatpush.bf16.msrb.mxu1 %v8019_v61 }
 0x886   : > { %5797 = vmatpush.bf16.msrb.mxu0 %v8015_v32  ;;  %v8510_v32 = vld [vmem:[%s12198_s13 + $0x380] sm:$0xf] }
 0x887   : > { %v8511_v55 = vor.u32 %v8935_v21, %v8510_v32  ;;  %v8945_v32 = vld [vmem:[%s12198_s13 + $0x3e4] sm:$0xf] }
 0x888   : > { %7923 = vmatmul.msk.bf16.vlgmr.msrb.gmra.mxu2 %vm5283_vm0, %v5434_v22  ;;  %v8808_v22 = vld [vmem:[%s12197_s12 + $0x14] sm:$0xf0] }
 0x889   : > { %5821 = vmatpush.bf16.msrb.mxu2 %v8055_v18  ;;  %v8003_v42 = vor.u32 %v8808_v22, %v8002_v59  ;;  %v8931_v59 = vld [vmem:[%s12198_s13 + $0x36c] sm:$0xf0] }
 0x88a   : > { %5798 = vmatpush.bf16.msrb.mxu0 %v7999_v30  ;;  %v8494_v30 = vld [vmem:[%s12198_s13 + $0x360] sm:$0xf] }
 0x88b   : > { %5811 = vmatpush.bf16.msrb.mxu1 %v8003_v42 }
 0x88c   : > { %7974 = vmatmul.msk.bf16.vlgmr.msra.gmra.mxu1 %vm5283_vm0, %v5566_v50 }
 0x88d   : > { %5822 = vmatpush.bf16.msrb.mxu2 %v8039_v4 }
 0x88e   : > { %6629 = vmatpush.bf16.msra.mxu0 %v8303_v46  ;;  %v8827_v46 = vld [vmem:[%s12198_s13 + $0x2c] sm:$0xf0] }
 0x88f   : > { %6642 = vmatpush.bf16.msra.mxu1 %v8431_v48  ;;  %v8479_v48 = vor.u32 %v8927_v6, %v8478_v43  ;;  %v8841_v43 = vld [vmem:[%s12198_s13 + $0xa4] sm:$0xf] }
 0x891   : > { %5823 = vmatpush.bf16.msrb.mxu2 %v8023_v52  ;;  %v8907_v52 = vld [vmem:[%s12198_s13 + $0x2ac] sm:$0xf0] }
 0x892   : > { %v8399_v61 = vor.u32 %v8907_v52, %v8398_v38  ;;  %v8919_v52 = vld [vmem:[%s12198_s13 + $0x30c] sm:$0xf0] }
 0x895   : > { %5824 = vmatpush.bf16.msrb.mxu2 %v8007_v14  ;;  %v9030_v14 = vld [vmem:[%s12193_s8] ss:$0 sm:$0xff] }
 0x898   : > { %7991 = vmatmul.msk.bf16.vlgmr.msra.gmra.mxu2 %vm5283_vm0, %v5608_v47 }
 0x899   : > { %6655 = vmatpush.bf16.msra.mxu2 %v8559_v37 }
 0x89d   : > { %6656 = vmatpush.bf16.msra.mxu2 %v8543_v36 }
 0x8f1   : > { %v5336_v24 = vpop.f32.mrf.mxu3  ;;  %v5377_v16 = vpop.f32.mrf.mxu0 }
 0x8f9   : > { %v11135_v0 = vpop.f32.mrf.mxu1  ;;  %v5338_v62 = vpop.f32.mrf.mxu3 }
 0x8fa   : > { %v5379_v5 = vpop.f32.mrf.mxu0  ;;  %v8851_v62 = vld [vmem:[%s12198_s13 + $0xec] sm:$0xf0] }
 0x8fb   : > { %v5296_v9 = vpop.f32.mrf.mxu2  ;;  %v8158_v5 = vld [vmem:[%s12198_s13 + $0xc0] sm:$0xf] }
 0x8fc   : > { %v5337_v49 = vadd.f32 %v5336_v24, %v5296_v9 }
 0x8fe   : > { %v5381_v60 = vadd.f32 %v5377_v16, %v5337_v49  ;;  %v8174_v16 = vld [vmem:[%s12198_s13 + $0xe0] sm:$0xf]  ;;  %v8527_v49 = vor.u32 %v8939_v25, %v8526_v35 }
 0x8ff   : > { %v8175_v19 = vor.u32 %v8851_v62, %v8174_v16  ;;  %v8366_v16 = vld [vmem:[%s12198_s13 + $0x260] sm:$0xf]  ;;  %v8899_v62 = vld [vmem:[%s12198_s13 + $0x26c] sm:$0xf0] }
 0x900   : > { %v5426_v24 = vadd.f32 %v11135_v0, %v5381_v60  ;;  %v8847_v0 = vld [vmem:[%s12198_s13 + $0xcc] sm:$0xf0]  ;;  %6657 = vmatpush.bf16.msra.mxu2 %v8527_v49  ;;  %v8367_v1 = vor.u32 %v8899_v62, %v8366_v16  ;;  %v8334_v35 = vld [vmem:[%s12198_s13 + $0x220] sm:$0xf]  ;;  %v8849_v49 = vld [vmem:[%s12198_s13 + $0xe4] sm:$0xf] }
 0x901   : > { %v5424_v11 = vpop.f32.mrf.mxu1  ;;  %v11179_v3 = vpop.f32.mrf.mxu3  ;;  %6616 = vmatpush.bf16.msrb.mxu3 %v8175_v19  ;;  %v8159_v18 = vor.u32 %v8847_v0, %v8158_v5  ;;  %v8903_v60 = vld [vmem:[%s12198_s13 + $0x28c] sm:$0xf0]  ;;  %v8094_v5 = vld [vmem:[%s12198_s13 + $0x40] sm:$0xf]  ;;  %v8495_v19 = vor.u32 %v8931_v59, %v8494_v30  ;;  %v8179_v30 = vor.u32 %v8849_v49, %v8176_v12  ;;  %v8845_v59 = vld [vmem:[%s12198_s13 + $0xc4] sm:$0xf] }
 0x902   : > { %v11187_v2 = vpop.f32.mrf.mxu0  ;;  %v8879_v11 = vld [vmem:[%s12198_s13 + $0x1cc] sm:$0xf0]  ;;  %v8383_v42 = vor.u32 %v8903_v60, %v8382_v8  ;;  %v8877_v62 = vld [vmem:[%s12198_s13 + $0x1c4] sm:$0xf] }
 0x903   : > { %v5298_v15 = vpop.f32.mrf.mxu2  ;;  %v8287_v51 = vor.u32 %v8879_v11, %v8286_v58  ;;  %v8887_v8 = vld [vmem:[%s12198_s13 + $0x20c] sm:$0xf0]  ;;  %v8901_v12 = vld [vmem:[%s12198_s13 + $0x284] sm:$0xf] }
 0x904   : > { %v8126_v15 = vld [vmem:[%s12198_s13 + $0x80] sm:$0xf]  ;;  %6658 = vmatpush.bf16.msra.mxu2 %v8511_v55  ;;  %v8304_v55 = vld [vmem:[%s12198_s13 + $0x1f0] sm:$0xf0] }
 0x905   : > { %6617 = vmatpush.bf16.msrb.mxu3 %v8159_v18  ;;  %6630 = vmatpush.bf16.msra.mxu0 %v8287_v51  ;;  %v8127_v27 = vor.u32 %v8839_v31, %v8126_v15  ;;  %v8863_v18 = vld [vmem:[%s12198_s13 + $0x14c] sm:$0xf0]  ;;  %v8062_v15 = vld [vmem:[%s12198_s13] sm:$0xf] }
 0x906   : > { %v8223_v58 = vor.u32 %v8863_v18, %v8222_v45  ;;  %v8823_v31 = vld [vmem:[%s12198_s13 + $0xc] sm:$0xf0]  ;;  %v8528_v45 = vld [vmem:[%s12198_s13 + $0x3b0] sm:$0xf0] }
 0x908   : > { %6659 = vmatpush.bf16.msra.mxu2 %v8495_v19  ;;  %v8416_v19 = vld [vmem:[%s12198_s13 + $0x2d0] sm:$0xf0] }
 0x909   : > { %v11231_v57 = vpop.f32.mrf.mxu1  ;;  %v5515_v13 = vpop.f32.mrf.mxu3  ;;  %6618 = vmatpush.bf16.msrb.mxu3 %v8143_v33  ;;  %6631 = vmatpush.bf16.msra.mxu0 %v8271_v7  ;;  %v8891_v33 = vld [vmem:[%s12198_s13 + $0x22c] sm:$0xf0]  ;;  %v8560_v7 = vld [vmem:[%s12198_s13 + $0x3f0] sm:$0xf0] }
 0x90a   : > { %v5556_v50 = vpop.f32.mrf.mxu0  ;;  %v8335_v38 = vor.u32 %v8891_v33, %v8334_v35  ;;  %v8833_v35 = vld [vmem:[%s12198_s13 + $0x64] sm:$0xf]  ;;  %v8112_v33 = vld [vmem:[%s12198_s13 + $0x70] sm:$0xf0] }
 0x90b   : > { %v5471_v47 = vpop.f32.mrf.mxu2 }
 0x90c   : > { %v5475_v9 = vadd.f32 %v5471_v47, %v5426_v24  ;;  %v8111_v47 = vor.u32 %v8835_v63, %v8110_v17  ;;  %v8867_v24 = vld [vmem:[%s12198_s13 + $0x16c] sm:$0xf0]  ;;  %6660 = vmatpush.bf16.msra.mxu2 %v8479_v48  ;;  %v8063_v17 = vor.u32 %v8823_v31, %v8062_v15  ;;  %v8837_v48 = vld [vmem:[%s12198_s13 + $0x84] sm:$0xf]  ;;  %v8115_v31 = vor.u32 %v8833_v35, %v8112_v33 }
 0x90d   : > { %6619 = vmatpush.bf16.msrb.mxu3 %v8127_v27  ;;  %v8881_v27 = vld [vmem:[%s12198_s13 + $0x1e4] sm:$0xf] }
 0x90e   : > { %v5517_v44 = vadd.f32 %v11179_v3, %v5475_v9  ;;  %v8911_v3 = vld [vmem:[%s12198_s13 + $0x2cc] sm:$0xf0] }
 0x90f   : > { %v8415_v39 = vor.u32 %v8911_v3, %v8414_v29  ;;  %v8831_v9 = vld [vmem:[%s12198_s13 + $0x4c] sm:$0xf0]  ;;  %v8079_v29 = vor.u32 %v8827_v46, %v8078_v10  ;;  %v8400_v10 = vld [vmem:[%s12198_s13 + $0x2b0] sm:$0xf0] }
 0x910   : > { %v5558_v40 = vadd.f32 %v11187_v2, %v5517_v44  ;;  %v8254_v2 = vld [vmem:[%s12198_s13 + $0x180] sm:$0xf]  ;;  %v8095_v34 = vor.u32 %v8831_v9, %v8094_v5  ;;  %v8923_v44 = vld [vmem:[%s12198_s13 + $0x32c] sm:$0xf0]  ;;  %v8288_v5 = vld [vmem:[%s12198_s13 + $0x1d0] sm:$0xf0] }
 0x911   : > { %v5605_v41 = vpop.f32.mrf.mxu1  ;;  %6643 = vmatpush.bf16.msra.mxu1 %v8415_v39  ;;  %v8255_v13 = vor.u32 %v8871_v54, %v8254_v2  ;;  %6620 = vmatpush.bf16.msrb.mxu3 %v8111_v47  ;;  %v8859_v3 = vld [vmem:[%s12198_s13 + $0x12c] sm:$0xf0]  ;;  %v8463_v39 = vor.u32 %v8923_v44, %v8462_v28  ;;  %v8318_v54 = vld [vmem:[%s12198_s13 + $0x200] sm:$0xf]  ;;  %v8544_v47 = vld [vmem:[%s12198_s13 + $0x3d0] sm:$0xf0]  ;;  %v8291_v18 = vor.u32 %v8877_v62, %v8288_v5 }
 0x912   : > { %v5607_v20 = vadd.f32 %v11231_v57, %v5558_v40  ;;  %v8238_v57 = vld [vmem:[%s12198_s13 + $0x160] sm:$0xf]  ;;  %v8895_v41 = vld [vmem:[%s12198_s13 + $0x24c] sm:$0xf0]  ;;  %v8909_v9 = vld [vmem:[%s12198_s13 + $0x2c4] sm:$0xf] }
 0x913   : > { %v5473_v4 = vpop.f32.mrf.mxu2  ;;  %6632 = vmatpush.bf16.msra.mxu0 %v8255_v13  ;;  %v8239_v37 = vor.u32 %v8867_v24, %v8238_v57  ;;  %v8351_v11 = vor.u32 %v8895_v41, %v8350_v53  ;;  %v8446_v40 = vld [vmem:[%s12198_s13 + $0x300] sm:$0xf]  ;;  %v8855_v2 = vld [vmem:[%s12198_s13 + $0x10c] sm:$0xf0]  ;;  %6661 = vmatpush.bf16.msra.mxu2 %v8463_v39  ;;  %v8160_v13 = vld [vmem:[%s12198_s13 + $0xd0] sm:$0xf0]  ;;  %v8319_v57 = vor.u32 %v8887_v8, %v8318_v54 }
 0x914   : > { %v8206_v4 = vld [vmem:[%s12198_s13 + $0x120] sm:$0xf]  ;;  %v8447_v63 = vor.u32 %v8919_v52, %v8446_v40  ;;  %v8307_v24 = vor.u32 %v8881_v27, %v8304_v55  ;;  %v8272_v53 = vld [vmem:[%s12198_s13 + $0x1b0] sm:$0xf0]  ;;  %v8905_v41 = vld [vmem:[%s12198_s13 + $0x2a4] sm:$0xf] }
 0x915   : > { %6644 = vmatpush.bf16.msra.mxu1 %v8399_v61  ;;  %6621 = vmatpush.bf16.msrb.mxu3 %v8095_v34  ;;  %v8207_v56 = vor.u32 %v8859_v3, %v8206_v4  ;;  %v8190_v61 = vld [vmem:[%s12198_s13 + $0x100] sm:$0xf]  ;;  %v8873_v34 = vld [vmem:[%s12198_s13 + $0x1a4] sm:$0xf]  ;;  %v8128_v28 = vld [vmem:[%s12198_s13 + $0x90] sm:$0xf0] }
 0x916   : > { %v8933_v44 = vld [vmem:[%s12198_s13 + $0x384] sm:$0xf]  ;;  %v8240_v52 = vld [vmem:[%s12198_s13 + $0x170] sm:$0xf0] }
 0x917   : > { %6633 = vmatpush.bf16.msra.mxu0 %v8239_v37  ;;  %6662 = vmatpush.bf16.msra.mxu2 %v8447_v63  ;;  %v8144_v37 = vld [vmem:[%s12198_s13 + $0xb0] sm:$0xf0]  ;;  %v8869_v4 = vld [vmem:[%s12198_s13 + $0x184] sm:$0xf] }
 0x918   : > { %v8147_v46 = vor.u32 %v8841_v43, %v8144_v37  ;;  %v8829_v39 = vld [vmem:[%s12198_s13 + $0x44] sm:$0xf]  ;;  %v8224_v27 = vld [vmem:[%s12198_s13 + $0x150] sm:$0xf0] }
 0x919   : > { %6645 = vmatpush.bf16.msra.mxu1 %v8383_v42  ;;  %6622 = vmatpush.bf16.msrb.mxu3 %v8079_v29  ;;  %v8191_v42 = vor.u32 %v8855_v2, %v8190_v61  ;;  %v8131_v29 = vor.u32 %v8837_v48, %v8128_v28  ;;  %v8865_v40 = vld [vmem:[%s12198_s13 + $0x164] sm:$0xf]  ;;  %v8496_v63 = vld [vmem:[%s12198_s13 + $0x370] sm:$0xf0] }
 0x91a   : > { %v8861_v2 = vld [vmem:[%s12198_s13 + $0x144] sm:$0xf]  ;;  %v8320_v37 = vld [vmem:[%s12198_s13 + $0x210] sm:$0xf0] }
 0x91b   : > { %v5645_v22 = vpop.f32.mrf.mxu2  ;;  %6634 = vmatpush.bf16.msra.mxu0 %v8223_v58  ;;  %v8275_v58 = vor.u32 %v8873_v34, %v8272_v53  ;;  %v8893_v54 = vld [vmem:[%s12198_s13 + $0x244] sm:$0xf]  ;;  %v8227_v8 = vor.u32 %v8861_v2, %v8224_v27  ;;  %v8880_v2 = vld [vmem:[%s12198_s13 + $0x1d4] sm:$0xf0]  ;;  %v8422_v27 = vld [vmem:[%s12198_s13 + $0x2c8] sm:$0xf] }
 0x91c   : > { %v5649_v50 = vadd.f32 %v5645_v22, %v5607_v20  ;;  %v8913_v20 = vld [vmem:[%s12198_s13 + $0x2e4] sm:$0xf]  ;;  %v8563_v22 = vor.u32 %v8945_v32, %v8560_v7  ;;  %v8368_v7 = vld [vmem:[%s12198_s13 + $0x270] sm:$0xf0] }
 0x91d   : > { %6646 = vmatpush.bf16.msra.mxu1 %v8367_v1  ;;  %6623 = vmatpush.bf16.msrb.mxu3 %v8063_v17  ;;  %v8937_v1 = vld [vmem:[%s12198_s13 + $0x3a4] sm:$0xf] }
 0x91e   : > { %v5654_v0 = vadd.f32 %v9030_v14, %v5649_v50  ;;  %v8432_v14 = vld [vmem:[%s12198_s13 + $0x2f0] sm:$0xf0]  ;;  %v8941_v50 = vld [vmem:[%s12198_s13 + $0x3c4] sm:$0xf] }
 0x91f   : > { %6635 = vmatpush.bf16.msra.mxu0 %v8207_v56  ;;  %v8435_v16 = vor.u32 %v8913_v20, %v8432_v14  ;;  %v8547_v6 = vor.u32 %v8941_v50, %v8544_v47  ;;  %v8384_v56 = vld [vmem:[%s12198_s13 + $0x290] sm:$0xf0]  ;;  %v8897_v32 = vld [vmem:[%s12198_s13 + $0x264] sm:$0xf] }
 0x920   : > { %v5655_v23 = vmax.f32 %v5654_v0, 0.0  ;;  %v8163_v0 = vor.u32 %v8845_v59, %v8160_v13  ;;  %v8371_v61 = vor.u32 %v8897_v32, %v8368_v7  ;;  %v8929_v17 = vld [vmem:[%s12198_s13 + $0x364] sm:$0xf]  ;;  %v8336_v13 = vld [vmem:[%s12198_s13 + $0x230] sm:$0xf0] }
 0x921   : > { %6647 = vmatpush.bf16.msra.mxu1 %v8351_v11  ;;  %v8403_v11 = vor.u32 %v8905_v41, %v8400_v10  ;;  %v8499_v20 = vor.u32 %v8929_v17, %v8496_v63  ;;  %v8857_v14 = vld [vmem:[%s12198_s13 + $0x124] sm:$0xf]  ;;  %v8448_v41 = vld [vmem:[%s12198_s13 + $0x310] sm:$0xf0]  ;;  %v8948_v7 = vld [vmem:[%s12198_s13 + $0x3f4] sm:$0xf0] }
 0x922   : > { %v5659_v26 = vrot.slane %v5655_v23, 1  ;;  %v8885_v5 = vld [vmem:[%s12198_s13 + $0x204] sm:$0xf] }
 0x923   : > { %v5647_v36 = vpop.f32.mrf.mxu2  ;;  %6636 = vmatpush.bf16.msra.mxu0 %v8191_v42  ;;  %v8925_v42 = vld [vmem:[%s12198_s13 + $0x344] sm:$0xf] }
 0x924   : > { %v5661_v51 = vmax.f32 %v5655_v23, %v5659_v26  ;;  %v8419_v23 = vor.u32 %v8909_v9, %v8416_v19  ;;  %v8531_v26 = vor.u32 %v8937_v1, %v8528_v45  ;;  %v8512_v36 = vld [vmem:[%s12198_s13 + $0x390] sm:$0xf0]  ;;  %v8825_v9 = vld [vmem:[%s12198_s13 + $0x24] sm:$0xf]  ;;  %v8323_v45 = vor.u32 %v8885_v5, %v8320_v37  ;;  %v8534_v37 = vld [vmem:[%s12198_s13 + $0x3a8] sm:$0xf] }
 0x925   : > { %6648 = vmatpush.bf16.msra.mxu1 %v8335_v38  ;;  %v8515_v3 = vor.u32 %v8933_v44, %v8512_v36  ;;  %v8387_v38 = vor.u32 %v8901_v12, %v8384_v56  ;;  %v8080_v19 = vld [vmem:[%s12198_s13 + $0x30] sm:$0xf0]  ;;  %v8921_v43 = vld [vmem:[%s12198_s13 + $0x324] sm:$0xf]  ;;  %v8310_v36 = vld [vmem:[%s12198_s13 + $0x1e8] sm:$0xf] }
 0x926   : > { %v5665_v25 = vrot.slane %v5661_v51, 4  ;;  %v8917_v34 = vld [vmem:[%s12198_s13 + $0x304] sm:$0xf]  ;;  %v8182_v12 = vld [vmem:[%s12198_s13 + $0xe8] sm:$0xf] }
 0x927   : > { %v8451_v10 = vor.u32 %v8917_v34, %v8448_v41  ;;  %v8852_v56 = vld [vmem:[%s12198_s13 + $0xf4] sm:$0xf0] }
 0x928   : > { %v5667_v21 = vmax.f32 %v5661_v51, %v5665_v25  ;;  %v8256_v51 = vld [vmem:[%s12198_s13 + $0x190] sm:$0xf0]  ;;  %v8872_v34 = vld [vmem:[%s12198_s13 + $0x194] sm:$0xf0] }
 0x929   : > { %6649 = vmatpush.bf16.msra.mxu1 %v8319_v57  ;;  %v8259_v15 = vor.u32 %v8869_v4, %v8256_v51  ;;  %v8096_v25 = vld [vmem:[%s12198_s13 + $0x50] sm:$0xf0]  ;;  %v8884_v4 = vld [vmem:[%s12198_s13 + $0x1f4] sm:$0xf0]  ;;  %v8438_v51 = vld [vmem:[%s12198_s13 + $0x2e8] sm:$0xf] }
 0x92a   : > { %v5668_v60 = vpack.c.bf16 %v5667_v21, %v5667_v21  ;;  %v8099_v49 = vor.u32 %v8829_v39, %v8096_v25  ;;  %v8243_v21 = vor.u32 %v8865_v40, %v8240_v52  ;;  %v8480_v57 = vld [vmem:[%s12198_s13 + $0x350] sm:$0xf0]  ;;  %v8904_v41 = vld [vmem:[%s12198_s13 + $0x294] sm:$0xf0] }
 0x92b   : > { %v8483_v47 = vor.u32 %v8925_v42, %v8480_v57  ;;  %v8944_v42 = vld [vmem:[%s12198_s13 + $0x3d4] sm:$0xf0] }
 0x92c   : > { %8056 = vmatmul.msk.bf16.vlgmr.msra.gmra.mxu3 %vm5283_vm0, %v5668_v60  ;;  %8059 = vmatmul.msk.bf16.vlgmr.msrb.gmra.mxu2 %vm5283_vm0, %v5668_v60 }
 0x92d   : > { %8057 = vmatmul.msk.bf16.vlgmr.msrb.gmra.mxu0 %vm5283_vm0, %v5668_v60  ;;  %8058 = vmatmul.msk.bf16.vlgmr.msrb.gmra.mxu1 %vm5283_vm0, %v5668_v60  ;;  %v8352_v60 = vld [vmem:[%s12198_s13 + $0x250] sm:$0xf0] }
 0x92e   : > { %6668 = vmatpush.bf16.msra.mxu3 %v8179_v30  ;;  %6707 = vmatpush.bf16.msrb.mxu2 %v8563_v22  ;;  %v8355_v55 = vor.u32 %v8893_v54, %v8352_v60  ;;  %v8208_v30 = vld [vmem:[%s12198_s13 + $0x130] sm:$0xf0]  ;;  %v8889_v22 = vld [vmem:[%s12198_s13 + $0x224] sm:$0xf]  ;;  %v8912_v54 = vld [vmem:[%s12198_s13 + $0x2d4] sm:$0xf0] }
 0x92f   : > { %6681 = vmatpush.bf16.msrb.mxu0 %v8307_v24  ;;  %6694 = vmatpush.bf16.msrb.mxu1 %v8435_v16  ;;  %v8211_v59 = vor.u32 %v8857_v14, %v8208_v30  ;;  %v8339_v50 = vor.u32 %v8889_v22, %v8336_v13  ;;  %v8853_v24 = vld [vmem:[%s12198_s13 + $0x104] sm:$0xf]  ;;  %v8192_v16 = vld [vmem:[%s12198_s13 + $0x110] sm:$0xf0]  ;;  %v8848_v14 = vld [vmem:[%s12198_s13 + $0xd4] sm:$0xf0] }
 0x930   : > { %v8195_v62 = vor.u32 %v8853_v24, %v8192_v16  ;;  %v8550_v13 = vld [vmem:[%s12198_s13 + $0x3c8] sm:$0xf]  ;;  %v8876_v24 = vld [vmem:[%s12198_s13 + $0x1b4] sm:$0xf0] }
 0x931   : > { %v8406_v16 = vld [vmem:[%s12198_s13 + $0x2a8] sm:$0xf] }
 0x932   : > { %6669 = vmatpush.bf16.msra.mxu3 %v8163_v0  ;;  %6708 = vmatpush.bf16.msrb.mxu2 %v8547_v6  ;;  %v8083_v0 = vor.u32 %v8825_v9, %v8080_v19  ;;  %v8464_v6 = vld [vmem:[%s12198_s13 + $0x330] sm:$0xf0]  ;;  %v8150_v9 = vld [vmem:[%s12198_s13 + $0xa8] sm:$0xf]  ;;  %v8844_v19 = vld [vmem:[%s12198_s13 + $0xb4] sm:$0xf0] }
 0x933   : > { %6682 = vmatpush.bf16.msrb.mxu0 %v8291_v18  ;;  %6695 = vmatpush.bf16.msrb.mxu1 %v8419_v23  ;;  %v8467_v1 = vor.u32 %v8921_v43, %v8464_v6  ;;  %v8821_v18 = vld [vmem:[%s12198_s13 + $0x4] sm:$0xf]  ;;  %v8064_v23 = vld [vmem:[%s12198_s13 + $0x10] sm:$0xf0] }
 0x934   : > { %v8067_v53 = vor.u32 %v8821_v18, %v8064_v23  ;;  %v8262_v23 = vld [vmem:[%s12198_s13 + $0x188] sm:$0xf] }
 0x936   : > { %6670 = vmatpush.bf16.msra.mxu3 %v8147_v46  ;;  %6709 = vmatpush.bf16.msrb.mxu2 %v8531_v26  ;;  %v5685_v46 = vld [vmem:[%s12200_s15] sm:$0xf] }
 0x937   : > { %6683 = vmatpush.bf16.msrb.mxu0 %v8275_v58  ;;  %6696 = vmatpush.bf16.msrb.mxu1 %v8403_v11  ;;  %v5768_v48 = vperm.slane %v5685_v46, 1  ;;  %v5769_v26 = vperm.slane %v5685_v46, 2  ;;  %v5770_v35 = vperm.slane %v5685_v46, 3 }
 0x93a   : > { %6671 = vmatpush.bf16.msra.mxu3 %v8131_v29  ;;  %6710 = vmatpush.bf16.msrb.mxu2 %v8515_v3  ;;  %v8916_v29 = vld [vmem:[%s12198_s13 + $0x2f4] sm:$0xf0]  ;;  %v5767_v3 = vperm.slane %v5685_v46, 0  ;;  %v8134_v46 = vld [vmem:[%s12198_s13 + $0x88] sm:$0xf] }
 0x93b   : > { %6684 = vmatpush.bf16.msrb.mxu0 %v8259_v15  ;;  %6697 = vmatpush.bf16.msrb.mxu1 %v8387_v38  ;;  %v8439_v39 = vor.u32 %v8916_v29, %v8438_v51  ;;  %v8374_v51 = vld [vmem:[%s12198_s13 + $0x268] sm:$0xf]  ;;  %v8900_v29 = vld [vmem:[%s12198_s13 + $0x274] sm:$0xf0] }
 0x93e   : > { %6672 = vmatpush.bf16.msra.mxu3 %v8115_v31  ;;  %6711 = vmatpush.bf16.msrb.mxu2 %v8499_v20  ;;  %v8311_v31 = vor.u32 %v8884_v4, %v8310_v36  ;;  %v8166_v20 = vld [vmem:[%s12198_s13 + $0xc8] sm:$0xf]  ;;  %v8263_v36 = vor.u32 %v8872_v34, %v8262_v23  ;;  %v8868_v4 = vld [vmem:[%s12198_s13 + $0x174] sm:$0xf0]  ;;  %v8850_v23 = vld [vmem:[%s12198_s13 + $0xec] sm:$0xf] }
 0x93f   : > { %6685 = vmatpush.bf16.msrb.mxu0 %v8243_v21  ;;  %6698 = vmatpush.bf16.msrb.mxu1 %v8371_v61  ;;  %v8566_v21 = vld [vmem:[%s12198_s13 + $0x3e8] sm:$0xf]  ;;  %v8167_v5 = vor.u32 %v8848_v14, %v8166_v20  ;;  %v8892_v20 = vld [vmem:[%s12198_s13 + $0x234] sm:$0xf0] }
 0x940   : > { %v8294_v61 = vld [vmem:[%s12198_s13 + $0x1c8] sm:$0xf]  ;;  %v8567_v30 = vor.u32 %v8948_v7, %v8566_v21 }
 0x941   : > { %v8295_v57 = vor.u32 %v8880_v2, %v8294_v61  ;;  %v8102_v7 = vld [vmem:[%s12198_s13 + $0x48] sm:$0xf]  ;;  %v8832_v61 = vld [vmem:[%s12198_s13 + $0x54] sm:$0xf0] }
 0x942   : > { %6673 = vmatpush.bf16.msra.mxu3 %v8099_v49  ;;  %6712 = vmatpush.bf16.msrb.mxu2 %v8483_v47  ;;  %v8278_v47 = vld [vmem:[%s12198_s13 + $0x1a8] sm:$0xf]  ;;  %v8103_v14 = vor.u32 %v8832_v61, %v8102_v7  ;;  %v8842_v7 = vld [vmem:[%s12198_s13 + $0xac] sm:$0xf]  ;;  %v8152_v61 = vld [vmem:[%s12198_s13 + $0xb8] sm:$0xf0] }
 0x943   : > { %6686 = vmatpush.bf16.msrb.mxu0 %v8227_v8  ;;  %6699 = vmatpush.bf16.msrb.mxu1 %v8355_v55  ;;  %v8183_v55 = vor.u32 %v8852_v56, %v8182_v12  ;;  %v8230_v12 = vld [vmem:[%s12198_s13 + $0x148] sm:$0xf]  ;;  %v8864_v56 = vld [vmem:[%s12198_s13 + $0x154] sm:$0xf0] }
 0x944   : > { %v8454_v34 = vld [vmem:[%s12198_s13 + $0x308] sm:$0xf] }
 0x946   : > { %6674 = vmatpush.bf16.msra.mxu3 %v8083_v0  ;;  %6713 = vmatpush.bf16.msrb.mxu2 %v8467_v1  ;;  %v8551_v0 = vor.u32 %v8944_v42, %v8550_v13  ;;  %v8940_v1 = vld [vmem:[%s12198_s13 + $0x3b4] sm:$0xf0] }
 0x947   : > { %6687 = vmatpush.bf16.msrb.mxu0 %v8211_v59  ;;  %6700 = vmatpush.bf16.msrb.mxu1 %v8339_v50  ;;  %v8423_v50 = vor.u32 %v8912_v54, %v8422_v27  ;;  %v8486_v27 = vld [vmem:[%s12198_s13 + $0x348] sm:$0xf]  ;;  %v8928_v54 = vld [vmem:[%s12198_s13 + $0x354] sm:$0xf0] }
 0x948   : > { %v8828_v13 = vld [vmem:[%s12198_s13 + $0x34] sm:$0xf0]  ;;  %v8487_v42 = vor.u32 %v8928_v54, %v8486_v27  ;;  %v8938_v27 = vld [vmem:[%s12198_s13 + $0x3ac] sm:$0xf]  ;;  %v8536_v54 = vld [vmem:[%s12198_s13 + $0x3b8] sm:$0xf0] }
 0x94a   : > { %6675 = vmatpush.bf16.msra.mxu3 %v8067_v53  ;;  %6714 = vmatpush.bf16.msrb.mxu2 %v8451_v10  ;;  %v8390_v53 = vld [vmem:[%s12198_s13 + $0x288] sm:$0xf]  ;;  %v8151_v10 = vor.u32 %v8844_v19, %v8150_v9  ;;  %v8888_v19 = vld [vmem:[%s12198_s13 + $0x214] sm:$0xf0] }
 0x94b   : > { %6688 = vmatpush.bf16.msrb.mxu0 %v8195_v62  ;;  %6701 = vmatpush.bf16.msrb.mxu1 %v8323_v45  ;;  %v8908_v62 = vld [vmem:[%s12198_s13 + $0x2b4] sm:$0xf0]  ;;  %v8279_v45 = vor.u32 %v8876_v24, %v8278_v47  ;;  %v8326_v9 = vld [vmem:[%s12198_s13 + $0x208] sm:$0xf] }
 0x94c   : > { %v8407_v18 = vor.u32 %v8908_v62, %v8406_v16  ;;  %v8924_v47 = vld [vmem:[%s12198_s13 + $0x334] sm:$0xf0] }
 0x94d   : > { %v8856_v62 = vld [vmem:[%s12198_s13 + $0x114] sm:$0xf0] }
 0x9aa   : > { %v5800_v28 = vpop.f32.mrf.mxu0  ;;  %v5813_v44 = vpop.f32.mrf.mxu1 }
 0x9ab   : > { %v5801_v58 = vadd.f32 %v5800_v28, %v5768_v48  ;;  %v5814_v11 = vadd.f32 %v5813_v44, %v5769_v26  ;;  %v8840_v48 = vld [vmem:[%s12198_s13 + $0x94] sm:$0xf0]  ;;  %v8535_v26 = vor.u32 %v8940_v1, %v8534_v37  ;;  %v8518_v28 = vld [vmem:[%s12198_s13 + $0x388] sm:$0xf] }
 0x9ac   : > { %v8936_v44 = vld [vmem:[%s12198_s13 + $0x394] sm:$0xf0]  ;;  %v8070_v1 = vld [vmem:[%s12198_s13 + $0x8] sm:$0xf] }
 0x9ad   : > { %v5831_v33 = vmax.f32 %v5801_v58, 0.0  ;;  %v5832_v15 = vmax.f32 %v5814_v11, 0.0  ;;  %v8391_v58 = vor.u32 %v8904_v41, %v8390_v53  ;;  %v8246_v11 = vld [vmem:[%s12198_s13 + $0x168] sm:$0xf]  ;;  %v8920_v53 = vld [vmem:[%s12198_s13 + $0x314] sm:$0xf0] }
 0x9af   : > { %v5787_v25 = vpop.f32.mrf.mxu3  ;;  %v5826_v49 = vpop.f32.mrf.mxu2  ;;  %v11655_v38 = vpack.c.bf16 %v5831_v33, %v5831_v33  ;;  %v11657_v40 = vpack.c.bf16 %v5832_v15, %v5832_v15  ;;  %v8836_v33 = vld [vmem:[%s12198_s13 + $0x74] sm:$0xf0]  ;;  %v8519_v15 = vor.u32 %v8936_v44, %v8518_v28  ;;  %v8568_v28 = vld [vmem:[%s12198_s13 + $0x3f8] sm:$0xf0] }
 0x9b0   : > { %v5788_v52 = vadd.f32 %v5787_v25, %v5767_v3  ;;  %v5827_v32 = vadd.f32 %v5826_v49, %v5770_v35  ;;  %v8135_v3 = vor.u32 %v8840_v48, %v8134_v46  ;;  %v8118_v35 = vld [vmem:[%s12198_s13 + $0x68] sm:$0xf]  ;;  %v8247_v25 = vor.u32 %v8868_v4, %v8246_v11  ;;  %v8878_v46 = vld [vmem:[%s12198_s13 + $0x1cc] sm:$0xf]  ;;  %v8184_v48 = vld [vmem:[%s12198_s13 + $0xf8] sm:$0xf0] }
 0x9b1   : > { %6637 = vmatmul.bf16.vlgmr.msra.gmra.mxu0 %v11655_v38  ;;  %6650 = vmatmul.bf16.vlgmr.msra.gmra.mxu1 %v11657_v40  ;;  %v8375_v49 = vor.u32 %v8900_v29, %v8374_v51  ;;  %v8119_v21 = vor.u32 %v8836_v33, %v8118_v35  ;;  %v8910_v11 = vld [vmem:[%s12198_s13 + $0x2cc] sm:$0xf]  ;;  %v8424_v4 = vld [vmem:[%s12198_s13 + $0x2d8] sm:$0xf0]  ;;  %v8455_v29 = vor.u32 %v8920_v53, %v8454_v34 }
 0x9b2   : > { %v5830_v8 = vmax.f32 %v5788_v52, 0.0  ;;  %v5833_v60 = vmax.f32 %v5827_v32, 0.0  ;;  %6733 = vmatpush.bf16.msra.mxu0 %v8311_v31  ;;  %6746 = vmatpush.bf16.msra.mxu1 %v8439_v39  ;;  %v5802_v17 = vpop.f32.mrf.mxu0  ;;  %v5815_v63 = vpop.f32.mrf.mxu1  ;;  %v8502_v31 = vld [vmem:[%s12198_s13 + $0x368] sm:$0xf]  ;;  %v8932_v39 = vld [vmem:[%s12198_s13 + $0x374] sm:$0xf0] }
 0x9b3   : > { %v8358_v52 = vld [vmem:[%s12198_s13 + $0x248] sm:$0xf]  ;;  %v8896_v32 = vld [vmem:[%s12198_s13 + $0x254] sm:$0xf0]  ;;  %v8503_v2 = vor.u32 %v8932_v39, %v8502_v31  ;;  %v8846_v35 = vld [vmem:[%s12198_s13 + $0xcc] sm:$0xf] }
 0x9b4   : > { %v11685_v59 = vpack.c.bf16 %v5830_v8, %v5830_v8  ;;  %v11687_v22 = vpack.c.bf16 %v5833_v60, %v5833_v60  ;;  %v8231_v8 = vor.u32 %v8864_v56, %v8230_v12  ;;  %v8359_v60 = vor.u32 %v8896_v32, %v8358_v52  ;;  %v8214_v17 = vld [vmem:[%s12198_s13 + $0x128] sm:$0xf]  ;;  %v8860_v63 = vld [vmem:[%s12198_s13 + $0x134] sm:$0xf0]  ;;  %v8168_v33 = vld [vmem:[%s12198_s13 + $0xd8] sm:$0xf0] }
 0x9b5   : > { %v8215_v24 = vor.u32 %v8860_v63, %v8214_v17  ;;  %v8942_v31 = vld [vmem:[%s12198_s13 + $0x3cc] sm:$0xf]  ;;  %v8552_v39 = vld [vmem:[%s12198_s13 + $0x3d8] sm:$0xf0] }
 0x9b6   : > { %6624 = vmatmul.bf16.vlgmr.msrb.gmra.mxu3 %v11685_v59  ;;  %6663 = vmatmul.bf16.vlgmr.msra.gmra.mxu2 %v11687_v22  ;;  %v8874_v12 = vld [vmem:[%s12198_s13 + $0x1ac] sm:$0xf]  ;;  %v8280_v56 = vld [vmem:[%s12198_s13 + $0x1b8] sm:$0xf0] }
 0x9b7   : > { %6720 = vmatpush.bf16.msrb.mxu3 %v8183_v55  ;;  %6759 = vmatpush.bf16.msra.mxu2 %v8567_v30  ;;  %v5789_v43 = vpop.f32.mrf.mxu3  ;;  %v5828_v6 = vpop.f32.mrf.mxu2  ;;  %v8342_v55 = vld [vmem:[%s12198_s13 + $0x228] sm:$0xf]  ;;  %v8906_v52 = vld [vmem:[%s12198_s13 + $0x2ac] sm:$0xf]  ;;  %v8408_v32 = vld [vmem:[%s12198_s13 + $0x2b8] sm:$0xf0] }
 0x9b8   : > { %6734 = vmatpush.bf16.msra.mxu0 %v8295_v57  ;;  %6747 = vmatpush.bf16.msra.mxu1 %v8423_v50  ;;  %v8086_v30 = vld [vmem:[%s12198_s13 + $0x28] sm:$0xf]  ;;  %v8343_v16 = vor.u32 %v8892_v20, %v8342_v55  ;;  %v8914_v43 = vld [vmem:[%s12198_s13 + $0x2ec] sm:$0xf]  ;;  %v8440_v6 = vld [vmem:[%s12198_s13 + $0x2f8] sm:$0xf0] }
 0x9b9   : > { %v8198_v57 = vld [vmem:[%s12198_s13 + $0x108] sm:$0xf]  ;;  %v8087_v37 = vor.u32 %v8828_v13, %v8086_v30  ;;  %v8870_v17 = vld [vmem:[%s12198_s13 + $0x18c] sm:$0xf]  ;;  %v8264_v63 = vld [vmem:[%s12198_s13 + $0x198] sm:$0xf0] }
 0x9ba   : > { %v8470_v50 = vld [vmem:[%s12198_s13 + $0x328] sm:$0xf]  ;;  %v8199_v41 = vor.u32 %v8856_v62, %v8198_v57  ;;  %v8902_v55 = vld [vmem:[%s12198_s13 + $0x28c] sm:$0xf]  ;;  %v8392_v20 = vld [vmem:[%s12198_s13 + $0x298] sm:$0xf0] }
 0x9bb   : > { %6721 = vmatpush.bf16.msrb.mxu3 %v8167_v5  ;;  %6760 = vmatpush.bf16.msra.mxu2 %v8551_v0  ;;  %v8882_v5 = vld [vmem:[%s12198_s13 + $0x1ec] sm:$0xf]  ;;  %v8312_v0 = vld [vmem:[%s12198_s13 + $0x1f8] sm:$0xf0] }
 0x9bc   : > { %6735 = vmatpush.bf16.msra.mxu0 %v8279_v45  ;;  %6748 = vmatpush.bf16.msra.mxu1 %v8407_v18  ;;  %v8824_v45 = vld [vmem:[%s12198_s13 + $0x14] sm:$0xf0]  ;;  %v8471_v18 = vor.u32 %v8924_v47, %v8470_v50  ;;  %v8315_v44 = vor.u32 %v8882_v5, %v8312_v0  ;;  %v8838_v30 = vld [vmem:[%s12198_s13 + $0x8c] sm:$0xf]  ;;  %v8136_v13 = vld [vmem:[%s12198_s13 + $0x98] sm:$0xf0]  ;;  %v8267_v47 = vor.u32 %v8870_v17, %v8264_v63 }
 0x9bd   : > { %v8071_v51 = vor.u32 %v8824_v45, %v8070_v1  ;;  %v8934_v57 = vld [vmem:[%s12198_s13 + $0x38c] sm:$0xf]  ;;  %v8520_v50 = vld [vmem:[%s12198_s13 + $0x398] sm:$0xf0] }
 0x9be   : > { %v8248_v62 = vld [vmem:[%s12198_s13 + $0x178] sm:$0xf0]  ;;  %v8898_v5 = vld [vmem:[%s12198_s13 + $0x26c] sm:$0xf] }
 0x9bf   : > { %6722 = vmatpush.bf16.msrb.mxu3 %v8151_v10  ;;  %6761 = vmatpush.bf16.msra.mxu2 %v8535_v26  ;;  %v8327_v10 = vor.u32 %v8888_v19, %v8326_v9  ;;  %v8946_v26 = vld [vmem:[%s12198_s13 + $0x3ec] sm:$0xf]  ;;  %v8376_v9 = vld [vmem:[%s12198_s13 + $0x278] sm:$0xf0]  ;;  %v8139_v19 = vor.u32 %v8838_v30, %v8136_v13  ;;  %v8951_v30 = vld [vmem:[%s12199_s14 + $0x10] sm:$0xff] }
 0x9c0   : > { %6736 = vmatpush.bf16.msra.mxu0 %v8263_v36  ;;  %6749 = vmatpush.bf16.msra.mxu1 %v8391_v58  ;;  %v8443_v36 = vor.u32 %v8914_v43, %v8440_v6  ;;  %v8296_v58 = vld [vmem:[%s12198_s13 + $0x1d8] sm:$0xf0]  ;;  %v8834_v0 = vld [vmem:[%s12198_s13 + $0x6c] sm:$0xf]  ;;  %v8523_v6 = vor.u32 %v8934_v57, %v8520_v50  ;;  %v8961_v57 = vld [vmem:[%s12199_s14 + $0x60] sm:$0xff] }
 0x9c1   : > { %6689 = vmatmul.bf16.vlgmr.msrb.gmra.mxu0 %v11655_v38  ;;  %6702 = vmatmul.bf16.vlgmr.msrb.gmra.mxu1 %v11657_v40  ;;  %v8120_v43 = vld [vmem:[%s12198_s13 + $0x78] sm:$0xf0]  ;;  %v8894_v53 = vld [vmem:[%s12198_s13 + $0x24c] sm:$0xf]  ;;  %v8949_v50 = vld [vmem:[%s12199_s14] sm:$0xff] }
 0x9c2   : > { %v8504_v1 = vld [vmem:[%s12198_s13 + $0x378] sm:$0xf0]  ;;  %v8962_v13 = vld [vmem:[%s12199_s14 + $0x68] sm:$0xff] }
 0x9c3   : > { %6723 = vmatpush.bf16.msrb.mxu3 %v8135_v3  ;;  %6762 = vmatpush.bf16.msra.mxu2 %v8519_v15  ;;  %v8187_v3 = vor.u32 %v8850_v23, %v8184_v48  ;;  %v8571_v15 = vor.u32 %v8946_v26, %v8568_v28  ;;  %v8862_v23 = vld [vmem:[%s12198_s13 + $0x14c] sm:$0xf]  ;;  %v8232_v34 = vld [vmem:[%s12198_s13 + $0x158] sm:$0xf0] }
 0x9c4   : > { %6737 = vmatpush.bf16.msra.mxu0 %v8247_v25  ;;  %6750 = vmatpush.bf16.msra.mxu1 %v8375_v49  ;;  %v8299_v25 = vor.u32 %v8878_v46, %v8296_v58  ;;  %v8427_v49 = vor.u32 %v8910_v11, %v8424_v4  ;;  %v8830_v46 = vld [vmem:[%s12198_s13 + $0x4c] sm:$0xf]  ;;  %v8104_v48 = vld [vmem:[%s12198_s13 + $0x58] sm:$0xf0] }
 0x9c5   : > { %v8926_v28 = vld [vmem:[%s12198_s13 + $0x34c] sm:$0xf]  ;;  %v8216_v4 = vld [vmem:[%s12198_s13 + $0x138] sm:$0xf0] }
 0x9c6   : > { %6676 = vmatmul.bf16.vlgmr.msra.gmra.mxu3 %v11685_v59  ;;  %6715 = vmatmul.bf16.vlgmr.msrb.gmra.mxu2 %v11687_v22  ;;  %v8858_v11 = vld [vmem:[%s12198_s13 + $0x12c] sm:$0xf] }
 0x9c7   : > { %6724 = vmatpush.bf16.msrb.mxu3 %v8119_v21  ;;  %6763 = vmatpush.bf16.msra.mxu2 %v8503_v2  ;;  %v8171_v21 = vor.u32 %v8846_v35, %v8168_v33  ;;  %v8555_v2 = vor.u32 %v8942_v31, %v8552_v39  ;;  %v8826_v35 = vld [vmem:[%s12198_s13 + $0x2c] sm:$0xf]  ;;  %v8088_v33 = vld [vmem:[%s12198_s13 + $0x38] sm:$0xf0] }
 0x9c8   : > { %6738 = vmatpush.bf16.msra.mxu0 %v8231_v8  ;;  %6751 = vmatpush.bf16.msra.mxu1 %v8359_v60  ;;  %v8283_v8 = vor.u32 %v8874_v12, %v8280_v56  ;;  %v8411_v60 = vor.u32 %v8906_v52, %v8408_v32  ;;  %v8922_v31 = vld [vmem:[%s12198_s13 + $0x32c] sm:$0xf]  ;;  %v8472_v39 = vld [vmem:[%s12198_s13 + $0x338] sm:$0xf0] }
 0x9c9   : > { %v8854_v12 = vld [vmem:[%s12198_s13 + $0x10c] sm:$0xf]  ;;  %v8200_v56 = vld [vmem:[%s12198_s13 + $0x118] sm:$0xf0] }
 0x9ca   : > { %v8886_v52 = vld [vmem:[%s12198_s13 + $0x20c] sm:$0xf]  ;;  %v8328_v32 = vld [vmem:[%s12198_s13 + $0x218] sm:$0xf0] }
 0x9cb   : > { %6725 = vmatpush.bf16.msrb.mxu3 %v8103_v14  ;;  %6764 = vmatpush.bf16.msra.mxu2 %v8487_v42  ;;  %v8155_v14 = vor.u32 %v8842_v7, %v8152_v61  ;;  %v8539_v42 = vor.u32 %v8938_v27, %v8536_v54  ;;  %v8822_v7 = vld [vmem:[%s12198_s13 + $0xc] sm:$0xf]  ;;  %v8475_v61 = vor.u32 %v8922_v31, %v8472_v39  ;;  %v8456_v54 = vld [vmem:[%s12198_s13 + $0x318] sm:$0xf0]  ;;  %v8977_v39 = vld [vmem:[%s12199_s14 + $0xe0] sm:$0xff] }
 0x9cc   : > { %6739 = vmatpush.bf16.msra.mxu0 %v8215_v24  ;;  %6752 = vmatpush.bf16.msra.mxu1 %v8343_v16  ;;  %v8395_v24 = vor.u32 %v8902_v55, %v8392_v20  ;;  %v8866_v16 = vld [vmem:[%s12198_s13 + $0x16c] sm:$0xf]  ;;  %v8956_v55 = vld [vmem:[%s12199_s14 + $0x38] sm:$0xff]  ;;  %v8955_v20 = vld [vmem:[%s12199_s14 + $0x30] sm:$0xff] }
 0x9cd   : > { %v8251_v45 = vor.u32 %v8866_v16, %v8248_v62  ;;  %v8918_v27 = vld [vmem:[%s12198_s13 + $0x30c] sm:$0xf] }
 0x9ce   : > { %v8459_v63 = vor.u32 %v8918_v27, %v8456_v54 }
 0x9cf   : > { %6726 = vmatpush.bf16.msrb.mxu3 %v8087_v37  ;;  %6765 = vmatpush.bf16.msra.mxu2 %v8471_v18  ;;  %v8930_v37 = vld [vmem:[%s12198_s13 + $0x36c] sm:$0xf]  ;;  %v8379_v18 = vor.u32 %v8898_v5, %v8376_v9  ;;  %v8971_v5 = vld [vmem:[%s12199_s14 + $0xb0] sm:$0xff] }
 0x9d0   : > { %6740 = vmatpush.bf16.msra.mxu0 %v8199_v41  ;;  %6753 = vmatpush.bf16.msra.mxu1 %v8327_v10  ;;  %v8360_v41 = vld [vmem:[%s12198_s13 + $0x258] sm:$0xf0]  ;;  %v8123_v10 = vor.u32 %v8834_v0, %v8120_v43  ;;  %v8507_v26 = vor.u32 %v8930_v37, %v8504_v1  ;;  %v8959_v9 = vld [vmem:[%s12199_s14 + $0x50] sm:$0xff]  ;;  %v8970_v43 = vld [vmem:[%s12199_s14 + $0xa8] sm:$0xff] }
 0x9d1   : > { %v8363_v58 = vor.u32 %v8894_v53, %v8360_v41  ;;  %v8980_v0 = vld [vmem:[%s12199_s14 + $0xf8] sm:$0xff] }
 0x9d3   : > { %6727 = vmatpush.bf16.msrb.mxu3 %v8071_v51  ;;  %6766 = vmatpush.bf16.msra.mxu2 %v8455_v29  ;;  %v8890_v51 = vld [vmem:[%s12198_s13 + $0x22c] sm:$0xf]  ;;  %v8344_v29 = vld [vmem:[%s12198_s13 + $0x238] sm:$0xf0] }
 0x9d4   : > { %6785 = vmatpush.bf16.msrb.mxu0 %v8315_v44  ;;  %6798 = vmatpush.bf16.msrb.mxu1 %v8443_v36  ;;  %v8488_v44 = vld [vmem:[%s12198_s13 + $0x358] sm:$0xf0]  ;;  %v8235_v36 = vor.u32 %v8862_v23, %v8232_v34  ;;  %v8957_v23 = vld [vmem:[%s12199_s14 + $0x40] sm:$0xff] }
 0x9d5   : > { %6741 = vmatmul.bf16.vlgmr.msra.gmra.mxu0 %v11655_v38  ;;  %6754 = vmatmul.bf16.vlgmr.msra.gmra.mxu1 %v11657_v40 }
 0x9d6   : > { %6728 = vmatmul.bf16.vlgmr.msrb.gmra.mxu3 %v11685_v59  ;;  %6767 = vmatmul.bf16.vlgmr.msra.gmra.mxu2 %v11687_v22 }
 0x9d7   : > { %6772 = vmatpush.bf16.msra.mxu3 %v8187_v3  ;;  %6811 = vmatpush.bf16.msrb.mxu2 %v8571_v15  ;;  %v8107_v3 = vor.u32 %v8830_v46, %v8104_v48  ;;  %v8491_v15 = vor.u32 %v8926_v28, %v8488_v44  ;;  %v8979_v46 = vld [vmem:[%s12199_s14 + $0xf0] sm:$0xff]  ;;  %v8968_v48 = vld [vmem:[%s12199_s14 + $0x98] sm:$0xff] }
 0x9d8   : > { %6786 = vmatpush.bf16.msrb.mxu0 %v8299_v25  ;;  %6799 = vmatpush.bf16.msrb.mxu1 %v8427_v49  ;;  %v8219_v25 = vor.u32 %v8858_v11, %v8216_v4  ;;  %v8347_v49 = vor.u32 %v8890_v51, %v8344_v29 }
 0x9db   : > { %6773 = vmatpush.bf16.msra.mxu3 %v8171_v21  ;;  %6812 = vmatpush.bf16.msrb.mxu2 %v8555_v2  ;;  %v8091_v21 = vor.u32 %v8826_v35, %v8088_v33  ;;  %v8072_v2 = vld [vmem:[%s12198_s13 + $0x18] sm:$0xf0]  ;;  %v8966_v35 = vld [vmem:[%s12199_s14 + $0x88] sm:$0xff] }
 0x9dc   : > { %6787 = vmatpush.bf16.msrb.mxu0 %v8283_v8  ;;  %6800 = vmatpush.bf16.msrb.mxu1 %v8411_v60  ;;  %v8203_v8 = vor.u32 %v8854_v12, %v8200_v56  ;;  %v8331_v60 = vor.u32 %v8886_v52, %v8328_v32  ;;  %v8075_v17 = vor.u32 %v8822_v7, %v8072_v2  ;;  %v8976_v52 = vld [vmem:[%s12199_s14 + $0xd8] sm:$0xff] }
 0x9df   : > { %6774 = vmatpush.bf16.msra.mxu3 %v8155_v14  ;;  %6813 = vmatpush.bf16.msrb.mxu2 %v8539_v42  ;;  %v8963_v14 = vld [vmem:[%s12199_s14 + $0x70] sm:$0xff]  ;;  %v8950_v42 = vld [vmem:[%s12199_s14 + $0x8] sm:$0xff] }
 0x9e0   : > { %6788 = vmatpush.bf16.msrb.mxu0 %v8267_v47  ;;  %6801 = vmatpush.bf16.msrb.mxu1 %v8395_v24  ;;  %v8972_v47 = vld [vmem:[%s12199_s14 + $0xb8] sm:$0xff] }
 0x9e1   : > { %v8960_v24 = vld [vmem:[%s12199_s14 + $0x58] sm:$0xff] }
 0x9e3   : > { %6775 = vmatpush.bf16.msra.mxu3 %v8139_v19  ;;  %6814 = vmatpush.bf16.msrb.mxu2 %v8523_v6  ;;  %v12096_v19 = vld [vmem:[%s12201_s16] sm:$0xf]  ;;  %v8958_v6 = vld [vmem:[%s12199_s14 + $0x48] sm:$0xff] }
 0x9e4   : > { %6789 = vmatpush.bf16.msrb.mxu0 %v8251_v45  ;;  %6802 = vmatpush.bf16.msrb.mxu1 %v8379_v18  ;;  %v6608_v37 = vperm.slane %v12096_v19, 0  ;;  %v8969_v18 = vld [vmem:[%s12199_s14 + $0xa0] sm:$0xff]  ;;  %v6609_v33 = vperm.slane %v12096_v19, 1 }
 0x9e7   : > { %6776 = vmatpush.bf16.msra.mxu3 %v8123_v10  ;;  %6815 = vmatpush.bf16.msrb.mxu2 %v8507_v26 }
 0x9e8   : > { %6790 = vmatpush.bf16.msrb.mxu0 %v8235_v36  ;;  %6803 = vmatpush.bf16.msrb.mxu1 %v8363_v58  ;;  %v8967_v58 = vld [vmem:[%s12199_s14 + $0x90] sm:$0xff] }
 0x9eb   : > { %6777 = vmatpush.bf16.msra.mxu3 %v8107_v3  ;;  %6816 = vmatpush.bf16.msrb.mxu2 %v8491_v15  ;;  %v8978_v3 = vld [vmem:[%s12199_s14 + $0xe8] sm:$0xff] }
 0x9ec   : > { %6791 = vmatpush.bf16.msrb.mxu0 %v8219_v25  ;;  %6804 = vmatpush.bf16.msrb.mxu1 %v8347_v49  ;;  %v8965_v25 = vld [vmem:[%s12199_s14 + $0x80] sm:$0xff] }
 0x9ef   : > { %6778 = vmatpush.bf16.msra.mxu3 %v8091_v21  ;;  %6817 = vmatpush.bf16.msrb.mxu2 %v8475_v61 }
 0x9f0   : > { %6792 = vmatpush.bf16.msrb.mxu0 %v8203_v8  ;;  %6805 = vmatpush.bf16.msrb.mxu1 %v8331_v60 }
 0x9f3   : > { %6779 = vmatpush.bf16.msra.mxu3 %v8075_v17  ;;  %6818 = vmatpush.bf16.msrb.mxu2 %v8459_v63  ;;  %v6610_v17 = vperm.slane %v12096_v19, 2 }
 0x9f4   : > { %6793 = vmatmul.bf16.vlgmr.msrb.gmra.mxu0 %v11655_v38  ;;  %6806 = vmatmul.bf16.vlgmr.msrb.gmra.mxu1 %v11657_v40  ;;  %v8954_v38 = vld [vmem:[%s12199_s14 + $0x28] sm:$0xff]  ;;  %v8953_v40 = vld [vmem:[%s12199_s14 + $0x20] sm:$0xff] }
 0x9f5   : > { %7115 = vmatpush.bf16.msra.mxu1 %v8972_v47  ;;  %v8973_v47 = vld [vmem:[%s12199_s14 + $0xc0] sm:$0xff] }
 0x9f6   : > { %6780 = vmatmul.bf16.vlgmr.msra.gmra.mxu3 %v11685_v59  ;;  %6819 = vmatmul.bf16.vlgmr.msrb.gmra.mxu2 %v11687_v22  ;;  %v8964_v59 = vld [vmem:[%s12199_s14 + $0x78] sm:$0xff] }
 0x9f7   : > { %7089 = vmatpush.bf16.msrb.mxu3 %v8956_v55  ;;  %v8952_v22 = vld [vmem:[%s12199_s14 + $0x18] sm:$0xff]  ;;  %7102 = vmatpush.bf16.msra.mxu0 %v8964_v59 }
 0x9f8   : > { %7128 = vmatpush.bf16.msra.mxu2 %v8980_v0 }
 0x9f9   : > { %7116 = vmatpush.bf16.msra.mxu1 %v8971_v5  ;;  %v6611_v5 = vperm.slane %v12096_v19, 3 }
 0x9fb   : > { %7090 = vmatpush.bf16.msrb.mxu3 %v8955_v20  ;;  %7103 = vmatpush.bf16.msra.mxu0 %v8963_v14  ;;  %v8975_v20 = vld [vmem:[%s12199_s14 + $0xd0] sm:$0xff] }
 0x9fc   : > { %7129 = vmatpush.bf16.msra.mxu2 %v8979_v46 }
 0x9fd   : > { %7117 = vmatpush.bf16.msra.mxu1 %v8970_v43 }
 0x9ff   : > { %7091 = vmatpush.bf16.msrb.mxu3 %v8954_v38  ;;  %7104 = vmatpush.bf16.msra.mxu0 %v8962_v13  ;;  %v8974_v13 = vld [vmem:[%s12199_s14 + $0xc8] sm:$0xff] }
 0xa00   : > { %7130 = vmatpush.bf16.msra.mxu2 %v8978_v3 }
 0xa01   : > { %7118 = vmatpush.bf16.msra.mxu1 %v8969_v18 }
 0xa03   : > { %7092 = vmatpush.bf16.msrb.mxu3 %v8953_v40  ;;  %7105 = vmatpush.bf16.msra.mxu0 %v8961_v57 }
 0xa04   : > { %7131 = vmatpush.bf16.msra.mxu2 %v8977_v39 }
 0xa05   : > { %7119 = vmatpush.bf16.msra.mxu1 %v8968_v48 }
 0xa07   : > { %7093 = vmatpush.bf16.msrb.mxu3 %v8952_v22  ;;  %7106 = vmatpush.bf16.msra.mxu0 %v8960_v24 }
 0xa08   : > { %7132 = vmatpush.bf16.msra.mxu2 %v8976_v52 }
 0xa09   : > { %7120 = vmatpush.bf16.msra.mxu1 %v8967_v58 }
 0xa0b   : > { %7094 = vmatpush.bf16.msrb.mxu3 %v8951_v30  ;;  %7107 = vmatpush.bf16.msra.mxu0 %v8959_v9 }
 0xa0c   : > { %7133 = vmatpush.bf16.msra.mxu2 %v8975_v20 }
 0xa0d   : > { %7121 = vmatpush.bf16.msra.mxu1 %v8966_v35 }
 0xa0f   : > { %7095 = vmatpush.bf16.msrb.mxu3 %v8950_v42  ;;  %7108 = vmatpush.bf16.msra.mxu0 %v8958_v6 }
 0xa10   : > { %7134 = vmatpush.bf16.msra.mxu2 %v8974_v13 }
 0xa11   : > { %7122 = vmatpush.bf16.msra.mxu1 %v8965_v25 }
 0xa13   : > { %7096 = vmatpush.bf16.msrb.mxu3 %v8949_v50  ;;  %7109 = vmatpush.bf16.msra.mxu0 %v8957_v23 }
 0xa14   : > { %7135 = vmatpush.bf16.msra.mxu2 %v8973_v47 }
 0xa2e   : > { %v6638_v16 = vpop.f32.mrf.mxu0  ;;  %v6651_v62 = vpop.f32.mrf.mxu1 }
 0xa36   : > { %v6640_v1 = vpop.f32.mrf.mxu0  ;;  %v6653_v45 = vpop.f32.mrf.mxu1 }
 0xa39   : > { %v6625_v34 = vpop.f32.mrf.mxu3  ;;  %v6664_v53 = vpop.f32.mrf.mxu2 }
 0xa3a   : > { %v6626_v41 = vadd.f32 %v6625_v34, %v6608_v37 }
 0xa3c   : > { %v6639_v10 = vadd.f32 %v6638_v16, %v6626_v41 }
 0xa3e   : > { %v6652_v26 = vadd.f32 %v6651_v62, %v6639_v10  ;;  %v6690_v28 = vpop.f32.mrf.mxu0  ;;  %v6703_v44 = vpop.f32.mrf.mxu1 }
 0xa40   : > { %v6665_v36 = vadd.f32 %v6664_v53, %v6652_v26 }
 0xa41   : > { %v6627_v11 = vpop.f32.mrf.mxu3  ;;  %v6666_v4 = vpop.f32.mrf.mxu2 }
 0xa42   : > { %v6824_v51 = vmax.f32 %v6665_v36, 0.0 }
 0xa44   : > { %v6828_v29 = vpack.c.bf16 %v6824_v51, %v6824_v51 }
 0xa46   : > { %v6692_v15 = vpop.f32.mrf.mxu0  ;;  %v6705_v31 = vpop.f32.mrf.mxu1  ;;  %7097 = vmatmul.bf16.vlgmr.msrb.gmra.mxu3 %v6828_v29 }
 0xa49   : > { %v6677_v49 = vpop.f32.mrf.mxu3  ;;  %v6716_v12 = vpop.f32.mrf.mxu2 }
 0xa4a   : > { %v6678_v56 = vadd.f32 %v6677_v49, %v6609_v33 }
 0xa4c   : > { %v6691_v32 = vadd.f32 %v6690_v28, %v6678_v56 }
 0xa4e   : > { %v6704_v21 = vadd.f32 %v6703_v44, %v6691_v32  ;;  %v6896_v44 = vld [vmem:[%s12202_s17] sm:$0x1] }
 0xa50   : > { %v6717_v7 = vadd.f32 %v6716_v12, %v6704_v21 }
 0xa51   : > { %v6679_v61 = vpop.f32.mrf.mxu3  ;;  %v6718_v2 = vpop.f32.mrf.mxu2 }
 0xa52   : > { %v6825_v27 = vmax.f32 %v6717_v7, 0.0  ;;  %v6742_v8 = vpop.f32.mrf.mxu0  ;;  %v6755_v60 = vpop.f32.mrf.mxu1 }
 0xa54   : > { %v6829_v54 = vpack.c.bf16 %v6825_v27, %v6825_v27 }
 0xa56   : > { %7110 = vmatmul.bf16.vlgmr.msra.gmra.mxu0 %v6829_v54 }
 0xa59   : > { %v6729_v63 = vpop.f32.mrf.mxu3  ;;  %v6768_v55 = vpop.f32.mrf.mxu2 }
 0xa5a   : > { %v6730_v38 = vadd.f32 %v6729_v63, %v6610_v17  ;;  %v6744_v59 = vpop.f32.mrf.mxu0  ;;  %v6757_v22 = vpop.f32.mrf.mxu1 }
 0xa5c   : > { %v6743_v40 = vadd.f32 %v6742_v8, %v6730_v38 }
 0xa5e   : > { %v6756_v14 = vadd.f32 %v6755_v60, %v6743_v40 }
 0xa60   : > { %v6769_v30 = vadd.f32 %v6768_v55, %v6756_v14 }
 0xa61   : > { %v6731_v42 = vpop.f32.mrf.mxu3  ;;  %v6770_v57 = vpop.f32.mrf.mxu2 }
 0xa62   : > { %v6826_v50 = vmax.f32 %v6769_v30, 0.0 }
 0xa64   : > { %v6830_v24 = vpack.c.bf16 %v6826_v50, %v6826_v50 }
 0xa66   : > { %7123 = vmatmul.bf16.vlgmr.msra.gmra.mxu1 %v6830_v24 }
 0xa71   : > { %v6794_v16 = vpop.f32.mrf.mxu0  ;;  %v6807_v62 = vpop.f32.mrf.mxu1 }
 0xa79   : > { %v6781_v9 = vpop.f32.mrf.mxu3  ;;  %v6820_v0 = vpop.f32.mrf.mxu2 }
 0xa7a   : > { %v6782_v43 = vadd.f32 %v6781_v9, %v6611_v5  ;;  %v6796_v6 = vpop.f32.mrf.mxu0  ;;  %v6809_v37 = vpop.f32.mrf.mxu1 }
 0xa7c   : > { %v6795_v1 = vadd.f32 %v6794_v16, %v6782_v43 }
 0xa7e   : > { %v6808_v45 = vadd.f32 %v6807_v62, %v6795_v1 }
 0xa80   : > { %v6821_v18 = vadd.f32 %v6820_v0, %v6808_v45 }
 0xa81   : > { %v6783_v23 = vpop.f32.mrf.mxu3  ;;  %v6822_v34 = vpop.f32.mrf.mxu2 }
 0xa82   : > { %v6827_v53 = vmax.f32 %v6821_v18, 0.0 }
 0xa84   : > { %v6831_v41 = vpack.c.bf16 %v6827_v53, %v6827_v53 }
 0xa86   : > { %7136 = vmatmul.bf16.vlgmr.msra.gmra.mxu2 %v6831_v41 }
 0xac9   : > { %v7098_v10 = vpop.f32.mrf.mxu3 }
 0xaca   : > { %v7099_v36 = vadd.f32 %v7098_v10, %v6896_v44 }
 0xad1   : > { %v7100_v46 = vpop.f32.mrf.mxu3 }
 0xad3   : > { %v7111_v48 = vpop.f32.mrf.mxu0 }
 0xad4   : > { %v7112_v58 = vadd.f32 %v7111_v48, %v7099_v36 }
 0xadb   : > { %v7113_v26 = vpop.f32.mrf.mxu0 }
 0xae3   : > { %v7124_v19 = vpop.f32.mrf.mxu1 }
 0xae4   : > { %v7125_v11 = vadd.f32 %v7124_v19, %v7112_v58 }
 0xaeb   : > { %v7126_v28 = vpop.f32.mrf.mxu1 }
 0xb09   : > { %v7137_v4 = vpop.f32.mrf.mxu2 }
 0xb0a   : > { %v7138_v51 = vadd.f32 %v7137_v4, %v7125_v11 }
 0xb0c   : > { %7141 = vst [vmem:[%s567_s6] sm:$0x1] %v7138_v51 }
 0xb0d   : > { %9075 = shalt.err (!%p9072_p3)
}
 0xb0e   : > { %8987 = dma.vmem_to_hbm [thread:$0]  (%p9246_p5), %s7154_s20, 16, %s7156_s1, %s7143_s22  }
 0xb11   : > { %v7139_v29 = vpop.f32.mrf.mxu2 }
 0xb12 PF: > { %p8993_p4 = scmp.ge.s32.totalorder %s9110_s30, 2  ;;  %s7167_s19 = sand.u32 1, %s9098_s27  }
 0xb13   : > { %s7168_s6 = scalar_lea.sflag [#allocation3], %s7167_s19 }
 0xb14   : > { %p8990_p7 = pnand %p8993_p4, %p9250_p6 }
 0xb16   : > { %p8991_p8 = pneg %p8990_p7 }
 0xb18   : > { %9093 = dma.done.wait (%p8991_p8), %s7168_s6, 16  }
 0xb19   : > { %9095 = vsyncadd (%p8991_p8), %s7168_s6, 4294967280  ;;  %s12371_s30 = sld [smem:[#allocation6_spill]]  ;;  %s12374_s27 = smov %s9102_s28 }
 0xb1a   : > { %s12372_s23 = sld [smem:[#allocation5_spill]] }
 0xb1b   : > { %s12373_s29 = sld [smem:[#allocation7_spill]] }
 0xb1f   : > { %p28_p9 = scmp.ge.s32.totalorder %s12371_s30, 4  }
 0xb20   : > { %s12375_s28 = smov %s12372_s23 }
 0xb21   :  { %30 = sbr.rel (!%p28_p9) target bundleno = 11 (0xb), region = 159 }
 0xb26   :  { %7173 = vsyncpa [#allocation3], 1 }
 0xb27   :  { %7175 = vsyncpa [#allocation3 + $0x1], 1 }

</bundles_post_ra>
